<compile_context>
chip_gen: v6e
topology: v6e:2x2x1
jax: 0.10.0
libtpu: 0.0.40
codegen_flags: <defaults>
</compile_context>

<pallas_src>
import functools

import jax
import jax.numpy as jnp
from jax import lax
from jax.experimental import pallas as pl
from jax.experimental.pallas import tpu as pltpu

EPS = 1e-5  # torch.nn.BatchNorm2d default eps


def _round_up(x, m):
    return ((x + m - 1) // m) * m


def fused_kernel(x_ref, w_ref, bnp_ref, hm_ref, blk_ref, blkp_ref,
                 v4_ref, v9_ref, v5_ref, s2_ref, *, P, Wp, Gw):
    # x_ref   : (8, Pp)  rows 0..2 = x1 chans, 3..5 = x2 chans, 6 = ones, 7 = valid mask
    # w_ref   : (16, 8)  cols 0..2 = w(x1), 3..5 = w(x2), 6 = folded bias, 7 = 0
    # bnp_ref : (8, 8)   cols = [g1, be1, g2, be2, g3, be3, 0, 0]
    # hm_ref  : (64, Pp) head mask: 1 where (p mod 64) < 64 - ((r*P) mod 64)
    # blk_ref : (Pp, G)  block-ones: 1 where p//64 == g
    # blkp_ref: (Pp, G)  shifted block-ones: 1 where p//64 + 1 == g
    x = x_ref[...]
    w = w_ref[...]
    bnp = bnp_ref[...]
    validf = x[7:8, :]                       # (1, Pp), 1.0 on the P valid lanes
    inv_P = 1.0 / float(P)

    # ---- four 1x1 convs (+ folded biases) as ONE small MXU matmul -------------
    y = jnp.dot(w, x, preferred_element_type=jnp.float32,
                precision=lax.Precision.HIGHEST)          # (16, Pp)
    v3 = y[0:8, :]                                        # conv1(x1) + conv2(x2)
    v8 = y[8:16, :]                                       # conv3(x1) + conv4(x2)

    # ---- training-mode BatchNorm, single masked-stats pass --------------------
    def normalize(v):
        vm = v * validf
        mean = jnp.sum(vm, axis=1, keepdims=True) * inv_P
        ex2 = jnp.sum(vm * v, axis=1, keepdims=True) * inv_P
        var = ex2 - mean * mean
        return (v - mean) * lax.rsqrt(var + EPS)

    xhat3 = normalize(v3)                 # shared by bn1 (-> v4) and bn2 (-> v5)
    xhat8 = normalize(v8)
    v4 = bnp[:, 0:1] * xhat3 + bnp[:, 1:2]
    v5 = bnp[:, 2:3] * xhat3 + bnp[:, 3:4]
    v9 = bnp[:, 4:5] * xhat8 + bnp[:, 5:6]
    v4_ref[...] = v4
    v9_ref[...] = v9
    v5_ref[...] = v5

    # ---- s2 without materializing s1 -------------------------------------------
    # torch: s1[a,0,c,h,w] = v4[0,a,h,w] * v9[0,c,h,w]; flat m = (8a+c)*P + p,
    #        s2_flat[q] = (1/Wp) * sum_{m//64 == q} s1_flat[m].
    # Per row r = 8a+c with base B_r = (r*P)//64 and offset o_r = (r*P) % 64,
    # local group g (global q = B_r + g) = TAIL (last o_r lanes) of aligned
    # 64-lane block g-1  +  HEAD (first 64-o_r lanes) of block g.
    # Both pieces are lane-aligned segment sums -> two block-ones MXU matmuls,
    # then a 64-step static scatter-add (B_r is a compile-time constant).
    v4m = v4 * validf                                         # zero pad lanes
    U = jnp.concatenate([v4m[a:a + 1, :] * v9 for a in range(8)], axis=0)  # (64, Pp)
    Uh = U * hm_ref[...]                                      # head part
    Ut = U - Uh                                               # tail part
    L = (jnp.dot(Uh, blk_ref[...], preferred_element_type=jnp.float32,
                 precision=lax.Precision.HIGHEST)
         + jnp.dot(Ut, blkp_ref[...], preferred_element_type=jnp.float32,
                   precision=lax.Precision.HIGHEST)) * (1.0 / float(Wp))   # (64, G)

    s2_ref[...] = jnp.zeros(s2_ref.shape, s2_ref.dtype)
    for r in range(64):                                       # static bases
        Br = (r * P) // 64
        s2_ref[0:1, Br:Br + Gw] = s2_ref[0:1, Br:Br + Gw] + L[r:r + 1, 0:Gw]


def model_forward(x1, x2, params):
    (w1, b1, w2, b2, w3, w4, b4, g1, be1, g2, be2, g3, be3) = params
    N, C, H, W = x1.shape
    assert N == 1 and C == 3
    Hp, Wp = H + 2, W + 2
    P = Hp * Wp
    Pp = _round_up(P, 128)                 # lane-dense spatial extent
    Sp = _round_up(P + 2, 128)             # s2 lanes (slack for last scatter window)
    G = _round_up(Pp // 64 + 1, 128)       # segment-sum matmul columns
    Gw = (P + 126) // 64                   # max groups touched by one row
    assert Gw <= G and ((63 * P) // 64) + Gw <= Sp

    # zero-pad spatially (padding=1 of a 1x1 conv), flatten channel-major (C, P)
    x1p = jnp.pad(x1, ((0, 0), (0, 0), (1, 1), (1, 1)))[0].reshape(C, P)
    x2p = jnp.pad(x2, ((0, 0), (0, 0), (1, 1), (1, 1)))[0].reshape(C, P)
    X = jnp.zeros((8, Pp), jnp.float32)
    X = (X.at[0:3, :P].set(x1p).at[3:6, :P].set(x2p)
          .at[6, :].set(1.0)               # bias "channel"
          .at[7, :P].set(1.0))             # valid-lane mask

    # pack the 4 conv weights + 3 biases into one (16, 8) block
    Wstk = jnp.zeros((16, 8), jnp.float32)
    Wstk = (Wstk.at[0:8, 0:3].set(w1).at[0:8, 3:6].set(w2).at[0:8, 6].set(b1 + b2)
                 .at[8:16, 0:3].set(w3).at[8:16, 3:6].set(w4).at[8:16, 6].set(b4))

    zeros8 = jnp.zeros((8,), jnp.float32)
    BNP = jnp.stack([g1, be1, g2, be2, g3, be3, zeros8, zeros8], axis=1)   # (8, 8)

    # static index structure for the s2 segmented sum (precomputed host-side)
    s = P % 64
    r_idx = jnp.arange(64, dtype=jnp.int32)[:, None]                       # (64, 1)
    off = (r_idx * s) % 64
    pmod = (jnp.arange(Pp, dtype=jnp.int32) % 64)[None, :]                 # (1, Pp)
    HM = (pmod < (64 - off)).astype(jnp.float32)                           # (64, Pp)
    pblk = (jnp.arange(Pp, dtype=jnp.int32) // 64)[:, None]                # (Pp, 1)
    gidx = jnp.arange(G, dtype=jnp.int32)[None, :]                         # (1, G)
    BLK = (pblk == gidx).astype(jnp.float32)                               # (Pp, G)
    BLKP = (pblk + 1 == gidx).astype(jnp.float32)                          # (Pp, G)

    kernel = functools.partial(fused_kernel, P=P, Wp=Wp, Gw=Gw)

    def full(shape):
        return pl.BlockSpec(shape, lambda i, _s=len(shape): (0,) * _s)

    v4, v9, v5, s2p = pl.pallas_call(
        kernel,
        grid=(1,),
        in_specs=[full((8, Pp)), full((16, 8)), full((8, 8)),
                  full((64, Pp)), full((Pp, G)), full((Pp, G))],
        out_specs=(full((8, Pp)), full((8, Pp)), full((8, Pp)), full((1, Sp))),
        out_shape=(
            jax.ShapeDtypeStruct((8, Pp), jnp.float32),   # v4
            jax.ShapeDtypeStruct((8, Pp), jnp.float32),   # v9
            jax.ShapeDtypeStruct((8, Pp), jnp.float32),   # v5
            jax.ShapeDtypeStruct((1, Sp), jnp.float32),   # s2 (flat groups)
        ),
        compiler_params=pltpu.CompilerParams(dimension_semantics=("arbitrary",)),
    )(X, Wstk, BNP, HM, BLK, BLKP)

    v4_o = v4[:, :P].reshape(1, 8, Hp, Wp)
    v9_o = v9[:, :P].reshape(1, 8, Hp, Wp)
    v5_o = v5[:, :P].reshape(1, 8, Hp, Wp)
    s2 = s2p[0, :P].reshape(Hp, Wp)
    return v4_o, v9_o, v5_o, s2


def reference_forward(x1, x2, params):
    """Plain-JAX mirror of the torch forward (for correctness checking)."""
    (w1, b1, w2, b2, w3, w4, b4, g1, be1, g2, be2, g3, be3) = params

    def conv1x1_pad(x, w, b):
        xp = jnp.pad(x, ((0, 0), (0, 0), (1, 1), (1, 1)))
        y = jnp.einsum('oc,nchw->nohw', w, xp, precision=jax.lax.Precision.HIGHEST)
        if b is not None:
            y = y + b[None, :, None, None]
        return y

    def bn(x, g, be):
        mean = jnp.mean(x, axis=(0, 2, 3), keepdims=True)
        var = jnp.mean((x - mean) ** 2, axis=(0, 2, 3), keepdims=True)
        return g[None, :, None, None] * (x - mean) * lax.rsqrt(var + EPS) + be[None, :, None, None]

    v1 = conv1x1_pad(x1, w1, b1)
    v2 = conv1x1_pad(x2, w2, b2)
    v3 = v1 + v2
    v4 = bn(v3, g1, be1)
    v5 = bn(v3, g2, be2)
    v6 = conv1x1_pad(x1, w3, None)
    v7 = conv1x1_pad(x2, w4, b4)
    v8 = v6 + v7
    v9 = bn(v8, g3, be3)
    s1 = v9[None] * jnp.transpose(v4[None], (2, 1, 0, 3, 4))
    n, k = s1.shape[-2:]
    s2 = s1.reshape(n, k, -1).sum(-1) / k
    return v4, v9, v5, s2


def init_params(key):
    ks = jax.random.split(key, 7)
    w1 = jax.random.normal(ks[0], (8, 3), jnp.float32) * 0.5
    b1 = jax.random.normal(ks[1], (8,), jnp.float32) * 0.1
    w2 = jax.random.normal(ks[2], (8, 3), jnp.float32) * 0.5
    b2 = jax.random.normal(ks[3], (8,), jnp.float32) * 0.1
    w3 = jax.random.normal(ks[4], (8, 3), jnp.float32) * 0.5   # conv3: bias=False
    w4 = jax.random.normal(ks[5], (8, 3), jnp.float32) * 0.5
    b4 = jax.random.normal(ks[6], (8,), jnp.float32) * 0.1
    g1 = jnp.ones((8,), jnp.float32); be1 = jnp.zeros((8,), jnp.float32)
    g2 = jnp.ones((8,), jnp.float32); be2 = jnp.zeros((8,), jnp.float32)
    g3 = jnp.ones((8,), jnp.float32); be3 = jnp.zeros((8,), jnp.float32)
    return (w1, b1, w2, b2, w3, w4, b4, g1, be1, g2, be2, g3, be3)


if __name__ == "__main__":
    key = jax.random.PRNGKey(0)
    k_p, k_x1, k_x2 = jax.random.split(key, 3)
    params = init_params(k_p)

    # Small shapes consistent with the module: N=1, C=3 required, spatial 16x16.
    x1 = jax.random.normal(k_x1, (1, 3, 16, 16), jnp.float32)
    x2 = jax.random.normal(k_x2, (1, 3, 16, 16), jnp.float32)

    fwd = jax.jit(model_forward)
    v4, v9, v5, s2 = fwd(x1, x2, params)
    jax.block_until_ready((v4, v9, v5, s2))

    assert v4.shape == (1, 8, 18, 18)
    assert v9.shape == (1, 8, 18, 18)
    assert v5.shape == (1, 8, 18, 18)
    assert s2.shape == (18, 18)

    # correctness check against the plain-JAX reference of the torch module
    r4, r9, r5, rs2 = jax.jit(reference_forward)(x1, x2, params)
    for got, want in ((v4, r4), (v9, r9), (v5, r5), (s2, rs2)):
        err = float(jnp.max(jnp.abs(got - want)))
        assert err < 1e-3, err

    print("KERNEL_OK")
</pallas_src>

<mosaic_0001>
module attributes {stable_mosaic.version = 11 : i64} {
  func.func @fused_kernel(%arg0: i32, %arg1: memref<8x384xf32, #tpu.memory_space<vmem>>, %arg2: memref<16x8xf32, #tpu.memory_space<vmem>>, %arg3: memref<8x8xf32, #tpu.memory_space<vmem>>, %arg4: memref<64x384xf32, #tpu.memory_space<vmem>>, %arg5: memref<384x128xf32, #tpu.memory_space<vmem>>, %arg6: memref<384x128xf32, #tpu.memory_space<vmem>>, %arg7: memref<8x384xf32, #tpu.memory_space<vmem>>, %arg8: memref<8x384xf32, #tpu.memory_space<vmem>>, %arg9: memref<8x384xf32, #tpu.memory_space<vmem>>, %arg10: memref<1x384xf32, #tpu.memory_space<vmem>>) attributes {dimension_semantics = [#tpu.dimension_semantics<arbitrary>], iteration_bounds = array<i64: 1>, scalar_prefetch = 0 : i64, scratch_operands = 0 : i64, tpu.core_type = #tpu.core_type<tc>, window_params = [{pipeline_mode = #tpu.pipeline_mode<synchronous>, transform_indices = @transform_0, window_bounds = array<i64: 8, 384>}, {pipeline_mode = #tpu.pipeline_mode<synchronous>, transform_indices = @transform_1, window_bounds = array<i64: 16, 8>}, {pipeline_mode = #tpu.pipeline_mode<synchronous>, transform_indices = @transform_2, window_bounds = array<i64: 8, 8>}, {pipeline_mode = #tpu.pipeline_mode<synchronous>, transform_indices = @transform_3, window_bounds = array<i64: 64, 384>}, {pipeline_mode = #tpu.pipeline_mode<synchronous>, transform_indices = @transform_4, window_bounds = array<i64: 384, 128>}, {pipeline_mode = #tpu.pipeline_mode<synchronous>, transform_indices = @transform_5, window_bounds = array<i64: 384, 128>}, {pipeline_mode = #tpu.pipeline_mode<synchronous>, transform_indices = @transform_6, window_bounds = array<i64: 8, 384>}, {pipeline_mode = #tpu.pipeline_mode<synchronous>, transform_indices = @transform_7, window_bounds = array<i64: 8, 384>}, {pipeline_mode = #tpu.pipeline_mode<synchronous>, transform_indices = @transform_8, window_bounds = array<i64: 8, 384>}, {pipeline_mode = #tpu.pipeline_mode<synchronous>, transform_indices = @transform_9, window_bounds = array<i64: 1, 384>}]} {
    %c0 = arith.constant 0 : index
    %c0_0 = arith.constant 0 : index
    %0 = vector.load %arg1[%c0, %c0_0] : memref<8x384xf32, #tpu.memory_space<vmem>>, vector<8x384xf32>
    %c0_1 = arith.constant 0 : index
    %c0_2 = arith.constant 0 : index
    %1 = vector.load %arg2[%c0_1, %c0_2] : memref<16x8xf32, #tpu.memory_space<vmem>>, vector<16x8xf32>
    %c0_3 = arith.constant 0 : index
    %c0_4 = arith.constant 0 : index
    %2 = vector.load %arg3[%c0_3, %c0_4] : memref<8x8xf32, #tpu.memory_space<vmem>>, vector<8x8xf32>
    %3 = vector.extract_strided_slice %0 {offsets = [7, 0], sizes = [1, 384], strides = [1, 1]} : vector<8x384xf32> to vector<1x384xf32>
    %cst = arith.constant dense<0.000000e+00> : vector<16x384xf32>
    %4 = tpu.matmul %1, %0, %cst {dimension_numbers = #tpu.dot_dimension_numbers<[1], [0], [0], [1], [0, 0, 1, 1], [], []>, precision = #tpu.contract_precision<fp32>} : vector<16x8xf32>, vector<8x384xf32>, vector<16x384xf32> -> vector<16x384xf32>
    %5 = vector.extract_strided_slice %4 {offsets = [0, 0], sizes = [8, 384], strides = [1, 1]} : vector<16x384xf32> to vector<8x384xf32>
    %6 = vector.extract_strided_slice %4 {offsets = [8, 0], sizes = [8, 384], strides = [1, 1]} : vector<16x384xf32> to vector<8x384xf32>
    %7 = vector.broadcast %3 : vector<1x384xf32> to vector<8x384xf32>
    %8 = arith.mulf %5, %7 : vector<8x384xf32>
    %cst_5 = arith.constant dense<0.000000e+00> : vector<8xf32>
    %9 = vector.multi_reduction <add>, %8, %cst_5 [1] : vector<8x384xf32> to vector<8xf32>
    %10 = vector.shape_cast %9 : vector<8xf32> to vector<8x1xf32>
    %cst_6 = arith.constant 0.00308641978 : f32
    %11 = vector.broadcast %cst_6 : f32 to vector<8x1xf32>
    %12 = arith.mulf %10, %11 : vector<8x1xf32>
    %13 = arith.mulf %8, %5 : vector<8x384xf32>
    %cst_7 = arith.constant dense<0.000000e+00> : vector<8xf32>
    %14 = vector.multi_reduction <add>, %13, %cst_7 [1] : vector<8x384xf32> to vector<8xf32>
    %15 = vector.shape_cast %14 : vector<8xf32> to vector<8x1xf32>
    %cst_8 = arith.constant 0.00308641978 : f32
    %16 = vector.broadcast %cst_8 : f32 to vector<8x1xf32>
    %17 = arith.mulf %15, %16 : vector<8x1xf32>
    %18 = arith.mulf %12, %12 : vector<8x1xf32>
    %19 = arith.subf %17, %18 : vector<8x1xf32>
    %20 = vector.broadcast %12 : vector<8x1xf32> to vector<8x384xf32>
    %21 = arith.subf %5, %20 : vector<8x384xf32>
    %cst_9 = arith.constant 9.99999974E-6 : f32
    %22 = vector.broadcast %cst_9 : f32 to vector<8x1xf32>
    %23 = arith.addf %19, %22 : vector<8x1xf32>
    %24 = math.rsqrt %23 : vector<8x1xf32>
    %25 = vector.broadcast %24 : vector<8x1xf32> to vector<8x384xf32>
    %26 = arith.mulf %21, %25 : vector<8x384xf32>
    %27 = vector.broadcast %3 : vector<1x384xf32> to vector<8x384xf32>
    %28 = arith.mulf %6, %27 : vector<8x384xf32>
    %cst_10 = arith.constant dense<0.000000e+00> : vector<8xf32>
    %29 = vector.multi_reduction <add>, %28, %cst_10 [1] : vector<8x384xf32> to vector<8xf32>
    %30 = vector.shape_cast %29 : vector<8xf32> to vector<8x1xf32>
    %cst_11 = arith.constant 0.00308641978 : f32
    %31 = vector.broadcast %cst_11 : f32 to vector<8x1xf32>
    %32 = arith.mulf %30, %31 : vector<8x1xf32>
    %33 = arith.mulf %28, %6 : vector<8x384xf32>
    %cst_12 = arith.constant dense<0.000000e+00> : vector<8xf32>
    %34 = vector.multi_reduction <add>, %33, %cst_12 [1] : vector<8x384xf32> to vector<8xf32>
    %35 = vector.shape_cast %34 : vector<8xf32> to vector<8x1xf32>
    %cst_13 = arith.constant 0.00308641978 : f32
    %36 = vector.broadcast %cst_13 : f32 to vector<8x1xf32>
    %37 = arith.mulf %35, %36 : vector<8x1xf32>
    %38 = arith.mulf %32, %32 : vector<8x1xf32>
    %39 = arith.subf %37, %38 : vector<8x1xf32>
    %40 = vector.broadcast %32 : vector<8x1xf32> to vector<8x384xf32>
    %41 = arith.subf %6, %40 : vector<8x384xf32>
    %cst_14 = arith.constant 9.99999974E-6 : f32
    %42 = vector.broadcast %cst_14 : f32 to vector<8x1xf32>
    %43 = arith.addf %39, %42 : vector<8x1xf32>
    %44 = math.rsqrt %43 : vector<8x1xf32>
    %45 = vector.broadcast %44 : vector<8x1xf32> to vector<8x384xf32>
    %46 = arith.mulf %41, %45 : vector<8x384xf32>
    %47 = vector.extract_strided_slice %2 {offsets = [0, 0], sizes = [8, 1], strides = [1, 1]} : vector<8x8xf32> to vector<8x1xf32>
    %48 = vector.broadcast %47 : vector<8x1xf32> to vector<8x384xf32>
    %49 = arith.mulf %48, %26 : vector<8x384xf32>
    %50 = vector.extract_strided_slice %2 {offsets = [0, 1], sizes = [8, 1], strides = [1, 1]} : vector<8x8xf32> to vector<8x1xf32>
    %51 = vector.broadcast %50 : vector<8x1xf32> to vector<8x384xf32>
    %52 = arith.addf %49, %51 : vector<8x384xf32>
    %53 = vector.extract_strided_slice %2 {offsets = [0, 2], sizes = [8, 1], strides = [1, 1]} : vector<8x8xf32> to vector<8x1xf32>
    %54 = vector.broadcast %53 : vector<8x1xf32> to vector<8x384xf32>
    %55 = arith.mulf %54, %26 : vector<8x384xf32>
    %56 = vector.extract_strided_slice %2 {offsets = [0, 3], sizes = [8, 1], strides = [1, 1]} : vector<8x8xf32> to vector<8x1xf32>
    %57 = vector.broadcast %56 : vector<8x1xf32> to vector<8x384xf32>
    %58 = arith.addf %55, %57 : vector<8x384xf32>
    %59 = vector.extract_strided_slice %2 {offsets = [0, 4], sizes = [8, 1], strides = [1, 1]} : vector<8x8xf32> to vector<8x1xf32>
    %60 = vector.broadcast %59 : vector<8x1xf32> to vector<8x384xf32>
    %61 = arith.mulf %60, %46 : vector<8x384xf32>
    %62 = vector.extract_strided_slice %2 {offsets = [0, 5], sizes = [8, 1], strides = [1, 1]} : vector<8x8xf32> to vector<8x1xf32>
    %63 = vector.broadcast %62 : vector<8x1xf32> to vector<8x384xf32>
    %64 = arith.addf %61, %63 : vector<8x384xf32>
    %c0_15 = arith.constant 0 : index
    %c0_16 = arith.constant 0 : index
    %65 = vector.load %arg7[%c0_15, %c0_16] : memref<8x384xf32, #tpu.memory_space<vmem>>, vector<8x384xf32>
    tpu.vector_store %arg7[%c0_15, %c0_16], %52 {strides = array<i32>} : memref<8x384xf32, #tpu.memory_space<vmem>>, vector<8x384xf32>,
    %c0_17 = arith.constant 0 : index
    %c0_18 = arith.constant 0 : index
    %66 = vector.load %arg8[%c0_17, %c0_18] : memref<8x384xf32, #tpu.memory_space<vmem>>, vector<8x384xf32>
    tpu.vector_store %arg8[%c0_17, %c0_18], %64 {strides = array<i32>} : memref<8x384xf32, #tpu.memory_space<vmem>>, vector<8x384xf32>,
    %c0_19 = arith.constant 0 : index
    %c0_20 = arith.constant 0 : index
    %67 = vector.load %arg9[%c0_19, %c0_20] : memref<8x384xf32, #tpu.memory_space<vmem>>, vector<8x384xf32>
    tpu.vector_store %arg9[%c0_19, %c0_20], %58 {strides = array<i32>} : memref<8x384xf32, #tpu.memory_space<vmem>>, vector<8x384xf32>,
    %68 = vector.broadcast %3 : vector<1x384xf32> to vector<8x384xf32>
    %69 = arith.mulf %52, %68 : vector<8x384xf32>
    %70 = vector.extract_strided_slice %69 {offsets = [0, 0], sizes = [1, 384], strides = [1, 1]} : vector<8x384xf32> to vector<1x384xf32>
    %71 = vector.broadcast %70 : vector<1x384xf32> to vector<8x384xf32>
    %72 = arith.mulf %71, %64 : vector<8x384xf32>
    %73 = vector.extract_strided_slice %69 {offsets = [1, 0], sizes = [1, 384], strides = [1, 1]} : vector<8x384xf32> to vector<1x384xf32>
    %74 = vector.broadcast %73 : vector<1x384xf32> to vector<8x384xf32>
    %75 = arith.mulf %74, %64 : vector<8x384xf32>
    %76 = vector.extract_strided_slice %69 {offsets = [2, 0], sizes = [1, 384], strides = [1, 1]} : vector<8x384xf32> to vector<1x384xf32>
    %77 = vector.broadcast %76 : vector<1x384xf32> to vector<8x384xf32>
    %78 = arith.mulf %77, %64 : vector<8x384xf32>
    %79 = vector.extract_strided_slice %69 {offsets = [3, 0], sizes = [1, 384], strides = [1, 1]} : vector<8x384xf32> to vector<1x384xf32>
    %80 = vector.broadcast %79 : vector<1x384xf32> to vector<8x384xf32>
    %81 = arith.mulf %80, %64 : vector<8x384xf32>
    %82 = vector.extract_strided_slice %69 {offsets = [4, 0], sizes = [1, 384], strides = [1, 1]} : vector<8x384xf32> to vector<1x384xf32>
    %83 = vector.broadcast %82 : vector<1x384xf32> to vector<8x384xf32>
    %84 = arith.mulf %83, %64 : vector<8x384xf32>
    %85 = vector.extract_strided_slice %69 {offsets = [5, 0], sizes = [1, 384], strides = [1, 1]} : vector<8x384xf32> to vector<1x384xf32>
    %86 = vector.broadcast %85 : vector<1x384xf32> to vector<8x384xf32>
    %87 = arith.mulf %86, %64 : vector<8x384xf32>
    %88 = vector.extract_strided_slice %69 {offsets = [6, 0], sizes = [1, 384], strides = [1, 1]} : vector<8x384xf32> to vector<1x384xf32>
    %89 = vector.broadcast %88 : vector<1x384xf32> to vector<8x384xf32>
    %90 = arith.mulf %89, %64 : vector<8x384xf32>
    %91 = vector.extract_strided_slice %69 {offsets = [7, 0], sizes = [1, 384], strides = [1, 1]} : vector<8x384xf32> to vector<1x384xf32>
    %92 = vector.broadcast %91 : vector<1x384xf32> to vector<8x384xf32>
    %93 = arith.mulf %92, %64 : vector<8x384xf32>
    %94 = tpu.concatenate %72, %75, %78, %81, %84, %87, %90, %93 in 0 : vector<8x384xf32>, vector<8x384xf32>, vector<8x384xf32>, vector<8x384xf32>, vector<8x384xf32>, vector<8x384xf32>, vector<8x384xf32>, vector<8x384xf32> -> vector<64x384xf32>
    %c0_21 = arith.constant 0 : index
    %c0_22 = arith.constant 0 : index
    %95 = vector.load %arg4[%c0_21, %c0_22] : memref<64x384xf32, #tpu.memory_space<vmem>>, vector<64x384xf32>
    %96 = arith.mulf %94, %95 : vector<64x384xf32>
    %97 = arith.subf %94, %96 : vector<64x384xf32>
    %c0_23 = arith.constant 0 : index
    %c0_24 = arith.constant 0 : index
    %98 = vector.load %arg5[%c0_23, %c0_24] : memref<384x128xf32, #tpu.memory_space<vmem>>, vector<384x128xf32>
    %cst_25 = arith.constant dense<0.000000e+00> : vector<64x128xf32>
    %99 = tpu.matmul %96, %98, %cst_25 {dimension_numbers = #tpu.dot_dimension_numbers<[1], [0], [0], [1], [0, 0, 1, 1], [], []>, precision = #tpu.contract_precision<fp32>} : vector<64x384xf32>, vector<384x128xf32>, vector<64x128xf32> -> vector<64x128xf32>
    %c0_26 = arith.constant 0 : index
    %c0_27 = arith.constant 0 : index
    %100 = vector.load %arg6[%c0_26, %c0_27] : memref<384x128xf32, #tpu.memory_space<vmem>>, vector<384x128xf32>
    %cst_28 = arith.constant dense<0.000000e+00> : vector<64x128xf32>
    %101 = tpu.matmul %97, %100, %cst_28 {dimension_numbers = #tpu.dot_dimension_numbers<[1], [0], [0], [1], [0, 0, 1, 1], [], []>, precision = #tpu.contract_precision<fp32>} : vector<64x384xf32>, vector<384x128xf32>, vector<64x128xf32> -> vector<64x128xf32>
    %102 = arith.addf %99, %101 : vector<64x128xf32>
    %cst_29 = arith.constant 0.055555556 : f32
    %103 = vector.broadcast %cst_29 : f32 to vector<64x128xf32>
    %104 = arith.mulf %102, %103 : vector<64x128xf32>
    %cst_30 = arith.constant 0.000000e+00 : f32
    %105 = vector.broadcast %cst_30 : f32 to vector<1x384xf32>
    %c0_31 = arith.constant 0 : index
    %c0_32 = arith.constant 0 : index
    %106 = vector.load %arg10[%c0_31, %c0_32] : memref<1x384xf32, #tpu.memory_space<vmem>>, vector<1x384xf32>
    tpu.vector_store %arg10[%c0_31, %c0_32], %105 {strides = array<i32>} : memref<1x384xf32, #tpu.memory_space<vmem>>, vector<1x384xf32>,
    %c0_33 = arith.constant 0 : index
    %c0_34 = arith.constant 0 : index
    %107 = vector.load %arg10[%c0_33, %c0_34] : memref<1x384xf32, #tpu.memory_space<vmem>>, vector<1x7xf32>
    %108 = vector.extract_strided_slice %104 {offsets = [0, 0], sizes = [1, 7], strides = [1, 1]} : vector<64x128xf32> to vector<1x7xf32>
    %109 = arith.addf %107, %108 : vector<1x7xf32>
    %c0_35 = arith.constant 0 : index
    %c0_36 = arith.constant 0 : index
    %110 = vector.load %arg10[%c0_35, %c0_36] : memref<1x384xf32, #tpu.memory_space<vmem>>, vector<1x7xf32>
    tpu.vector_store %arg10[%c0_35, %c0_36], %109 {strides = array<i32>} : memref<1x384xf32, #tpu.memory_space<vmem>>, vector<1x7xf32>,
    %c0_37 = arith.constant 0 : index
    %c5 = arith.constant 5 : index
    %111 = vector.load %arg10[%c0_37, %c5] : memref<1x384xf32, #tpu.memory_space<vmem>>, vector<1x7xf32>
    %112 = vector.extract_strided_slice %104 {offsets = [1, 0], sizes = [1, 7], strides = [1, 1]} : vector<64x128xf32> to vector<1x7xf32>
    %113 = arith.addf %111, %112 : vector<1x7xf32>
    %c0_38 = arith.constant 0 : index
    %c5_39 = arith.constant 5 : index
    %114 = vector.load %arg10[%c0_38, %c5_39] : memref<1x384xf32, #tpu.memory_space<vmem>>, vector<1x7xf32>
    tpu.vector_store %arg10[%c0_38, %c5_39], %113 {strides = array<i32>} : memref<1x384xf32, #tpu.memory_space<vmem>>, vector<1x7xf32>,
    %c0_40 = arith.constant 0 : index
    %c10 = arith.constant 10 : index
    %115 = vector.load %arg10[%c0_40, %c10] : memref<1x384xf32, #tpu.memory_space<vmem>>, vector<1x7xf32>
    %116 = vector.extract_strided_slice %104 {offsets = [2, 0], sizes = [1, 7], strides = [1, 1]} : vector<64x128xf32> to vector<1x7xf32>
    %117 = arith.addf %115, %116 : vector<1x7xf32>
    %c0_41 = arith.constant 0 : index
    %c10_42 = arith.constant 10 : index
    %118 = vector.load %arg10[%c0_41, %c10_42] : memref<1x384xf32, #tpu.memory_space<vmem>>, vector<1x7xf32>
    tpu.vector_store %arg10[%c0_41, %c10_42], %117 {strides = array<i32>} : memref<1x384xf32, #tpu.memory_space<vmem>>, vector<1x7xf32>,
    %c0_43 = arith.constant 0 : index
    %c15 = arith.constant 15 : index
    %119 = vector.load %arg10[%c0_43, %c15] : memref<1x384xf32, #tpu.memory_space<vmem>>, vector<1x7xf32>
    %120 = vector.extract_strided_slice %104 {offsets = [3, 0], sizes = [1, 7], strides = [1, 1]} : vector<64x128xf32> to vector<1x7xf32>
    %121 = arith.addf %119, %120 : vector<1x7xf32>
    %c0_44 = arith.constant 0 : index
    %c15_45 = arith.constant 15 : index
    %122 = vector.load %arg10[%c0_44, %c15_45] : memref<1x384xf32, #tpu.memory_space<vmem>>, vector<1x7xf32>
    tpu.vector_store %arg10[%c0_44, %c15_45], %121 {strides = array<i32>} : memref<1x384xf32, #tpu.memory_space<vmem>>, vector<1x7xf32>,
    %c0_46 = arith.constant 0 : index
    %c20 = arith.constant 20 : index
    %123 = vector.load %arg10[%c0_46, %c20] : memref<1x384xf32, #tpu.memory_space<vmem>>, vector<1x7xf32>
    %124 = vector.extract_strided_slice %104 {offsets = [4, 0], sizes = [1, 7], strides = [1, 1]} : vector<64x128xf32> to vector<1x7xf32>
    %125 = arith.addf %123, %124 : vector<1x7xf32>
    %c0_47 = arith.constant 0 : index
    %c20_48 = arith.constant 20 : index
    %126 = vector.load %arg10[%c0_47, %c20_48] : memref<1x384xf32, #tpu.memory_space<vmem>>, vector<1x7xf32>
    tpu.vector_store %arg10[%c0_47, %c20_48], %125 {strides = array<i32>} : memref<1x384xf32, #tpu.memory_space<vmem>>, vector<1x7xf32>,
    %c0_49 = arith.constant 0 : index
    %c25 = arith.constant 25 : index
    %127 = vector.load %arg10[%c0_49, %c25] : memref<1x384xf32, #tpu.memory_space<vmem>>, vector<1x7xf32>
    %128 = vector.extract_strided_slice %104 {offsets = [5, 0], sizes = [1, 7], strides = [1, 1]} : vector<64x128xf32> to vector<1x7xf32>
    %129 = arith.addf %127, %128 : vector<1x7xf32>
    %c0_50 = arith.constant 0 : index
    %c25_51 = arith.constant 25 : index
    %130 = vector.load %arg10[%c0_50, %c25_51] : memref<1x384xf32, #tpu.memory_space<vmem>>, vector<1x7xf32>
    tpu.vector_store %arg10[%c0_50, %c25_51], %129 {strides = array<i32>} : memref<1x384xf32, #tpu.memory_space<vmem>>, vector<1x7xf32>,
    %c0_52 = arith.constant 0 : index
    %c30 = arith.constant 30 : index
    %131 = vector.load %arg10[%c0_52, %c30] : memref<1x384xf32, #tpu.memory_space<vmem>>, vector<1x7xf32>
    %132 = vector.extract_strided_slice %104 {offsets = [6, 0], sizes = [1, 7], strides = [1, 1]} : vector<64x128xf32> to vector<1x7xf32>
    %133 = arith.addf %131, %132 : vector<1x7xf32>
    %c0_53 = arith.constant 0 : index
    %c30_54 = arith.constant 30 : index
    %134 = vector.load %arg10[%c0_53, %c30_54] : memref<1x384xf32, #tpu.memory_space<vmem>>, vector<1x7xf32>
    tpu.vector_store %arg10[%c0_53, %c30_54], %133 {strides = array<i32>} : memref<1x384xf32, #tpu.memory_space<vmem>>, vector<1x7xf32>,
    %c0_55 = arith.constant 0 : index
    %c35 = arith.constant 35 : index
    %135 = vector.load %arg10[%c0_55, %c35] : memref<1x384xf32, #tpu.memory_space<vmem>>, vector<1x7xf32>
    %136 = vector.extract_strided_slice %104 {offsets = [7, 0], sizes = [1, 7], strides = [1, 1]} : vector<64x128xf32> to vector<1x7xf32>
    %137 = arith.addf %135, %136 : vector<1x7xf32>
    %c0_56 = arith.constant 0 : index
    %c35_57 = arith.constant 35 : index
    %138 = vector.load %arg10[%c0_56, %c35_57] : memref<1x384xf32, #tpu.memory_space<vmem>>, vector<1x7xf32>
    tpu.vector_store %arg10[%c0_56, %c35_57], %137 {strides = array<i32>} : memref<1x384xf32, #tpu.memory_space<vmem>>, vector<1x7xf32>,
    %c0_58 = arith.constant 0 : index
    %c40 = arith.constant 40 : index
    %139 = vector.load %arg10[%c0_58, %c40] : memref<1x384xf32, #tpu.memory_space<vmem>>, vector<1x7xf32>
    %140 = vector.extract_strided_slice %104 {offsets = [8, 0], sizes = [1, 7], strides = [1, 1]} : vector<64x128xf32> to vector<1x7xf32>
    %141 = arith.addf %139, %140 : vector<1x7xf32>
    %c0_59 = arith.constant 0 : index
    %c40_60 = arith.constant 40 : index
    %142 = vector.load %arg10[%c0_59, %c40_60] : memref<1x384xf32, #tpu.memory_space<vmem>>, vector<1x7xf32>
    tpu.vector_store %arg10[%c0_59, %c40_60], %141 {strides = array<i32>} : memref<1x384xf32, #tpu.memory_space<vmem>>, vector<1x7xf32>,
    %c0_61 = arith.constant 0 : index
    %c45 = arith.constant 45 : index
    %143 = vector.load %arg10[%c0_61, %c45] : memref<1x384xf32, #tpu.memory_space<vmem>>, vector<1x7xf32>
    %144 = vector.extract_strided_slice %104 {offsets = [9, 0], sizes = [1, 7], strides = [1, 1]} : vector<64x128xf32> to vector<1x7xf32>
    %145 = arith.addf %143, %144 : vector<1x7xf32>
    %c0_62 = arith.constant 0 : index
    %c45_63 = arith.constant 45 : index
    %146 = vector.load %arg10[%c0_62, %c45_63] : memref<1x384xf32, #tpu.memory_space<vmem>>, vector<1x7xf32>
    tpu.vector_store %arg10[%c0_62, %c45_63], %145 {strides = array<i32>} : memref<1x384xf32, #tpu.memory_space<vmem>>, vector<1x7xf32>,
    %c0_64 = arith.constant 0 : index
    %c50 = arith.constant 50 : index
    %147 = vector.load %arg10[%c0_64, %c50] : memref<1x384xf32, #tpu.memory_space<vmem>>, vector<1x7xf32>
    %148 = vector.extract_strided_slice %104 {offsets = [10, 0], sizes = [1, 7], strides = [1, 1]} : vector<64x128xf32> to vector<1x7xf32>
    %149 = arith.addf %147, %148 : vector<1x7xf32>
    %c0_65 = arith.constant 0 : index
    %c50_66 = arith.constant 50 : index
    %150 = vector.load %arg10[%c0_65, %c50_66] : memref<1x384xf32, #tpu.memory_space<vmem>>, vector<1x7xf32>
    tpu.vector_store %arg10[%c0_65, %c50_66], %149 {strides = array<i32>} : memref<1x384xf32, #tpu.memory_space<vmem>>, vector<1x7xf32>,
    %c0_67 = arith.constant 0 : index
    %c55 = arith.constant 55 : index
    %151 = vector.load %arg10[%c0_67, %c55] : memref<1x384xf32, #tpu.memory_space<vmem>>, vector<1x7xf32>
    %152 = vector.extract_strided_slice %104 {offsets = [11, 0], sizes = [1, 7], strides = [1, 1]} : vector<64x128xf32> to vector<1x7xf32>
    %153 = arith.addf %151, %152 : vector<1x7xf32>
    %c0_68 = arith.constant 0 : index
    %c55_69 = arith.constant 55 : index
    %154 = vector.load %arg10[%c0_68, %c55_69] : memref<1x384xf32, #tpu.memory_space<vmem>>, vector<1x7xf32>
    tpu.vector_store %arg10[%c0_68, %c55_69], %153 {strides = array<i32>} : memref<1x384xf32, #tpu.memory_space<vmem>>, vector<1x7xf32>,
    %c0_70 = arith.constant 0 : index
    %c60 = arith.constant 60 : index
    %155 = vector.load %arg10[%c0_70, %c60] : memref<1x384xf32, #tpu.memory_space<vmem>>, vector<1x7xf32>
    %156 = vector.extract_strided_slice %104 {offsets = [12, 0], sizes = [1, 7], strides = [1, 1]} : vector<64x128xf32> to vector<1x7xf32>
    %157 = arith.addf %155, %156 : vector<1x7xf32>
    %c0_71 = arith.constant 0 : index
    %c60_72 = arith.constant 60 : index
    %158 = vector.load %arg10[%c0_71, %c60_72] : memref<1x384xf32, #tpu.memory_space<vmem>>, vector<1x7xf32>
    tpu.vector_store %arg10[%c0_71, %c60_72], %157 {strides = array<i32>} : memref<1x384xf32, #tpu.memory_space<vmem>>, vector<1x7xf32>,
    %c0_73 = arith.constant 0 : index
    %c65 = arith.constant 65 : index
    %159 = vector.load %arg10[%c0_73, %c65] : memref<1x384xf32, #tpu.memory_space<vmem>>, vector<1x7xf32>
    %160 = vector.extract_strided_slice %104 {offsets = [13, 0], sizes = [1, 7], strides = [1, 1]} : vector<64x128xf32> to vector<1x7xf32>
    %161 = arith.addf %159, %160 : vector<1x7xf32>
    %c0_74 = arith.constant 0 : index
    %c65_75 = arith.constant 65 : index
    %162 = vector.load %arg10[%c0_74, %c65_75] : memref<1x384xf32, #tpu.memory_space<vmem>>, vector<1x7xf32>
    tpu.vector_store %arg10[%c0_74, %c65_75], %161 {strides = array<i32>} : memref<1x384xf32, #tpu.memory_space<vmem>>, vector<1x7xf32>,
    %c0_76 = arith.constant 0 : index
    %c70 = arith.constant 70 : index
    %163 = vector.load %arg10[%c0_76, %c70] : memref<1x384xf32, #tpu.memory_space<vmem>>, vector<1x7xf32>
    %164 = vector.extract_strided_slice %104 {offsets = [14, 0], sizes = [1, 7], strides = [1, 1]} : vector<64x128xf32> to vector<1x7xf32>
    %165 = arith.addf %163, %164 : vector<1x7xf32>
    %c0_77 = arith.constant 0 : index
    %c70_78 = arith.constant 70 : index
    %166 = vector.load %arg10[%c0_77, %c70_78] : memref<1x384xf32, #tpu.memory_space<vmem>>, vector<1x7xf32>
    tpu.vector_store %arg10[%c0_77, %c70_78], %165 {strides = array<i32>} : memref<1x384xf32, #tpu.memory_space<vmem>>, vector<1x7xf32>,
    %c0_79 = arith.constant 0 : index
    %c75 = arith.constant 75 : index
    %167 = vector.load %arg10[%c0_79, %c75] : memref<1x384xf32, #tpu.memory_space<vmem>>, vector<1x7xf32>
    %168 = vector.extract_strided_slice %104 {offsets = [15, 0], sizes = [1, 7], strides = [1, 1]} : vector<64x128xf32> to vector<1x7xf32>
    %169 = arith.addf %167, %168 : vector<1x7xf32>
    %c0_80 = arith.constant 0 : index
    %c75_81 = arith.constant 75 : index
    %170 = vector.load %arg10[%c0_80, %c75_81] : memref<1x384xf32, #tpu.memory_space<vmem>>, vector<1x7xf32>
    tpu.vector_store %arg10[%c0_80, %c75_81], %169 {strides = array<i32>} : memref<1x384xf32, #tpu.memory_space<vmem>>, vector<1x7xf32>,
    %c0_82 = arith.constant 0 : index
    %c81 = arith.constant 81 : index
    %171 = vector.load %arg10[%c0_82, %c81] : memref<1x384xf32, #tpu.memory_space<vmem>>, vector<1x7xf32>
    %172 = vector.extract_strided_slice %104 {offsets = [16, 0], sizes = [1, 7], strides = [1, 1]} : vector<64x128xf32> to vector<1x7xf32>
    %173 = arith.addf %171, %172 : vector<1x7xf32>
    %c0_83 = arith.constant 0 : index
    %c81_84 = arith.constant 81 : index
    %174 = vector.load %arg10[%c0_83, %c81_84] : memref<1x384xf32, #tpu.memory_space<vmem>>, vector<1x7xf32>
    tpu.vector_store %arg10[%c0_83, %c81_84], %173 {strides = array<i32>} : memref<1x384xf32, #tpu.memory_space<vmem>>, vector<1x7xf32>,
    %c0_85 = arith.constant 0 : index
    %c86 = arith.constant 86 : index
    %175 = vector.load %arg10[%c0_85, %c86] : memref<1x384xf32, #tpu.memory_space<vmem>>, vector<1x7xf32>
    %176 = vector.extract_strided_slice %104 {offsets = [17, 0], sizes = [1, 7], strides = [1, 1]} : vector<64x128xf32> to vector<1x7xf32>
    %177 = arith.addf %175, %176 : vector<1x7xf32>
    %c0_86 = arith.constant 0 : index
    %c86_87 = arith.constant 86 : index
    %178 = vector.load %arg10[%c0_86, %c86_87] : memref<1x384xf32, #tpu.memory_space<vmem>>, vector<1x7xf32>
    tpu.vector_store %arg10[%c0_86, %c86_87], %177 {strides = array<i32>} : memref<1x384xf32, #tpu.memory_space<vmem>>, vector<1x7xf32>,
    %c0_88 = arith.constant 0 : index
    %c91 = arith.constant 91 : index
    %179 = vector.load %arg10[%c0_88, %c91] : memref<1x384xf32, #tpu.memory_space<vmem>>, vector<1x7xf32>
    %180 = vector.extract_strided_slice %104 {offsets = [18, 0], sizes = [1, 7], strides = [1, 1]} : vector<64x128xf32> to vector<1x7xf32>
    %181 = arith.addf %179, %180 : vector<1x7xf32>
    %c0_89 = arith.constant 0 : index
    %c91_90 = arith.constant 91 : index
    %182 = vector.load %arg10[%c0_89, %c91_90] : memref<1x384xf32, #tpu.memory_space<vmem>>, vector<1x7xf32>
    tpu.vector_store %arg10[%c0_89, %c91_90], %181 {strides = array<i32>} : memref<1x384xf32, #tpu.memory_space<vmem>>, vector<1x7xf32>,
    %c0_91 = arith.constant 0 : index
    %c96 = arith.constant 96 : index
    %183 = vector.load %arg10[%c0_91, %c96] : memref<1x384xf32, #tpu.memory_space<vmem>>, vector<1x7xf32>
    %184 = vector.extract_strided_slice %104 {offsets = [19, 0], sizes = [1, 7], strides = [1, 1]} : vector<64x128xf32> to vector<1x7xf32>
    %185 = arith.addf %183, %184 : vector<1x7xf32>
    %c0_92 = arith.constant 0 : index
    %c96_93 = arith.constant 96 : index
    %186 = vector.load %arg10[%c0_92, %c96_93] : memref<1x384xf32, #tpu.memory_space<vmem>>, vector<1x7xf32>
    tpu.vector_store %arg10[%c0_92, %c96_93], %185 {strides = array<i32>} : memref<1x384xf32, #tpu.memory_space<vmem>>, vector<1x7xf32>,
    %c0_94 = arith.constant 0 : index
    %c101 = arith.constant 101 : index
    %187 = vector.load %arg10[%c0_94, %c101] : memref<1x384xf32, #tpu.memory_space<vmem>>, vector<1x7xf32>
    %188 = vector.extract_strided_slice %104 {offsets = [20, 0], sizes = [1, 7], strides = [1, 1]} : vector<64x128xf32> to vector<1x7xf32>
    %189 = arith.addf %187, %188 : vector<1x7xf32>
    %c0_95 = arith.constant 0 : index
    %c101_96 = arith.constant 101 : index
    %190 = vector.load %arg10[%c0_95, %c101_96] : memref<1x384xf32, #tpu.memory_space<vmem>>, vector<1x7xf32>
    tpu.vector_store %arg10[%c0_95, %c101_96], %189 {strides = array<i32>} : memref<1x384xf32, #tpu.memory_space<vmem>>, vector<1x7xf32>,
    %c0_97 = arith.constant 0 : index
    %c106 = arith.constant 106 : index
    %191 = vector.load %arg10[%c0_97, %c106] : memref<1x384xf32, #tpu.memory_space<vmem>>, vector<1x7xf32>
    %192 = vector.extract_strided_slice %104 {offsets = [21, 0], sizes = [1, 7], strides = [1, 1]} : vector<64x128xf32> to vector<1x7xf32>
    %193 = arith.addf %191, %192 : vector<1x7xf32>
    %c0_98 = arith.constant 0 : index
    %c106_99 = arith.constant 106 : index
    %194 = vector.load %arg10[%c0_98, %c106_99] : memref<1x384xf32, #tpu.memory_space<vmem>>, vector<1x7xf32>
    tpu.vector_store %arg10[%c0_98, %c106_99], %193 {strides = array<i32>} : memref<1x384xf32, #tpu.memory_space<vmem>>, vector<1x7xf32>,
    %c0_100 = arith.constant 0 : index
    %c111 = arith.constant 111 : index
    %195 = vector.load %arg10[%c0_100, %c111] : memref<1x384xf32, #tpu.memory_space<vmem>>, vector<1x7xf32>
    %196 = vector.extract_strided_slice %104 {offsets = [22, 0], sizes = [1, 7], strides = [1, 1]} : vector<64x128xf32> to vector<1x7xf32>
    %197 = arith.addf %195, %196 : vector<1x7xf32>
    %c0_101 = arith.constant 0 : index
    %c111_102 = arith.constant 111 : index
    %198 = vector.load %arg10[%c0_101, %c111_102] : memref<1x384xf32, #tpu.memory_space<vmem>>, vector<1x7xf32>
    tpu.vector_store %arg10[%c0_101, %c111_102], %197 {strides = array<i32>} : memref<1x384xf32, #tpu.memory_space<vmem>>, vector<1x7xf32>,
    %c0_103 = arith.constant 0 : index
    %c116 = arith.constant 116 : index
    %199 = vector.load %arg10[%c0_103, %c116] : memref<1x384xf32, #tpu.memory_space<vmem>>, vector<1x7xf32>
    %200 = vector.extract_strided_slice %104 {offsets = [23, 0], sizes = [1, 7], strides = [1, 1]} : vector<64x128xf32> to vector<1x7xf32>
    %201 = arith.addf %199, %200 : vector<1x7xf32>
    %c0_104 = arith.constant 0 : index
    %c116_105 = arith.constant 116 : index
    %202 = vector.load %arg10[%c0_104, %c116_105] : memref<1x384xf32, #tpu.memory_space<vmem>>, vector<1x7xf32>
    tpu.vector_store %arg10[%c0_104, %c116_105], %201 {strides = array<i32>} : memref<1x384xf32, #tpu.memory_space<vmem>>, vector<1x7xf32>,
    %c0_106 = arith.constant 0 : index
    %c121 = arith.constant 121 : index
    %203 = vector.load %arg10[%c0_106, %c121] : memref<1x384xf32, #tpu.memory_space<vmem>>, vector<1x7xf32>
    %204 = vector.extract_strided_slice %104 {offsets = [24, 0], sizes = [1, 7], strides = [1, 1]} : vector<64x128xf32> to vector<1x7xf32>
    %205 = arith.addf %203, %204 : vector<1x7xf32>
    %c0_107 = arith.constant 0 : index
    %c121_108 = arith.constant 121 : index
    %206 = vector.load %arg10[%c0_107, %c121_108] : memref<1x384xf32, #tpu.memory_space<vmem>>, vector<1x7xf32>
    tpu.vector_store %arg10[%c0_107, %c121_108], %205 {strides = array<i32>} : memref<1x384xf32, #tpu.memory_space<vmem>>, vector<1x7xf32>,
    %c0_109 = arith.constant 0 : index
    %c126 = arith.constant 126 : index
    %207 = vector.load %arg10[%c0_109, %c126] : memref<1x384xf32, #tpu.memory_space<vmem>>, vector<1x7xf32>
    %208 = vector.extract_strided_slice %104 {offsets = [25, 0], sizes = [1, 7], strides = [1, 1]} : vector<64x128xf32> to vector<1x7xf32>
    %209 = arith.addf %207, %208 : vector<1x7xf32>
    %c0_110 = arith.constant 0 : index
    %c126_111 = arith.constant 126 : index
    %210 = vector.load %arg10[%c0_110, %c126_111] : memref<1x384xf32, #tpu.memory_space<vmem>>, vector<1x7xf32>
    tpu.vector_store %arg10[%c0_110, %c126_111], %209 {strides = array<i32>} : memref<1x384xf32, #tpu.memory_space<vmem>>, vector<1x7xf32>,
    %c0_112 = arith.constant 0 : index
    %c131 = arith.constant 131 : index
    %211 = vector.load %arg10[%c0_112, %c131] : memref<1x384xf32, #tpu.memory_space<vmem>>, vector<1x7xf32>
    %212 = vector.extract_strided_slice %104 {offsets = [26, 0], sizes = [1, 7], strides = [1, 1]} : vector<64x128xf32> to vector<1x7xf32>
    %213 = arith.addf %211, %212 : vector<1x7xf32>
    %c0_113 = arith.constant 0 : index
    %c131_114 = arith.constant 131 : index
    %214 = vector.load %arg10[%c0_113, %c131_114] : memref<1x384xf32, #tpu.memory_space<vmem>>, vector<1x7xf32>
    tpu.vector_store %arg10[%c0_113, %c131_114], %213 {strides = array<i32>} : memref<1x384xf32, #tpu.memory_space<vmem>>, vector<1x7xf32>,
    %c0_115 = arith.constant 0 : index
    %c136 = arith.constant 136 : index
    %215 = vector.load %arg10[%c0_115, %c136] : memref<1x384xf32, #tpu.memory_space<vmem>>, vector<1x7xf32>
    %216 = vector.extract_strided_slice %104 {offsets = [27, 0], sizes = [1, 7], strides = [1, 1]} : vector<64x128xf32> to vector<1x7xf32>
    %217 = arith.addf %215, %216 : vector<1x7xf32>
    %c0_116 = arith.constant 0 : index
    %c136_117 = arith.constant 136 : index
    %218 = vector.load %arg10[%c0_116, %c136_117] : memref<1x384xf32, #tpu.memory_space<vmem>>, vector<1x7xf32>
    tpu.vector_store %arg10[%c0_116, %c136_117], %217 {strides = array<i32>} : memref<1x384xf32, #tpu.memory_space<vmem>>, vector<1x7xf32>,
    %c0_118 = arith.constant 0 : index
    %c141 = arith.constant 141 : index
    %219 = vector.load %arg10[%c0_118, %c141] : memref<1x384xf32, #tpu.memory_space<vmem>>, vector<1x7xf32>
    %220 = vector.extract_strided_slice %104 {offsets = [28, 0], sizes = [1, 7], strides = [1, 1]} : vector<64x128xf32> to vector<1x7xf32>
    %221 = arith.addf %219, %220 : vector<1x7xf32>
    %c0_119 = arith.constant 0 : index
    %c141_120 = arith.constant 141 : index
    %222 = vector.load %arg10[%c0_119, %c141_120] : memref<1x384xf32, #tpu.memory_space<vmem>>, vector<1x7xf32>
    tpu.vector_store %arg10[%c0_119, %c141_120], %221 {strides = array<i32>} : memref<1x384xf32, #tpu.memory_space<vmem>>, vector<1x7xf32>,
    %c0_121 = arith.constant 0 : index
    %c146 = arith.constant 146 : index
    %223 = vector.load %arg10[%c0_121, %c146] : memref<1x384xf32, #tpu.memory_space<vmem>>, vector<1x7xf32>
    %224 = vector.extract_strided_slice %104 {offsets = [29, 0], sizes = [1, 7], strides = [1, 1]} : vector<64x128xf32> to vector<1x7xf32>
    %225 = arith.addf %223, %224 : vector<1x7xf32>
    %c0_122 = arith.constant 0 : index
    %c146_123 = arith.constant 146 : index
    %226 = vector.load %arg10[%c0_122, %c146_123] : memref<1x384xf32, #tpu.memory_space<vmem>>, vector<1x7xf32>
    tpu.vector_store %arg10[%c0_122, %c146_123], %225 {strides = array<i32>} : memref<1x384xf32, #tpu.memory_space<vmem>>, vector<1x7xf32>,
    %c0_124 = arith.constant 0 : index
    %c151 = arith.constant 151 : index
    %227 = vector.load %arg10[%c0_124, %c151] : memref<1x384xf32, #tpu.memory_space<vmem>>, vector<1x7xf32>
    %228 = vector.extract_strided_slice %104 {offsets = [30, 0], sizes = [1, 7], strides = [1, 1]} : vector<64x128xf32> to vector<1x7xf32>
    %229 = arith.addf %227, %228 : vector<1x7xf32>
    %c0_125 = arith.constant 0 : index
    %c151_126 = arith.constant 151 : index
    %230 = vector.load %arg10[%c0_125, %c151_126] : memref<1x384xf32, #tpu.memory_space<vmem>>, vector<1x7xf32>
    tpu.vector_store %arg10[%c0_125, %c151_126], %229 {strides = array<i32>} : memref<1x384xf32, #tpu.memory_space<vmem>>, vector<1x7xf32>,
    %c0_127 = arith.constant 0 : index
    %c156 = arith.constant 156 : index
    %231 = vector.load %arg10[%c0_127, %c156] : memref<1x384xf32, #tpu.memory_space<vmem>>, vector<1x7xf32>
    %232 = vector.extract_strided_slice %104 {offsets = [31, 0], sizes = [1, 7], strides = [1, 1]} : vector<64x128xf32> to vector<1x7xf32>
    %233 = arith.addf %231, %232 : vector<1x7xf32>
    %c0_128 = arith.constant 0 : index
    %c156_129 = arith.constant 156 : index
    %234 = vector.load %arg10[%c0_128, %c156_129] : memref<1x384xf32, #tpu.memory_space<vmem>>, vector<1x7xf32>
    tpu.vector_store %arg10[%c0_128, %c156_129], %233 {strides = array<i32>} : memref<1x384xf32, #tpu.memory_space<vmem>>, vector<1x7xf32>,
    %c0_130 = arith.constant 0 : index
    %c162 = arith.constant 162 : index
    %235 = vector.load %arg10[%c0_130, %c162] : memref<1x384xf32, #tpu.memory_space<vmem>>, vector<1x7xf32>
    %236 = vector.extract_strided_slice %104 {offsets = [32, 0], sizes = [1, 7], strides = [1, 1]} : vector<64x128xf32> to vector<1x7xf32>
    %237 = arith.addf %235, %236 : vector<1x7xf32>
    %c0_131 = arith.constant 0 : index
    %c162_132 = arith.constant 162 : index
    %238 = vector.load %arg10[%c0_131, %c162_132] : memref<1x384xf32, #tpu.memory_space<vmem>>, vector<1x7xf32>
    tpu.vector_store %arg10[%c0_131, %c162_132], %237 {strides = array<i32>} : memref<1x384xf32, #tpu.memory_space<vmem>>, vector<1x7xf32>,
    %c0_133 = arith.constant 0 : index
    %c167 = arith.constant 167 : index
    %239 = vector.load %arg10[%c0_133, %c167] : memref<1x384xf32, #tpu.memory_space<vmem>>, vector<1x7xf32>
    %240 = vector.extract_strided_slice %104 {offsets = [33, 0], sizes = [1, 7], strides = [1, 1]} : vector<64x128xf32> to vector<1x7xf32>
    %241 = arith.addf %239, %240 : vector<1x7xf32>
    %c0_134 = arith.constant 0 : index
    %c167_135 = arith.constant 167 : index
    %242 = vector.load %arg10[%c0_134, %c167_135] : memref<1x384xf32, #tpu.memory_space<vmem>>, vector<1x7xf32>
    tpu.vector_store %arg10[%c0_134, %c167_135], %241 {strides = array<i32>} : memref<1x384xf32, #tpu.memory_space<vmem>>, vector<1x7xf32>,
    %c0_136 = arith.constant 0 : index
    %c172 = arith.constant 172 : index
    %243 = vector.load %arg10[%c0_136, %c172] : memref<1x384xf32, #tpu.memory_space<vmem>>, vector<1x7xf32>
    %244 = vector.extract_strided_slice %104 {offsets = [34, 0], sizes = [1, 7], strides = [1, 1]} : vector<64x128xf32> to vector<1x7xf32>
    %245 = arith.addf %243, %244 : vector<1x7xf32>
    %c0_137 = arith.constant 0 : index
    %c172_138 = arith.constant 172 : index
    %246 = vector.load %arg10[%c0_137, %c172_138] : memref<1x384xf32, #tpu.memory_space<vmem>>, vector<1x7xf32>
    tpu.vector_store %arg10[%c0_137, %c172_138], %245 {strides = array<i32>} : memref<1x384xf32, #tpu.memory_space<vmem>>, vector<1x7xf32>,
    %c0_139 = arith.constant 0 : index
    %c177 = arith.constant 177 : index
    %247 = vector.load %arg10[%c0_139, %c177] : memref<1x384xf32, #tpu.memory_space<vmem>>, vector<1x7xf32>
    %248 = vector.extract_strided_slice %104 {offsets = [35, 0], sizes = [1, 7], strides = [1, 1]} : vector<64x128xf32> to vector<1x7xf32>
    %249 = arith.addf %247, %248 : vector<1x7xf32>
    %c0_140 = arith.constant 0 : index
    %c177_141 = arith.constant 177 : index
    %250 = vector.load %arg10[%c0_140, %c177_141] : memref<1x384xf32, #tpu.memory_space<vmem>>, vector<1x7xf32>
    tpu.vector_store %arg10[%c0_140, %c177_141], %249 {strides = array<i32>} : memref<1x384xf32, #tpu.memory_space<vmem>>, vector<1x7xf32>,
    %c0_142 = arith.constant 0 : index
    %c182 = arith.constant 182 : index
    %251 = vector.load %arg10[%c0_142, %c182] : memref<1x384xf32, #tpu.memory_space<vmem>>, vector<1x7xf32>
    %252 = vector.extract_strided_slice %104 {offsets = [36, 0], sizes = [1, 7], strides = [1, 1]} : vector<64x128xf32> to vector<1x7xf32>
    %253 = arith.addf %251, %252 : vector<1x7xf32>
    %c0_143 = arith.constant 0 : index
    %c182_144 = arith.constant 182 : index
    %254 = vector.load %arg10[%c0_143, %c182_144] : memref<1x384xf32, #tpu.memory_space<vmem>>, vector<1x7xf32>
    tpu.vector_store %arg10[%c0_143, %c182_144], %253 {strides = array<i32>} : memref<1x384xf32, #tpu.memory_space<vmem>>, vector<1x7xf32>,
    %c0_145 = arith.constant 0 : index
    %c187 = arith.constant 187 : index
    %255 = vector.load %arg10[%c0_145, %c187] : memref<1x384xf32, #tpu.memory_space<vmem>>, vector<1x7xf32>
    %256 = vector.extract_strided_slice %104 {offsets = [37, 0], sizes = [1, 7], strides = [1, 1]} : vector<64x128xf32> to vector<1x7xf32>
    %257 = arith.addf %255, %256 : vector<1x7xf32>
    %c0_146 = arith.constant 0 : index
    %c187_147 = arith.constant 187 : index
    %258 = vector.load %arg10[%c0_146, %c187_147] : memref<1x384xf32, #tpu.memory_space<vmem>>, vector<1x7xf32>
    tpu.vector_store %arg10[%c0_146, %c187_147], %257 {strides = array<i32>} : memref<1x384xf32, #tpu.memory_space<vmem>>, vector<1x7xf32>,
    %c0_148 = arith.constant 0 : index
    %c192 = arith.constant 192 : index
    %259 = vector.load %arg10[%c0_148, %c192] : memref<1x384xf32, #tpu.memory_space<vmem>>, vector<1x7xf32>
    %260 = vector.extract_strided_slice %104 {offsets = [38, 0], sizes = [1, 7], strides = [1, 1]} : vector<64x128xf32> to vector<1x7xf32>
    %261 = arith.addf %259, %260 : vector<1x7xf32>
    %c0_149 = arith.constant 0 : index
    %c192_150 = arith.constant 192 : index
    %262 = vector.load %arg10[%c0_149, %c192_150] : memref<1x384xf32, #tpu.memory_space<vmem>>, vector<1x7xf32>
    tpu.vector_store %arg10[%c0_149, %c192_150], %261 {strides = array<i32>} : memref<1x384xf32, #tpu.memory_space<vmem>>, vector<1x7xf32>,
    %c0_151 = arith.constant 0 : index
    %c197 = arith.constant 197 : index
    %263 = vector.load %arg10[%c0_151, %c197] : memref<1x384xf32, #tpu.memory_space<vmem>>, vector<1x7xf32>
    %264 = vector.extract_strided_slice %104 {offsets = [39, 0], sizes = [1, 7], strides = [1, 1]} : vector<64x128xf32> to vector<1x7xf32>
    %265 = arith.addf %263, %264 : vector<1x7xf32>
    %c0_152 = arith.constant 0 : index
    %c197_153 = arith.constant 197 : index
    %266 = vector.load %arg10[%c0_152, %c197_153] : memref<1x384xf32, #tpu.memory_space<vmem>>, vector<1x7xf32>
    tpu.vector_store %arg10[%c0_152, %c197_153], %265 {strides = array<i32>} : memref<1x384xf32, #tpu.memory_space<vmem>>, vector<1x7xf32>,
    %c0_154 = arith.constant 0 : index
    %c202 = arith.constant 202 : index
    %267 = vector.load %arg10[%c0_154, %c202] : memref<1x384xf32, #tpu.memory_space<vmem>>, vector<1x7xf32>
    %268 = vector.extract_strided_slice %104 {offsets = [40, 0], sizes = [1, 7], strides = [1, 1]} : vector<64x128xf32> to vector<1x7xf32>
    %269 = arith.addf %267, %268 : vector<1x7xf32>
    %c0_155 = arith.constant 0 : index
    %c202_156 = arith.constant 202 : index
    %270 = vector.load %arg10[%c0_155, %c202_156] : memref<1x384xf32, #tpu.memory_space<vmem>>, vector<1x7xf32>
    tpu.vector_store %arg10[%c0_155, %c202_156], %269 {strides = array<i32>} : memref<1x384xf32, #tpu.memory_space<vmem>>, vector<1x7xf32>,
    %c0_157 = arith.constant 0 : index
    %c207 = arith.constant 207 : index
    %271 = vector.load %arg10[%c0_157, %c207] : memref<1x384xf32, #tpu.memory_space<vmem>>, vector<1x7xf32>
    %272 = vector.extract_strided_slice %104 {offsets = [41, 0], sizes = [1, 7], strides = [1, 1]} : vector<64x128xf32> to vector<1x7xf32>
    %273 = arith.addf %271, %272 : vector<1x7xf32>
    %c0_158 = arith.constant 0 : index
    %c207_159 = arith.constant 207 : index
    %274 = vector.load %arg10[%c0_158, %c207_159] : memref<1x384xf32, #tpu.memory_space<vmem>>, vector<1x7xf32>
    tpu.vector_store %arg10[%c0_158, %c207_159], %273 {strides = array<i32>} : memref<1x384xf32, #tpu.memory_space<vmem>>, vector<1x7xf32>,
    %c0_160 = arith.constant 0 : index
    %c212 = arith.constant 212 : index
    %275 = vector.load %arg10[%c0_160, %c212] : memref<1x384xf32, #tpu.memory_space<vmem>>, vector<1x7xf32>
    %276 = vector.extract_strided_slice %104 {offsets = [42, 0], sizes = [1, 7], strides = [1, 1]} : vector<64x128xf32> to vector<1x7xf32>
    %277 = arith.addf %275, %276 : vector<1x7xf32>
    %c0_161 = arith.constant 0 : index
    %c212_162 = arith.constant 212 : index
    %278 = vector.load %arg10[%c0_161, %c212_162] : memref<1x384xf32, #tpu.memory_space<vmem>>, vector<1x7xf32>
    tpu.vector_store %arg10[%c0_161, %c212_162], %277 {strides = array<i32>} : memref<1x384xf32, #tpu.memory_space<vmem>>, vector<1x7xf32>,
    %c0_163 = arith.constant 0 : index
    %c217 = arith.constant 217 : index
    %279 = vector.load %arg10[%c0_163, %c217] : memref<1x384xf32, #tpu.memory_space<vmem>>, vector<1x7xf32>
    %280 = vector.extract_strided_slice %104 {offsets = [43, 0], sizes = [1, 7], strides = [1, 1]} : vector<64x128xf32> to vector<1x7xf32>
    %281 = arith.addf %279, %280 : vector<1x7xf32>
    %c0_164 = arith.constant 0 : index
    %c217_165 = arith.constant 217 : index
    %282 = vector.load %arg10[%c0_164, %c217_165] : memref<1x384xf32, #tpu.memory_space<vmem>>, vector<1x7xf32>
    tpu.vector_store %arg10[%c0_164, %c217_165], %281 {strides = array<i32>} : memref<1x384xf32, #tpu.memory_space<vmem>>, vector<1x7xf32>,
    %c0_166 = arith.constant 0 : index
    %c222 = arith.constant 222 : index
    %283 = vector.load %arg10[%c0_166, %c222] : memref<1x384xf32, #tpu.memory_space<vmem>>, vector<1x7xf32>
    %284 = vector.extract_strided_slice %104 {offsets = [44, 0], sizes = [1, 7], strides = [1, 1]} : vector<64x128xf32> to vector<1x7xf32>
    %285 = arith.addf %283, %284 : vector<1x7xf32>
    %c0_167 = arith.constant 0 : index
    %c222_168 = arith.constant 222 : index
    %286 = vector.load %arg10[%c0_167, %c222_168] : memref<1x384xf32, #tpu.memory_space<vmem>>, vector<1x7xf32>
    tpu.vector_store %arg10[%c0_167, %c222_168], %285 {strides = array<i32>} : memref<1x384xf32, #tpu.memory_space<vmem>>, vector<1x7xf32>,
    %c0_169 = arith.constant 0 : index
    %c227 = arith.constant 227 : index
    %287 = vector.load %arg10[%c0_169, %c227] : memref<1x384xf32, #tpu.memory_space<vmem>>, vector<1x7xf32>
    %288 = vector.extract_strided_slice %104 {offsets = [45, 0], sizes = [1, 7], strides = [1, 1]} : vector<64x128xf32> to vector<1x7xf32>
    %289 = arith.addf %287, %288 : vector<1x7xf32>
    %c0_170 = arith.constant 0 : index
    %c227_171 = arith.constant 227 : index
    %290 = vector.load %arg10[%c0_170, %c227_171] : memref<1x384xf32, #tpu.memory_space<vmem>>, vector<1x7xf32>
    tpu.vector_store %arg10[%c0_170, %c227_171], %289 {strides = array<i32>} : memref<1x384xf32, #tpu.memory_space<vmem>>, vector<1x7xf32>,
    %c0_172 = arith.constant 0 : index
    %c232 = arith.constant 232 : index
    %291 = vector.load %arg10[%c0_172, %c232] : memref<1x384xf32, #tpu.memory_space<vmem>>, vector<1x7xf32>
    %292 = vector.extract_strided_slice %104 {offsets = [46, 0], sizes = [1, 7], strides = [1, 1]} : vector<64x128xf32> to vector<1x7xf32>
    %293 = arith.addf %291, %292 : vector<1x7xf32>
    %c0_173 = arith.constant 0 : index
    %c232_174 = arith.constant 232 : index
    %294 = vector.load %arg10[%c0_173, %c232_174] : memref<1x384xf32, #tpu.memory_space<vmem>>, vector<1x7xf32>
    tpu.vector_store %arg10[%c0_173, %c232_174], %293 {strides = array<i32>} : memref<1x384xf32, #tpu.memory_space<vmem>>, vector<1x7xf32>,
    %c0_175 = arith.constant 0 : index
    %c237 = arith.constant 237 : index
    %295 = vector.load %arg10[%c0_175, %c237] : memref<1x384xf32, #tpu.memory_space<vmem>>, vector<1x7xf32>
    %296 = vector.extract_strided_slice %104 {offsets = [47, 0], sizes = [1, 7], strides = [1, 1]} : vector<64x128xf32> to vector<1x7xf32>
    %297 = arith.addf %295, %296 : vector<1x7xf32>
    %c0_176 = arith.constant 0 : index
    %c237_177 = arith.constant 237 : index
    %298 = vector.load %arg10[%c0_176, %c237_177] : memref<1x384xf32, #tpu.memory_space<vmem>>, vector<1x7xf32>
    tpu.vector_store %arg10[%c0_176, %c237_177], %297 {strides = array<i32>} : memref<1x384xf32, #tpu.memory_space<vmem>>, vector<1x7xf32>,
    %c0_178 = arith.constant 0 : index
    %c243 = arith.constant 243 : index
    %299 = vector.load %arg10[%c0_178, %c243] : memref<1x384xf32, #tpu.memory_space<vmem>>, vector<1x7xf32>
    %300 = vector.extract_strided_slice %104 {offsets = [48, 0], sizes = [1, 7], strides = [1, 1]} : vector<64x128xf32> to vector<1x7xf32>
    %301 = arith.addf %299, %300 : vector<1x7xf32>
    %c0_179 = arith.constant 0 : index
    %c243_180 = arith.constant 243 : index
    %302 = vector.load %arg10[%c0_179, %c243_180] : memref<1x384xf32, #tpu.memory_space<vmem>>, vector<1x7xf32>
    tpu.vector_store %arg10[%c0_179, %c243_180], %301 {strides = array<i32>} : memref<1x384xf32, #tpu.memory_space<vmem>>, vector<1x7xf32>,
    %c0_181 = arith.constant 0 : index
    %c248 = arith.constant 248 : index
    %303 = vector.load %arg10[%c0_181, %c248] : memref<1x384xf32, #tpu.memory_space<vmem>>, vector<1x7xf32>
    %304 = vector.extract_strided_slice %104 {offsets = [49, 0], sizes = [1, 7], strides = [1, 1]} : vector<64x128xf32> to vector<1x7xf32>
    %305 = arith.addf %303, %304 : vector<1x7xf32>
    %c0_182 = arith.constant 0 : index
    %c248_183 = arith.constant 248 : index
    %306 = vector.load %arg10[%c0_182, %c248_183] : memref<1x384xf32, #tpu.memory_space<vmem>>, vector<1x7xf32>
    tpu.vector_store %arg10[%c0_182, %c248_183], %305 {strides = array<i32>} : memref<1x384xf32, #tpu.memory_space<vmem>>, vector<1x7xf32>,
    %c0_184 = arith.constant 0 : index
    %c253 = arith.constant 253 : index
    %307 = vector.load %arg10[%c0_184, %c253] : memref<1x384xf32, #tpu.memory_space<vmem>>, vector<1x7xf32>
    %308 = vector.extract_strided_slice %104 {offsets = [50, 0], sizes = [1, 7], strides = [1, 1]} : vector<64x128xf32> to vector<1x7xf32>
    %309 = arith.addf %307, %308 : vector<1x7xf32>
    %c0_185 = arith.constant 0 : index
    %c253_186 = arith.constant 253 : index
    %310 = vector.load %arg10[%c0_185, %c253_186] : memref<1x384xf32, #tpu.memory_space<vmem>>, vector<1x7xf32>
    tpu.vector_store %arg10[%c0_185, %c253_186], %309 {strides = array<i32>} : memref<1x384xf32, #tpu.memory_space<vmem>>, vector<1x7xf32>,
    %c0_187 = arith.constant 0 : index
    %c258 = arith.constant 258 : index
    %311 = vector.load %arg10[%c0_187, %c258] : memref<1x384xf32, #tpu.memory_space<vmem>>, vector<1x7xf32>
    %312 = vector.extract_strided_slice %104 {offsets = [51, 0], sizes = [1, 7], strides = [1, 1]} : vector<64x128xf32> to vector<1x7xf32>
    %313 = arith.addf %311, %312 : vector<1x7xf32>
    %c0_188 = arith.constant 0 : index
    %c258_189 = arith.constant 258 : index
    %314 = vector.load %arg10[%c0_188, %c258_189] : memref<1x384xf32, #tpu.memory_space<vmem>>, vector<1x7xf32>
    tpu.vector_store %arg10[%c0_188, %c258_189], %313 {strides = array<i32>} : memref<1x384xf32, #tpu.memory_space<vmem>>, vector<1x7xf32>,
    %c0_190 = arith.constant 0 : index
    %c263 = arith.constant 263 : index
    %315 = vector.load %arg10[%c0_190, %c263] : memref<1x384xf32, #tpu.memory_space<vmem>>, vector<1x7xf32>
    %316 = vector.extract_strided_slice %104 {offsets = [52, 0], sizes = [1, 7], strides = [1, 1]} : vector<64x128xf32> to vector<1x7xf32>
    %317 = arith.addf %315, %316 : vector<1x7xf32>
    %c0_191 = arith.constant 0 : index
    %c263_192 = arith.constant 263 : index
    %318 = vector.load %arg10[%c0_191, %c263_192] : memref<1x384xf32, #tpu.memory_space<vmem>>, vector<1x7xf32>
    tpu.vector_store %arg10[%c0_191, %c263_192], %317 {strides = array<i32>} : memref<1x384xf32, #tpu.memory_space<vmem>>, vector<1x7xf32>,
    %c0_193 = arith.constant 0 : index
    %c268 = arith.constant 268 : index
    %319 = vector.load %arg10[%c0_193, %c268] : memref<1x384xf32, #tpu.memory_space<vmem>>, vector<1x7xf32>
    %320 = vector.extract_strided_slice %104 {offsets = [53, 0], sizes = [1, 7], strides = [1, 1]} : vector<64x128xf32> to vector<1x7xf32>
    %321 = arith.addf %319, %320 : vector<1x7xf32>
    %c0_194 = arith.constant 0 : index
    %c268_195 = arith.constant 268 : index
    %322 = vector.load %arg10[%c0_194, %c268_195] : memref<1x384xf32, #tpu.memory_space<vmem>>, vector<1x7xf32>
    tpu.vector_store %arg10[%c0_194, %c268_195], %321 {strides = array<i32>} : memref<1x384xf32, #tpu.memory_space<vmem>>, vector<1x7xf32>,
    %c0_196 = arith.constant 0 : index
    %c273 = arith.constant 273 : index
    %323 = vector.load %arg10[%c0_196, %c273] : memref<1x384xf32, #tpu.memory_space<vmem>>, vector<1x7xf32>
    %324 = vector.extract_strided_slice %104 {offsets = [54, 0], sizes = [1, 7], strides = [1, 1]} : vector<64x128xf32> to vector<1x7xf32>
    %325 = arith.addf %323, %324 : vector<1x7xf32>
    %c0_197 = arith.constant 0 : index
    %c273_198 = arith.constant 273 : index
    %326 = vector.load %arg10[%c0_197, %c273_198] : memref<1x384xf32, #tpu.memory_space<vmem>>, vector<1x7xf32>
    tpu.vector_store %arg10[%c0_197, %c273_198], %325 {strides = array<i32>} : memref<1x384xf32, #tpu.memory_space<vmem>>, vector<1x7xf32>,
    %c0_199 = arith.constant 0 : index
    %c278 = arith.constant 278 : index
    %327 = vector.load %arg10[%c0_199, %c278] : memref<1x384xf32, #tpu.memory_space<vmem>>, vector<1x7xf32>
    %328 = vector.extract_strided_slice %104 {offsets = [55, 0], sizes = [1, 7], strides = [1, 1]} : vector<64x128xf32> to vector<1x7xf32>
    %329 = arith.addf %327, %328 : vector<1x7xf32>
    %c0_200 = arith.constant 0 : index
    %c278_201 = arith.constant 278 : index
    %330 = vector.load %arg10[%c0_200, %c278_201] : memref<1x384xf32, #tpu.memory_space<vmem>>, vector<1x7xf32>
    tpu.vector_store %arg10[%c0_200, %c278_201], %329 {strides = array<i32>} : memref<1x384xf32, #tpu.memory_space<vmem>>, vector<1x7xf32>,
    %c0_202 = arith.constant 0 : index
    %c283 = arith.constant 283 : index
    %331 = vector.load %arg10[%c0_202, %c283] : memref<1x384xf32, #tpu.memory_space<vmem>>, vector<1x7xf32>
    %332 = vector.extract_strided_slice %104 {offsets = [56, 0], sizes = [1, 7], strides = [1, 1]} : vector<64x128xf32> to vector<1x7xf32>
    %333 = arith.addf %331, %332 : vector<1x7xf32>
    %c0_203 = arith.constant 0 : index
    %c283_204 = arith.constant 283 : index
    %334 = vector.load %arg10[%c0_203, %c283_204] : memref<1x384xf32, #tpu.memory_space<vmem>>, vector<1x7xf32>
    tpu.vector_store %arg10[%c0_203, %c283_204], %333 {strides = array<i32>} : memref<1x384xf32, #tpu.memory_space<vmem>>, vector<1x7xf32>,
    %c0_205 = arith.constant 0 : index
    %c288 = arith.constant 288 : index
    %335 = vector.load %arg10[%c0_205, %c288] : memref<1x384xf32, #tpu.memory_space<vmem>>, vector<1x7xf32>
    %336 = vector.extract_strided_slice %104 {offsets = [57, 0], sizes = [1, 7], strides = [1, 1]} : vector<64x128xf32> to vector<1x7xf32>
    %337 = arith.addf %335, %336 : vector<1x7xf32>
    %c0_206 = arith.constant 0 : index
    %c288_207 = arith.constant 288 : index
    %338 = vector.load %arg10[%c0_206, %c288_207] : memref<1x384xf32, #tpu.memory_space<vmem>>, vector<1x7xf32>
    tpu.vector_store %arg10[%c0_206, %c288_207], %337 {strides = array<i32>} : memref<1x384xf32, #tpu.memory_space<vmem>>, vector<1x7xf32>,
    %c0_208 = arith.constant 0 : index
    %c293 = arith.constant 293 : index
    %339 = vector.load %arg10[%c0_208, %c293] : memref<1x384xf32, #tpu.memory_space<vmem>>, vector<1x7xf32>
    %340 = vector.extract_strided_slice %104 {offsets = [58, 0], sizes = [1, 7], strides = [1, 1]} : vector<64x128xf32> to vector<1x7xf32>
    %341 = arith.addf %339, %340 : vector<1x7xf32>
    %c0_209 = arith.constant 0 : index
    %c293_210 = arith.constant 293 : index
    %342 = vector.load %arg10[%c0_209, %c293_210] : memref<1x384xf32, #tpu.memory_space<vmem>>, vector<1x7xf32>
    tpu.vector_store %arg10[%c0_209, %c293_210], %341 {strides = array<i32>} : memref<1x384xf32, #tpu.memory_space<vmem>>, vector<1x7xf32>,
    %c0_211 = arith.constant 0 : index
    %c298 = arith.constant 298 : index
    %343 = vector.load %arg10[%c0_211, %c298] : memref<1x384xf32, #tpu.memory_space<vmem>>, vector<1x7xf32>
    %344 = vector.extract_strided_slice %104 {offsets = [59, 0], sizes = [1, 7], strides = [1, 1]} : vector<64x128xf32> to vector<1x7xf32>
    %345 = arith.addf %343, %344 : vector<1x7xf32>
    %c0_212 = arith.constant 0 : index
    %c298_213 = arith.constant 298 : index
    %346 = vector.load %arg10[%c0_212, %c298_213] : memref<1x384xf32, #tpu.memory_space<vmem>>, vector<1x7xf32>
    tpu.vector_store %arg10[%c0_212, %c298_213], %345 {strides = array<i32>} : memref<1x384xf32, #tpu.memory_space<vmem>>, vector<1x7xf32>,
    %c0_214 = arith.constant 0 : index
    %c303 = arith.constant 303 : index
    %347 = vector.load %arg10[%c0_214, %c303] : memref<1x384xf32, #tpu.memory_space<vmem>>, vector<1x7xf32>
    %348 = vector.extract_strided_slice %104 {offsets = [60, 0], sizes = [1, 7], strides = [1, 1]} : vector<64x128xf32> to vector<1x7xf32>
    %349 = arith.addf %347, %348 : vector<1x7xf32>
    %c0_215 = arith.constant 0 : index
    %c303_216 = arith.constant 303 : index
    %350 = vector.load %arg10[%c0_215, %c303_216] : memref<1x384xf32, #tpu.memory_space<vmem>>, vector<1x7xf32>
    tpu.vector_store %arg10[%c0_215, %c303_216], %349 {strides = array<i32>} : memref<1x384xf32, #tpu.memory_space<vmem>>, vector<1x7xf32>,
    %c0_217 = arith.constant 0 : index
    %c308 = arith.constant 308 : index
    %351 = vector.load %arg10[%c0_217, %c308] : memref<1x384xf32, #tpu.memory_space<vmem>>, vector<1x7xf32>
    %352 = vector.extract_strided_slice %104 {offsets = [61, 0], sizes = [1, 7], strides = [1, 1]} : vector<64x128xf32> to vector<1x7xf32>
    %353 = arith.addf %351, %352 : vector<1x7xf32>
    %c0_218 = arith.constant 0 : index
    %c308_219 = arith.constant 308 : index
    %354 = vector.load %arg10[%c0_218, %c308_219] : memref<1x384xf32, #tpu.memory_space<vmem>>, vector<1x7xf32>
    tpu.vector_store %arg10[%c0_218, %c308_219], %353 {strides = array<i32>} : memref<1x384xf32, #tpu.memory_space<vmem>>, vector<1x7xf32>,
    %c0_220 = arith.constant 0 : index
    %c313 = arith.constant 313 : index
    %355 = vector.load %arg10[%c0_220, %c313] : memref<1x384xf32, #tpu.memory_space<vmem>>, vector<1x7xf32>
    %356 = vector.extract_strided_slice %104 {offsets = [62, 0], sizes = [1, 7], strides = [1, 1]} : vector<64x128xf32> to vector<1x7xf32>
    %357 = arith.addf %355, %356 : vector<1x7xf32>
    %c0_221 = arith.constant 0 : index
    %c313_222 = arith.constant 313 : index
    %358 = vector.load %arg10[%c0_221, %c313_222] : memref<1x384xf32, #tpu.memory_space<vmem>>, vector<1x7xf32>
    tpu.vector_store %arg10[%c0_221, %c313_222], %357 {strides = array<i32>} : memref<1x384xf32, #tpu.memory_space<vmem>>, vector<1x7xf32>,
    %c0_223 = arith.constant 0 : index
    %c318 = arith.constant 318 : index
    %359 = vector.load %arg10[%c0_223, %c318] : memref<1x384xf32, #tpu.memory_space<vmem>>, vector<1x7xf32>
    %360 = vector.extract_strided_slice %104 {offsets = [63, 0], sizes = [1, 7], strides = [1, 1]} : vector<64x128xf32> to vector<1x7xf32>
    %361 = arith.addf %359, %360 : vector<1x7xf32>
    %c0_224 = arith.constant 0 : index
    %c318_225 = arith.constant 318 : index
    %362 = vector.load %arg10[%c0_224, %c318_225] : memref<1x384xf32, #tpu.memory_space<vmem>>, vector<1x7xf32>
    tpu.vector_store %arg10[%c0_224, %c318_225], %361 {strides = array<i32>} : memref<1x384xf32, #tpu.memory_space<vmem>>, vector<1x7xf32>,
    return
  }
  func.func @transform_0(%arg0: i32) -> (i32, i32) {
    %c0_i32 = arith.constant 0 : i32
    %c0_i32_0 = arith.constant 0 : i32
    %c0_i32_1 = arith.constant 0 : i32
    return %c0_i32, %c0_i32_0 : i32, i32
  }
  func.func @transform_1(%arg0: i32) -> (i32, i32) {
    %c0_i32 = arith.constant 0 : i32
    %c0_i32_0 = arith.constant 0 : i32
    %c0_i32_1 = arith.constant 0 : i32
    return %c0_i32, %c0_i32_0 : i32, i32
  }
  func.func @transform_2(%arg0: i32) -> (i32, i32) {
    %c0_i32 = arith.constant 0 : i32
    %c0_i32_0 = arith.constant 0 : i32
    %c0_i32_1 = arith.constant 0 : i32
    return %c0_i32, %c0_i32_0 : i32, i32
  }
  func.func @transform_3(%arg0: i32) -> (i32, i32) {
    %c0_i32 = arith.constant 0 : i32
    %c0_i32_0 = arith.constant 0 : i32
    %c0_i32_1 = arith.constant 0 : i32
    return %c0_i32, %c0_i32_0 : i32, i32
  }
  func.func @transform_4(%arg0: i32) -> (i32, i32) {
    %c0_i32 = arith.constant 0 : i32
    %c0_i32_0 = arith.constant 0 : i32
    %c0_i32_1 = arith.constant 0 : i32
    return %c0_i32, %c0_i32_0 : i32, i32
  }
  func.func @transform_5(%arg0: i32) -> (i32, i32) {
    %c0_i32 = arith.constant 0 : i32
    %c0_i32_0 = arith.constant 0 : i32
    %c0_i32_1 = arith.constant 0 : i32
    return %c0_i32, %c0_i32_0 : i32, i32
  }
  func.func @transform_6(%arg0: i32) -> (i32, i32) {
    %c0_i32 = arith.constant 0 : i32
    %c0_i32_0 = arith.constant 0 : i32
    %c0_i32_1 = arith.constant 0 : i32
    return %c0_i32, %c0_i32_0 : i32, i32
  }
  func.func @transform_7(%arg0: i32) -> (i32, i32) {
    %c0_i32 = arith.constant 0 : i32
    %c0_i32_0 = arith.constant 0 : i32
    %c0_i32_1 = arith.constant 0 : i32
    return %c0_i32, %c0_i32_0 : i32, i32
  }
  func.func @transform_8(%arg0: i32) -> (i32, i32) {
    %c0_i32 = arith.constant 0 : i32
    %c0_i32_0 = arith.constant 0 : i32
    %c0_i32_1 = arith.constant 0 : i32
    return %c0_i32, %c0_i32_0 : i32, i32
  }
  func.func @transform_9(%arg0: i32) -> (i32, i32) {
    %c0_i32 = arith.constant 0 : i32
    %c0_i32_0 = arith.constant 0 : i32
    %c0_i32_1 = arith.constant 0 : i32
    return %c0_i32, %c0_i32_0 : i32, i32
  }
}

</mosaic_0001>

<bundles_post_ra>
// kernel: squeeze.5
= control target key start
LH: loop header
LB: loop body
LE: loop exit
PB: predicated region body
PF: predicated region fallthrough
CT: control target
= control target key end

     0   :  { %s237_s0 = inlined_call_operand.vmem [shape: f32[324], index: 0, kind: input, shape index: {}]   ;;  %s238_s1 = inlined_call_operand.hbm [shape: f32[18,18], index: 1, kind: output, shape index: {}]  }
   0x1   :  { %v6_v0 = vld [vmem:[%s237_s0] sm:$0xf] }
   0x2   :  { %7 = vst [vmem:[#allocation2] sm:$0xf] %v6_v0 }
   0x3   :  { %2 = vsyncpa [#allocation1], 0  ;;  %vm114_vm0 = vcmask 1014784   ;;  %s187_s0 = smov 110   ;;  %s188_s8 = smov 114   ;;  %vm127_vm1 = vcmask 1031168  }
   0x4   :  { %s189_s9 = smov 4   ;;  %s190_s10 = smov 112   ;;  %vm9_vm2 = vcmask 146432   ;;  %vm118_vm3 = vcmask 31744   ;;  %vm121_vm4 = vcmask 146464   ;;  %vm131_vm5 = vcmask 15360  }
   0x5   :  { %s191_s11 = smov 2   ;;  %s192_s12 = smov 96   ;;  %vm134_vm6 = vcmask 146448  }
   0x6   :  { %s193_s13 = smov 94   ;;  %s194_s14 = smov 92  }
   0x7   :  { %s195_s15 = smov 78   ;;  %s196_s16 = smov 76  }
   0x8   :  { %s197_s17 = smov 74   ;;  %s198_s18 = smov 58  }
   0x9   :  { %v25_v1 = vld [vmem:[#allocation2] sm:$0x1]   ;;  %v111_v2 = vld [vmem:[#allocation2 + $0x1] sm:$0x1]   ;;  %v113_v3 = vld [vmem:[#allocation2 + $0x2] sm:$0x1]  }
   0xa   :  { %26 = vrot.lane.b32.xlu0 %v25_v1, %s187_s0  ;;  %v12_v4 = vld [vmem:[#allocation2 + $0x2] sm:$0x1]   ;;  %v115_v5 = vsel %vm114_vm0, %v113_v3, %v111_v2  ;;  %v124_v6 = vld [vmem:[#allocation2] sm:$0x1]   ;;  %v126_v7 = vld [vmem:[#allocation2 + $0x1] sm:$0x1]  }
   0xb   :  { %13 = vrot.lane.b32.xlu1 %v12_v4, %s188_s8  ;;  %v19_v8 = vld [vmem:[#allocation2 + $0x1] sm:$0x1]   ;;  %v128_v9 = vsel %vm127_vm1, %v126_v7, %v124_v6  ;;  %v32_v10 = vld [vmem:[#allocation2 + $0x2] sm:$0x1]   ;;  %v45_v12 = vld [vmem:[#allocation2] sm:$0x1]  }
   0xc   :  { %v39_v11 = vld [vmem:[#allocation2 + $0x1] sm:$0x1]   ;;  %v52_v13 = vld [vmem:[#allocation2 + $0x2] sm:$0x1]   ;;  %v65_v15 = vld [vmem:[#allocation2] sm:$0x1]  }
   0xd   :  { %v59_v14 = vld [vmem:[#allocation2 + $0x1] sm:$0x1]   ;;  %v8_v17 = vld [vmem:[#allocation2] sm:$0x1]   ;;  %s199_s19 = smov 56   ;;  %s200_s20 = smov 40  }
   0xe   :  { %116 = vrot.lane.b32.xlu0 %v115_v5, %s189_s9  ;;  %v72_v16 = vld [vmem:[#allocation2 + $0x1] sm:$0x1]   ;;  %10 = vst.msk [vmem:[#allocation0] sm:$0x1] %vm9_vm2, %v8_v17   ;;  %v78_v18 = vld [vmem:[#allocation2] sm:$0x1]  }
   0xf   :  { %20 = vrot.lane.b32.xlu1 %v19_v8, %s190_s10  ;;  %v85_v19 = vld [vmem:[#allocation2 + $0x1] sm:$0x1]   ;;  %v91_v20 = vld [vmem:[#allocation2] sm:$0x1]   ;;  %s201_s21 = smov 38   ;;  %s202_s22 = smov 22  }
  0x10   :  { %v98_v21 = vld [vmem:[#allocation2 + $0x1] sm:$0x1]   ;;  %v104_v22 = vld [vmem:[#allocation2] sm:$0x1]   ;;  %s203_s23 = smov 20   ;;  %s204_s24 = smov [#allocation0]  }
  0x11   :  { %s141_s25 = sshll.u32 %s204_s24, 4  ;;  %s142_s25 = int_to_ptr.vmem [resolvable:$true] %s141_s25 }
  0x12   :  { %129 = vrot.lane.b32.xlu0 %v128_v9, %s191_s11  ;;  %s165_s26 = scalar_lea.vmem %s142_s25, 384  ;;  %p170_p1 = scmp.lt.s32.totalorder %s142_s25, %s142_s25 }
  0x13   :  { %33 = vrot.lane.b32.xlu1 %v32_v10, %s192_s12  ;;  %p166_p0 = scmp.ne.s32.totalorder %s142_s25, %s165_s26  ;;  %p171_p2 = scmp.lt.s32.totalorder %s165_s26, %s165_s26 }
  0x15   :  { %p172_p3 = por %p171_p2, %p170_p1 }
  0x16   :  { %40 = vrot.lane.b32.xlu0 %v39_v11, %s193_s13 }
  0x17   :  { %46 = vrot.lane.b32.xlu1 %v45_v12, %s194_s14  ;;  %p173_p4 = pnand %p172_p3, %p166_p0 }
  0x1a   :  { %53 = vrot.lane.b32.xlu0 %v52_v13, %s195_s15 }
  0x1b   :  { %60 = vrot.lane.b32.xlu1 %v59_v14, %s196_s16 }
  0x1e   :  { %66 = vrot.lane.b32.xlu0 %v65_v15, %s197_s17 }
  0x1f   :  { %73 = vrot.lane.b32.xlu1 %v72_v16, %s198_s18 }
  0x22   :  { %79 = vrot.lane.b32.xlu0 %v78_v18, %s199_s19 }
  0x23   :  { %86 = vrot.lane.b32.xlu1 %v85_v19, %s200_s20 }
  0x26   :  { %92 = vrot.lane.b32.xlu0 %v91_v20, %s201_s21 }
  0x27   :  { %99 = vrot.lane.b32.xlu1 %v98_v21, %s202_s22 }
  0x2a   :  { %105 = vrot.lane.b32.xlu0 %v104_v22, %s203_s23 }
  0x7c   :  { %v27_v23 = vpop.permute.xlu0 %26  }
  0x7d   :  { %30 = vst.msk [vmem:[#allocation0 + $0x1] sm:$0x1] %vm9_vm2, %v27_v23   ;;  %v14_v24 = vpop.permute.xlu1 %13  }
  0x7e   :  { %17 = vst.msk [vmem:[#allocation0 + $0xf] sm:$0x1] %vm9_vm2, %v14_v24  }
  0x80   :  { %v117_v25 = vpop.permute.xlu0 %116  }
  0x81   :  { %120 = vst.msk [vmem:[#allocation0 + $0xe] sm:$0x1] %vm118_vm3, %v117_v25   ;;  %v21_v26 = vpop.permute.xlu1 %20  }
  0x82   :  { %123 = vst.msk [vmem:[#allocation0 + $0xe] sm:$0x1] %vm121_vm4, %v117_v25  }
  0x83   :  { %24 = vst.msk [vmem:[#allocation0 + $0x8] sm:$0x1] %vm9_vm2, %v21_v26  }
  0x84   :  { %v130_v27 = vpop.permute.xlu0 %129  }
  0x85   :  { %133 = vst.msk [vmem:[#allocation0 + $0x7] sm:$0x1] %vm131_vm5, %v130_v27   ;;  %v34_v28 = vpop.permute.xlu1 %33  }
  0x86   :  { %136 = vst.msk [vmem:[#allocation0 + $0x7] sm:$0x1] %vm134_vm6, %v130_v27  }
  0x87   :  { %37 = vst.msk [vmem:[#allocation0 + $0x10] sm:$0x1] %vm9_vm2, %v34_v28  }
  0x88   :  { %v41_v29 = vpop.permute.xlu0 %40  }
  0x89   :  { %44 = vst.msk [vmem:[#allocation0 + $0x9] sm:$0x1] %vm9_vm2, %v41_v29   ;;  %v47_v30 = vpop.permute.xlu1 %46  }
  0x8a   :  { %50 = vst.msk [vmem:[#allocation0 + $0x2] sm:$0x1] %vm9_vm2, %v47_v30  }
  0x8c   :  { %v54_v31 = vpop.permute.xlu0 %53  }
  0x8d   :  { %57 = vst.msk [vmem:[#allocation0 + $0x11] sm:$0x1] %vm9_vm2, %v54_v31   ;;  %v61_v32 = vpop.permute.xlu1 %60  }
  0x8e   :  { %64 = vst.msk [vmem:[#allocation0 + $0xa] sm:$0x1] %vm9_vm2, %v61_v32  }
  0x90   :  { %v67_v33 = vpop.permute.xlu0 %66  }
  0x91   :  { %70 = vst.msk [vmem:[#allocation0 + $0x3] sm:$0x1] %vm9_vm2, %v67_v33   ;;  %v74_v34 = vpop.permute.xlu1 %73  }
  0x92   :  { %77 = vst.msk [vmem:[#allocation0 + $0xb] sm:$0x1] %vm9_vm2, %v74_v34  }
  0x94   :  { %v80_v35 = vpop.permute.xlu0 %79  }
  0x95   :  { %83 = vst.msk [vmem:[#allocation0 + $0x4] sm:$0x1] %vm9_vm2, %v80_v35   ;;  %v87_v36 = vpop.permute.xlu1 %86  }
  0x96   :  { %90 = vst.msk [vmem:[#allocation0 + $0xc] sm:$0x1] %vm9_vm2, %v87_v36  }
  0x98   :  { %v93_v37 = vpop.permute.xlu0 %92  }
  0x99   :  { %96 = vst.msk [vmem:[#allocation0 + $0x5] sm:$0x1] %vm9_vm2, %v93_v37   ;;  %v100_v38 = vpop.permute.xlu1 %99  }
  0x9a   :  { %103 = vst.msk [vmem:[#allocation0 + $0xd] sm:$0x1] %vm9_vm2, %v100_v38  }
  0x9c   :  { %v106_v39 = vpop.permute.xlu0 %105  }
  0x9d   :  { %109 = vst.msk [vmem:[#allocation0 + $0x6] sm:$0x1] %vm9_vm2, %v106_v39  }
  0x9e   :  { %176 = shalt.err (!%p173_p4)
}
  0x9f   :  { %144 = dma.vmem_to_hbm [thread:$0]  %s142_s25, 384, %s238_s1, [#allocation1]  }
  0xa0   :  { %185 = dma.done.wait [#allocation1], 384  }
  0xa1   :  { %186 = vsyncadd [#allocation1], 4294966912 }
  0xa2   :  { %146 = vsyncpa [#allocation1], 1 }

// kernel: model_forward.1
= control target key start
LH: loop header
LB: loop body
LE: loop exit
PB: predicated region body
PF: predicated region fallthrough
CT: control target
= control target key end

     0   :  { %vm33_vm0 = vcmask 64512   ;;  %v12952_v2 = vmov 0.0   ;;  %v8469_v33 = vmov 1   ;;  %v8470_v34 = vmov 0   ;;  %s8474_s22 = smov 5   ;;  %s8476_s23 = smov 10   ;;  %s12942_s0 = inlined_call_operand.vmem [shape: f32[8,384], index: 0, kind: input, shape index: {}]   ;;  %s12943_s1 = inlined_call_operand.vmem [shape: f32[16,8], index: 1, kind: input, shape index: {}]   ;;  %s12944_s5 = inlined_call_operand.vmem [shape: f32[384,128], index: 5, kind: input, shape index: {}]   ;;  %s12945_s2 = inlined_call_operand.vmem [shape: f32[8,8], index: 2, kind: input, shape index: {}]   ;;  %s12946_s7 = inlined_call_operand.vmem [shape: f32[8,384], index: 7, kind: output, shape index: {1}]   ;;  %s12947_s6 = inlined_call_operand.vmem [shape: f32[8,384], index: 6, kind: output, shape index: {0}]   ;;  %s12948_s3 = inlined_call_operand.vmem [shape: f32[64,384], index: 3, kind: input, shape index: {}]   ;;  %s12949_s4 = inlined_call_operand.vmem [shape: f32[384,128], index: 4, kind: input, shape index: {}]   ;;  %s12950_s9 = inlined_call_operand.vmem [shape: f32[1,384], index: 9, kind: output, shape index: {3}]   ;;  %s12951_s8 = inlined_call_operand.vmem [shape: f32[8,384], index: 8, kind: output, shape index: {2}]  }
   0x1   :  { %v8592_v0 = vld [vmem:[%s12942_s0 + $0x8] sm:$0xff]  ;;  %v8597_v1 = vld [vmem:[%s12942_s0] sm:$0xff]  ;;  %106 = vmatprep.mubr.f32.mxu0 %v12952_v2  ;;  %203 = vmatprep.mubr.f32.mxu1 %v12952_v2  ;;  %v8604_v3 = vld [vmem:[%s12942_s0 + $0x10] sm:$0xff]  ;;  %v12954_v63 = vlaneseq  ;;  %s8477_s24 = smov 40   ;;  %s8478_s25 = smov 15  }
   0x2   :  { %v70_v4 = vand.u32 4294901760, %v8592_v0  ;;  %v72_v5 = vand.u32 4294901760, %v8597_v1  ;;  %v30_v6 = vld [vmem:[%s12943_s1] sm:$0xff]  ;;  %v31_v7 = vld [vmem:[%s12943_s1 + $0x8] sm:$0xff]  ;;  %v8621_v14 = vand.u32 4294901760, %v8604_v3  ;;  %8457 = vset.pattern.permute.xlu1 %v8469_v33  ;;  %8456 = vset.pattern.permute.xlu0 %v8470_v34  ;;  %s8479_s26 = smov 50  }
   0x3   :  { %v35_v8 = vsel %vm33_vm0, %v30_v6, 0  ;;  %v38_v9 = vsel %vm33_vm0, %v31_v7, 0  ;;  %s8482_s27 = smov 25   ;;  %s8483_s28 = smov 70  }
   0x4   :  { %71 = vmatprep.subr.mxu0 %v70_v4  ;;  %v160_v10 = vsub.f32 %v8592_v0, %v70_v4  ;;  %v8615_v11 = vand.u32 4294901760, %v35_v8  ;;  %v166_v12 = vsub.f32 %v8597_v1, %v72_v5  ;;  %v8618_v13 = vand.u32 4294901760, %v38_v9  ;;  %s8484_s29 = smov 35   ;;  %s8485_s30 = smov 81  }
   0x5   :  { %73 = vmatpush1.msra.mxu0 %v72_v5  ;;  %v672_v23 = vsub.f32 %v8604_v3, %v8621_v14  ;;  %s8486_s10 = smov 45   ;;  %s8489_s11 = smov 91  }
   0x6   :  { %v161_v15 = vand.u32 4294901760, %v160_v10  ;;  %250 = vmatprep.subr.mxu0 %v160_v10  ;;  %v108_v16 = vsub.f32 %v35_v8, %v8615_v11  ;;  %v167_v17 = vand.u32 4294901760, %v166_v12  ;;  %v119_v18 = vsub.f32 %v38_v9, %v8618_v13  ;;  %s8490_s12 = smov 55   ;;  %s8491_s13 = smov 101  }
   0x7   :  { %v673_v29 = vand.u32 4294901760, %v672_v23  ;;  %s8492_s14 = smov 65   ;;  %s8493_s15 = smov 111  }
   0x8   :  { %v162_v19 = vsub.f32 %v160_v10, %v161_v15  ;;  %v109_v20 = vand.u32 4294901760, %v108_v16  ;;  %v168_v21 = vsub.f32 %v166_v12, %v167_v17  ;;  %v120_v22 = vand.u32 4294901760, %v119_v18  ;;  %s8494_s16 = smov 75   ;;  %s8495_s17 = smov 121  }
   0x9   :  { %v674_v31 = vsub.f32 %v672_v23, %v673_v29  ;;  %s8496_s18 = smov 86   ;;  %s8497_s0 = smov 3  }
   0xa   :  { %v163_v24 = vand.u32 4294901760, %v162_v19  ;;  %v110_v25 = vsub.f32 %v108_v16, %v109_v20  ;;  %v169_v26 = vand.u32 4294901760, %v168_v21  ;;  %v121_v27 = vsub.f32 %v119_v18, %v120_v22  ;;  %s8499_s1 = smov 13   ;;  %s8500_s19 = smov 106  }
   0xb   :  { %v675_v32 = vand.u32 4294901760, %v674_v31  ;;  %s8501_s20 = smov 23   ;;  %s8502_s21 = smov 116  }
   0xc   :  { %164 = vmatprep.subr.mxu1 %v163_v24  ;;  %v111_v28 = vand.u32 4294901760, %v110_v25  ;;  %v122_v30 = vand.u32 4294901760, %v121_v27 }
   0xd   :  { %170 = vmatpush1.msra.mxu1 %v169_v26 }
   0xe   :  { %112 = vmatmul.mubr.f32.vlgmr.msra.gmra.mxu0 %v111_v28  ;;  %205 = vmatmul.mubr.f32.vlgmr.msra.gmra.mxu1 %v8615_v11 }
   0xf   :  { %253 = vmatpush1.msra.mxu0 %v166_v12  ;;  %334 = vmatprep.subr.mxu1 %v70_v4  ;;  %v8656_v12 = vshrl.u32 %v12954_v63, 7 }
  0x10   :  { %336 = vmatpush1.msra.mxu1 %v72_v5  ;;  %117 = vmatprep.mubr.f32.mxu0 %v12952_v2 }
  0x11   :  { %210 = vmatprep.mubr.f32.mxu1 %v12952_v2  ;;  %421 = vmatprep.subr.mxu0 %v161_v15  ;;  %13346 = vst [vmem:[#allocation2_spill] sm:$0xff] %v8656_v12  ;;  %v8659_v25 = vsub.s32 7, %v8656_v12 }
  0x12   :  { %123 = vmatmul.mubr.f32.gmra.mxu0 %v122_v30  ;;  %212 = vmatmul.mubr.f32.gmra.mxu1 %v8618_v13 }
  0x13   :  { %286 = vmatprep.mubr.f32.mxu0 %v12952_v2  ;;  %369 = vmatprep.mubr.f32.mxu1 %v12952_v2  ;;  %v8667_v31 = vrot.slane %v8592_v0, %v8659_v25 }
  0x14   :  { %504 = vmatprep.subr.mxu1 %v70_v4 }
  0x16   :  { %289 = vmatmul.mubr.f32.vlgmr.msra.gmra.mxu0 %v108_v16  ;;  %373 = vmatmul.mubr.f32.vlgmr.msra.gmra.mxu1 %v109_v20 }
  0x17   :  { %425 = vmatpush1.msra.mxu0 %v167_v17  ;;  %506 = vmatpush1.msra.mxu1 %v72_v5 }
  0x18   :  { %294 = vmatprep.mubr.f32.mxu0 %v12952_v2  ;;  %378 = vmatprep.mubr.f32.mxu1 %v12952_v2 }
  0x19   :  { %7827 = vmatprep.subr.mxu0 %v8621_v14  ;;  %7832 = vmatprep.subr.mxu1 %v675_v32 }
  0x1a   :  { %297 = vmatmul.mubr.f32.gmra.mxu0 %v119_v18  ;;  %382 = vmatmul.mubr.f32.gmra.mxu1 %v120_v22 }
  0x1b   :  { %458 = vmatprep.mubr.f32.mxu0 %v12952_v2  ;;  %539 = vmatprep.mubr.f32.mxu1 %v12952_v2 }
  0x1e   :  { %460 = vmatmul.mubr.f32.vlgmr.msra.gmra.mxu0 %v8615_v11  ;;  %541 = vmatmul.mubr.f32.vlgmr.msra.gmra.mxu1 %v8615_v11 }
  0x1f   :  { %7828 = vmatpush3.msra.mxu0 %v8621_v14  ;;  %7833 = vmatpush3.msra.mxu1 %v675_v32 }
  0x20   :  { %465 = vmatprep.mubr.f32.mxu0 %v12952_v2  ;;  %546 = vmatprep.mubr.f32.mxu1 %v12952_v2 }
  0x21   :  { %7837 = vmatprep.subr.mxu0 %v672_v23  ;;  %7842 = vmatprep.subr.mxu1 %v8621_v14 }
  0x22   :  { %467 = vmatmul.mubr.f32.gmra.mxu0 %v8618_v13  ;;  %548 = vmatmul.mubr.f32.gmra.mxu1 %v8618_v13 }
  0x23   :  { %7829 = vmatprep.mubr.f32.mxu0 %v111_v28  ;;  %7834 = vmatprep.mubr.f32.mxu1 %v8615_v11 }
  0x26   :  { %7830 = vmatmul.mubr.f32.vlgmr.msra.gmra.mxu0 %v122_v30  ;;  %7835 = vmatmul.mubr.f32.vlgmr.msra.gmra.mxu1 %v8618_v13 }
  0x27   :  { %7838 = vmatpush3.msra.mxu0 %v672_v23  ;;  %7843 = vmatpush3.msra.mxu1 %v8621_v14 }
  0x28   :  { %7839 = vmatprep.mubr.f32.mxu0 %v108_v16  ;;  %7847 = vmatprep.subr.mxu0 %v673_v29 }
  0x29   :  { %7844 = vmatprep.mubr.f32.mxu1 %v109_v20  ;;  %7852 = vmatprep.subr.mxu1 %v8621_v14 }
  0x2a   :  { %7840 = vmatmul.mubr.f32.vlgmr.msra.gmra.mxu0 %v119_v18  ;;  %7845 = vmatmul.mubr.f32.vlgmr.msra.gmra.mxu1 %v120_v22 }
  0x2b   :  { %7848 = vmatpush3.msra.mxu0 %v673_v29  ;;  %7853 = vmatpush3.msra.mxu1 %v8621_v14 }
  0x2c   :  { %7849 = vmatprep.mubr.f32.mxu0 %v8615_v11  ;;  %7854 = vmatprep.mubr.f32.mxu1 %v8615_v11 }
  0x2e   :  { %7850 = vmatmul.mubr.f32.vlgmr.msra.gmra.mxu0 %v8618_v13  ;;  %7855 = vmatmul.mubr.f32.vlgmr.msra.gmra.mxu1 %v8618_v13 }
  0xce   :  { %v113_v35 = vpop.f32.mrf.mxu0  ;;  %v206_v36 = vpop.f32.mrf.mxu1 }
  0xcf   :  { %v207_v59 = vadd.f32 %v206_v36, %v113_v35 }
  0xd0   :  { %v115_v37 = vpop.f32.mrf.mxu0  ;;  %v208_v38 = vpop.f32.mrf.mxu1 }
  0xd1   :  { %v209_v54 = vadd.f32 %v208_v38, %v115_v37  ;;  %v8675_v38 = vrot.slane %v8597_v1, %v8659_v25 }
  0xd2   :  { %v124_v39 = vpop.f32.mrf.mxu0  ;;  %v213_v40 = vpop.f32.mrf.mxu1 }
  0xd3   :  { %v214_v57 = vadd.f32 %v213_v40, %v124_v39 }
  0xd4   :  { %v126_v41 = vpop.f32.mrf.mxu0  ;;  %v215_v42 = vpop.f32.mrf.mxu1 }
  0xd5   :  { %v216_v53 = vadd.f32 %v215_v42, %v126_v41  ;;  %v8679_v41 = vrot.slane %v8604_v3, %v8659_v25 }
  0xd6   :  { %v290_v43 = vpop.f32.mrf.mxu0  ;;  %v374_v44 = vpop.f32.mrf.mxu1 }
  0xd7   :  { %v291_v5 = vadd.f32 %v290_v43, %v207_v59 }
  0xd8   :  { %v292_v45 = vpop.f32.mrf.mxu0  ;;  %v376_v46 = vpop.f32.mrf.mxu1 }
  0xd9   :  { %v293_v60 = vadd.f32 %v292_v45, %v209_v54  ;;  %v375_v16 = vadd.f32 %v374_v44, %v291_v5  ;;  %v1433_v5 = vld [vmem:[%s12944_s5 + $0xf8] sm:$0xff] }
  0xda   :  { %v298_v47 = vpop.f32.mrf.mxu0  ;;  %v383_v48 = vpop.f32.mrf.mxu1 }
  0xdb   :  { %v299_v4 = vadd.f32 %v298_v47, %v214_v57  ;;  %v377_v9 = vadd.f32 %v376_v46, %v293_v60 }
  0xdc   :  { %v300_v49 = vpop.f32.mrf.mxu0  ;;  %v385_v50 = vpop.f32.mrf.mxu1 }
  0xdd   :  { %v301_v58 = vadd.f32 %v300_v49, %v216_v53  ;;  %v384_v13 = vadd.f32 %v383_v48, %v299_v4 }
  0xde   :  { %v461_v51 = vpop.f32.mrf.mxu0  ;;  %v542_v52 = vpop.f32.mrf.mxu1 }
  0xdf   :  { %v386_v8 = vadd.f32 %v385_v50, %v301_v58  ;;  %v462_v22 = vadd.f32 %v461_v51, %v375_v16  ;;  %v1431_v16 = vld [vmem:[%s12944_s5 + $0xe8] sm:$0xff] }
  0xe0   :  { %v463_v55 = vpop.f32.mrf.mxu0  ;;  %v544_v56 = vpop.f32.mrf.mxu1 }
  0xe1   :  { %v464_v17 = vadd.f32 %v463_v55, %v377_v9  ;;  %v8671_v35 = vadd.f32 %v542_v52, %v462_v22  ;;  %v1432_v9 = vld [vmem:[%s12944_s5 + $0xf0] sm:$0xff] }
  0xe2   :  { %v468_v61 = vpop.f32.mrf.mxu0  ;;  %v549_v62 = vpop.f32.mrf.mxu1 }
  0xe3   :  { %v469_v20 = vadd.f32 %v468_v61, %v384_v13  ;;  %v8663_v28 = vadd.f32 %v544_v56, %v464_v17  ;;  %v1055_v47 = vmul.f32 %v8675_v38, %v8671_v35  ;;  %v1416_v13 = vld [vmem:[%s12944_s5 + $0x70] sm:$0xff] }
  0xe4   :  { %v470_v6 = vpop.f32.mrf.mxu0  ;;  %v551_v7 = vpop.f32.mrf.mxu1 }
  0xe5   :  { %v471_v14 = vadd.f32 %v470_v6, %v386_v8  ;;  %v8669_v32 = vadd.f32 %v549_v62, %v469_v20  ;;  %v1056_v44 = vmul.f32 %v8667_v31, %v8663_v28  ;;  %v1063_v59 = vmul.f32 %v1055_v47, %v8671_v35  ;;  %v1415_v20 = vld [vmem:[%s12944_s5 + $0x68] sm:$0xff] }
  0xe6   :  { %v7831_v10 = vpop.f32.mrf.mxu0  ;;  %v7836_v11 = vpop.f32.mrf.mxu1  ;;  %v8706_v6 = vand.u32 4294901760, %v1433_v5 }
  0xe7   :  { %v719_v15 = vadd.f32 %v7836_v11, %v7831_v10  ;;  %v8661_v26 = vadd.f32 %v551_v7, %v471_v14  ;;  %v1081_v1 = vmul.f32 %v8675_v38, %v8669_v32  ;;  %v1058_v51 = vadd.f32 %v1056_v44, %v1055_v47  ;;  %v1417_v7 = vld [vmem:[%s12944_s5 + $0x78] sm:$0xff] }
  0xe8   :  { %v626_v18 = vpop.f32.mrf.mxu0  ;;  %v712_v19 = vpop.f32.mrf.mxu1  ;;  %v1064_v52 = vmul.f32 %v1056_v44, %v8663_v28  ;;  %13347 = vst [vmem:[#allocation3_spill] sm:$0xff] %v8706_v6  ;;  %v8711_v8 = vand.u32 4294901760, %v1417_v7  ;;  %v8717_v10 = vsub.f32 %v1433_v5, %v8706_v6  ;;  %v8719_v11 = vand.u32 4294901760, %v1432_v9  ;;  %6867 = vmatprep.subr.mxu0 %v8706_v6  ;;  %v1413_v47 = vld [vmem:[%s12944_s5 + $0x58] sm:$0xff] }
  0xe9   :  { %v713_v21 = vadd.f32 %v712_v19, %v626_v18  ;;  %v1082_v0 = vmul.f32 %v8667_v31, %v8661_v26  ;;  %v1089_v55 = vmul.f32 %v1081_v1, %v8669_v32  ;;  %v8738_v19 = vand.u32 4294901760, %v1431_v16 }
  0xea   :  { %v7841_v23 = vpop.f32.mrf.mxu0  ;;  %v7846_v24 = vpop.f32.mrf.mxu1  ;;  %v1066_v62 = vadd.f32 %v1064_v52, %v1063_v59  ;;  %13348 = vst [vmem:[#allocation4_spill] sm:$0xff] %v8717_v10  ;;  %13349 = vst [vmem:[#allocation5_spill] sm:$0xff] %v8719_v11  ;;  %v8726_v14 = vsub.f32 %v1417_v7, %v8711_v8  ;;  %6868 = vmatpush3.msra.mxu0 %v8711_v8  ;;  %v12970_v17 = vand.u32 4294901760, %v8717_v10  ;;  %v1428_v52 = vld [vmem:[%s12944_s5 + $0xd0] sm:$0xff] }
  0xeb   :  { %v800_v27 = vadd.f32 %v7841_v23, %v719_v15  ;;  %v1084_v49 = vadd.f32 %v1082_v0, %v1081_v1  ;;  %v1090_v50 = vmul.f32 %v1082_v0, %v8661_v26  ;;  %v8728_v15 = vand.u32 4294901760, %v1416_v13  ;;  %6869 = vmatprep.subr.mxu0 %v8719_v11 }
  0xec   :  { %v792_v29 = vpop.f32.mrf.mxu0  ;;  %v873_v30 = vpop.f32.mrf.mxu1  ;;  %v8736_v18 = vsub.f32 %v1432_v9, %v8719_v11  ;;  %v12969_v22 = vand.u32 4294901760, %v8726_v14 }
  0xed   :  { %v882_v33 = vadd.f32 %v7846_v24, %v800_v27  ;;  %v793_v34 = vadd.f32 %v792_v29, %v713_v21  ;;  %v1092_v58 = vadd.f32 %v1090_v50, %v1089_v55  ;;  %13350 = vst [vmem:[#allocation6_spill] sm:$0xff] %v8728_v15  ;;  %v8747_v21 = vld [vmem:[%s12945_s2] sm:$0xff]  ;;  %v8751_v23 = vsub.f32 %v1416_v13, %v8728_v15 }
  0xee   :  { %v7851_v36 = vpop.f32.mrf.mxu0  ;;  %v7856_v37 = vpop.f32.mrf.mxu1  ;;  %v8753_v24 = vand.u32 4294901760, %v1415_v20  ;;  %v1430_v27 = vld [vmem:[%s12944_s5 + $0xe0] sm:$0xff]  ;;  %6870 = vmatpush3.msra.mxu0 %v8728_v15  ;;  %v1783_v29 = vsub.f32 %v8717_v10, %v12970_v17  ;;  %v8832_v13 = vand.u32 4294901760, %v1428_v52 }
  0xef   :  { %v874_v39 = vadd.f32 %v873_v30, %v793_v34  ;;  %v962_v40 = vadd.f32 %v7851_v36, %v882_v33  ;;  %v12967_v30 = vand.u32 4294901760, %v8736_v18  ;;  %v8764_v33 = vsub.f32 %v1431_v16, %v8738_v19  ;;  %v1414_v36 = vld [vmem:[%s12944_s5 + $0x60] sm:$0xff]  ;;  %6871 = vmatprep.subr.mxu0 %v8738_v19  ;;  %v1411_v16 = vld [vmem:[%s12944_s5 + $0x48] sm:$0xff] }
  0xf0   :  { %v955_v42 = vpop.f32.mrf.mxu0  ;;  %v1033_v43 = vpop.f32.mrf.mxu1  ;;  %13351 = vst [vmem:[#allocation7_spill] sm:$0xff] %v8753_v24  ;;  %v8766_v34 = vand.u32 4294901760, %v1430_v27  ;;  %v8779_v0 = vand.u32 4294901760, %v1414_v36  ;;  %6872 = vmatpush3.msra.mxu0 %v8753_v24 }
  0xf1   :  { %v8685_v45 = vadd.f32 %v7856_v37, %v962_v40  ;;  %v956_v46 = vadd.f32 %v955_v42, %v874_v39  ;;  %v1671_v37 = vsub.f32 %v8726_v14, %v12969_v22  ;;  %v12966_v39 = vand.u32 4294901760, %v8751_v23  ;;  %v1429_v42 = vld [vmem:[%s12944_s5 + $0xd8] sm:$0xff] }
  0xf2   :  { %13352 = vst [vmem:[#allocation8_spill] sm:$0xff] %v8766_v34  ;;  %v8777_v40 = vsub.f32 %v1415_v20, %v8753_v24  ;;  %13353 = vst [vmem:[#allocation9_spill] sm:$0xff] %v8779_v0  ;;  %v1790_v44 = vsub.f32 %v8736_v18, %v12967_v30  ;;  %v8791_v1 = vsub.f32 %v1430_v27, %v8766_v34  ;;  %6873 = vmatprep.subr.mxu0 %v8766_v34 }
  0xf3   :  { %v8691_v48 = vadd.f32 %v1033_v43, %v956_v46  ;;  %v1083_v3 = vmul.f32 %v8679_v41, %v8685_v45  ;;  %v1784_v43 = vand.u32 4294901760, %v1783_v29  ;;  %v12964_v46 = vand.u32 4294901760, %v8764_v33  ;;  %6874 = vmatpush3.msra.mxu0 %v8779_v0 }
  0xf4   :  { %v12962_v50 = vand.u32 4294901760, %v8777_v40  ;;  %v12961_v55 = vand.u32 4294901760, %v8791_v1 }
  0xf5   :  { %v1085_v53 = vadd.f32 %v1084_v49, %v1083_v3  ;;  %v1057_v54 = vmul.f32 %v8679_v41, %v8691_v48  ;;  %v1091_v56 = vmul.f32 %v1083_v3, %v8685_v45  ;;  %v1672_v3 = vand.u32 4294901760, %v1671_v37  ;;  %6923 = vmatprep.subr.mxu1 %v1784_v43  ;;  %v1426_v37 = vld [vmem:[%s12944_s5 + $0xc0] sm:$0xff] }
  0xf6   :  { %v1678_v49 = vsub.f32 %v8751_v23, %v12966_v39  ;;  %v1685_v59 = vsub.f32 %v8777_v40, %v12962_v50  ;;  %v1804_v7 = vsub.f32 %v8791_v1, %v12961_v55  ;;  %v1407_v39 = vld [vmem:[%s12944_s5 + $0x28] sm:$0xff] }
  0xf7   :  { %1086 = vadd.xlane.f32.xlu1 %v1085_v53  ;;  %v1059_v57 = vadd.f32 %v1058_v51, %v1057_v54  ;;  %v1065_v60 = vmul.f32 %v1057_v54, %v8691_v48  ;;  %v1093_v61 = vadd.f32 %v1092_v58, %v1091_v56  ;;  %v8802_v51 = vsub.f32 %v1414_v36, %v8779_v0 }
  0xf8   :  { %v1791_v53 = vand.u32 4294901760, %v1790_v44  ;;  %v1797_v54 = vsub.f32 %v8764_v33, %v12964_v46  ;;  %v8812_v56 = vand.u32 4294901760, %v1429_v42  ;;  %6924 = vmatpush3.msra.mxu1 %v1672_v3  ;;  %v1679_v58 = vand.u32 4294901760, %v1678_v49 }
  0xf9   :  { %1060 = vadd.xlane.f32.xlu0 %v1059_v57  ;;  %v1067_v4 = vadd.f32 %v1066_v62, %v1065_v60  ;;  %v1412_v57 = vld [vmem:[%s12944_s5 + $0x50] sm:$0xff]  ;;  %v12959_v60 = vand.u32 4294901760, %v8802_v51  ;;  %v1427_v62 = vld [vmem:[%s12944_s5 + $0xc8] sm:$0xff]  ;;  %v1686_v20 = vand.u32 4294901760, %v1685_v59  ;;  %v8851_v44 = vsub.f32 %v1428_v52, %v8832_v13 }
  0xfa   :  { %13354 = vst [vmem:[#allocation10_spill] sm:$0xff] %v8812_v56  ;;  %6925 = vmatprep.subr.mxu1 %v1791_v53  ;;  %v1798_v5 = vand.u32 4294901760, %v1797_v54  ;;  %v8830_v9 = vsub.f32 %v1429_v42, %v8812_v56  ;;  %v8844_v36 = vand.u32 4294901760, %v1412_v57  ;;  %v1805_v42 = vand.u32 4294901760, %v1804_v7  ;;  %6875 = vmatprep.subr.mxu0 %v8812_v56 }
  0xfb   :  { %1094 = vadd.xlane.f32.xlu1 %v1093_v61  ;;  %v8821_v61 = vand.u32 4294901760, %v1413_v47  ;;  %6926 = vmatpush3.msra.mxu1 %v1679_v58  ;;  %v1692_v27 = vsub.f32 %v8802_v51, %v12959_v60  ;;  %v8853_v3 = vand.u32 4294901760, %v1427_v62  ;;  %v8864_v58 = vand.u32 4294901760, %v1411_v16 }
  0xfc   :  { %6927 = vmatprep.subr.mxu1 %v1798_v5  ;;  %v12958_v43 = vand.u32 4294901760, %v8830_v9  ;;  %v8862_v54 = vsub.f32 %v1412_v57, %v8844_v36  ;;  %v12957_v59 = vand.u32 4294901760, %v8851_v44  ;;  %v8873_v5 = vand.u32 4294901760, %v1426_v37 }
  0xfd   :  { %1068 = vadd.xlane.f32.xlu0 %v1067_v4  ;;  %v8471_v4 = vmov 4   ;;  %v8842_v29 = vsub.f32 %v1413_v47, %v8821_v61  ;;  %v1410_v47 = vld [vmem:[%s12944_s5 + $0x40] sm:$0xff]  ;;  %6928 = vmatpush3.msra.mxu1 %v1686_v20  ;;  %v1693_v49 = vand.u32 4294901760, %v1692_v27  ;;  %v12953_v7 = vmov 5  }
  0xfe   :  { %6929 = vmatprep.subr.mxu1 %v1805_v42  ;;  %v1811_v52 = vsub.f32 %v8830_v9, %v12958_v43  ;;  %6876 = vmatpush3.msra.mxu0 %v8821_v61  ;;  %v12960_v20 = vand.u32 4294901760, %v8862_v54  ;;  %v8882_v27 = vsub.f32 %v1411_v16, %v8864_v58  ;;  %v8884_v42 = vand.u32 4294901760, %v1410_v47  ;;  %v1409_v16 = vld [vmem:[%s12944_s5 + $0x38] sm:$0xff] }
  0xff   :  { %v12956_v53 = vand.u32 4294901760, %v8842_v29  ;;  %6930 = vmatpush3.msra.mxu1 %v1693_v49  ;;  %v1818_v49 = vsub.f32 %v8851_v44, %v12957_v59  ;;  %v8895_v63 = vsub.f32 %v1426_v37, %v8873_v5  ;;  %6877 = vmatprep.subr.mxu0 %v8832_v13  ;;  %v1424_v37 = vld [vmem:[%s12944_s5 + $0xb0] sm:$0xff]  ;;  %v8926_v50 = vand.u32 4294901760, %v1409_v16 }
 0x100   :  { %13356 = vst [vmem:[#allocation12_spill] sm:$0xff] %v8882_v27  ;;  %v1812_v2 = vand.u32 4294901760, %v1811_v52  ;;  %v12965_v52 = vand.u32 4294901760, %v8882_v27  ;;  %v8906_v59 = vsub.f32 %v1410_v47, %v8884_v42  ;;  %6878 = vmatpush3.msra.mxu0 %v8844_v36  ;;  %v1408_v47 = vld [vmem:[%s12944_s5 + $0x30] sm:$0xff] }
 0x101   :  { %v1699_v57 = vsub.f32 %v8842_v29, %v12956_v53  ;;  %13357 = vst [vmem:[#allocation13_spill] sm:$0xff] %v8895_v63  ;;  %v1819_v43 = vand.u32 4294901760, %v1818_v49  ;;  %v12968_v60 = vand.u32 4294901760, %v8895_v63  ;;  %6879 = vmatprep.subr.mxu0 %v8853_v3 }
 0x102   :  { %13358 = vst [vmem:[#allocation14_spill] sm:$0xff] %v8906_v59  ;;  %6931 = vmatprep.subr.mxu1 %v1812_v2  ;;  %v1713_v2 = vsub.f32 %v8882_v27, %v12965_v52  ;;  %v12971_v49 = vand.u32 4294901760, %v8906_v59  ;;  %6880 = vmatpush3.msra.mxu0 %v8864_v58  ;;  %v8938_v52 = vand.u32 4294901760, %v1424_v37 }
 0x103   :  { %v1700_v53 = vand.u32 4294901760, %v1699_v57  ;;  %6881 = vmatprep.subr.mxu0 %v8873_v5 }
 0x104   :  { %v1714_v30 = vand.u32 4294901760, %v1713_v2  ;;  %6882 = vmatpush3.msra.mxu0 %v8884_v42  ;;  %v8958_v2 = vsub.f32 %v1424_v37, %v8938_v52 }
 0x105   :  { %6932 = vmatpush3.msra.mxu1 %v1700_v53  ;;  %v1832_v53 = vsub.f32 %v8895_v63, %v12968_v60  ;;  %v8950_v60 = vand.u32 4294901760, %v1408_v47 }
 0x106   :  { %6933 = vmatprep.subr.mxu1 %v1819_v43  ;;  %v1720_v43 = vsub.f32 %v8906_v59, %v12971_v49  ;;  %13362 = vst [vmem:[#allocation18_spill] sm:$0xff] %v8958_v2 }
 0x107   :  { %13361 = vst [vmem:[#allocation17_spill] sm:$0xff] %v8950_v60  ;;  %v1833_v22 = vand.u32 4294901760, %v1832_v53  ;;  %v8970_v53 = vand.u32 4294901760, %v1407_v39 }
 0x108   :  { %v1721_v49 = vand.u32 4294901760, %v1720_v43 }
 0x109   :  { %13365 = vst [vmem:[#allocation21_spill] sm:$0xff] %v8970_v53  ;;  %v8988_v43 = vsub.f32 %v1407_v39, %v8970_v53  ;;  %v1405_v39 = vld [vmem:[%s12944_s5 + $0x18] sm:$0xff] }
 0x10b   :  { %13368 = vst [vmem:[#allocation24_spill] sm:$0xff] %v8988_v43 }
 0x10c   :  { %1116 = vperm.xlu1 %8457, %v8747_v21  }
 0x110   :  { %8458 = vset.pattern.permute.xlu1 %v8471_v4  ;;  %v8871_v4 = vsub.f32 %v1427_v62, %v8853_v3  ;;  %v1425_v62 = vld [vmem:[%s12944_s5 + $0xb8] sm:$0xff] }
 0x111   :  { %1137 = vperm.xlu1 %8458, %v8747_v21  }
 0x112   :  { %13355 = vst [vmem:[#allocation11_spill] sm:$0xff] %v8871_v4 }
 0x113   :  { %1109 = vperm.xlu0 %8456, %v8747_v21  }
 0x115   :  { %8459 = vset.pattern.permute.xlu1 %v12953_v7  ;;  %v12963_v7 = vand.u32 4294901760, %v8871_v4 }
 0x116   :  { %1144 = vperm.xlu1 %8459, %v8747_v21   ;;  %v1706_v21 = vsub.f32 %v8862_v54, %v12960_v20  ;;  %v8916_v20 = vand.u32 4294901760, %v1425_v62 }
 0x117   :  { %v1825_v57 = vsub.f32 %v8871_v4, %v12963_v7  ;;  %v1423_v7 = vld [vmem:[%s12944_s5 + $0xa8] sm:$0xff] }
 0x118   :  { %v1707_v55 = vand.u32 4294901760, %v1706_v21  ;;  %v8936_v21 = vsub.f32 %v1425_v62, %v8916_v20  ;;  %v1422_v62 = vld [vmem:[%s12944_s5 + $0xa0] sm:$0xff]  ;;  %v8960_v17 = vand.u32 4294901760, %v1423_v7  ;;  %6883 = vmatprep.subr.mxu0 %v8916_v20 }
 0x119   :  { %v1826_v46 = vand.u32 4294901760, %v1825_v57  ;;  %v8948_v57 = vsub.f32 %v1409_v16, %v8926_v50  ;;  %v1406_v16 = vld [vmem:[%s12944_s5 + $0x20] sm:$0xff]  ;;  %6884 = vmatpush3.msra.mxu0 %v8926_v50 }
 0x11a   :  { %13359 = vst [vmem:[#allocation15_spill] sm:$0xff] %v8936_v21  ;;  %6934 = vmatpush3.msra.mxu1 %v1707_v55  ;;  %v12978_v55 = vand.u32 4294901760, %v8936_v21  ;;  %13363 = vst [vmem:[#allocation19_spill] sm:$0xff] %v8960_v17  ;;  %v8978_v27 = vsub.f32 %v1423_v7, %v8960_v17  ;;  %6885 = vmatprep.subr.mxu0 %v8938_v52  ;;  %v1421_v7 = vld [vmem:[%s12944_s5 + $0x98] sm:$0xff] }
 0x11b   :  { %13360 = vst [vmem:[#allocation16_spill] sm:$0xff] %v8948_v57  ;;  %6935 = vmatprep.subr.mxu1 %v1826_v46  ;;  %v12981_v59 = vand.u32 4294901760, %v8948_v57  ;;  %v8968_v46 = vsub.f32 %v1408_v47, %v8950_v60  ;;  %6886 = vmatpush3.msra.mxu0 %v8950_v60 }
 0x11c   :  { %6936 = vmatpush3.msra.mxu1 %v1714_v30  ;;  %v1839_v37 = vsub.f32 %v8936_v21, %v12978_v55  ;;  %13366 = vst [vmem:[#allocation22_spill] sm:$0xff] %v8978_v27  ;;  %v8980_v30 = vand.u32 4294901760, %v1422_v62  ;;  %v8990_v55 = vand.u32 4294901760, %v1406_v16  ;;  %6887 = vmatprep.subr.mxu0 %v8960_v17 }
 0x11d   :  { %13364 = vst [vmem:[#allocation20_spill] sm:$0xff] %v8968_v46  ;;  %6937 = vmatprep.subr.mxu1 %v1833_v22  ;;  %v1727_v47 = vsub.f32 %v8948_v57, %v12981_v59  ;;  %v13372_v4 = vand.u32 4294901760, %v8968_v46  ;;  %6888 = vmatpush3.msra.mxu0 %v8970_v53  ;;  %v9032_v53 = vand.u32 4294901760, %v1405_v39 }
 0x11e   :  { %13367 = vst [vmem:[#allocation23_spill] sm:$0xff] %v8980_v30  ;;  %6938 = vmatpush3.msra.mxu1 %v1721_v49  ;;  %13369 = vst [vmem:[#allocation25_spill] sm:$0xff] %v8990_v55  ;;  %v1840_v63 = vand.u32 4294901760, %v1839_v37  ;;  %v13370_v49 = vand.u32 4294901760, %v8958_v2  ;;  %v9001_v22 = vsub.f32 %v1422_v62, %v8980_v30  ;;  %v1420_v62 = vld [vmem:[%s12944_s5 + $0x90] sm:$0xff]  ;;  %6889 = vmatprep.subr.mxu0 %v8980_v30 }
 0x11f   :  { %v1728_v57 = vand.u32 4294901760, %v1727_v47  ;;  %v1734_v37 = vsub.f32 %v8968_v46, %v13372_v4  ;;  %v9022_v4 = vand.u32 4294901760, %v1421_v7  ;;  %v13376_v46 = vand.u32 4294901760, %v8988_v43  ;;  %13377 = vst [vmem:[#allocation29_spill] sm:$0xff] %v9032_v53  ;;  %6890 = vmatpush3.msra.mxu0 %v8990_v55 }
 0x120   :  { %v1846_v21 = vsub.f32 %v8958_v2, %v13370_v49  ;;  %13371 = vst [vmem:[#allocation26_spill] sm:$0xff] %v9001_v22  ;;  %v9012_v49 = vsub.f32 %v1406_v16, %v8990_v55  ;;  %6939 = vmatprep.subr.mxu1 %v1840_v63  ;;  %v13374_v2 = vand.u32 4294901760, %v8978_v27  ;;  %v1404_v16 = vld [vmem:[%s12944_s5 + $0x10] sm:$0xff]  ;;  %v9054_v55 = vsub.f32 %v1405_v39, %v9032_v53  ;;  %v1402_v39 = vld [vmem:[%s12944_s5] sm:$0xff] }
 0x121   :  { %13375 = vst [vmem:[#allocation28_spill] sm:$0xff] %v9022_v4  ;;  %6940 = vmatpush3.msra.mxu1 %v1728_v57  ;;  %v1735_v60 = vand.u32 4294901760, %v1734_v37  ;;  %v1741_v63 = vsub.f32 %v8988_v43, %v13376_v46  ;;  %v9042_v37 = vsub.f32 %v1421_v7, %v9022_v4  ;;  %v9044_v46 = vand.u32 4294901760, %v1420_v62  ;;  %6891 = vmatprep.subr.mxu0 %v9022_v4  ;;  %v1418_v7 = vld [vmem:[%s12944_s5 + $0x80] sm:$0xff] }
 0x122   :  { %13373 = vst [vmem:[#allocation27_spill] sm:$0xff] %v9012_v49  ;;  %v1847_v59 = vand.u32 4294901760, %v1846_v21  ;;  %v1853_v47 = vsub.f32 %v8978_v27, %v13374_v2  ;;  %v1419_v2 = vld [vmem:[%s12944_s5 + $0x88] sm:$0xff]  ;;  %v13378_v27 = vand.u32 4294901760, %v9001_v22  ;;  %13382 = vst [vmem:[#allocation32_spill] sm:$0xff] %v9054_v55  ;;  %6892 = vmatpush3.msra.mxu0 %v9032_v53 }
 0x123   :  { %13379 = vst [vmem:[#allocation30_spill] sm:$0xff] %v9042_v37  ;;  %13380 = vst [vmem:[#allocation31_spill] sm:$0xff] %v9044_v46  ;;  %v1403_v21 = vld [vmem:[%s12944_s5 + $0x8] sm:$0xff]  ;;  %v1742_v43 = vand.u32 4294901760, %v1741_v63  ;;  %v9064_v63 = vsub.f32 %v1420_v62, %v9044_v46  ;;  %v9066_v4 = vand.u32 4294901760, %v1419_v2  ;;  %6893 = vmatprep.subr.mxu0 %v9044_v46 }
 0x124   :  { %6941 = vmatprep.subr.mxu1 %v1847_v59  ;;  %v1854_v17 = vand.u32 4294901760, %v1853_v47  ;;  %v1860_v57 = vsub.f32 %v9001_v22, %v13378_v27  ;;  %v13381_v59 = vand.u32 4294901760, %v9012_v49  ;;  %v9056_v27 = vand.u32 4294901760, %v1404_v16 }
 0x125   :  { %6942 = vmatpush3.msra.mxu1 %v1735_v60  ;;  %v13012_v60 = vand.u32 4294901760, %v9042_v37  ;;  %13384 = vst [vmem:[#allocation34_spill] sm:$0xff] %v9064_v63  ;;  %13385 = vst [vmem:[#allocation35_spill] sm:$0xff] %v9066_v4  ;;  %v13020_v53 = vand.u32 4294901760, %v9064_v63  ;;  %v9084_v46 = vsub.f32 %v1419_v2, %v9066_v4 }
 0x126   :  { %v1748_v47 = vsub.f32 %v9012_v49, %v13381_v59  ;;  %13383 = vst [vmem:[#allocation33_spill] sm:$0xff] %v9056_v27  ;;  %6943 = vmatprep.subr.mxu1 %v1854_v17  ;;  %v1861_v22 = vand.u32 4294901760, %v1860_v57  ;;  %v13017_v49 = vand.u32 4294901760, %v9054_v55  ;;  %v9074_v17 = vsub.f32 %v1404_v16, %v9056_v27  ;;  %6894 = vmatpush3.msra.mxu0 %v9056_v27 }
 0x127   :  { %6944 = vmatpush3.msra.mxu1 %v1742_v43  ;;  %v9076_v57 = vand.u32 4294901760, %v1403_v21  ;;  %v1867_v62 = vsub.f32 %v9042_v37, %v13012_v60  ;;  %13388 = vst [vmem:[#allocation38_spill] sm:$0xff] %v9084_v46  ;;  %v9086_v43 = vand.u32 4294901760, %v1418_v7  ;;  %6895 = vmatprep.subr.mxu0 %v9066_v4  ;;  %v9096_v60 = vand.u32 4294901760, %v1402_v39 }
 0x128   :  { %v1749_v59 = vand.u32 4294901760, %v1748_v47  ;;  %13386 = vst [vmem:[#allocation36_spill] sm:$0xff] %v9074_v17  ;;  %6945 = vmatprep.subr.mxu1 %v1861_v22  ;;  %v1755_v16 = vsub.f32 %v9054_v55, %v13017_v49  ;;  %v13023_v22 = vand.u32 4294901760, %v9074_v17  ;;  %v1874_v37 = vsub.f32 %v9064_v63, %v13020_v53 }
 0x129   :  { %13387 = vst [vmem:[#allocation37_spill] sm:$0xff] %v9076_v57  ;;  %13389 = vst [vmem:[#allocation39_spill] sm:$0xff] %v9086_v43  ;;  %v9094_v47 = vsub.f32 %v1403_v21, %v9076_v57  ;;  %6896 = vmatpush3.msra.mxu0 %v9076_v57  ;;  %v1868_v2 = vand.u32 4294901760, %v1867_v62  ;;  %v9104_v4 = vsub.f32 %v1418_v7, %v9086_v43 }
 0x12a   :  { %6946 = vmatpush3.msra.mxu1 %v1749_v59  ;;  %13391 = vst [vmem:[#allocation41_spill] sm:$0xff] %v9096_v60  ;;  %v13026_v59 = vand.u32 4294901760, %v9084_v46  ;;  %6897 = vmatprep.subr.mxu0 %v9086_v43  ;;  %v1756_v49 = vand.u32 4294901760, %v1755_v16  ;;  %v1762_v21 = vsub.f32 %v9074_v17, %v13023_v22  ;;  %v9112_v62 = vsub.f32 %v1402_v39, %v9096_v60 }
 0x12b   :  { %13390 = vst [vmem:[#allocation40_spill] sm:$0xff] %v9094_v47  ;;  %13392 = vst [vmem:[#allocation42_spill] sm:$0xff] %v9104_v4  ;;  %v13027_v55 = vand.u32 4294901760, %v9094_v47  ;;  %6898 = vmatpush3.msra.mxu0 %v9096_v60  ;;  %6947 = vmatprep.subr.mxu1 %v1868_v2  ;;  %v1875_v53 = vand.u32 4294901760, %v1874_v37  ;;  %v13031_v63 = vand.u32 4294901760, %v9104_v4 }
 0x12c   :  { %13393 = vst [vmem:[#allocation43_spill] sm:$0xff] %v9112_v62  ;;  %v1881_v7 = vsub.f32 %v9084_v46, %v13026_v59  ;;  %6979 = vmatprep.subr.mxu0 %v8717_v10  ;;  %6948 = vmatpush3.msra.mxu1 %v1756_v49  ;;  %v1763_v16 = vand.u32 4294901760, %v1762_v21  ;;  %v13038_v39 = vand.u32 4294901760, %v9112_v62 }
 0x12d   :  { %v1769_v22 = vsub.f32 %v9094_v47, %v13027_v55  ;;  %6949 = vmatprep.subr.mxu1 %v1875_v53  ;;  %v1888_v37 = vsub.f32 %v9104_v4, %v13031_v63 }
 0x12e   :  { %v1882_v17 = vand.u32 4294901760, %v1881_v7  ;;  %6950 = vmatpush3.msra.mxu1 %v1763_v16  ;;  %v1776_v59 = vsub.f32 %v9112_v62, %v13038_v39 }
 0x12f   :  { %v1770_v2 = vand.u32 4294901760, %v1769_v22  ;;  %v1889_v49 = vand.u32 4294901760, %v1888_v37 }
 0x130   :  { %6951 = vmatprep.subr.mxu1 %v1882_v17  ;;  %v1777_v21 = vand.u32 4294901760, %v1776_v59 }
 0x131   :  { %6952 = vmatpush3.msra.mxu1 %v1770_v2 }
 0x132   :  { %6953 = vmatprep.subr.mxu1 %v1889_v49 }
 0x133   :  { %6954 = vmatpush3.msra.mxu1 %v1777_v21 }
 0x134   :  { %7035 = vmatprep.subr.mxu1 %v8706_v6 }
 0x180   :  { %v1087_v53 = vpop.xlane.xlu1 %1086 }
 0x181   :  { %v1088_v7 = vmul.f32 0.0030864198, %v1087_v53 }
 0x182   :  { %v1061_v55 = vpop.xlane.xlu0 %1060 }
 0x183   :  { %v1062_v10 = vmul.f32 0.0030864198, %v1061_v55  ;;  %v1097_v63 = vmul.f32 %v1088_v7, %v1088_v7  ;;  %v1099_v49 = vsub.f32 %v8669_v32, %v1088_v7  ;;  %v1100_v21 = vsub.f32 %v8661_v26, %v1088_v7 }
 0x184   :  { %v1095_v47 = vpop.xlane.xlu1 %1094  ;;  %v1101_v55 = vsub.f32 %v8685_v45, %v1088_v7 }
 0x185   :  { %v1096_v16 = vmul.f32 0.0030864198, %v1095_v47  ;;  %v1071_v46 = vmul.f32 %v1062_v10, %v1062_v10 }
 0x186   :  { %v1069_v22 = vpop.xlane.xlu0 %1068 }
 0x187   :  { %v1098_v4 = vsub.f32 %v1096_v16, %v1097_v63  ;;  %v1070_v60 = vmul.f32 0.0030864198, %v1069_v22  ;;  %v1073_v63 = vsub.f32 %v8671_v35, %v1062_v10 }
 0x188   :  { %v1117_v59 = vpop.permute.xlu1 %1116 }
 0x189   :  { %v1102_v39 = vadd.f32 1e-05, %v1098_v4  ;;  %v1072_v17 = vsub.f32 %v1070_v60, %v1071_v46  ;;  %v1074_v4 = vsub.f32 %v8663_v28, %v1062_v10  ;;  %v1075_v46 = vsub.f32 %v8691_v48, %v1062_v10 }
 0x18b   :  { %8463 = vrsqrt.f32 %v1102_v39  ;;  %v1076_v37 = vadd.f32 1e-05, %v1072_v17 }
 0x18c   :  { %v1138_v2 = vpop.permute.xlu1 %1137 }
 0x18d   :  { %8465 = vrsqrt.f32 %v1076_v37 }
 0x18e   :  { %v1110_v60 = vpop.permute.xlu0 %1109 }
 0x191   :  { %v1145_v39 = vpop.permute.xlu1 %1144 }
 0x198   :  { %v8464_v53 = vpop.eup %8463 }
 0x199   :  { %v1104_v62 = vmul.f32 %v8464_v53, %v1099_v49  ;;  %v1105_v47 = vmul.f32 %v8464_v53, %v1100_v21  ;;  %v1106_v6 = vmul.f32 %v8464_v53, %v1101_v55  ;;  %v9171_v21 = vsub.s32 2, %v8656_v12 }
 0x19a   :  { %v8466_v16 = vpop.eup %8465 }
 0x19b   :  { %v1140_v22 = vmul.f32 %v1138_v2, %v1104_v62  ;;  %v1141_v17 = vmul.f32 %v1138_v2, %v1105_v47  ;;  %v1142_v32 = vmul.f32 %v1138_v2, %v1106_v6  ;;  %v9137_v37 = vmul.f32 %v8466_v16, %v1073_v63  ;;  %13399 = vst [vmem:[#allocation49_spill] sm:$0xff] %v9171_v21 }
 0x19c   :  { %v9139_v26 = vmul.f32 %v8466_v16, %v1074_v4  ;;  %v9141_v45 = vmul.f32 %v8466_v16, %v1075_v46  ;;  %v9165_v6 = vsub.s32 0, %v8656_v12  ;;  %v9168_v2 = vsub.s32 1, %v8656_v12 }
 0x19d   :  { %13394 = vst [vmem:[#allocation44_spill] sm:$0xff] %v9137_v37  ;;  %v1112_v7 = vmul.f32 %v1110_v60, %v9137_v37  ;;  %v9144_v49 = vadd.f32 %v1145_v39, %v1140_v22  ;;  %v9146_v35 = vadd.f32 %v1145_v39, %v1141_v17  ;;  %v9148_v28 = vadd.f32 %v1145_v39, %v1142_v32  ;;  %v1285_v22 = vld [vmem:[%s12948_s3 + $0x18] sm:$0xff] }
 0x19e   :  { %13395 = vst [vmem:[#allocation45_spill] sm:$0xff] %v9139_v26  ;;  %13396 = vst [vmem:[#allocation46_spill] sm:$0xff] %v9141_v45  ;;  %v1113_v48 = vmul.f32 %v1110_v60, %v9139_v26  ;;  %v1114_v10 = vmul.f32 %v1110_v60, %v9141_v45  ;;  %v9176_v47 = vsub.s32 3, %v8656_v12  ;;  %v1283_v60 = vld [vmem:[%s12948_s3 + $0x8] sm:$0xff]  ;;  %v1288_v45 = vld [vmem:[%s12948_s3 + $0x30] sm:$0xff] }
 0x19f   :  { %13397 = vst [vmem:[#allocation47_spill] sm:$0xff] %v9148_v28  ;;  %v1119_v62 = vadd.f32 %v1117_v59, %v1112_v7  ;;  %1153 = vst [vmem:[%s12946_s7] sm:$0xff] %v9144_v49 }
 0x1a0   :  { %1154 = vst [vmem:[%s12946_s7 + $0x8] sm:$0xff] %v9146_v35  ;;  %1155 = vst [vmem:[%s12946_s7 + $0x10] sm:$0xff] %v9148_v28  ;;  %v1120_v55 = vadd.f32 %v1117_v59, %v1113_v48  ;;  %v9173_v53 = vadd.f32 %v1117_v59, %v1114_v10  ;;  %v1286_v48 = vld [vmem:[%s12948_s3 + $0x20] sm:$0xff]  ;;  %s8503_s7 = smov 34  }
 0x1a1   :  { %13398 = vst [vmem:[#allocation48_spill] sm:$0xff] %v9168_v2  ;;  %1150 = vst [vmem:[%s12947_s6] sm:$0xff] %v1119_v62  ;;  %v9182_v63 = vmul.f32 %v1119_v62, %v8675_v38  ;;  %v1289_v62 = vld [vmem:[%s12948_s3 + $0x38] sm:$0xff] }
 0x1a2   :  { %1151 = vst [vmem:[%s12947_s6 + $0x8] sm:$0xff] %v1120_v55  ;;  %1152 = vst [vmem:[%s12947_s6 + $0x10] sm:$0xff] %v9173_v53  ;;  %v9192_v59 = vmul.f32 %v1120_v55, %v8667_v31  ;;  %v1282_v31 = vld [vmem:[%s12948_s3] sm:$0xff]  ;;  %s8480_s6 = smov 20  }
 0x1a3   :  { %v1165_v16 = vrot.slane %v9182_v63, %v9165_v6  ;;  %v1180_v4 = vrot.slane %v9182_v63, %v9168_v2  ;;  %v1195_v38 = vrot.slane %v9182_v63, %v9171_v21  ;;  %v1210_v26 = vrot.slane %v9182_v63, %v9176_v47 }
 0x1a4   :  { %v1169_v46 = vrot.slane %v9192_v59, %v9165_v6  ;;  %v1184_v39 = vrot.slane %v9192_v59, %v9168_v2  ;;  %v1199_v17 = vrot.slane %v9192_v59, %v9171_v21  ;;  %v1214_v32 = vrot.slane %v9192_v59, %v9176_v47 }
 0x1a5   :  { %v1174_v7 = vmul.f32 %v1165_v16, %v9144_v49  ;;  %v1189_v10 = vmul.f32 %v1180_v4, %v9144_v49  ;;  %v1204_v55 = vmul.f32 %v1195_v38, %v9144_v49 }
 0x1a6   :  { %v1175_v16 = vmul.f32 %v1169_v46, %v9146_v35  ;;  %v1190_v37 = vmul.f32 %v1184_v39, %v9146_v35  ;;  %v1205_v43 = vmul.f32 %v1199_v17, %v9146_v35  ;;  %v1220_v27 = vmul.f32 %v1214_v32, %v9146_v35  ;;  %v1292_v46 = vld [vmem:[%s12948_s3 + $0x50] sm:$0xff] }
 0x1a7   :  { %v9234_v4 = vmul.f32 %v1282_v31, %v1174_v7  ;;  %v9236_v57 = vmul.f32 %v1285_v22, %v1189_v10  ;;  %v9245_v28 = vmul.f32 %v1288_v45, %v1204_v55  ;;  %v1219_v22 = vmul.f32 %v1210_v26, %v9144_v49 }
 0x1a8   :  { %v9239_v38 = vmul.f32 %v1283_v60, %v1175_v16  ;;  %v9241_v21 = vmul.f32 %v1286_v48, %v1190_v37  ;;  %v9243_v2 = vmul.f32 %v1289_v62, %v1205_v43  ;;  %v9254_v17 = vsub.s32 4, %v8656_v12  ;;  %v1291_v48 = vld [vmem:[%s12948_s3 + $0x48] sm:$0xff] }
 0x1a9   :  { %13400 = vst [vmem:[#allocation50_spill] sm:$0xff] %v9234_v4  ;;  %13401 = vst [vmem:[#allocation51_spill] sm:$0xff] %v9236_v57  ;;  %v1330_v39 = vsub.f32 %v1174_v7, %v9234_v4  ;;  %v1333_v31 = vsub.f32 %v1189_v10, %v9236_v57  ;;  %v9266_v10 = vmul.f32 %v1292_v46, %v1220_v27 }
 0x1aa   :  { %13402 = vst [vmem:[#allocation52_spill] sm:$0xff] %v9239_v38  ;;  %13403 = vst [vmem:[#allocation53_spill] sm:$0xff] %v9241_v21  ;;  %v1331_v60 = vsub.f32 %v1175_v16, %v9239_v38  ;;  %v1334_v32 = vsub.f32 %v1190_v37, %v9241_v21  ;;  %v1337_v45 = vsub.f32 %v1205_v43, %v9243_v2 }
 0x1ab   :  { %13404 = vst [vmem:[#allocation54_spill] sm:$0xff] %v9243_v2  ;;  %13405 = vst [vmem:[#allocation55_spill] sm:$0xff] %v9245_v28  ;;  %v9262_v62 = vand.u32 4294901760, %v1330_v39  ;;  %v9264_v7 = vand.u32 4294901760, %v1333_v31  ;;  %v1336_v37 = vsub.f32 %v1204_v55, %v9245_v28  ;;  %v9278_v16 = vmul.f32 %v1291_v48, %v1219_v22  ;;  %v1295_v55 = vld [vmem:[%s12948_s3 + $0x68] sm:$0xff] }
 0x1ac   :  { %13406 = vst [vmem:[#allocation56_spill] sm:$0xff] %v9254_v17  ;;  %13409 = vst [vmem:[#allocation59_spill] sm:$0xff] %v9266_v10  ;;  %v9268_v26 = vand.u32 4294901760, %v1331_v60  ;;  %v9270_v57 = vand.u32 4294901760, %v1334_v32  ;;  %v9272_v4 = vand.u32 4294901760, %v1337_v45  ;;  %v1229_v2 = vrot.slane %v9192_v59, %v9254_v17 }
 0x1ad   :  { %13407 = vst [vmem:[#allocation57_spill] sm:$0xff] %v9262_v62  ;;  %13408 = vst [vmem:[#allocation58_spill] sm:$0xff] %v9264_v7  ;;  %v9276_v43 = vsub.f32 %v1330_v39, %v9262_v62  ;;  %v9290_v38 = vsub.f32 %v1333_v31, %v9264_v7  ;;  %v1225_v39 = vrot.slane %v9182_v63, %v9254_v17 }
 0x1ae   :  { %13410 = vst [vmem:[#allocation60_spill] sm:$0xff] %v9268_v26  ;;  %13411 = vst [vmem:[#allocation61_spill] sm:$0xff] %v9270_v57  ;;  %1892 = vmatprep.mubr.f32.mxu1 %v9268_v26  ;;  %v9284_v46 = vsub.f32 %v1331_v60, %v9268_v26  ;;  %v9287_v21 = vsub.f32 %v1334_v32, %v9270_v57  ;;  %v1340_v60 = vsub.f32 %v1220_v27, %v9266_v10 }
 0x1af   :  { %13412 = vst [vmem:[#allocation62_spill] sm:$0xff] %v9272_v4  ;;  %13413 = vst [vmem:[#allocation63_spill] sm:$0xff] %v9278_v16  ;;  %1894 = vmatmul.mubr.f32.vlgmr.msra.gmra.mxu1 %v9262_v62  ;;  %v13076_v48 = vand.u32 4294901760, %v9276_v43  ;;  %v9301_v28 = vsub.f32 %v1337_v45, %v9272_v4  ;;  %v1235_v32 = vmul.f32 %v1229_v2, %v9146_v35  ;;  %v9307_v26 = vand.u32 4294901760, %v1336_v37 }
 0x1b0   :  { %7036 = vmatpush3.msra.mxu1 %v8711_v8  ;;  %1899 = vmatprep.mubr.f32.mxu1 %v9270_v57  ;;  %v13078_v31 = vand.u32 4294901760, %v9284_v46  ;;  %v1234_v2 = vmul.f32 %v1225_v39, %v9144_v49  ;;  %v9318_v10 = vsub.s32 5, %v8656_v12  ;;  %v1339_v62 = vsub.f32 %v1219_v22, %v9278_v16 }
 0x1b1   :  { %13414 = vst [vmem:[#allocation64_spill] sm:$0xff] %v9301_v28  ;;  %13415 = vst [vmem:[#allocation65_spill] sm:$0xff] %v9307_v26  ;;  %7037 = vmatprep.subr.mxu1 %v8719_v11  ;;  %v1555_v27 = vsub.f32 %v9276_v43, %v13076_v48  ;;  %v9314_v45 = vmul.f32 %v1295_v55, %v1235_v32  ;;  %v1294_v55 = vld [vmem:[%s12948_s3 + $0x60] sm:$0xff]  ;;  %v9330_v48 = vsub.s32 6, %v8656_v12  ;;  %v9337_v11 = vand.u32 4294901760, %v1340_v60 }
 0x1b2   :  { %7038 = vmatpush3.msra.mxu1 %v8728_v15  ;;  %v1549_v57 = vsub.f32 %v9284_v46, %v13078_v31  ;;  %v13417_v15 = vand.u32 4294901760, %v9287_v21  ;;  %v9343_v12 = vsub.f32 %v1336_v37, %v9307_v26  ;;  %v9347_v16 = vmul.f32 %v1294_v55, %v1234_v2  ;;  %v1298_v37 = vld [vmem:[%s12948_s3 + $0x80] sm:$0xff] }
 0x1b3   :  { %13416 = vst [vmem:[#allocation66_spill] sm:$0xff] %v9314_v45  ;;  %7039 = vmatprep.subr.mxu1 %v8738_v19  ;;  %1901 = vmatmul.mubr.f32.gmra.mxu1 %v9264_v7  ;;  %v1556_v39 = vand.u32 4294901760, %v1555_v27  ;;  %13418 = vst [vmem:[#allocation67_spill] sm:$0xff] %v9337_v11  ;;  %v1343_v27 = vsub.f32 %v1235_v32, %v9314_v45  ;;  %v13420_v22 = vand.u32 4294901760, %v9290_v38  ;;  %v13422_v45 = vand.u32 4294901760, %v9301_v28 }
 0x1b4   :  { %v1564_v31 = vsub.f32 %v9287_v21, %v13417_v15  ;;  %7040 = vmatpush3.msra.mxu1 %v8753_v24  ;;  %1906 = vmatprep.mubr.f32.mxu1 %v9272_v4  ;;  %v1550_v17 = vand.u32 4294901760, %v1549_v57  ;;  %13419 = vst [vmem:[#allocation68_spill] sm:$0xff] %v9347_v16  ;;  %v1244_v15 = vrot.slane %v9192_v59, %v9318_v10  ;;  %v9355_v57 = vand.u32 4294901760, %v1339_v62  ;;  %v1301_v24 = vld [vmem:[%s12948_s3 + $0x98] sm:$0xff] }
 0x1b5   :  { %7041 = vmatprep.subr.mxu1 %v8766_v34  ;;  %v1570_v4 = vsub.f32 %v9290_v38, %v13420_v22  ;;  %v1240_v32 = vrot.slane %v9182_v63, %v9318_v10  ;;  %v1259_v55 = vrot.slane %v9192_v59, %v9330_v48  ;;  %v1579_v22 = vsub.f32 %v9301_v28, %v13422_v45  ;;  %v1297_v34 = vld [vmem:[%s12948_s3 + $0x78] sm:$0xff] }
 0x1b6   :  { %7042 = vmatpush3.msra.mxu1 %v8779_v0  ;;  %1551 = vmatprep.mubr.f32.mxu0 %v1550_v17  ;;  %13421 = vst [vmem:[#allocation69_spill] sm:$0xff] %v9355_v57  ;;  %v1565_v17 = vand.u32 4294901760, %v1564_v31  ;;  %v9369_v7 = vsub.f32 %v1340_v60, %v9337_v11  ;;  %v1250_v0 = vmul.f32 %v1244_v15, %v9146_v35  ;;  %v9386_v15 = vand.u32 4294901760, %v1343_v27 }
 0x1b7   :  { %7043 = vmatprep.subr.mxu1 %v8812_v56  ;;  %1557 = vmatmul.mubr.f32.vlgmr.msra.gmra.mxu0 %v1556_v39  ;;  %v1249_v45 = vmul.f32 %v1240_v32, %v9144_v49  ;;  %v1265_v60 = vmul.f32 %v1259_v55, %v9146_v35  ;;  %v1255_v39 = vrot.slane %v9182_v63, %v9330_v48  ;;  %v1571_v55 = vand.u32 4294901760, %v1570_v4 }
 0x1b8   :  { %1908 = vmatmul.mubr.f32.gmra.mxu1 %v9307_v26  ;;  %6980 = vmatpush3.msra.mxu0 %v8726_v14  ;;  %13423 = vst [vmem:[#allocation70_spill] sm:$0xff] %v9386_v15  ;;  %v1342_v56 = vsub.f32 %v1234_v2, %v9347_v16  ;;  %v9389_v28 = vmul.f32 %v1298_v37, %v1250_v0 }
 0x1b9   :  { %7044 = vmatpush3.msra.mxu1 %v8821_v61  ;;  %1566 = vmatprep.mubr.f32.mxu0 %v1565_v17  ;;  %v9393_v31 = vmul.f32 %v1297_v34, %v1249_v45  ;;  %v9395_v32 = vmul.f32 %v1301_v24, %v1265_v60  ;;  %v9402_v2 = vsub.f32 %v1339_v62, %v9355_v57  ;;  %v1580_v34 = vand.u32 4294901760, %v1579_v22  ;;  %v1300_v22 = vld [vmem:[%s12948_s3 + $0x90] sm:$0xff] }
 0x1ba   :  { %13424 = vst [vmem:[#allocation71_spill] sm:$0xff] %v9389_v28  ;;  %1913 = vmatprep.mubr.f32.mxu1 %v9337_v11  ;;  %6981 = vmatprep.subr.mxu0 %v8736_v18  ;;  %v1346_v26 = vsub.f32 %v1250_v0, %v9389_v28  ;;  %v13427_v24 = vand.u32 4294901760, %v9343_v12  ;;  %v1264_v16 = vmul.f32 %v1255_v39, %v9144_v49  ;;  %v9411_v4 = vand.u32 4294901760, %v1342_v56 }
 0x1bb   :  { %13425 = vst [vmem:[#allocation72_spill] sm:$0xff] %v9393_v31  ;;  %13426 = vst [vmem:[#allocation73_spill] sm:$0xff] %v9395_v32  ;;  %7045 = vmatprep.subr.mxu1 %v8832_v13  ;;  %6982 = vmatpush3.msra.mxu0 %v8751_v23  ;;  %v1345_v0 = vsub.f32 %v1249_v45, %v9393_v31  ;;  %v9415_v62 = vsub.f32 %v1343_v27, %v9386_v15  ;;  %v13429_v27 = vand.u32 4294901760, %v9369_v7 }
 0x1bc   :  { %7046 = vmatpush3.msra.mxu1 %v8844_v36  ;;  %6983 = vmatprep.subr.mxu0 %v8764_v33  ;;  %v1585_v37 = vsub.f32 %v9343_v12, %v13427_v24  ;;  %13428 = vst [vmem:[#allocation74_spill] sm:$0xff] %v9411_v4  ;;  %v1274_v17 = vrot.slane %v9192_v59, %v8659_v25  ;;  %v9431_v24 = vand.u32 4294901760, %v1346_v26 }
 0x1bd   :  { %7047 = vmatprep.subr.mxu1 %v8853_v3  ;;  %1572 = vmatmul.mubr.f32.gmra.mxu0 %v1571_v55  ;;  %v1349_v39 = vsub.f32 %v1265_v60, %v9395_v32  ;;  %v1270_v55 = vrot.slane %v9182_v63, %v8659_v25  ;;  %v1594_v45 = vsub.f32 %v9369_v7, %v13429_v27  ;;  %v1304_v60 = vld [vmem:[%s12948_s3 + $0xb0] sm:$0xff]  ;;  %v9445_v59 = vand.u32 4294901760, %v1345_v0  ;;  %v1303_v32 = vld [vmem:[%s12948_s3 + $0xa8] sm:$0xff] }
 0x1be   :  { %1915 = vmatmul.mubr.f32.gmra.mxu1 %v9355_v57  ;;  %6984 = vmatpush3.msra.mxu0 %v8777_v40  ;;  %13430 = vst [vmem:[#allocation75_spill] sm:$0xff] %v9431_v24  ;;  %v1280_v31 = vmul.f32 %v1274_v17, %v9146_v35  ;;  %v9440_v63 = vmul.f32 %v1300_v22, %v1264_v16  ;;  %v1586_v27 = vand.u32 4294901760, %v1585_v37  ;;  %v13447_v57 = vld [vmem:[#allocation21_spill] sm:$0xff] }
 0x1bf   :  { %7048 = vmatpush3.msra.mxu1 %v8864_v58  ;;  %1581 = vmatprep.mubr.f32.mxu0 %v1580_v34  ;;  %v1279_v34 = vmul.f32 %v1270_v55, %v9144_v49  ;;  %13432 = vst [vmem:[#allocation77_spill] sm:$0xff] %v9445_v59  ;;  %v9449_v17 = vsub.f32 %v1342_v56, %v9411_v4  ;;  %v9456_v49 = vand.u32 4294901760, %v1349_v39  ;;  %v1595_v37 = vand.u32 4294901760, %v1594_v45 }
 0x1c0   :  { %1920 = vmatprep.mubr.f32.mxu1 %v9386_v15  ;;  %6985 = vmatprep.subr.mxu0 %v8791_v1  ;;  %13431 = vst [vmem:[#allocation76_spill] sm:$0xff] %v9440_v63  ;;  %v9458_v22 = vmul.f32 %v1304_v60, %v1280_v31  ;;  %v13435_v55 = vand.u32 4294901760, %v9402_v2  ;;  %v9465_v35 = vsub.f32 %v1346_v26, %v9431_v24  ;;  %v13437_v45 = vand.u32 4294901760, %v9415_v62 }
 0x1c1   :  { %7049 = vmatprep.subr.mxu1 %v8873_v5  ;;  %6986 = vmatpush3.msra.mxu0 %v8802_v51  ;;  %13433 = vst [vmem:[#allocation78_spill] sm:$0xff] %v9456_v49  ;;  %v1348_v28 = vsub.f32 %v1264_v16, %v9440_v63  ;;  %v9470_v15 = vmul.f32 %v1303_v32, %v1279_v34 }
 0x1c2   :  { %7050 = vmatpush3.msra.mxu1 %v8884_v42  ;;  %6987 = vmatprep.subr.mxu0 %v8830_v9  ;;  %13434 = vst [vmem:[#allocation79_spill] sm:$0xff] %v9458_v22  ;;  %v1600_v56 = vsub.f32 %v9402_v2, %v13435_v55  ;;  %v1609_v60 = vsub.f32 %v9415_v62, %v13437_v45  ;;  %v13440_v45 = vld [vmem:[#allocation17_spill] sm:$0xff] }
 0x1c3   :  { %7051 = vmatprep.subr.mxu1 %v8916_v20  ;;  %1587 = vmatmul.mubr.f32.gmra.mxu0 %v1586_v27  ;;  %13436 = vst [vmem:[#allocation80_spill] sm:$0xff] %v9470_v15  ;;  %v9478_v26 = vsub.f32 %v1345_v0, %v9445_v59  ;;  %v1352_v16 = vsub.f32 %v1280_v31, %v9458_v22  ;;  %v13441_v27 = vld [vmem:[#allocation11_spill] sm:$0xff]  ;;  %v9495_v63 = vand.u32 4294901760, %v1348_v28  ;;  %v13445_v0 = vld [vmem:[#allocation12_spill] sm:$0xff] }
 0x1c4   :  { %1922 = vmatmul.mubr.f32.gmra.mxu1 %v9411_v4  ;;  %6988 = vmatpush3.msra.mxu0 %v8842_v29  ;;  %v9484_v32 = vsub.f32 %v1349_v39, %v9456_v49  ;;  %v1601_v55 = vand.u32 4294901760, %v1600_v56  ;;  %v1351_v31 = vsub.f32 %v1279_v34, %v9470_v15  ;;  %v13443_v39 = vld [vmem:[#allocation19_spill] sm:$0xff]  ;;  %v13448_v34 = vand.u32 4294901760, %v9465_v35  ;;  %v13451_v4 = vld [vmem:[#allocation14_spill] sm:$0xff] }
 0x1c5   :  { %7052 = vmatpush3.msra.mxu1 %v8926_v50  ;;  %1596 = vmatprep.mubr.f32.mxu0 %v1595_v37  ;;  %13438 = vst [vmem:[#allocation81_spill] sm:$0xff] %v9478_v26  ;;  %v9488_v37 = vmul.f32 %v9173_v53, %v8679_v41  ;;  %13442 = vst [vmem:[#allocation17_spill] sm:$0xff] %v9495_v63  ;;  %v1610_v41 = vand.u32 4294901760, %v1609_v60  ;;  %v13444_v53 = vand.u32 4294901760, %v9449_v17 }
 0x1c6   :  { %1927 = vmatprep.mubr.f32.mxu1 %v9431_v24  ;;  %6989 = vmatprep.subr.mxu0 %v8851_v44  ;;  %13439 = vst [vmem:[#allocation82_spill] sm:$0xff] %v9484_v32  ;;  %v9505_v24 = vand.u32 4294901760, %v1352_v16  ;;  %v1624_v60 = vsub.f32 %v9465_v35, %v13448_v34  ;;  %v9516_v56 = vand.u32 4294901760, %v1351_v31  ;;  %v9519_v15 = vsub.f32 %v1348_v28, %v9495_v63  ;;  %v13455_v28 = vld [vmem:[#allocation25_spill] sm:$0xff] }
 0x1c7   :  { %7053 = vmatprep.subr.mxu1 %v8938_v52  ;;  %6990 = vmatpush3.msra.mxu0 %v8862_v54  ;;  %v1615_v22 = vsub.f32 %v9449_v17, %v13444_v53  ;;  %v13449_v53 = vld [vmem:[#allocation13_spill] sm:$0xff] }
 0x1c8   :  { %7054 = vmatpush3.msra.mxu1 %v13440_v45  ;;  %6991 = vmatprep.subr.mxu0 %v13441_v27  ;;  %13446 = vst [vmem:[#allocation83_spill] sm:$0xff] %v9505_v24  ;;  %13450 = vst [vmem:[#allocation84_spill] sm:$0xff] %v9516_v56  ;;  %v13466_v27 = vld [vmem:[#allocation18_spill] sm:$0xff] }
 0x1c9   :  { %7055 = vmatprep.subr.mxu1 %v13443_v39  ;;  %1602 = vmatmul.mubr.f32.gmra.mxu0 %v1601_v55  ;;  %v1173_v55 = vrot.slane %v9488_v37, %v9165_v6  ;;  %v1616_v34 = vand.u32 4294901760, %v1615_v22  ;;  %v13452_v6 = vand.u32 4294901760, %v9478_v26  ;;  %v13457_v39 = vand.u32 4294901760, %v9484_v32  ;;  %v1287_v22 = vld [vmem:[%s12948_s3 + $0x28] sm:$0xff] }
 0x1ca   :  { %1929 = vmatmul.mubr.f32.gmra.mxu1 %v9445_v59  ;;  %6992 = vmatpush3.msra.mxu0 %v13445_v0  ;;  %v13453_v59 = vld [vmem:[#allocation47_spill] sm:$0xff] }
 0x1cb   :  { %7056 = vmatpush3.msra.mxu1 %v13447_v57  ;;  %1611 = vmatprep.mubr.f32.mxu0 %v1610_v41  ;;  %v1284_v41 = vld [vmem:[%s12948_s3 + $0x10] sm:$0xff]  ;;  %v1176_v11 = vmul.f32 %v1173_v55, %v13453_v59  ;;  %v13456_v0 = vld [vmem:[#allocation15_spill] sm:$0xff] }
 0x1cc   :  { %1934 = vmatprep.mubr.f32.mxu1 %v9456_v49  ;;  %6993 = vmatprep.subr.mxu0 %v13449_v53  ;;  %v1630_v49 = vsub.f32 %v9478_v26, %v13452_v6  ;;  %v13454_v53 = vld [vmem:[#allocation48_spill] sm:$0xff]  ;;  %v13458_v6 = vld [vmem:[#allocation49_spill] sm:$0xff] }
 0x1cd   :  { %7057 = vmatprep.subr.mxu1 %v8980_v30  ;;  %6994 = vmatpush3.msra.mxu0 %v13451_v4  ;;  %v1188_v57 = vrot.slane %v9488_v37, %v13454_v53  ;;  %v1639_v30 = vsub.f32 %v9484_v32, %v13457_v39  ;;  %v9538_v4 = vsub.f32 %v1352_v16, %v9505_v24  ;;  %v13459_v26 = vld [vmem:[#allocation28_spill] sm:$0xff]  ;;  %v1625_v53 = vand.u32 4294901760, %v1624_v60  ;;  %v1290_v16 = vld [vmem:[%s12948_s3 + $0x40] sm:$0xff] }
 0x1ce   :  { %7058 = vmatpush3.msra.mxu1 %v13455_v28  ;;  %6995 = vmatprep.subr.mxu0 %v13456_v0  ;;  %v1203_v55 = vrot.slane %v9488_v37, %v13458_v6  ;;  %v9546_v28 = vmul.f32 %v1284_v41, %v1176_v11  ;;  %v1218_v39 = vrot.slane %v9488_v37, %v9176_v47  ;;  %v13461_v32 = vld [vmem:[#allocation16_spill] sm:$0xff] }
 0x1cf   :  { %7059 = vmatprep.subr.mxu1 %v13459_v26  ;;  %1617 = vmatmul.mubr.f32.gmra.mxu0 %v1616_v34  ;;  %v1191_v0 = vmul.f32 %v1188_v57, %v13453_v59  ;;  %v9557_v6 = vsub.f32 %v1351_v31, %v9516_v56  ;;  %v1293_v57 = vld [vmem:[%s12948_s3 + $0x58] sm:$0xff]  ;;  %v13462_v41 = vld [vmem:[#allocation56_spill] sm:$0xff] }
 0x1d0   :  { %13460 = vst [vmem:[#allocation47_spill] sm:$0xff] %v9546_v28  ;;  %1936 = vmatmul.mubr.f32.gmra.mxu1 %v9495_v63  ;;  %6996 = vmatpush3.msra.mxu0 %v13461_v32  ;;  %v1206_v60 = vmul.f32 %v1203_v55, %v13453_v59  ;;  %v1233_v34 = vrot.slane %v9488_v37, %v13462_v41  ;;  %v13463_v26 = vld [vmem:[#allocation29_spill] sm:$0xff]  ;;  %v1296_v55 = vld [vmem:[%s12948_s3 + $0x70] sm:$0xff]  ;;  %v1631_v41 = vand.u32 4294901760, %v1630_v49  ;;  %v1299_v49 = vld [vmem:[%s12948_s3 + $0x88] sm:$0xff] }
 0x1d1   :  { %7060 = vmatpush3.msra.mxu1 %v13463_v26  ;;  %1626 = vmatprep.mubr.f32.mxu0 %v1625_v53  ;;  %v9568_v63 = vsub.f32 %v1176_v11, %v9546_v28  ;;  %v9570_v32 = vmul.f32 %v1287_v22, %v1191_v0  ;;  %v1221_v31 = vmul.f32 %v1218_v39, %v13453_v59  ;;  %v13468_v22 = vld [vmem:[#allocation31_spill] sm:$0xff]  ;;  %v13469_v47 = vld [vmem:[#allocation20_spill] sm:$0xff] }
 0x1d2   :  { %1941 = vmatprep.mubr.f32.mxu1 %v9505_v24  ;;  %6997 = vmatprep.subr.mxu0 %v13466_v27  ;;  %v9578_v26 = vmul.f32 %v1290_v16, %v1206_v60  ;;  %v1236_v53 = vmul.f32 %v1233_v34, %v13453_v59  ;;  %v1248_v11 = vrot.slane %v9488_v37, %v9318_v10  ;;  %v13472_v34 = vld [vmem:[#allocation33_spill] sm:$0xff]  ;;  %v13473_v10 = vld [vmem:[#allocation22_spill] sm:$0xff] }
 0x1d3   :  { %13464 = vst [vmem:[#allocation48_spill] sm:$0xff] %v9568_v63  ;;  %13465 = vst [vmem:[#allocation49_spill] sm:$0xff] %v9570_v32  ;;  %7061 = vmatprep.subr.mxu1 %v13468_v22  ;;  %6998 = vmatpush3.msra.mxu0 %v13469_v47  ;;  %v9587_v28 = vsub.f32 %v1191_v0, %v9570_v32  ;;  %v9589_v63 = vmul.f32 %v1293_v57, %v1221_v31  ;;  %v1302_v57 = vld [vmem:[%s12948_s3 + $0xa0] sm:$0xff]  ;;  %v13476_v32 = vld [vmem:[#allocation35_spill] sm:$0xff] }
 0x1d4   :  { %13467 = vst [vmem:[#allocation56_spill] sm:$0xff] %v9578_v26  ;;  %v1263_v16 = vrot.slane %v9488_v37, %v9330_v48  ;;  %7062 = vmatpush3.msra.mxu1 %v13472_v34  ;;  %6999 = vmatprep.subr.mxu0 %v13473_v10  ;;  %v9599_v24 = vsub.f32 %v1206_v60, %v9578_v26  ;;  %v13477_v48 = vand.u32 4294901760, %v9519_v15 }
 0x1d5   :  { %13470 = vst [vmem:[#allocation18_spill] sm:$0xff] %v9587_v28  ;;  %13471 = vst [vmem:[#allocation31_spill] sm:$0xff] %v9589_v63  ;;  %v9601_v39 = vmul.f32 %v1296_v55, %v1236_v53  ;;  %v1251_v0 = vmul.f32 %v1248_v11, %v13453_v59  ;;  %7063 = vmatprep.subr.mxu1 %v13476_v32  ;;  %1632 = vmatmul.mubr.f32.gmra.mxu0 %v1631_v41  ;;  %v1640_v28 = vand.u32 4294901760, %v1639_v30  ;;  %v13479_v55 = vld [vmem:[#allocation24_spill] sm:$0xff]  ;;  %v13482_v41 = vld [vmem:[#allocation37_spill] sm:$0xff] }
 0x1d6   :  { %13474 = vst [vmem:[#allocation20_spill] sm:$0xff] %v9599_v24  ;;  %v1645_v34 = vsub.f32 %v9519_v15, %v13477_v48  ;;  %v9612_v10 = vsub.f32 %v1221_v31, %v9589_v63  ;;  %v1266_v60 = vmul.f32 %v1263_v16, %v13453_v59  ;;  %1943 = vmatmul.mubr.f32.gmra.mxu1 %v9516_v56  ;;  %v13483_v31 = vand.u32 4294901760, %v9538_v4  ;;  %v13492_v56 = vld [vmem:[#allocation3_spill] sm:$0xff] }
 0x1d7   :  { %13475 = vst [vmem:[#allocation85_spill] sm:$0xff] %v9601_v39  ;;  %7000 = vmatpush3.msra.mxu0 %v13479_v55  ;;  %v9618_v11 = vsub.f32 %v1236_v53, %v9601_v39  ;;  %v9620_v26 = vmul.f32 %v1299_v49, %v1251_v0  ;;  %v1278_v30 = vrot.slane %v9488_v37, %v8659_v25  ;;  %v1305_v53 = vld [vmem:[%s12948_s3 + $0xb8] sm:$0xff]  ;;  %v13485_v49 = vld [vmem:[#allocation26_spill] sm:$0xff]  ;;  %v13486_v39 = vld [vmem:[#allocation39_spill] sm:$0xff]  ;;  %s8475_s3 = smov 30  }
 0x1d8   :  { %13478 = vst [vmem:[#allocation35_spill] sm:$0xff] %v9612_v10  ;;  %7064 = vmatpush3.msra.mxu1 %v13482_v41  ;;  %1641 = vmatprep.mubr.f32.mxu0 %v1640_v28  ;;  %v1654_v48 = vsub.f32 %v9538_v4, %v13483_v31  ;;  %v9629_v63 = vmul.f32 %v1302_v57, %v1266_v60  ;;  %v13487_v28 = vand.u32 4294901760, %v9284_v46  ;;  %v13488_v31 = vld [vmem:[#allocation27_spill] sm:$0xff]  ;;  %v1646_v57 = vand.u32 4294901760, %v1645_v34  ;;  %v13490_v10 = vld [vmem:[#allocation30_spill] sm:$0xff] }
 0x1d9   :  { %13480 = vst [vmem:[#allocation24_spill] sm:$0xff] %v9618_v11  ;;  %13481 = vst [vmem:[#allocation86_spill] sm:$0xff] %v9620_v26  ;;  %7001 = vmatprep.subr.mxu0 %v13485_v49  ;;  %7065 = vmatprep.subr.mxu1 %v13486_v39  ;;  %v9637_v25 = vsub.f32 %v1251_v0, %v9620_v26  ;;  %v1281_v37 = vmul.f32 %v1278_v30, %v13453_v59  ;;  %v13489_v11 = vld [vmem:[#allocation41_spill] sm:$0xff]  ;;  %v13493_v59 = vand.u32 4294901760, %v9557_v6  ;;  %v13502_v26 = vld [vmem:[#allocation38_spill] sm:$0xff] }
 0x1da   :  { %13484 = vst [vmem:[#allocation37_spill] sm:$0xff] %v9629_v63  ;;  %2248 = vmatprep.mubr.f32.mxu1 %v13487_v28  ;;  %7002 = vmatpush3.msra.mxu0 %v13488_v31  ;;  %v9644_v16 = vsub.f32 %v1266_v60, %v9629_v63  ;;  %v1655_v0 = vand.u32 4294901760, %v1654_v48  ;;  %v13494_v28 = vld [vmem:[#allocation32_spill] sm:$0xff]  ;;  %v13495_v34 = vand.u32 4294901760, %v9276_v43  ;;  %v13499_v48 = vld [vmem:[#allocation5_spill] sm:$0xff]  ;;  %v13501_v63 = vld [vmem:[#allocation6_spill] sm:$0xff] }
 0x1db   :  { %7066 = vmatpush3.msra.mxu1 %v13489_v11  ;;  %7003 = vmatprep.subr.mxu0 %v13490_v10  ;;  %v9648_v24 = vmul.f32 %v1305_v53, %v1281_v37  ;;  %v1660_v30 = vsub.f32 %v9557_v6, %v13493_v59  ;;  %v13497_v53 = vld [vmem:[#allocation34_spill] sm:$0xff] }
 0x1dc   :  { %7147 = vmatprep.subr.mxu1 %v13492_v56  ;;  %1647 = vmatmul.mubr.f32.gmra.mxu0 %v1646_v57  ;;  %v13498_v56 = vand.u32 4294901760, %v9287_v21  ;;  %v13500_v57 = vld [vmem:[#allocation36_spill] sm:$0xff] }
 0x1dd   :  { %13491 = vst [vmem:[#allocation26_spill] sm:$0xff] %v9648_v24  ;;  %7004 = vmatpush3.msra.mxu0 %v13494_v28  ;;  %2252 = vmatmul.mubr.f32.vlgmr.msra.gmra.mxu1 %v13495_v34  ;;  %v9658_v60 = vsub.f32 %v1281_v37, %v9648_v24  ;;  %v1661_v59 = vand.u32 4294901760, %v1660_v30  ;;  %v13503_v37 = vld [vmem:[#allocation40_spill] sm:$0xff]  ;;  %v13506_v34 = vld [vmem:[#allocation42_spill] sm:$0xff] }
 0x1de   :  { %7148 = vmatpush3.msra.mxu1 %v8711_v8  ;;  %1656 = vmatprep.mubr.f32.mxu0 %v1655_v0  ;;  %v13504_v8 = vand.u32 4294901760, %v9290_v38  ;;  %v13505_v0 = vld [vmem:[#allocation7_spill] sm:$0xff] }
 0x1df   :  { %13496 = vst [vmem:[#allocation39_spill] sm:$0xff] %v9658_v60  ;;  %7005 = vmatprep.subr.mxu0 %v13497_v53  ;;  %2259 = vmatprep.mubr.f32.mxu1 %v13498_v56  ;;  %v13507_v56 = vld [vmem:[#allocation64_spill] sm:$0xff]  ;;  %v13514_v60 = vld [vmem:[#allocation10_spill] sm:$0xff] }
 0x1e0   :  { %7149 = vmatprep.subr.mxu1 %v13499_v48  ;;  %7006 = vmatpush3.msra.mxu0 %v13500_v57  ;;  %v13508_v30 = vand.u32 4294901760, %v13507_v56  ;;  %v13510_v48 = vld [vmem:[#allocation43_spill] sm:$0xff] }
 0x1e1   :  { %7150 = vmatpush3.msra.mxu1 %v13501_v63  ;;  %7007 = vmatprep.subr.mxu0 %v13502_v26  ;;  %v13509_v63 = vld [vmem:[#allocation8_spill] sm:$0xff] }
 0x1e2   :  { %7151 = vmatprep.subr.mxu1 %v8738_v19  ;;  %1662 = vmatmul.mubr.f32.gmra.mxu0 %v1661_v59  ;;  %v13511_v19 = vld [vmem:[#allocation9_spill] sm:$0xff]  ;;  %v13512_v59 = vld [vmem:[#allocation4_spill] sm:$0xff] }
 0x1e3   :  { %7008 = vmatpush3.msra.mxu0 %v13503_v37  ;;  %2263 = vmatmul.mubr.f32.gmra.mxu1 %v13504_v8  ;;  %v13513_v24 = vand.u32 4294901760, %v13512_v59  ;;  %v13515_v8 = vand.u32 4294901760, %v9343_v12 }
 0x1e4   :  { %7152 = vmatpush3.msra.mxu1 %v13505_v0  ;;  %7009 = vmatprep.subr.mxu0 %v13506_v34  ;;  %v13517_v0 = vand.u32 4294901760, %v9369_v7 }
 0x1e5   :  { %2078 = vmatprep.mubr.f32.mxu0 %v9284_v46  ;;  %2270 = vmatprep.mubr.f32.mxu1 %v13508_v30  ;;  %v13516_v46 = vand.u32 4294901760, %v8726_v14  ;;  %v13518_v30 = vand.u32 4294901760, %v8736_v18  ;;  %v13520_v14 = vand.u32 4294901760, %v8764_v33  ;;  %v13522_v18 = vand.u32 4294901760, %v8777_v40 }
 0x1e6   :  { %7153 = vmatprep.subr.mxu1 %v13509_v63  ;;  %7010 = vmatpush3.msra.mxu0 %v13510_v48  ;;  %v13524_v33 = vand.u32 4294901760, %v8791_v1  ;;  %v13526_v40 = vand.u32 4294901760, %v8830_v9  ;;  %v13528_v1 = vand.u32 4294901760, %v8842_v29  ;;  %v13529_v9 = vand.u32 4294901760, %v9465_v35  ;;  %v13544_v63 = vld [vmem:[#allocation23_spill] sm:$0xff] }
 0x1e7   :  { %7154 = vmatpush3.msra.mxu1 %v13511_v19  ;;  %7091 = vmatprep.subr.mxu0 %v13513_v24  ;;  %v13545_v19 = vld [vmem:[#allocation14_spill] sm:$0xff] }
 0x1e8   :  { %7155 = vmatprep.subr.mxu1 %v13514_v60  ;;  %2081 = vmatmul.mubr.f32.vlgmr.msra.gmra.mxu0 %v9276_v43  ;;  %v13519_v43 = vand.u32 4294901760, %v8751_v23  ;;  %v13523_v23 = vand.u32 4294901760, %v9415_v62  ;;  %v13542_v60 = vld [vmem:[#allocation13_spill] sm:$0xff]  ;;  %v13546_v59 = vand.u32 4294901760, %v13545_v19  ;;  %v13567_v19 = vand.u32 4294901760, %v13494_v28 }
 0x1e9   :  { %2274 = vmatmul.mubr.f32.gmra.mxu1 %v13515_v8  ;;  %7092 = vmatpush3.msra.mxu0 %v13516_v46  ;;  %v13547_v46 = vld [vmem:[#allocation25_spill] sm:$0xff]  ;;  %v13569_v28 = vand.u32 4294901760, %v13497_v53  ;;  %v1440_v53 = vld [vmem:[%s12944_s5 + $0x130] sm:$0xff] }
 0x1ea   :  { %7156 = vmatpush3.msra.mxu1 %v8821_v61  ;;  %2087 = vmatprep.mubr.f32.mxu0 %v9287_v21  ;;  %v13521_v61 = vand.u32 4294901760, %v9402_v2  ;;  %v1447_v21 = vld [vmem:[%s12944_s5 + $0x168] sm:$0xff] }
 0x1eb   :  { %2281 = vmatprep.mubr.f32.mxu1 %v13517_v0  ;;  %7093 = vmatprep.subr.mxu0 %v13518_v30  ;;  %v9767_v8 = vand.u32 4294901760, %v1447_v21  ;;  %v1446_v30 = vld [vmem:[%s12944_s5 + $0x160] sm:$0xff] }
 0x1ec   :  { %7157 = vmatprep.subr.mxu1 %v8832_v13  ;;  %7094 = vmatpush3.msra.mxu0 %v13519_v43  ;;  %v13525_v13 = vand.u32 4294901760, %v8802_v51  ;;  %v1449_v51 = vld [vmem:[%s12944_s5 + $0x178] sm:$0xff]  ;;  %v13550_v43 = vld [vmem:[#allocation28_spill] sm:$0xff] }
 0x1ed   :  { %7158 = vmatpush3.msra.mxu1 %v8844_v36  ;;  %7095 = vmatprep.subr.mxu0 %v13520_v14  ;;  %v13527_v36 = vand.u32 4294901760, %v9449_v17  ;;  %v9736_v29 = vand.u32 4294901760, %v1449_v51 }
 0x1ee   :  { %7159 = vmatprep.subr.mxu1 %v8853_v3  ;;  %2090 = vmatmul.mubr.f32.gmra.mxu0 %v9290_v38  ;;  %v13530_v3 = vand.u32 4294901760, %v8851_v44  ;;  %v13535_v44 = vld [vmem:[#allocation81_spill] sm:$0xff] }
 0x1ef   :  { %2285 = vmatmul.mubr.f32.gmra.mxu1 %v13521_v61  ;;  %7096 = vmatpush3.msra.mxu0 %v13522_v18  ;;  %v13539_v38 = vld [vmem:[#allocation21_spill] sm:$0xff]  ;;  %v13551_v18 = vand.u32 4294901760, %v9519_v15 }
 0x1f0   :  { %7160 = vmatpush3.msra.mxu1 %v8864_v58  ;;  %2096 = vmatprep.mubr.f32.mxu0 %v13507_v56  ;;  %v13532_v58 = vld [vmem:[#allocation11_spill] sm:$0xff]  ;;  %v13543_v56 = vand.u32 4294901760, %v13542_v60 }
 0x1f1   :  { %2292 = vmatprep.mubr.f32.mxu1 %v13523_v23  ;;  %7097 = vmatprep.subr.mxu0 %v13524_v33  ;;  %v13552_v23 = vld [vmem:[#allocation16_spill] sm:$0xff] }
 0x1f2   :  { %7161 = vmatprep.subr.mxu1 %v8873_v5  ;;  %7098 = vmatpush3.msra.mxu0 %v13525_v13  ;;  %v13533_v5 = vand.u32 4294901760, %v13532_v58  ;;  %v13553_v33 = vand.u32 4294901760, %v13552_v23  ;;  %v1445_v13 = vld [vmem:[%s12944_s5 + $0x158] sm:$0xff]  ;;  %v13572_v23 = vand.u32 4294901760, %v13502_v26  ;;  %v1439_v26 = vld [vmem:[%s12944_s5 + $0x128] sm:$0xff] }
 0x1f3   :  { %7162 = vmatpush3.msra.mxu1 %v8884_v42  ;;  %7099 = vmatprep.subr.mxu0 %v13526_v40  ;;  %v13536_v42 = vand.u32 4294901760, %v13535_v44  ;;  %v13554_v40 = vld [vmem:[#allocation29_spill] sm:$0xff] }
 0x1f4   :  { %7163 = vmatprep.subr.mxu1 %v8916_v20  ;;  %2099 = vmatmul.mubr.f32.gmra.mxu0 %v9343_v12  ;;  %v13531_v12 = vand.u32 4294901760, %v8862_v54  ;;  %v13534_v20 = vld [vmem:[#allocation19_spill] sm:$0xff]  ;;  %v13537_v54 = vld [vmem:[#allocation12_spill] sm:$0xff]  ;;  %v13558_v58 = vld [vmem:[#allocation33_spill] sm:$0xff] }
 0x1f5   :  { %2296 = vmatmul.mubr.f32.gmra.mxu1 %v13527_v36  ;;  %7100 = vmatpush3.msra.mxu0 %v13528_v1  ;;  %v9795_v36 = vand.u32 4294901760, %v1446_v30  ;;  %v13555_v1 = vand.u32 4294901760, %v9538_v4 }
 0x1f6   :  { %7164 = vmatpush3.msra.mxu1 %v8926_v50  ;;  %2105 = vmatprep.mubr.f32.mxu0 %v9369_v7  ;;  %v1448_v50 = vld [vmem:[%s12944_s5 + $0x170] sm:$0xff]  ;;  %v9756_v7 = vsub.f32 %v1449_v51, %v9736_v29  ;;  %v13556_v51 = vand.u32 4294901760, %v13466_v27 }
 0x1f7   :  { %2303 = vmatprep.mubr.f32.mxu1 %v13529_v9  ;;  %7101 = vmatprep.subr.mxu0 %v13530_v3  ;;  %v9758_v24 = vand.u32 4294901760, %v1448_v50  ;;  %v13557_v9 = vand.u32 4294901760, %v13469_v47  ;;  %v1444_v27 = vld [vmem:[%s12944_s5 + $0x150] sm:$0xff] }
 0x1f8   :  { %7165 = vmatprep.subr.mxu1 %v8938_v52  ;;  %7102 = vmatpush3.msra.mxu0 %v13531_v12  ;;  %v13538_v52 = vand.u32 4294901760, %v13537_v54  ;;  %v9778_v14 = vand.u32 4294901760, %v9756_v7  ;;  %v9809_v12 = vand.u32 4294901760, %v1445_v13  ;;  %v1443_v54 = vld [vmem:[%s12944_s5 + $0x148] sm:$0xff] }
 0x1f9   :  { %7166 = vmatpush3.msra.mxu1 %v13440_v45  ;;  %7103 = vmatprep.subr.mxu0 %v13533_v5  ;;  %v9781_v61 = vsub.f32 %v1448_v50, %v9758_v24  ;;  %v13559_v5 = vld [vmem:[#allocation22_spill] sm:$0xff]  ;;  %v9852_v60 = vand.u32 4294901760, %v1443_v54 }
 0x1fa   :  { %7167 = vmatprep.subr.mxu1 %v13534_v20  ;;  %2108 = vmatmul.mubr.f32.gmra.mxu0 %v9402_v2  ;;  %v13540_v2 = vld [vmem:[#allocation82_spill] sm:$0xff]  ;;  %v2869_v3 = vsub.f32 %v9756_v7, %v9778_v14  ;;  %v13560_v50 = vand.u32 4294901760, %v13559_v5  ;;  %v13561_v20 = vand.u32 4294901760, %v9557_v6  ;;  %v13577_v5 = vand.u32 4294901760, %v13510_v48 }
 0x1fb   :  { %2307 = vmatmul.mubr.f32.gmra.mxu1 %v13536_v42  ;;  %7104 = vmatpush3.msra.mxu0 %v13538_v52  ;;  %v13541_v45 = vand.u32 4294901760, %v13540_v2  ;;  %v13562_v42 = vand.u32 4294901760, %v13479_v55  ;;  %v9837_v52 = vsub.f32 %v1445_v13, %v9809_v12  ;;  %v13563_v55 = vand.u32 4294901760, %v13485_v49 }
 0x1fc   :  { %7168 = vmatpush3.msra.mxu1 %v13539_v38  ;;  %2114 = vmatprep.mubr.f32.mxu0 %v9415_v62  ;;  %v13548_v62 = vld [vmem:[#allocation15_spill] sm:$0xff]  ;;  %v13564_v38 = vld [vmem:[#allocation60_spill] sm:$0xff]  ;;  %v13566_v49 = vand.u32 4294901760, %v13490_v10  ;;  %v1441_v10 = vld [vmem:[%s12944_s5 + $0x138] sm:$0xff] }
 0x1fd   :  { %2314 = vmatprep.mubr.f32.mxu1 %v13541_v45  ;;  %7105 = vmatprep.subr.mxu0 %v13543_v56  ;;  %v13549_v0 = vand.u32 4294901760, %v13548_v62  ;;  %v9862_v56 = vand.u32 4294901760, %v9837_v52 }
 0x1fe   :  { %7169 = vmatprep.subr.mxu1 %v13544_v63  ;;  %7106 = vmatpush3.msra.mxu0 %v13546_v59 }
 0x1ff   :  { %7170 = vmatpush3.msra.mxu1 %v13547_v46  ;;  %7107 = vmatprep.subr.mxu0 %v13549_v0  ;;  %v9877_v46 = vsub.f32 %v1443_v54, %v9852_v60  ;;  %v13570_v0 = vld [vmem:[#allocation61_spill] sm:$0xff] }
 0x200   :  { %7171 = vmatprep.subr.mxu1 %v13550_v43  ;;  %2117 = vmatmul.mubr.f32.gmra.mxu0 %v9449_v17  ;;  %v9793_v17 = vsub.f32 %v1447_v21, %v9767_v8  ;;  %v9839_v21 = vand.u32 4294901760, %v1444_v27 }
 0x201   :  { %2318 = vmatmul.mubr.f32.gmra.mxu1 %v13551_v18  ;;  %7108 = vmatpush3.msra.mxu0 %v13553_v33  ;;  %v9891_v18 = vand.u32 4294901760, %v1441_v10  ;;  %v9900_v33 = vand.u32 4294901760, %v9877_v46 }
 0x202   :  { %7172 = vmatpush3.msra.mxu1 %v13554_v40  ;;  %2123 = vmatprep.mubr.f32.mxu0 %v9465_v35  ;;  %v9807_v35 = vand.u32 4294901760, %v9781_v61  ;;  %v9820_v47 = vand.u32 4294901760, %v9793_v17  ;;  %v9865_v63 = vsub.f32 %v1444_v27, %v9839_v21  ;;  %v13573_v40 = vand.u32 4294901760, %v13503_v37  ;;  %v13576_v37 = vld [vmem:[#allocation62_spill] sm:$0xff] }
 0x203   :  { %2325 = vmatprep.mubr.f32.mxu1 %v13555_v1  ;;  %7109 = vmatprep.subr.mxu0 %v13556_v51  ;;  %v13574_v1 = vld [vmem:[#allocation58_spill] sm:$0xff]  ;;  %v13575_v51 = vand.u32 4294901760, %v13506_v34  ;;  %v2911_v34 = vsub.f32 %v9877_v46, %v9900_v33  ;;  %v9929_v27 = vand.u32 4294901760, %v1439_v26 }
 0x204   :  { %7173 = vmatprep.subr.mxu1 %v13468_v22  ;;  %7110 = vmatpush3.msra.mxu0 %v13557_v9  ;;  %v9823_v22 = vsub.f32 %v1446_v30, %v9795_v36  ;;  %v13571_v30 = vand.u32 4294901760, %v13500_v57  ;;  %v9889_v43 = vand.u32 4294901760, %v9865_v63 }
 0x205   :  { %7174 = vmatpush3.msra.mxu1 %v13558_v58  ;;  %7111 = vmatprep.subr.mxu0 %v13560_v50  ;;  %v9918_v58 = vand.u32 4294901760, %v1440_v53 }
 0x206   :  { %7175 = vmatprep.subr.mxu1 %v13476_v32  ;;  %2126 = vmatmul.mubr.f32.gmra.mxu0 %v13535_v44  ;;  %v2870_v32 = vand.u32 4294901760, %v2869_v3  ;;  %v2876_v44 = vsub.f32 %v9781_v61, %v9807_v35  ;;  %v9850_v45 = vand.u32 4294901760, %v9823_v22  ;;  %v2904_v9 = vsub.f32 %v9865_v63, %v9889_v43 }
 0x207   :  { %2329 = vmatmul.mubr.f32.gmra.mxu1 %v13561_v20  ;;  %7112 = vmatpush3.msra.mxu0 %v13562_v42  ;;  %v9916_v3 = vsub.f32 %v1441_v10, %v9891_v18  ;;  %v1438_v20 = vld [vmem:[%s12944_s5 + $0x120] sm:$0xff]  ;;  %v9940_v54 = vsub.f32 %v1440_v53, %v9918_v58 }
 0x208   :  { %7176 = vmatpush3.msra.mxu1 %v13482_v41  ;;  %2132 = vmatprep.mubr.f32.mxu0 %v13540_v2  ;;  %v13565_v41 = vand.u32 4294901760, %v13488_v31  ;;  %v2883_v2 = vsub.f32 %v9793_v17, %v9820_v47  ;;  %v2877_v31 = vand.u32 4294901760, %v2876_v44  ;;  %v2890_v59 = vsub.f32 %v9823_v22, %v9850_v45  ;;  %v1437_v44 = vld [vmem:[%s12944_s5 + $0x118] sm:$0xff] }
 0x209   :  { %7113 = vmatprep.subr.mxu0 %v13563_v55  ;;  %7177 = vmatprep.subr.mxu1 %v13486_v39  ;;  %v1442_v39 = vld [vmem:[%s12944_s5 + $0x140] sm:$0xff]  ;;  %v2905_v48 = vand.u32 4294901760, %v2904_v9  ;;  %v9937_v42 = vand.u32 4294901760, %v9916_v3  ;;  %v2912_v55 = vand.u32 4294901760, %v2911_v34 }
 0x20a   :  { %2648 = vmatprep.mubr.f32.mxu1 %v13564_v38  ;;  %7114 = vmatpush3.msra.mxu0 %v13565_v41  ;;  %v9879_v62 = vand.u32 4294901760, %v1442_v39  ;;  %v2891_v57 = vand.u32 4294901760, %v2890_v59  ;;  %v9951_v41 = vsub.f32 %v1439_v26, %v9929_v27 }
 0x20b   :  { %7178 = vmatpush3.msra.mxu1 %v13489_v11  ;;  %7115 = vmatprep.subr.mxu0 %v13566_v49  ;;  %v13568_v11 = vld [vmem:[#allocation57_spill] sm:$0xff]  ;;  %v13579_v49 = vld [vmem:[#allocation67_spill] sm:$0xff] }
 0x20c   :  { %7901 = vmatprep.subr.mxu1 %v2870_v32  ;;  %2135 = vmatmul.mubr.f32.gmra.mxu0 %v9519_v15  ;;  %v2884_v15 = vand.u32 4294901760, %v2883_v2  ;;  %v9903_v13 = vsub.f32 %v1442_v39, %v9879_v62  ;;  %v9953_v2 = vand.u32 4294901760, %v1438_v20  ;;  %v2925_v39 = vsub.f32 %v9916_v3, %v9937_v42 }
 0x20d   :  { %7116 = vmatpush3.msra.mxu0 %v13567_v19  ;;  %2650 = vmatmul.mubr.f32.vlgmr.msra.gmra.mxu1 %v13568_v11  ;;  %v9963_v19 = vand.u32 4294901760, %v1437_v44 }
 0x20e   :  { %7902 = vmatpush3.msra.mxu1 %v2870_v32  ;;  %2141 = vmatprep.mubr.f32.mxu0 %v9538_v4  ;;  %v2897_v4 = vsub.f32 %v9837_v52, %v9862_v56  ;;  %v9927_v50 = vand.u32 4294901760, %v9903_v13  ;;  %v13578_v32 = vld [vmem:[#allocation65_spill] sm:$0xff]  ;;  %v9974_v59 = vsub.f32 %v1438_v20, %v9953_v2 }
 0x20f   :  { %7117 = vmatprep.subr.mxu0 %v13569_v28  ;;  %2655 = vmatprep.mubr.f32.mxu1 %v13570_v0  ;;  %v13580_v28 = vld [vmem:[#allocation69_spill] sm:$0xff] }
 0x210   :  { %7903 = vmatprep.subr.mxu1 %v2877_v31  ;;  %7118 = vmatpush3.msra.mxu0 %v13571_v30  ;;  %v2926_v30 = vand.u32 4294901760, %v2925_v39 }
 0x211   :  { %7904 = vmatpush3.msra.mxu1 %v2877_v31  ;;  %7119 = vmatprep.subr.mxu0 %v13572_v23  ;;  %v9961_v31 = vand.u32 4294901760, %v9940_v54  ;;  %v9985_v23 = vsub.f32 %v1437_v44, %v9963_v19  ;;  %v13583_v44 = vld [vmem:[#allocation75_spill] sm:$0xff] }
 0x212   :  { %7905 = vmatprep.subr.mxu1 %v2884_v15  ;;  %2144 = vmatmul.mubr.f32.gmra.mxu0 %v9557_v6  ;;  %v2898_v6 = vand.u32 4294901760, %v2897_v4 }
 0x213   :  { %7120 = vmatpush3.msra.mxu0 %v13573_v40  ;;  %2657 = vmatmul.mubr.f32.gmra.mxu1 %v13574_v1  ;;  %v2932_v4 = vsub.f32 %v9940_v54, %v9961_v31  ;;  %v10005_v9 = vand.u32 4294901760, %v9985_v23 }
 0x214   :  { %7906 = vmatpush3.msra.mxu1 %v2884_v15  ;;  %7121 = vmatprep.subr.mxu0 %v13575_v51  ;;  %v9971_v15 = vand.u32 4294901760, %v9951_v41  ;;  %v1434_v51 = vld [vmem:[%s12944_s5 + $0x100] sm:$0xff] }
 0x215   :  { %2495 = vmatprep.mubr.f32.mxu0 %v13564_v38  ;;  %2662 = vmatprep.mubr.f32.mxu1 %v13576_v37  ;;  %v2918_v38 = vsub.f32 %v9903_v13, %v9927_v50  ;;  %v10012_v34 = vand.u32 4294901760, %v1434_v51 }
 0x216   :  { %7907 = vmatprep.subr.mxu1 %v2891_v57  ;;  %7122 = vmatpush3.msra.mxu0 %v13577_v5  ;;  %v2939_v40 = vsub.f32 %v9951_v41, %v9971_v15  ;;  %v13582_v5 = vld [vmem:[#allocation74_spill] sm:$0xff] }
 0x217   :  { %7908 = vmatpush3.msra.mxu1 %v2891_v57  ;;  %7857 = vmatprep.subr.mxu0 %v9736_v29  ;;  %v2919_v10 = vand.u32 4294901760, %v2918_v38  ;;  %v13581_v57 = vld [vmem:[#allocation70_spill] sm:$0xff] }
 0x218   :  { %7909 = vmatprep.subr.mxu1 %v2898_v6  ;;  %2497 = vmatmul.mubr.f32.vlgmr.msra.gmra.mxu0 %v13568_v11  ;;  %v1436_v11 = vld [vmem:[%s12944_s5 + $0x110] sm:$0xff]  ;;  %v2940_v20 = vand.u32 4294901760, %v2939_v40 }
 0x219   :  { %2664 = vmatmul.mubr.f32.gmra.mxu1 %v13578_v32  ;;  %7858 = vmatpush3.msra.mxu0 %v9736_v29  ;;  %v9987_v53 = vand.u32 4294901760, %v1436_v11 }
 0x21a   :  { %7910 = vmatpush3.msra.mxu1 %v2898_v6  ;;  %2502 = vmatprep.mubr.f32.mxu0 %v13570_v0  ;;  %v1435_v0 = vld [vmem:[%s12944_s5 + $0x108] sm:$0xff]  ;;  %v2933_v6 = vand.u32 4294901760, %v2932_v4  ;;  %v13587_v4 = vld [vmem:[#allocation78_spill] sm:$0xff]  ;;  %s8481_s5 = smov 60  }
 0x21b   :  { %2669 = vmatprep.mubr.f32.mxu1 %v13579_v49  ;;  %7859 = vmatprep.subr.mxu0 %v9758_v24  ;;  %v9997_v26 = vand.u32 4294901760, %v1435_v0 }
 0x21c   :  { %7911 = vmatprep.subr.mxu1 %v2905_v48  ;;  %7860 = vmatpush3.msra.mxu0 %v9758_v24 }
 0x21d   :  { %7912 = vmatpush3.msra.mxu1 %v2905_v48  ;;  %7861 = vmatprep.subr.mxu0 %v9767_v8 }
 0x21e   :  { %7913 = vmatprep.subr.mxu1 %v2912_v55  ;;  %2504 = vmatmul.mubr.f32.gmra.mxu0 %v13574_v1  ;;  %v9995_v1 = vand.u32 4294901760, %v9974_v59 }
 0x21f   :  { %2671 = vmatmul.mubr.f32.gmra.mxu1 %v13580_v28  ;;  %7862 = vmatpush3.msra.mxu0 %v9767_v8 }
 0x220   :  { %7914 = vmatpush3.msra.mxu1 %v2912_v55  ;;  %2509 = vmatprep.mubr.f32.mxu0 %v13576_v37  ;;  %v10008_v37 = vsub.f32 %v1436_v11, %v9987_v53  ;;  %v2946_v48 = vsub.f32 %v9974_v59, %v9995_v1  ;;  %v2953_v55 = vsub.f32 %v9985_v23, %v10005_v9 }
 0x221   :  { %2676 = vmatprep.mubr.f32.mxu1 %v13581_v57  ;;  %7863 = vmatprep.subr.mxu0 %v9795_v36 }
 0x222   :  { %7915 = vmatprep.subr.mxu1 %v2919_v10  ;;  %7864 = vmatpush3.msra.mxu0 %v9795_v36  ;;  %v10026_v38 = vand.u32 4294901760, %v10008_v37  ;;  %v2947_v39 = vand.u32 4294901760, %v2946_v48  ;;  %v13590_v48 = vld [vmem:[#allocation83_spill] sm:$0xff] }
 0x223   :  { %7916 = vmatpush3.msra.mxu1 %v2919_v10  ;;  %7865 = vmatprep.subr.mxu0 %v9809_v12  ;;  %v13586_v10 = vld [vmem:[#allocation77_spill] sm:$0xff] }
 0x224   :  { %7917 = vmatprep.subr.mxu1 %v2926_v30  ;;  %2511 = vmatmul.mubr.f32.gmra.mxu0 %v13578_v32  ;;  %v10018_v32 = vsub.f32 %v1435_v0, %v9997_v26  ;;  %13584 = vst [vmem:[#allocation27_spill] sm:$0xff] %v10026_v38  ;;  %v2954_v0 = vand.u32 4294901760, %v2953_v55  ;;  %v13591_v55 = vld [vmem:[#allocation48_spill] sm:$0xff] }
 0x225   :  { %2678 = vmatmul.mubr.f32.gmra.mxu1 %v13582_v5  ;;  %7866 = vmatpush3.msra.mxu0 %v9809_v12 }
 0x226   :  { %7918 = vmatpush3.msra.mxu1 %v2926_v30  ;;  %2516 = vmatprep.mubr.f32.mxu0 %v13579_v49  ;;  %v10030_v49 = vsub.f32 %v1434_v51, %v10012_v34  ;;  %v10034_v11 = vand.u32 4294901760, %v10018_v32  ;;  %v2960_v30 = vsub.f32 %v10008_v37, %v10026_v38  ;;  %v13589_v51 = vld [vmem:[#allocation17_spill] sm:$0xff]  ;;  %v10123_v38 = vand.u32 4294901760, %v9637_v25 }
 0x227   :  { %2683 = vmatprep.mubr.f32.mxu1 %v13583_v44  ;;  %7867 = vmatprep.subr.mxu0 %v9839_v21 }
 0x228   :  { %7919 = vmatprep.subr.mxu1 %v2933_v6  ;;  %7868 = vmatpush3.msra.mxu0 %v9839_v21  ;;  %13585 = vst [vmem:[#allocation41_spill] sm:$0xff] %v10034_v11  ;;  %v2967_v40 = vsub.f32 %v10018_v32, %v10034_v11 }
 0x229   :  { %7920 = vmatpush3.msra.mxu1 %v2933_v6  ;;  %7869 = vmatprep.subr.mxu0 %v9852_v60 }
 0x22a   :  { %7921 = vmatprep.subr.mxu1 %v2940_v20  ;;  %2518 = vmatmul.mubr.f32.gmra.mxu0 %v13580_v28  ;;  %v10044_v28 = vand.u32 4294901760, %v10030_v49 }
 0x22b   :  { %2685 = vmatmul.mubr.f32.gmra.mxu1 %v13586_v10  ;;  %7870 = vmatpush3.msra.mxu0 %v9852_v60 }
 0x22c   :  { %7922 = vmatpush3.msra.mxu1 %v2940_v20  ;;  %2523 = vmatprep.mubr.f32.mxu0 %v13581_v57  ;;  %13588 = vst [vmem:[#allocation30_spill] sm:$0xff] %v10044_v28  ;;  %v2961_v57 = vand.u32 4294901760, %v2960_v30  ;;  %v2974_v6 = vsub.f32 %v10030_v49, %v10044_v28  ;;  %v2968_v20 = vand.u32 4294901760, %v2967_v40  ;;  %v13594_v30 = vld [vmem:[#allocation84_spill] sm:$0xff] }
 0x22d   :  { %2690 = vmatprep.mubr.f32.mxu1 %v13587_v4  ;;  %7871 = vmatprep.subr.mxu0 %v9879_v62 }
 0x22e   :  { %7923 = vmatprep.subr.mxu1 %v2947_v39  ;;  %7872 = vmatpush3.msra.mxu0 %v9879_v62 }
 0x22f   :  { %7924 = vmatpush3.msra.mxu1 %v2947_v39  ;;  %7873 = vmatprep.subr.mxu0 %v9891_v18  ;;  %v10059_v39 = vand.u32 4294901760, %v13591_v55 }
 0x230   :  { %7925 = vmatprep.subr.mxu1 %v2954_v0  ;;  %2525 = vmatmul.mubr.f32.gmra.mxu0 %v13582_v5  ;;  %v2975_v5 = vand.u32 4294901760, %v2974_v6 }
 0x231   :  { %2692 = vmatmul.mubr.f32.gmra.mxu1 %v13589_v51  ;;  %7874 = vmatpush3.msra.mxu0 %v9891_v18  ;;  %v10071_v40 = vsub.f32 %v13591_v55, %v10059_v39 }
 0x232   :  { %7926 = vmatpush3.msra.mxu1 %v2954_v0  ;;  %2530 = vmatprep.mubr.f32.mxu0 %v13583_v44  ;;  %v13592_v0 = vld [vmem:[#allocation18_spill] sm:$0xff] }
 0x233   :  { %2697 = vmatprep.mubr.f32.mxu1 %v13590_v48  ;;  %7875 = vmatprep.subr.mxu0 %v9918_v58  ;;  %v10065_v44 = vand.u32 4294901760, %v13592_v0  ;;  %v13162_v6 = vand.u32 4294901760, %v10071_v40 }
 0x234   :  { %7927 = vmatprep.subr.mxu1 %v2961_v57  ;;  %7876 = vmatpush3.msra.mxu0 %v9918_v58 }
 0x235   :  { %7928 = vmatpush3.msra.mxu1 %v2961_v57  ;;  %7877 = vmatprep.subr.mxu0 %v9929_v27  ;;  %13593 = vst [vmem:[#allocation3_spill] sm:$0xff] %v10065_v44  ;;  %v13595_v57 = vld [vmem:[#allocation20_spill] sm:$0xff] }
 0x236   :  { %7929 = vmatprep.subr.mxu1 %v2968_v20  ;;  %2532 = vmatmul.mubr.f32.gmra.mxu0 %v13586_v10  ;;  %v10075_v28 = vand.u32 4294901760, %v13595_v57  ;;  %v10082_v10 = vsub.f32 %v13592_v0, %v10065_v44 }
 0x237   :  { %2699 = vmatmul.mubr.f32.gmra.mxu1 %v13594_v30  ;;  %7878 = vmatpush3.msra.mxu0 %v9929_v27 }
 0x238   :  { %7930 = vmatpush3.msra.mxu1 %v2968_v20  ;;  %2537 = vmatprep.mubr.f32.mxu0 %v13587_v4  ;;  %13596 = vst [vmem:[#allocation32_spill] sm:$0xff] %v10075_v28  ;;  %v13597_v4 = vld [vmem:[#allocation35_spill] sm:$0xff]  ;;  %v10093_v55 = vsub.f32 %v13595_v57, %v10075_v28  ;;  %v2788_v57 = vsub.f32 %v10071_v40, %v13162_v6 }
 0x239   :  { %7879 = vmatprep.subr.mxu0 %v9953_v2  ;;  %7931 = vmatprep.subr.mxu1 %v2975_v5  ;;  %v10089_v20 = vand.u32 4294901760, %v13597_v4 }
 0x23a   :  { %7933 = vmatprep.mubr.f32.mxu1 %v10059_v39  ;;  %7880 = vmatpush3.msra.mxu0 %v9953_v2 }
 0x23b   :  { %7932 = vmatpush3.msra.mxu1 %v2975_v5  ;;  %7881 = vmatprep.subr.mxu0 %v9963_v19  ;;  %13598 = vst [vmem:[#allocation34_spill] sm:$0xff] %v10089_v20  ;;  %v13599_v5 = vld [vmem:[#allocation24_spill] sm:$0xff] }
 0x23c   :  { %7989 = vmatprep.subr.mxu1 %v9736_v29  ;;  %2539 = vmatmul.mubr.f32.gmra.mxu0 %v13589_v51  ;;  %v10100_v0 = vand.u32 4294901760, %v13599_v5  ;;  %v13165_v51 = vand.u32 4294901760, %v10082_v10 }
 0x23d   :  { %7882 = vmatpush3.msra.mxu0 %v9963_v19  ;;  %7934 = vmatmul.mubr.f32.vlgmr.msra.gmra.mxu1 %v10065_v44 }
 0x23e   :  { %7990 = vmatpush3.msra.mxu1 %v9736_v29  ;;  %2544 = vmatprep.mubr.f32.mxu0 %v13590_v48  ;;  %13600 = vst [vmem:[#allocation5_spill] sm:$0xff] %v10100_v0  ;;  %v10113_v48 = vsub.f32 %v13597_v4, %v10089_v20  ;;  %v2798_v6 = vsub.f32 %v10082_v10, %v13165_v51  ;;  %v2789_v4 = vand.u32 4294901760, %v2788_v57 }
 0x23f   :  { %7883 = vmatprep.subr.mxu0 %v9987_v53  ;;  %7936 = vmatprep.mubr.f32.mxu1 %v10075_v28  ;;  %v10127_v11 = vsub.f32 %v13599_v5, %v10100_v0  ;;  %v10137_v28 = vand.u32 4294901760, %v9644_v16 }
 0x240   :  { %7991 = vmatprep.subr.mxu1 %v9758_v24  ;;  %7884 = vmatpush3.msra.mxu0 %v9987_v53  ;;  %v2799_v5 = vand.u32 4294901760, %v2798_v6 }
 0x241   :  { %7992 = vmatpush3.msra.mxu1 %v9758_v24  ;;  %7885 = vmatprep.subr.mxu0 %v9997_v26  ;;  %v10159_v57 = vsub.f32 %v9644_v16, %v10137_v28 }
 0x242   :  { %7993 = vmatprep.subr.mxu1 %v9767_v8  ;;  %2546 = vmatmul.mubr.f32.gmra.mxu0 %v13594_v30  ;;  %v13601_v30 = vand.u32 4294901760, %v10093_v55 }
 0x243   :  { %7886 = vmatpush3.msra.mxu0 %v9997_v26  ;;  %7937 = vmatmul.mubr.f32.gmra.mxu1 %v10089_v20  ;;  %v10146_v20 = vsub.f32 %v9637_v25, %v10123_v38  ;;  %v13604_v25 = vand.u32 4294901760, %v10127_v11 }
 0x244   :  { %7994 = vmatpush3.msra.mxu1 %v9767_v8  ;;  %7887 = vmatprep.subr.mxu0 %v10012_v34  ;;  %v2808_v51 = vsub.f32 %v10093_v55, %v13601_v30  ;;  %v13602_v30 = vld [vmem:[#allocation39_spill] sm:$0xff] }
 0x245   :  { %7889 = vmatprep.mubr.f32.mxu0 %v2789_v4  ;;  %7939 = vmatprep.mubr.f32.mxu1 %v10100_v0  ;;  %v10151_v44 = vand.u32 4294901760, %v13602_v30  ;;  %v13603_v0 = vand.u32 4294901760, %v10113_v48 }
 0x246   :  { %7995 = vmatprep.subr.mxu1 %v9795_v36  ;;  %7888 = vmatpush3.msra.mxu0 %v10012_v34  ;;  %v2809_v4 = vand.u32 4294901760, %v2808_v51  ;;  %v2837_v51 = vand.u32 4294901760, %v10146_v20 }
 0x247   :  { %7996 = vmatpush3.msra.mxu1 %v9795_v36  ;;  %7945 = vmatprep.subr.mxu0 %v9756_v7  ;;  %v2818_v6 = vsub.f32 %v10113_v48, %v13603_v0  ;;  %v10172_v16 = vsub.f32 %v13602_v30, %v10151_v44  ;;  %v2847_v0 = vand.u32 4294901760, %v10159_v57 }
 0x248   :  { %7997 = vmatprep.subr.mxu1 %v9809_v12  ;;  %7890 = vmatmul.mubr.f32.vlgmr.msra.gmra.mxu0 %v2799_v5  ;;  %v2828_v5 = vsub.f32 %v10127_v11, %v13604_v25  ;;  %v2838_v30 = vsub.f32 %v10146_v20, %v2837_v51  ;;  %v13605_v25 = vand.u32 4294901760, %v10071_v40 }
 0x249   :  { %7940 = vmatmul.mubr.f32.gmra.mxu1 %v10123_v38  ;;  %7946 = vmatpush3.msra.mxu0 %v9756_v7  ;;  %v2819_v7 = vand.u32 4294901760, %v2818_v6  ;;  %v2848_v6 = vsub.f32 %v10159_v57, %v2847_v0 }
 0x24a   :  { %7998 = vmatpush3.msra.mxu1 %v9809_v12  ;;  %7892 = vmatprep.mubr.f32.mxu0 %v2809_v4  ;;  %v2829_v4 = vand.u32 4294901760, %v2828_v5  ;;  %v2839_v5 = vand.u32 4294901760, %v2838_v30 }
 0x24b   :  { %7942 = vmatprep.mubr.f32.mxu1 %v10137_v28  ;;  %7947 = vmatprep.subr.mxu0 %v9781_v61 }
 0x24c   :  { %7999 = vmatprep.subr.mxu1 %v9839_v21  ;;  %7948 = vmatpush3.msra.mxu0 %v9781_v61  ;;  %v2857_v61 = vand.u32 4294901760, %v10172_v16 }
 0x24d   :  { %8000 = vmatpush3.msra.mxu1 %v9839_v21  ;;  %7949 = vmatprep.subr.mxu0 %v9793_v17 }
 0x24e   :  { %8001 = vmatprep.subr.mxu1 %v9852_v60  ;;  %7893 = vmatmul.mubr.f32.gmra.mxu0 %v2819_v7  ;;  %v2849_v7 = vand.u32 4294901760, %v2848_v6 }
 0x24f   :  { %7943 = vmatmul.mubr.f32.gmra.mxu1 %v10151_v44  ;;  %7950 = vmatpush3.msra.mxu0 %v9793_v17  ;;  %v2858_v17 = vsub.f32 %v10172_v16, %v2857_v61 }
 0x250   :  { %8002 = vmatpush3.msra.mxu1 %v9852_v60  ;;  %7895 = vmatprep.mubr.f32.mxu0 %v2829_v4 }
 0x251   :  { %7951 = vmatprep.subr.mxu0 %v9823_v22  ;;  %8003 = vmatprep.subr.mxu1 %v9879_v62 }
 0x252   :  { %8021 = vmatprep.mubr.f32.mxu1 %v13605_v25  ;;  %7952 = vmatpush3.msra.mxu0 %v9823_v22  ;;  %v2859_v22 = vand.u32 4294901760, %v2858_v17 }
 0x253   :  { %8004 = vmatpush3.msra.mxu1 %v9879_v62  ;;  %7953 = vmatprep.subr.mxu0 %v9837_v52 }
 0x254   :  { %8005 = vmatprep.subr.mxu1 %v9891_v18  ;;  %7896 = vmatmul.mubr.f32.gmra.mxu0 %v2839_v5 }
 0x255   :  { %7954 = vmatpush3.msra.mxu0 %v9837_v52  ;;  %8006 = vmatpush3.msra.mxu1 %v9891_v18  ;;  %v13606_v52 = vand.u32 4294901760, %v10082_v10 }
 0x256   :  { %7898 = vmatprep.mubr.f32.mxu0 %v2849_v7  ;;  %7955 = vmatprep.subr.mxu0 %v9865_v63 }
 0x257   :  { %8007 = vmatprep.subr.mxu1 %v9918_v58  ;;  %7956 = vmatpush3.msra.mxu0 %v9865_v63  ;;  %v13607_v63 = vand.u32 4294901760, %v10093_v55 }
 0x258   :  { %8008 = vmatpush3.msra.mxu1 %v9918_v58  ;;  %7957 = vmatprep.subr.mxu0 %v9877_v46 }
 0x259   :  { %8009 = vmatprep.subr.mxu1 %v9929_v27  ;;  %7899 = vmatmul.mubr.f32.gmra.mxu0 %v2859_v22 }
 0x25a   :  { %7958 = vmatpush3.msra.mxu0 %v9877_v46  ;;  %8010 = vmatpush3.msra.mxu1 %v9929_v27  ;;  %v13608_v46 = vand.u32 4294901760, %v10113_v48 }
 0x25b   :  { %7959 = vmatprep.subr.mxu0 %v9903_v13  ;;  %7977 = vmatprep.mubr.f32.mxu0 %v10071_v40 }
 0x25c   :  { %8011 = vmatprep.subr.mxu1 %v9953_v2  ;;  %7960 = vmatpush3.msra.mxu0 %v9903_v13  ;;  %v13609_v13 = vand.u32 4294901760, %v10127_v11 }
 0x25d   :  { %8012 = vmatpush3.msra.mxu1 %v9953_v2  ;;  %7961 = vmatprep.subr.mxu0 %v9916_v3 }
 0x25e   :  { %8013 = vmatprep.subr.mxu1 %v9963_v19  ;;  %7962 = vmatpush3.msra.mxu0 %v9916_v3 }
 0x25f   :  { %8014 = vmatpush3.msra.mxu1 %v9963_v19  ;;  %7963 = vmatprep.subr.mxu0 %v9940_v54 }
 0x260   :  { %8015 = vmatprep.subr.mxu1 %v9987_v53  ;;  %7964 = vmatpush3.msra.mxu0 %v9940_v54  ;;  %v1368_v54 = vld [vmem:[%s12949_s4 + $0x70] sm:$0xff] }
 0x261   :  { %8016 = vmatpush3.msra.mxu1 %v9987_v53  ;;  %7965 = vmatprep.subr.mxu0 %v9951_v41 }
 0x262   :  { %8017 = vmatprep.subr.mxu1 %v9997_v26  ;;  %7966 = vmatpush3.msra.mxu0 %v9951_v41 }
 0x263   :  { %8018 = vmatpush3.msra.mxu1 %v9997_v26  ;;  %7967 = vmatprep.subr.mxu0 %v9974_v59 }
 0x264   :  { %8019 = vmatprep.subr.mxu1 %v10012_v34  ;;  %7968 = vmatpush3.msra.mxu0 %v9974_v59 }
 0x265   :  { %8020 = vmatpush3.msra.mxu1 %v10012_v34  ;;  %7969 = vmatprep.subr.mxu0 %v9985_v23 }
 0x266   :  { %8022 = vmatmul.mubr.f32.vlgmr.msra.gmra.mxu1 %v13606_v52  ;;  %8077 = vmatprep.subr.mxu1 %v9736_v29 }
 0x267   :  { %7970 = vmatpush3.msra.mxu0 %v9985_v23  ;;  %8024 = vmatprep.mubr.f32.mxu1 %v13607_v63  ;;  %v1383_v23 = vld [vmem:[%s12949_s4 + $0xe8] sm:$0xff] }
 0x268   :  { %8078 = vmatpush3.msra.mxu1 %v9736_v29  ;;  %7971 = vmatprep.subr.mxu0 %v10008_v37 }
 0x269   :  { %8079 = vmatprep.subr.mxu1 %v9758_v24  ;;  %7972 = vmatpush3.msra.mxu0 %v10008_v37 }
 0x26a   :  { %8080 = vmatpush3.msra.mxu1 %v9758_v24  ;;  %7973 = vmatprep.subr.mxu0 %v10018_v32 }
 0x26b   :  { %8025 = vmatmul.mubr.f32.gmra.mxu1 %v13608_v46  ;;  %8081 = vmatprep.subr.mxu1 %v9767_v8 }
 0x26c   :  { %7974 = vmatpush3.msra.mxu0 %v10018_v32  ;;  %8027 = vmatprep.mubr.f32.mxu1 %v13609_v13  ;;  %v10312_v32 = vand.u32 4294901760, %v1368_v54 }
 0x26d   :  { %8082 = vmatpush3.msra.mxu1 %v9767_v8  ;;  %7975 = vmatprep.subr.mxu0 %v10030_v49  ;;  %v1385_v8 = vld [vmem:[%s12949_s4 + $0xf8] sm:$0xff] }
 0x26e   :  { %8083 = vmatprep.subr.mxu1 %v9795_v36  ;;  %7976 = vmatpush3.msra.mxu0 %v10030_v49  ;;  %13614 = vst [vmem:[#allocation7_spill] sm:$0xff] %v10312_v32  ;;  %v1367_v49 = vld [vmem:[%s12949_s4 + $0x68] sm:$0xff] }
 0x26f   :  { %8084 = vmatpush3.msra.mxu1 %v9795_v36  ;;  %7978 = vmatmul.mubr.f32.vlgmr.msra.gmra.mxu0 %v10082_v10  ;;  %v6955_v29 = vpop.f32.mrf.mxu1  ;;  %v10345_v30 = vand.u32 4294901760, %v1367_v49 }
 0x270   :  { %8028 = vmatmul.mubr.f32.gmra.mxu1 %v2837_v51  ;;  %8033 = vmatprep.subr.mxu0 %v9778_v14  ;;  %v13618_v51 = vld [vmem:[#allocation52_spill] sm:$0xff] }
 0x271   :  { %8085 = vmatprep.subr.mxu1 %v9809_v12  ;;  %7980 = vmatprep.mubr.f32.mxu0 %v10093_v55  ;;  %v6956_v24 = vpop.f32.mrf.mxu1  ;;  %13620 = vst [vmem:[#allocation9_spill] sm:$0xff] %v10345_v30  ;;  %v10385_v13 = vsub.f32 %v1367_v49, %v10345_v30  ;;  %v13649_v49 = vld [vmem:[#allocation27_spill] sm:$0xff] }
 0x272   :  { %8030 = vmatprep.mubr.f32.mxu1 %v2847_v0  ;;  %8034 = vmatpush3.msra.mxu0 %v9778_v14  ;;  %v1369_v14 = vld [vmem:[%s12949_s4 + $0x78] sm:$0xff]  ;;  %v10338_v0 = vand.u32 4294901760, %v13618_v51 }
 0x273   :  { %8086 = vmatpush3.msra.mxu1 %v9809_v12  ;;  %8035 = vmatprep.subr.mxu0 %v9807_v35  ;;  %v10272_v36 = vpop.f32.mrf.mxu1  ;;  %v10282_v12 = vand.u32 4294901760, %v1385_v8  ;;  %13626 = vst [vmem:[#allocation12_spill] sm:$0xff] %v10385_v13 }
 0x274   :  { %8087 = vmatprep.subr.mxu1 %v9839_v21  ;;  %8036 = vmatpush3.msra.mxu0 %v9807_v35  ;;  %v1384_v35 = vld [vmem:[%s12949_s4 + $0xf0] sm:$0xff]  ;;  %13619 = vst [vmem:[#allocation43_spill] sm:$0xff] %v10338_v0 }
 0x275   :  { %8088 = vmatpush3.msra.mxu1 %v9839_v21  ;;  %7981 = vmatmul.mubr.f32.gmra.mxu0 %v10113_v48  ;;  %13610 = vst [vmem:[#allocation36_spill] sm:$0xff] %v10282_v12  ;;  %v6959_v3 = vpop.f32.mrf.mxu1  ;;  %v10291_v21 = vand.u32 4294901760, %v1369_v14  ;;  %v10298_v59 = vand.u32 4294901760, %v1384_v35  ;;  %v1366_v48 = vld [vmem:[%s12949_s4 + $0x60] sm:$0xff] }
 0x276   :  { %8031 = vmatmul.mubr.f32.gmra.mxu1 %v2857_v61  ;;  %8037 = vmatprep.subr.mxu0 %v9820_v47  ;;  %v10350_v61 = vsub.f32 %v1368_v54, %v10312_v32  ;;  %v10362_v17 = vand.u32 4294901760, %v1366_v48  ;;  %v6960_v22 = vadd.f32 %v6959_v3, %v10272_v36  ;;  %v1379_v36 = vld [vmem:[%s12949_s4 + $0xc8] sm:$0xff] }
 0x277   :  { %8089 = vmatprep.subr.mxu1 %v9852_v60  ;;  %7983 = vmatprep.mubr.f32.mxu0 %v10127_v11  ;;  %13611 = vst [vmem:[#allocation6_spill] sm:$0xff] %v10291_v21  ;;  %v6899_v41 = vpop.f32.mrf.mxu0  ;;  %13612 = vst [vmem:[#allocation38_spill] sm:$0xff] %v10298_v59  ;;  %v6957_v11 = vadd.f32 %v6956_v24, %v6955_v29  ;;  %v10332_v55 = vsub.f32 %v1384_v35, %v10298_v59  ;;  %v1365_v29 = vld [vmem:[%s12949_s4 + $0x58] sm:$0xff]  ;;  %v1380_v24 = vld [vmem:[%s12949_s4 + $0xd0] sm:$0xff] }
 0x278   :  { %8038 = vmatpush3.msra.mxu0 %v9820_v47  ;;  %8090 = vmatpush3.msra.mxu1 %v9852_v60  ;;  %v10303_v47 = vpop.f32.mrf.mxu1  ;;  %v10308_v60 = vsub.f32 %v1385_v8, %v10282_v12  ;;  %13621 = vst [vmem:[#allocation4_spill] sm:$0xff] %v10350_v61  ;;  %13624 = vst [vmem:[#allocation19_spill] sm:$0xff] %v10362_v17  ;;  %v1364_v8 = vld [vmem:[%s12949_s4 + $0x50] sm:$0xff]  ;;  %v10416_v3 = vsub.f32 %v1366_v48, %v10362_v17  ;;  %v10440_v48 = vand.u32 4294901760, %v1379_v36 }
 0x279   :  { %8109 = vmatprep.mubr.f32.mxu1 %v10059_v39  ;;  %8039 = vmatprep.subr.mxu0 %v9850_v45  ;;  %v6900_v37 = vpop.f32.mrf.mxu0  ;;  %13617 = vst [vmem:[#allocation8_spill] sm:$0xff] %v10332_v55 }
 0x27a   :  { %8091 = vmatprep.subr.mxu1 %v9879_v62  ;;  %8040 = vmatpush3.msra.mxu0 %v9850_v45  ;;  %13613 = vst [vmem:[#allocation40_spill] sm:$0xff] %v10308_v60  ;;  %v6901_v40 = vadd.f32 %v6900_v37, %v6899_v41  ;;  %v10317_v10 = vpop.f32.mrf.mxu1  ;;  %v10322_v45 = vsub.f32 %v1369_v14, %v10291_v21  ;;  %13629 = vst [vmem:[#allocation13_spill] sm:$0xff] %v10416_v3  ;;  %v10429_v37 = vand.u32 4294901760, %v1380_v24 }
 0x27b   :  { %8092 = vmatpush3.msra.mxu1 %v9879_v62  ;;  %7984 = vmatmul.mubr.f32.gmra.mxu0 %v10146_v20  ;;  %v10324_v62 = vand.u32 4294901760, %v1383_v23  ;;  %v1382_v20 = vld [vmem:[%s12949_s4 + $0xe0] sm:$0xff]  ;;  %13633 = vst [vmem:[#allocation15_spill] sm:$0xff] %v10440_v48 }
 0x27c   :  { %8041 = vmatprep.subr.mxu0 %v9862_v56  ;;  %8093 = vmatprep.subr.mxu1 %v9891_v18  ;;  %13615 = vst [vmem:[#allocation42_spill] sm:$0xff] %v10322_v45  ;;  %v10340_v4 = vadd.f32 %v6957_v11, %v6901_v40  ;;  %v10352_v6 = vand.u32 4294901760, %v1382_v20  ;;  %13631 = vst [vmem:[#allocation14_spill] sm:$0xff] %v10429_v37  ;;  %v13179_v40 = vand.u32 4294901760, %v10385_v13 }
 0x27d   :  { %13616 = vst [vmem:[#allocation64_spill] sm:$0xff] %v10324_v62  ;;  %7986 = vmatprep.mubr.f32.mxu0 %v10159_v57  ;;  %8042 = vmatpush3.msra.mxu0 %v9862_v56  ;;  %v13180_v57 = vand.u32 4294901760, %v10308_v60  ;;  %v6902_v56 = vpop.f32.mrf.mxu0  ;;  %v10360_v5 = vsub.f32 %v1383_v23, %v10324_v62  ;;  %v10427_v23 = vand.u32 4294901760, %v1365_v29 }
 0x27e   :  { %8094 = vmatpush3.msra.mxu1 %v9891_v18  ;;  %8043 = vmatprep.subr.mxu0 %v9889_v43  ;;  %13622 = vst [vmem:[#allocation10_spill] sm:$0xff] %v10352_v6  ;;  %v10354_v25 = vpop.f32.mrf.mxu1  ;;  %v13176_v18 = vand.u32 4294901760, %v10322_v45 }
 0x27f   :  { %8095 = vmatprep.subr.mxu1 %v9918_v58  ;;  %8044 = vmatpush3.msra.mxu0 %v9889_v43  ;;  %13623 = vst [vmem:[#allocation11_spill] sm:$0xff] %v10360_v5  ;;  %v6903_v7 = vpop.f32.mrf.mxu0  ;;  %v13175_v43 = vand.u32 4294901760, %v10332_v55  ;;  %v10382_v46 = vsub.f32 %v10308_v60, %v13180_v57  ;;  %v13177_v35 = vand.u32 4294901760, %v10360_v5  ;;  %v13660_v60 = vld [vmem:[#allocation34_spill] sm:$0xff] }
 0x280   :  { %8096 = vmatpush3.msra.mxu1 %v9918_v58  ;;  %7987 = vmatmul.mubr.f32.gmra.mxu0 %v10172_v16  ;;  %v1381_v58 = vld [vmem:[%s12949_s4 + $0xd8] sm:$0xff]  ;;  %v10372_v16 = vsub.f32 %v13618_v51, %v10338_v0  ;;  %v6904_v52 = vadd.f32 %v6903_v7, %v6902_v56  ;;  %v10375_v63 = vpop.f32.mrf.mxu1  ;;  %v1363_v7 = vld [vmem:[%s12949_s4 + $0x48] sm:$0xff] }
 0x281   :  { %8045 = vmatprep.subr.mxu0 %v9900_v33  ;;  %8097 = vmatprep.subr.mxu1 %v9929_v27  ;;  %v10418_v54 = vand.u32 4294901760, %v1381_v58 }
 0x282   :  { %13625 = vst [vmem:[#allocation81_spill] sm:$0xff] %v10372_v16  ;;  %8046 = vmatpush3.msra.mxu0 %v9900_v33  ;;  %8065 = vmatprep.mubr.f32.mxu0 %v10059_v39  ;;  %v13174_v33 = vand.u32 4294901760, %v10350_v61  ;;  %v10397_v39 = vsub.f32 %v1382_v20, %v10352_v6  ;;  %v10405_v14 = vadd.f32 %v6960_v22, %v6904_v52  ;;  %v10438_v20 = vand.u32 4294901760, %v1364_v8 }
 0x283   :  { %8098 = vmatpush3.msra.mxu1 %v9929_v27  ;;  %8047 = vmatprep.subr.mxu0 %v9927_v50  ;;  %v10412_v27 = vsub.f32 %v10322_v45, %v13176_v18  ;;  %13630 = vst [vmem:[#allocation23_spill] sm:$0xff] %v10418_v54  ;;  %v6905_v41 = vpop.f32.mrf.mxu0  ;;  %v6963_v22 = vadd.f32 %v10317_v10, %v10303_v47  ;;  %v1378_v47 = vld [vmem:[%s12949_s4 + $0xc0] sm:$0xff] }
 0x284   :  { %13627 = vst [vmem:[#allocation21_spill] sm:$0xff] %v10397_v39  ;;  %13628 = vst [vmem:[#allocation82_spill] sm:$0xff] %v10405_v14  ;;  %8099 = vmatprep.subr.mxu1 %v9953_v2  ;;  %8048 = vmatpush3.msra.mxu0 %v9927_v50  ;;  %v10425_v50 = vsub.f32 %v10332_v55, %v13175_v43  ;;  %v10432_v11 = vpop.f32.mrf.mxu1  ;;  %v10447_v56 = vsub.f32 %v10350_v61, %v13174_v33  ;;  %v13181_v43 = vand.u32 4294901760, %v10416_v3 }
 0x285   :  { %8100 = vmatpush3.msra.mxu1 %v9953_v2  ;;  %8049 = vmatprep.subr.mxu0 %v9937_v42  ;;  %v3980_v2 = vand.u32 4294901760, %v10382_v46  ;;  %13632 = vst [vmem:[#allocation25_spill] sm:$0xff] %v10438_v20  ;;  %v6906_v51 = vpop.f32.mrf.mxu0  ;;  %v10463_v33 = vsub.f32 %v10360_v5, %v13177_v35  ;;  %v10467_v18 = vsub.f32 %v1381_v58, %v10418_v54  ;;  %v1376_v5 = vld [vmem:[%s12949_s4 + $0xb0] sm:$0xff] }
 0x286   :  { %8101 = vmatprep.subr.mxu1 %v9963_v19  ;;  %8050 = vmatpush3.msra.mxu0 %v9937_v42  ;;  %v13178_v42 = vand.u32 4294901760, %v10397_v39  ;;  %v6907_v52 = vadd.f32 %v6906_v51, %v6905_v41  ;;  %v10455_v46 = vpop.f32.mrf.mxu1  ;;  %v3987_v10 = vand.u32 4294901760, %v10425_v50  ;;  %v10482_v58 = vsub.f32 %v1380_v24, %v10429_v37  ;;  %v1377_v41 = vld [vmem:[%s12949_s4 + $0xb8] sm:$0xff] }
 0x287   :  { %8102 = vmatpush3.msra.mxu1 %v9963_v19  ;;  %8051 = vmatprep.subr.mxu0 %v9961_v31  ;;  %v3868_v19 = vand.u32 4294901760, %v10412_v27  ;;  %13634 = vst [vmem:[#allocation28_spill] sm:$0xff] %v10467_v18  ;;  %v10479_v27 = vsub.f32 %v1365_v29, %v10427_v23  ;;  %v10497_v29 = vsub.f32 %v1364_v8, %v10438_v20  ;;  %v10502_v50 = vand.u32 4294901760, %v1363_v7 }
 0x288   :  { %8103 = vmatprep.subr.mxu1 %v9987_v53  ;;  %8052 = vmatpush3.msra.mxu0 %v9961_v31  ;;  %v1362_v31 = vld [vmem:[%s12949_s4 + $0x40] sm:$0xff]  ;;  %13636 = vst [vmem:[#allocation29_spill] sm:$0xff] %v10482_v58  ;;  %v10487_v51 = vadd.f32 %v6963_v22, %v6907_v52  ;;  %v10500_v24 = vsub.f32 %v1379_v36, %v10440_v48  ;;  %v10512_v52 = vand.u32 4294901760, %v1378_v47 }
 0x289   :  { %8104 = vmatpush3.msra.mxu1 %v9987_v53  ;;  %8053 = vmatprep.subr.mxu0 %v9971_v15  ;;  %13635 = vst [vmem:[#allocation16_spill] sm:$0xff] %v10479_v27  ;;  %v10494_v53 = vsub.f32 %v10385_v13, %v13179_v40  ;;  %13638 = vst [vmem:[#allocation22_spill] sm:$0xff] %v10497_v29  ;;  %v6908_v35 = vpop.f32.mrf.mxu0  ;;  %v10510_v22 = vsub.f32 %v10397_v39, %v13178_v42  ;;  %v10514_v8 = vand.u32 4294901760, %v1362_v31  ;;  %v13643_v39 = vld [vmem:[#allocation3_spill] sm:$0xff] }
 0x28a   :  { %13637 = vst [vmem:[#allocation33_spill] sm:$0xff] %v10487_v51  ;;  %8105 = vmatprep.subr.mxu1 %v9997_v26  ;;  %8054 = vmatpush3.msra.mxu0 %v9971_v15  ;;  %13639 = vst [vmem:[#allocation60_spill] sm:$0xff] %v10500_v24  ;;  %v3875_v15 = vand.u32 4294901760, %v10447_v56  ;;  %v10516_v36 = vpop.f32.mrf.mxu1  ;;  %v10524_v56 = vsub.f32 %v10416_v3, %v13181_v43  ;;  %v10527_v40 = vand.u32 4294901760, %v1377_v41  ;;  %v13650_v13 = vand.u32 4294901760, %v10467_v18 }
 0x28b   :  { %13640 = vst [vmem:[#allocation57_spill] sm:$0xff] %v10502_v50  ;;  %8106 = vmatpush3.msra.mxu1 %v9997_v26  ;;  %8055 = vmatprep.subr.mxu0 %v9995_v1  ;;  %13641 = vst [vmem:[#allocation61_spill] sm:$0xff] %v10512_v52  ;;  %v3994_v26 = vand.u32 4294901760, %v10463_v33  ;;  %v6909_v57 = vpop.f32.mrf.mxu0  ;;  %v1361_v33 = vld [vmem:[%s12949_s4 + $0x38] sm:$0xff]  ;;  %v6966_v43 = vadd.f32 %v10375_v63, %v10354_v25  ;;  %v13645_v25 = vld [vmem:[#allocation32_spill] sm:$0xff]  ;;  %v4001_v63 = vand.u32 4294901760, %v10510_v22 }
 0x28c   :  { %8107 = vmatprep.subr.mxu1 %v10012_v34  ;;  %8056 = vmatpush3.msra.mxu0 %v9995_v1  ;;  %13642 = vst [vmem:[#allocation58_spill] sm:$0xff] %v10527_v40  ;;  %v6910_v3 = vadd.f32 %v6909_v57, %v6908_v35  ;;  %v10538_v42 = vpop.f32.mrf.mxu1  ;;  %v10545_v1 = vsub.f32 %v1363_v7, %v10502_v50  ;;  %v1360_v57 = vld [vmem:[%s12949_s4 + $0x30] sm:$0xff]  ;;  %v1375_v7 = vld [vmem:[%s12949_s4 + $0xa8] sm:$0xff]  ;;  %v13663_v51 = vand.u32 4294901760, %v10372_v16 }
 0x28d   :  { %8108 = vmatpush3.msra.mxu1 %v10012_v34  ;;  %8057 = vmatprep.subr.mxu0 %v10005_v9  ;;  %v3882_v34 = vand.u32 4294901760, %v10494_v53  ;;  %v10557_v35 = vsub.f32 %v1378_v47, %v10512_v52  ;;  %v10572_v22 = vsub.f32 %v10467_v18, %v13650_v13  ;;  %v10575_v47 = vsub.f32 %v1377_v41, %v10527_v40 }
 0x28e   :  { %8110 = vmatmul.mubr.f32.vlgmr.msra.gmra.mxu1 %v13643_v39  ;;  %7403 = vmatprep.subr.mxu1 %v3980_v2  ;;  %13644 = vst [vmem:[#allocation62_spill] sm:$0xff] %v10545_v1  ;;  %v10560_v2 = vsub.f32 %v1362_v31, %v10514_v8  ;;  %v10565_v53 = vadd.f32 %v6966_v43, %v6910_v3  ;;  %v10577_v31 = vand.u32 4294901760, %v1361_v33  ;;  %v13653_v43 = vand.u32 4294901760, %v10479_v27 }
 0x28f   :  { %8058 = vmatpush3.msra.mxu0 %v10005_v9  ;;  %8112 = vmatprep.mubr.f32.mxu1 %v13645_v25  ;;  %13646 = vst [vmem:[#allocation65_spill] sm:$0xff] %v10557_v35  ;;  %v3889_v9 = vand.u32 4294901760, %v10524_v56  ;;  %13651 = vst [vmem:[#allocation70_spill] sm:$0xff] %v10575_v47  ;;  %v6911_v61 = vpop.f32.mrf.mxu0  ;;  %v10590_v13 = vand.u32 4294901760, %v1376_v5  ;;  %v10592_v41 = vand.u32 4294901760, %v1360_v57  ;;  %v10630_v14 = vsub.f32 %v10372_v16, %v13663_v51  ;;  %v1358_v51 = vld [vmem:[%s12949_s4 + $0x20] sm:$0xff] }
 0x290   :  { %13647 = vst [vmem:[#allocation67_spill] sm:$0xff] %v10560_v2  ;;  %13648 = vst [vmem:[#allocation69_spill] sm:$0xff] %v10565_v53  ;;  %7404 = vmatpush3.msra.mxu1 %v3868_v19  ;;  %8059 = vmatprep.subr.mxu0 %v13649_v49  ;;  %v10583_v3 = vsub.f32 %v10479_v27, %v13653_v43  ;;  %v13654_v19 = vand.u32 4294901760, %v10482_v58  ;;  %v10594_v18 = vpop.f32.mrf.mxu1  ;;  %v13658_v43 = vand.u32 4294901760, %v10500_v24  ;;  %v1357_v16 = vld [vmem:[%s12949_s4 + $0x18] sm:$0xff] }
 0x291   :  { %13652 = vst [vmem:[#allocation74_spill] sm:$0xff] %v10577_v31  ;;  %7405 = vmatprep.subr.mxu1 %v3987_v10  ;;  %8060 = vmatpush3.msra.mxu0 %v13649_v49  ;;  %13655 = vst [vmem:[#allocation75_spill] sm:$0xff] %v10590_v13  ;;  %v13656_v10 = vld [vmem:[#allocation41_spill] sm:$0xff]  ;;  %v13657_v49 = vand.u32 4294901760, %v10497_v29  ;;  %v6912_v45 = vpop.f32.mrf.mxu0  ;;  %v10625_v53 = vsub.f32 %v1361_v33, %v10577_v31  ;;  %v1374_v33 = vld [vmem:[%s12949_s4 + $0xa0] sm:$0xff] }
 0x292   :  { %v10588_v56 = vsub.f32 %v10482_v58, %v13654_v19  ;;  %7406 = vmatpush3.msra.mxu1 %v3875_v15  ;;  %8061 = vmatprep.subr.mxu0 %v13656_v10  ;;  %v10605_v27 = vsub.f32 %v10500_v24, %v13658_v43  ;;  %v10608_v58 = vand.u32 4294901760, %v1375_v7  ;;  %v6969_v43 = vadd.f32 %v10455_v46, %v10432_v11  ;;  %v13661_v19 = vld [vmem:[#allocation5_spill] sm:$0xff] }
 0x293   :  { %v10600_v55 = vsub.f32 %v10497_v29, %v13657_v49  ;;  %8113 = vmatmul.mubr.f32.gmra.mxu1 %v13660_v60  ;;  %7407 = vmatprep.subr.mxu1 %v3994_v26  ;;  %v1359_v49 = vld [vmem:[%s12949_s4 + $0x28] sm:$0xff]  ;;  %v6913_v24 = vadd.f32 %v6912_v45, %v6911_v61  ;;  %v10618_v29 = vpop.f32.mrf.mxu1  ;;  %v4008_v26 = vand.u32 4294901760, %v10572_v22  ;;  %13662 = vst [vmem:[#allocation78_spill] sm:$0xff] %v10625_v53  ;;  %v13664_v45 = vld [vmem:[#allocation30_spill] sm:$0xff]  ;;  %v3896_v61 = vand.u32 4294901760, %v10583_v3 }
 0x294   :  { %13659 = vst [vmem:[#allocation77_spill] sm:$0xff] %v10608_v58  ;;  %8062 = vmatpush3.msra.mxu0 %v13656_v10  ;;  %8115 = vmatprep.mubr.f32.mxu1 %v13661_v19  ;;  %v10635_v11 = vsub.f32 %v1376_v5, %v10590_v13  ;;  %v10638_v46 = vsub.f32 %v1360_v57, %v10592_v41  ;;  %v13668_v5 = vand.u32 4294901760, %v10545_v1  ;;  %v10658_v10 = vand.u32 4294901760, %v1359_v49 }
 0x295   :  { %7408 = vmatpush3.msra.mxu1 %v3882_v34  ;;  %8063 = vmatprep.subr.mxu0 %v13664_v45  ;;  %v10646_v22 = vadd.f32 %v6969_v43, %v6913_v24  ;;  %v4015_v34 = vand.u32 4294901760, %v10588_v56  ;;  %v10656_v3 = vsub.f32 %v1375_v7, %v10608_v58  ;;  %v6914_v15 = vpop.f32.mrf.mxu0  ;;  %v3903_v24 = vand.u32 4294901760, %v10600_v55 }
 0x296   :  { %13665 = vst [vmem:[#allocation17_spill] sm:$0xff] %v10635_v11  ;;  %13666 = vst [vmem:[#allocation83_spill] sm:$0xff] %v10638_v46  ;;  %7409 = vmatprep.subr.mxu1 %v4001_v63  ;;  %8064 = vmatpush3.msra.mxu0 %v13664_v45  ;;  %v10653_v57 = vsub.f32 %v10545_v1, %v13668_v5  ;;  %v4022_v63 = vand.u32 4294901760, %v10605_v27  ;;  %v13671_v56 = vand.u32 4294901760, %v10557_v35  ;;  %v13672_v45 = vand.u32 4294901760, %v10560_v2  ;;  %v10676_v5 = vpop.f32.mrf.mxu1 }
 0x297   :  { %13667 = vst [vmem:[#allocation48_spill] sm:$0xff] %v10646_v22  ;;  %13669 = vst [vmem:[#allocation18_spill] sm:$0xff] %v10656_v3  ;;  %7410 = vmatpush3.msra.mxu1 %v3889_v9  ;;  %8066 = vmatmul.mubr.f32.vlgmr.msra.gmra.mxu0 %v13643_v39  ;;  %v1373_v9 = vld [vmem:[%s12949_s4 + $0x98] sm:$0xff]  ;;  %v13673_v55 = vand.u32 4294901760, %v10575_v47  ;;  %v6972_v27 = vadd.f32 %v10538_v42, %v10516_v36  ;;  %v10708_v1 = vsub.f32 %v1359_v49, %v10658_v10  ;;  %v1356_v42 = vld [vmem:[%s12949_s4 + $0x10] sm:$0xff] }
 0x298   :  { %13670 = vst [vmem:[#allocation84_spill] sm:$0xff] %v10658_v10  ;;  %v10666_v43 = vsub.f32 %v10557_v35, %v13671_v56  ;;  %v10671_v7 = vsub.f32 %v10560_v2, %v13672_v45  ;;  %8116 = vmatmul.mubr.f32.gmra.mxu1 %v10123_v38  ;;  %7347 = vmatprep.subr.mxu0 %v10282_v12  ;;  %v10686_v56 = vand.u32 4294901760, %v1374_v33  ;;  %v10688_v45 = vand.u32 4294901760, %v1358_v51  ;;  %v6915_v2 = vpop.f32.mrf.mxu0  ;;  %v10701_v22 = vpop.f32.mrf.mxu1  ;;  %v1371_v49 = vld [vmem:[%s12949_s4 + $0x88] sm:$0xff] }
 0x299   :  { %v10683_v39 = vsub.f32 %v10575_v47, %v13673_v55  ;;  %7411 = vmatprep.subr.mxu1 %v4008_v26  ;;  %8068 = vmatprep.mubr.f32.mxu0 %v13645_v25  ;;  %v1372_v55 = vld [vmem:[%s12949_s4 + $0x90] sm:$0xff]  ;;  %v6916_v47 = vadd.f32 %v6915_v2, %v6914_v15  ;;  %v3910_v25 = vand.u32 4294901760, %v10653_v57  ;;  %v10710_v35 = vand.u32 4294901760, %v1373_v9 }
 0x29a   :  { %13674 = vst [vmem:[#allocation20_spill] sm:$0xff] %v10686_v56  ;;  %8118 = vmatprep.mubr.f32.mxu1 %v10137_v28  ;;  %7348 = vmatpush3.msra.mxu0 %v10291_v21  ;;  %v4029_v36 = vand.u32 4294901760, %v10666_v43  ;;  %v3917_v2 = vand.u32 4294901760, %v10671_v7  ;;  %v10718_v15 = vand.u32 4294901760, %v1357_v16  ;;  %v13676_v26 = vand.u32 4294901760, %v10625_v53 }
 0x29b   :  { %7412 = vmatpush3.msra.mxu1 %v3896_v61  ;;  %7349 = vmatprep.subr.mxu0 %v10298_v59  ;;  %v10723_v57 = vadd.f32 %v6972_v27, %v6916_v47  ;;  %v10732_v43 = vsub.f32 %v1374_v33, %v10686_v56  ;;  %v10735_v7 = vsub.f32 %v1358_v51, %v10688_v45  ;;  %v10737_v59 = vand.u32 4294901760, %v1372_v55  ;;  %v1355_v47 = vld [vmem:[%s12949_s4 + $0x8] sm:$0xff] }
 0x29c   :  { %7413 = vmatprep.subr.mxu1 %v4015_v34  ;;  %7350 = vmatpush3.msra.mxu0 %v10312_v32  ;;  %v10729_v61 = vsub.f32 %v10625_v53, %v13676_v26  ;;  %v6917_v34 = vpop.f32.mrf.mxu0  ;;  %v4036_v27 = vand.u32 4294901760, %v10683_v39  ;;  %v13677_v26 = vand.u32 4294901760, %v10635_v11  ;;  %v13678_v51 = vand.u32 4294901760, %v10638_v46 }
 0x29d   :  { %13675 = vst [vmem:[#allocation35_spill] sm:$0xff] %v10723_v57  ;;  %7414 = vmatpush3.msra.mxu1 %v3903_v24  ;;  %8069 = vmatmul.mubr.f32.gmra.mxu0 %v13660_v60  ;;  %v10754_v57 = vand.u32 4294901760, %v1356_v42  ;;  %v1370_v24 = vld [vmem:[%s12949_s4 + $0x80] sm:$0xff]  ;;  %v10759_v32 = vpop.f32.mrf.mxu1  ;;  %v13679_v60 = vand.u32 4294901760, %v10656_v3 }
 0x29e   :  { %v10747_v33 = vsub.f32 %v10635_v11, %v13677_v26  ;;  %v10752_v53 = vsub.f32 %v10638_v46, %v13678_v51  ;;  %8119 = vmatmul.mubr.f32.gmra.mxu1 %v10151_v44  ;;  %7351 = vmatprep.subr.mxu0 %v10324_v62  ;;  %v10770_v51 = vsub.f32 %v1373_v9, %v10710_v35  ;;  %v10772_v46 = vand.u32 4294901760, %v1371_v49  ;;  %v1354_v11 = vld [vmem:[%s12949_s4] sm:$0xff]  ;;  %v6918_v21 = vpop.f32.mrf.mxu0 }
 0x29f   :  { %v10766_v39 = vsub.f32 %v10656_v3, %v13679_v60  ;;  %7415 = vmatprep.subr.mxu1 %v4022_v63  ;;  %8071 = vmatprep.mubr.f32.mxu0 %v13661_v19  ;;  %v10779_v62 = vsub.f32 %v1357_v16, %v10718_v15  ;;  %v10781_v60 = vand.u32 4294901760, %v1355_v47  ;;  %v6975_v26 = vadd.f32 %v10618_v29, %v10594_v18  ;;  %v10785_v3 = vpop.f32.mrf.mxu1 }
 0x2a0   :  { %13680 = vst [vmem:[#allocation24_spill] sm:$0xff] %v10770_v51  ;;  %13681 = vst [vmem:[#allocation39_spill] sm:$0xff] %v10772_v46  ;;  %v6919_v9 = vadd.f32 %v6918_v21, %v6917_v34  ;;  %7352 = vmatpush3.msra.mxu0 %v10345_v30  ;;  %7416 = vmatpush3.msra.mxu1 %v3910_v25  ;;  %v10791_v19 = vsub.f32 %v1372_v55, %v10737_v59  ;;  %v10793_v16 = vand.u32 4294901760, %v1370_v24 }
 0x2a1   :  { %13682 = vst [vmem:[#allocation52_spill] sm:$0xff] %v10779_v62  ;;  %4088 = vmatprep.mubr.f32.mxu1 %v10338_v0  ;;  %7353 = vmatprep.subr.mxu0 %v10352_v6  ;;  %v3924_v21 = vand.u32 4294901760, %v10729_v61  ;;  %v10799_v18 = vsub.f32 %v1356_v42, %v10754_v57  ;;  %v10801_v29 = vand.u32 4294901760, %v1354_v11  ;;  %v4043_v55 = vand.u32 4294901760, %v10747_v33 }
 0x2a2   :  { %13683 = vst [vmem:[#allocation3_spill] sm:$0xff] %v10791_v19  ;;  %v10803_v25 = vadd.f32 %v6975_v26, %v6919_v9  ;;  %7417 = vmatprep.subr.mxu1 %v4029_v36  ;;  %7354 = vmatpush3.msra.mxu0 %v10362_v17  ;;  %v3931_v34 = vand.u32 4294901760, %v10752_v53  ;;  %v10810_v12 = vsub.f32 %v1371_v49, %v10772_v46  ;;  %v6920_v61 = vpop.f32.mrf.mxu0  ;;  %v4050_v42 = vand.u32 4294901760, %v10766_v39 }
 0x2a3   :  { %13684 = vst [vmem:[#allocation32_spill] sm:$0xff] %v10799_v18  ;;  %7418 = vmatpush3.msra.mxu1 %v3917_v2  ;;  %8072 = vmatmul.mubr.f32.gmra.mxu0 %v10123_v38  ;;  %v13686_v26 = vand.u32 4294901760, %v10708_v1  ;;  %v10819_v33 = vsub.f32 %v1355_v47, %v10781_v60  ;;  %v10821_v53 = vpop.f32.mrf.mxu1  ;;  %v13688_v2 = vand.u32 4294901760, %v10732_v43  ;;  %v13689_v49 = vand.u32 4294901760, %v10735_v7 }
 0x2a4   :  { %13685 = vst [vmem:[#allocation27_spill] sm:$0xff] %v10810_v12  ;;  %7355 = vmatprep.subr.mxu0 %v10418_v54  ;;  %7419 = vmatprep.subr.mxu1 %v4036_v27  ;;  %v10832_v9 = vsub.f32 %v1370_v24, %v10793_v16  ;;  %v6921_v47 = vpop.f32.mrf.mxu0  ;;  %v10838_v63 = vsub.f32 %v1354_v11, %v10801_v29  ;;  %v13692_v24 = vand.u32 4294901760, %v10770_v51  ;;  %v13693_v27 = vand.u32 4294901760, %v10779_v62 }
 0x2a5   :  { %v3937_v36 = vsub.f32 %v10708_v1, %v13686_v26  ;;  %13687 = vst [vmem:[#allocation41_spill] sm:$0xff] %v10819_v33  ;;  %v4056_v38 = vsub.f32 %v10732_v43, %v13688_v2  ;;  %v3944_v39 = vsub.f32 %v10735_v7, %v13689_v49  ;;  %8074 = vmatprep.mubr.f32.mxu0 %v10137_v28  ;;  %v10842_v49 = vpop.f32.mrf.mxu1 }
 0x2a6   :  { %13690 = vst [vmem:[#allocation34_spill] sm:$0xff] %v10832_v9  ;;  %7356 = vmatpush3.msra.mxu0 %v10427_v23  ;;  %13691 = vst [vmem:[#allocation5_spill] sm:$0xff] %v10838_v63  ;;  %v6978_v2 = vadd.f32 %v10701_v22, %v10676_v5  ;;  %v6922_v0 = vadd.f32 %v6921_v47, %v6920_v61  ;;  %7420 = vmatpush3.msra.mxu1 %v3924_v21  ;;  %v13240_v5 = vand.u32 4294901760, %v10819_v33 }
 0x2a7   :  { %7357 = vmatprep.subr.mxu0 %v10429_v37  ;;  %v4063_v28 = vsub.f32 %v10770_v51, %v13692_v24  ;;  %7421 = vmatprep.subr.mxu1 %v4043_v55  ;;  %v3938_v11 = vand.u32 4294901760, %v3937_v36  ;;  %v3951_v22 = vsub.f32 %v10779_v62, %v13693_v27  ;;  %v3746_v21 = vand.u32 4294901760, %v10630_v14 }
 0x2a8   :  { %7358 = vmatpush3.msra.mxu0 %v10438_v20  ;;  %v10854_v61 = vadd.f32 %v6978_v2, %v6922_v0  ;;  %7422 = vmatpush3.msra.mxu1 %v3931_v34  ;;  %v4057_v47 = vand.u32 4294901760, %v4056_v38  ;;  %v13694_v24 = vand.u32 4294901760, %v10791_v19  ;;  %v7011_v26 = vpop.f32.mrf.mxu0  ;;  %v3945_v27 = vand.u32 4294901760, %v3944_v39 }
 0x2a9   :  { %8075 = vmatmul.mubr.f32.gmra.mxu0 %v10151_v44  ;;  %7359 = vmatprep.subr.mxu0 %v10440_v48  ;;  %v13695_v0 = vand.u32 4294901760, %v10799_v18  ;;  %v10867_v2 = vpop.f32.mrf.mxu1  ;;  %v4064_v14 = vand.u32 4294901760, %v4063_v28  ;;  %v13696_v38 = vand.u32 4294901760, %v10810_v12  ;;  %v3965_v39 = vsub.f32 %v10819_v33, %v13240_v5 }
 0x2aa   :  { %v4070_v55 = vsub.f32 %v10791_v19, %v13694_v24  ;;  %7423 = vmatprep.subr.mxu1 %v4050_v42  ;;  %7360 = vmatpush3.msra.mxu0 %v10502_v50  ;;  %v7012_v36 = vpop.f32.mrf.mxu0  ;;  %v3952_v42 = vand.u32 4294901760, %v3951_v22  ;;  %v13700_v5 = vand.u32 4294901760, %v10838_v63  ;;  %v13718_v19 = vld [vmem:[#allocation59_spill] sm:$0xff] }
 0x2ab   :  { %v3958_v34 = vsub.f32 %v10799_v18, %v13695_v0  ;;  %3747 = vmatprep.mubr.f32.mxu0 %v3746_v21  ;;  %v4077_v24 = vsub.f32 %v10810_v12, %v13696_v38  ;;  %7424 = vmatpush3.msra.mxu1 %v3938_v11  ;;  %v7013_v0 = vadd.f32 %v7012_v36, %v7011_v26  ;;  %v10877_v44 = vpop.f32.mrf.mxu1  ;;  %v13697_v21 = vand.u32 4294901760, %v10832_v9  ;;  %v13698_v12 = vld [vmem:[#allocation50_spill] sm:$0xff]  ;;  %v13716_v18 = vld [vmem:[#allocation64_spill] sm:$0xff] }
 0x2ac   :  { %7361 = vmatprep.subr.mxu0 %v10512_v52  ;;  %7425 = vmatprep.subr.mxu1 %v4057_v47  ;;  %v4071_v28 = vand.u32 4294901760, %v4070_v55  ;;  %v10884_v11 = vand.u32 4294901760, %v13698_v12  ;;  %v3972_v26 = vsub.f32 %v10838_v63, %v13700_v5  ;;  %v7069_v47 = vadd.f32 %v10785_v3, %v10759_v32 }
 0x2ad   :  { %7362 = vmatpush3.msra.mxu0 %v10514_v8  ;;  %v4084_v38 = vsub.f32 %v10832_v9, %v13697_v21  ;;  %7426 = vmatpush3.msra.mxu1 %v3945_v27  ;;  %v3959_v22 = vand.u32 4294901760, %v3958_v34  ;;  %v2083_v55 = vadd.f32 %v7013_v0, %v10340_v4  ;;  %v4078_v36 = vand.u32 4294901760, %v4077_v24  ;;  %v13701_v9 = vld [vmem:[#allocation53_spill] sm:$0xff] }
 0x2ae   :  { %13699 = vst [vmem:[#allocation30_spill] sm:$0xff] %v10884_v11  ;;  %7363 = vmatprep.subr.mxu0 %v10527_v40  ;;  %7427 = vmatprep.subr.mxu1 %v4064_v14  ;;  %v7014_v21 = vpop.f32.mrf.mxu0  ;;  %v3966_v27 = vand.u32 4294901760, %v3965_v39  ;;  %v10896_v34 = vand.u32 4294901760, %v13701_v9  ;;  %v3973_v3 = vand.u32 4294901760, %v3972_v26  ;;  %v10906_v14 = vsub.f32 %v13698_v12, %v10884_v11  ;;  %v13703_v39 = vld [vmem:[#allocation51_spill] sm:$0xff]  ;;  %v13706_v26 = vld [vmem:[#allocation54_spill] sm:$0xff] }
 0x2af   :  { %7364 = vmatpush3.msra.mxu0 %v10577_v31  ;;  %7428 = vmatpush3.msra.mxu1 %v3952_v42  ;;  %v10898_v33 = vpop.f32.mrf.mxu1  ;;  %v10900_v5 = vadd.f32 %v7069_v47, %v2083_v55  ;;  %v4085_v32 = vand.u32 4294901760, %v4084_v38  ;;  %v10912_v0 = vand.u32 4294901760, %v13703_v39  ;;  %v7072_v12 = vadd.f32 %v10842_v49, %v10821_v53  ;;  %v13705_v38 = vld [vmem:[#allocation82_spill] sm:$0xff]  ;;  %v13708_v53 = vld [vmem:[#allocation36_spill] sm:$0xff] }
 0x2b0   :  { %7365 = vmatprep.subr.mxu0 %v10590_v13  ;;  %13702 = vst [vmem:[#allocation50_spill] sm:$0xff] %v10896_v34  ;;  %7429 = vmatprep.subr.mxu1 %v4071_v28  ;;  %v7015_v4 = vpop.f32.mrf.mxu0  ;;  %v10917_v28 = vsub.f32 %v13701_v9, %v10896_v34  ;;  %v10924_v47 = vand.u32 4294901760, %v13706_v26 }
 0x2b1   :  { %7366 = vmatpush3.msra.mxu0 %v10592_v41  ;;  %7430 = vmatpush3.msra.mxu1 %v3959_v22  ;;  %v7016_v24 = vadd.f32 %v7015_v4, %v7014_v21  ;;  %v10908_v42 = vpop.f32.mrf.mxu1  ;;  %13704 = vst [vmem:[#allocation53_spill] sm:$0xff] %v10912_v0  ;;  %v10936_v49 = vsub.f32 %v13703_v39, %v10912_v0 }
 0x2b2   :  { %7367 = vmatprep.subr.mxu0 %v10608_v58  ;;  %7431 = vmatprep.subr.mxu1 %v4078_v36  ;;  %13707 = vst [vmem:[#allocation51_spill] sm:$0xff] %v10924_v47  ;;  %v13253_v36 = vand.u32 4294901760, %v10906_v14  ;;  %v10950_v39 = vsub.f32 %v13706_v26, %v10924_v47  ;;  %v13723_v26 = vld [vmem:[#allocation69_spill] sm:$0xff] }
 0x2b3   :  { %7368 = vmatpush3.msra.mxu0 %v10658_v10  ;;  %7432 = vmatpush3.msra.mxu1 %v3966_v27  ;;  %v2092_v22 = vadd.f32 %v7016_v24, %v13705_v38  ;;  %13709 = vst [vmem:[#allocation82_spill] sm:$0xff] %v10936_v49  ;;  %v13710_v24 = vld [vmem:[#allocation6_spill] sm:$0xff] }
 0x2b4   :  { %7369 = vmatprep.subr.mxu0 %v10686_v56  ;;  %7433 = vmatprep.subr.mxu1 %v4085_v32  ;;  %v7017_v55 = vpop.f32.mrf.mxu0  ;;  %v13714_v32 = vld [vmem:[#allocation33_spill] sm:$0xff] }
 0x2b5   :  { %7370 = vmatpush3.msra.mxu0 %v10688_v45  ;;  %7434 = vmatpush3.msra.mxu1 %v3973_v3  ;;  %v10928_v21 = vpop.f32.mrf.mxu1  ;;  %v10930_v9 = vadd.f32 %v7072_v12, %v2092_v22  ;;  %v13711_v12 = vld [vmem:[#allocation55_spill] sm:$0xff]  ;;  %v13713_v22 = vld [vmem:[#allocation38_spill] sm:$0xff] }
 0x2b6   :  { %7371 = vmatprep.subr.mxu0 %v10710_v35  ;;  %4090 = vmatmul.mubr.f32.vlgmr.msra.gmra.mxu1 %v10884_v11  ;;  %v7018_v27 = vpop.f32.mrf.mxu0  ;;  %v10946_v38 = vand.u32 4294901760, %v13711_v12  ;;  %v13715_v11 = vld [vmem:[#allocation7_spill] sm:$0xff] }
 0x2b7   :  { %7515 = vmatprep.subr.mxu1 %v13708_v53  ;;  %7372 = vmatpush3.msra.mxu0 %v10718_v15  ;;  %v7019_v4 = vadd.f32 %v7018_v27, %v7017_v55  ;;  %v10941_v3 = vpop.f32.mrf.mxu1  ;;  %v3751_v55 = vsub.f32 %v10906_v14, %v13253_v36  ;;  %v7075_v27 = vadd.f32 %v10877_v44, %v10867_v2 }
 0x2b8   :  { %4095 = vmatprep.mubr.f32.mxu1 %v10896_v34  ;;  %7516 = vmatpush3.msra.mxu1 %v13710_v24  ;;  %13712 = vst [vmem:[#allocation54_spill] sm:$0xff] %v10946_v38  ;;  %v10969_v24 = vand.u32 4294901760, %v13718_v19 }
 0x2b9   :  { %7373 = vmatprep.subr.mxu0 %v10737_v59  ;;  %7517 = vmatprep.subr.mxu1 %v13713_v22  ;;  %v2101_v34 = vadd.f32 %v7019_v4, %v13714_v32  ;;  %v13717_v22 = vand.u32 4294901760, %v10917_v28  ;;  %v10979_v32 = vsub.f32 %v13711_v12, %v10946_v38 }
 0x2ba   :  { %7374 = vmatpush3.msra.mxu0 %v10754_v57  ;;  %7518 = vmatpush3.msra.mxu1 %v13715_v11  ;;  %v7020_v63 = vpop.f32.mrf.mxu0  ;;  %13719 = vst [vmem:[#allocation36_spill] sm:$0xff] %v10969_v24 }
 0x2bb   :  { %7375 = vmatprep.subr.mxu0 %v10772_v46  ;;  %4097 = vmatmul.mubr.f32.gmra.mxu1 %v10912_v0  ;;  %v3760_v36 = vsub.f32 %v10917_v28, %v13717_v22  ;;  %v10971_v44 = vpop.f32.mrf.mxu1  ;;  %v10973_v2 = vadd.f32 %v7075_v27, %v2101_v34  ;;  %v3752_v22 = vand.u32 4294901760, %v3751_v55  ;;  %v13720_v34 = vand.u32 4294901760, %v10936_v49  ;;  %v13721_v27 = vld [vmem:[#allocation63_spill] sm:$0xff] }
 0x2bc   :  { %7519 = vmatprep.subr.mxu1 %v13716_v18  ;;  %7376 = vmatpush3.msra.mxu0 %v10781_v60  ;;  %v7021_v4 = vpop.f32.mrf.mxu0 }
 0x2bd   :  { %4102 = vmatprep.mubr.f32.mxu1 %v10924_v47  ;;  %7520 = vmatpush3.msra.mxu1 %v10345_v30  ;;  %v7022_v0 = vadd.f32 %v7021_v4, %v7020_v63  ;;  %v10984_v18 = vpop.f32.mrf.mxu1  ;;  %v3766_v12 = vsub.f32 %v10936_v49, %v13720_v34  ;;  %v10992_v47 = vand.u32 4294901760, %v13721_v27  ;;  %v3761_v55 = vand.u32 4294901760, %v3760_v36  ;;  %v13724_v30 = vld [vmem:[#allocation40_spill] sm:$0xff] }
 0x2be   :  { %7377 = vmatprep.subr.mxu0 %v10793_v16  ;;  %7521 = vmatprep.subr.mxu1 %v10352_v6  ;;  %v10997_v63 = vsub.f32 %v13718_v19, %v10969_v24  ;;  %v7078_v4 = vadd.f32 %v10908_v42, %v10898_v33  ;;  %v13725_v36 = vand.u32 4294901760, %v10950_v39  ;;  %v13729_v34 = vld [vmem:[#allocation8_spill] sm:$0xff] }
 0x2bf   :  { %7378 = vmatpush3.msra.mxu0 %v10801_v29  ;;  %13722 = vst [vmem:[#allocation55_spill] sm:$0xff] %v10992_v47  ;;  %7522 = vmatpush3.msra.mxu1 %v10362_v17  ;;  %v2110_v6 = vadd.f32 %v7022_v0, %v13723_v26  ;;  %v13728_v0 = vld [vmem:[#allocation42_spill] sm:$0xff]  ;;  %v11020_v26 = vsub.f32 %v13721_v27, %v10992_v47 }
 0x2c0   :  { %3753 = vmatmul.mubr.f32.vlgmr.msra.gmra.mxu0 %v3752_v22  ;;  %4104 = vmatmul.mubr.f32.gmra.mxu1 %v10946_v38  ;;  %v7023_v49 = vpop.f32.mrf.mxu0  ;;  %v3775_v19 = vsub.f32 %v10950_v39, %v13725_v36  ;;  %v13726_v22 = vld [vmem:[#allocation66_spill] sm:$0xff]  ;;  %v3767_v36 = vand.u32 4294901760, %v3766_v12  ;;  %v13734_v38 = vld [vmem:[#allocation48_spill] sm:$0xff] }
 0x2c1   :  { %7459 = vmatprep.subr.mxu0 %v13724_v30  ;;  %7523 = vmatprep.subr.mxu1 %v10418_v54  ;;  %v11010_v17 = vand.u32 4294901760, %v13726_v22  ;;  %v11012_v33 = vpop.f32.mrf.mxu1  ;;  %v11014_v42 = vadd.f32 %v7078_v4, %v2110_v6  ;;  %v13730_v6 = vld [vmem:[#allocation4_spill] sm:$0xff]  ;;  %v13731_v4 = vand.u32 4294901760, %v10979_v32 }
 0x2c2   :  { %3762 = vmatprep.mubr.f32.mxu0 %v3761_v55  ;;  %4109 = vmatprep.mubr.f32.mxu1 %v10969_v24  ;;  %v7024_v55 = vpop.f32.mrf.mxu0  ;;  %v13732_v24 = vld [vmem:[#allocation68_spill] sm:$0xff]  ;;  %v3776_v12 = vand.u32 4294901760, %v3775_v19  ;;  %v13736_v19 = vand.u32 4294901760, %v10997_v63 }
 0x2c3   :  { %13727 = vst [vmem:[#allocation33_spill] sm:$0xff] %v11010_v17  ;;  %7460 = vmatpush3.msra.mxu0 %v13728_v0  ;;  %7524 = vmatpush3.msra.mxu1 %v10427_v23  ;;  %v7025_v54 = vadd.f32 %v7024_v55, %v7023_v49  ;;  %v11025_v30 = vpop.f32.mrf.mxu1  ;;  %v3781_v27 = vsub.f32 %v10979_v32, %v13731_v4  ;;  %v11033_v0 = vand.u32 4294901760, %v13732_v24  ;;  %v13740_v4 = vld [vmem:[#allocation21_spill] sm:$0xff] }
 0x2c4   :  { %7461 = vmatprep.subr.mxu0 %v13729_v34  ;;  %7525 = vmatprep.subr.mxu1 %v10429_v37  ;;  %v11038_v49 = vsub.f32 %v13726_v22, %v11010_v17  ;;  %v7081_v55 = vadd.f32 %v10941_v3, %v10928_v21  ;;  %v13735_v37 = vld [vmem:[#allocation11_spill] sm:$0xff]  ;;  %v3790_v22 = vsub.f32 %v10997_v63, %v13736_v19  ;;  %v13739_v3 = vld [vmem:[#allocation12_spill] sm:$0xff] }
 0x2c5   :  { %7462 = vmatpush3.msra.mxu0 %v13730_v6  ;;  %13733 = vst [vmem:[#allocation7_spill] sm:$0xff] %v11033_v0  ;;  %7526 = vmatpush3.msra.mxu1 %v10438_v20  ;;  %v2119_v6 = vadd.f32 %v7025_v54, %v13734_v38  ;;  %v11064_v19 = vsub.f32 %v13732_v24, %v11033_v0 }
 0x2c6   :  { %3768 = vmatmul.mubr.f32.gmra.mxu0 %v3767_v36  ;;  %4111 = vmatmul.mubr.f32.gmra.mxu1 %v10992_v47  ;;  %v7026_v34 = vpop.f32.mrf.mxu0  ;;  %v13737_v36 = vld [vmem:[#allocation71_spill] sm:$0xff] }
 0x2c7   :  { %7463 = vmatprep.subr.mxu0 %v13735_v37  ;;  %7527 = vmatprep.subr.mxu1 %v10440_v48  ;;  %v11051_v20 = vand.u32 4294901760, %v13737_v36  ;;  %v11053_v21 = vpop.f32.mrf.mxu1  ;;  %v11055_v54 = vadd.f32 %v7081_v55, %v2119_v6  ;;  %v13741_v6 = vld [vmem:[#allocation13_spill] sm:$0xff]  ;;  %v13742_v55 = vand.u32 4294901760, %v11020_v26 }
 0x2c8   :  { %3777 = vmatprep.mubr.f32.mxu0 %v3776_v12  ;;  %4116 = vmatprep.mubr.f32.mxu1 %v11010_v17  ;;  %v7027_v38 = vpop.f32.mrf.mxu0  ;;  %v3782_v12 = vand.u32 4294901760, %v3781_v27  ;;  %v3791_v27 = vand.u32 4294901760, %v3790_v22  ;;  %v13749_v22 = vand.u32 4294901760, %v11038_v49 }
 0x2c9   :  { %13738 = vst [vmem:[#allocation59_spill] sm:$0xff] %v11051_v20  ;;  %7464 = vmatpush3.msra.mxu0 %v13739_v3  ;;  %7528 = vmatpush3.msra.mxu1 %v10502_v50  ;;  %v7028_v48 = vadd.f32 %v7027_v38, %v7026_v34  ;;  %v11066_v37 = vpop.f32.mrf.mxu1  ;;  %v3796_v17 = vsub.f32 %v11020_v26, %v13742_v55  ;;  %v13743_v50 = vld [vmem:[#allocation72_spill] sm:$0xff]  ;;  %v13745_v38 = vld [vmem:[#allocation35_spill] sm:$0xff]  ;;  %v13747_v55 = vld [vmem:[#allocation73_spill] sm:$0xff] }
 0x2ca   :  { %7465 = vmatprep.subr.mxu0 %v13740_v4  ;;  %7529 = vmatprep.subr.mxu1 %v10512_v52  ;;  %v11074_v4 = vand.u32 4294901760, %v13743_v50  ;;  %v11079_v24 = vsub.f32 %v13737_v36, %v11051_v20  ;;  %v7084_v34 = vadd.f32 %v10984_v18, %v10971_v44  ;;  %v11087_v52 = vand.u32 4294901760, %v13747_v55 }
 0x2cb   :  { %7466 = vmatpush3.msra.mxu0 %v13741_v6  ;;  %7530 = vmatpush3.msra.mxu1 %v10514_v8  ;;  %v2128_v47 = vadd.f32 %v7028_v48, %v13745_v38  ;;  %v13746_v6 = vld [vmem:[#allocation28_spill] sm:$0xff]  ;;  %v3805_v36 = vsub.f32 %v11038_v49, %v13749_v22 }
 0x2cc   :  { %13744 = vst [vmem:[#allocation63_spill] sm:$0xff] %v11074_v4  ;;  %3783 = vmatmul.mubr.f32.gmra.mxu0 %v3782_v12  ;;  %4118 = vmatmul.mubr.f32.gmra.mxu1 %v11033_v0  ;;  %13748 = vst [vmem:[#allocation69_spill] sm:$0xff] %v11087_v52  ;;  %v7029_v3 = vpop.f32.mrf.mxu0  ;;  %v13750_v48 = vld [vmem:[#allocation16_spill] sm:$0xff]  ;;  %v13751_v0 = vld [vmem:[#allocation29_spill] sm:$0xff]  ;;  %v11103_v22 = vsub.f32 %v13743_v50, %v11074_v4 }
 0x2cd   :  { %7467 = vmatprep.subr.mxu0 %v13746_v6  ;;  %7531 = vmatprep.subr.mxu1 %v10527_v40  ;;  %v7179_v18 = vpop.f32.mrf.mxu1  ;;  %v11094_v44 = vadd.f32 %v7084_v34, %v2128_v47  ;;  %v3797_v40 = vand.u32 4294901760, %v3796_v17  ;;  %v13752_v47 = vld [vmem:[#allocation22_spill] sm:$0xff]  ;;  %v13753_v34 = vld [vmem:[#allocation76_spill] sm:$0xff]  ;;  %v3806_v50 = vand.u32 4294901760, %v3805_v36 }
 0x2ce   :  { %3792 = vmatprep.mubr.f32.mxu0 %v3791_v27  ;;  %4123 = vmatprep.mubr.f32.mxu1 %v11051_v20  ;;  %v7030_v38 = vpop.f32.mrf.mxu0  ;;  %v11108_v20 = vand.u32 4294901760, %v13753_v34  ;;  %v7087_v27 = vadd.f32 %v11025_v30, %v11012_v33 }
 0x2cf   :  { %7468 = vmatpush3.msra.mxu0 %v13750_v48  ;;  %7532 = vmatpush3.msra.mxu1 %v10577_v31  ;;  %v7031_v12 = vadd.f32 %v7030_v38, %v7029_v3  ;;  %v7180_v6 = vpop.f32.mrf.mxu1  ;;  %v11112_v31 = vsub.f32 %v13747_v55, %v11087_v52  ;;  %v13755_v3 = vand.u32 4294901760, %v11064_v19  ;;  %v13757_v55 = vld [vmem:[#allocation79_spill] sm:$0xff] }
 0x2d0   :  { %7469 = vmatprep.subr.mxu0 %v13751_v0  ;;  %7533 = vmatprep.subr.mxu1 %v10590_v13  ;;  %13754 = vst [vmem:[#allocation66_spill] sm:$0xff] %v11108_v20  ;;  %v11114_v17 = vadd.f32 %v7180_v6, %v7179_v18  ;;  %v13756_v13 = vld [vmem:[#allocation60_spill] sm:$0xff]  ;;  %v11126_v6 = vand.u32 4294901760, %v13757_v55 }
 0x2d1   :  { %7470 = vmatpush3.msra.mxu0 %v13752_v47  ;;  %7534 = vmatpush3.msra.mxu1 %v10592_v41  ;;  %v3811_v38 = vsub.f32 %v11064_v19, %v13755_v3  ;;  %v2137_v47 = vadd.f32 %v7031_v12, %v10803_v25  ;;  %v13760_v25 = vld [vmem:[#allocation62_spill] sm:$0xff] }
 0x2d2   :  { %3798 = vmatmul.mubr.f32.gmra.mxu0 %v3797_v40  ;;  %4125 = vmatmul.mubr.f32.gmra.mxu1 %v11074_v4  ;;  %13758 = vst [vmem:[#allocation68_spill] sm:$0xff] %v11126_v6  ;;  %v7032_v18 = vpop.f32.mrf.mxu0  ;;  %v13759_v40 = vand.u32 4294901760, %v11079_v24  ;;  %v13761_v4 = vld [vmem:[#allocation65_spill] sm:$0xff] }
 0x2d3   :  { %7471 = vmatprep.subr.mxu0 %v13756_v13  ;;  %7535 = vmatprep.subr.mxu1 %v10608_v58  ;;  %v7182_v30 = vpop.f32.mrf.mxu1  ;;  %v11133_v33 = vadd.f32 %v7087_v27, %v2137_v47  ;;  %v3812_v58 = vand.u32 4294901760, %v3811_v38  ;;  %v13762_v27 = vld [vmem:[#allocation67_spill] sm:$0xff]  ;;  %v13763_v47 = vld [vmem:[#allocation80_spill] sm:$0xff] }
 0x2d4   :  { %3807 = vmatprep.mubr.f32.mxu0 %v3806_v50  ;;  %v3820_v36 = vsub.f32 %v11079_v24, %v13759_v40  ;;  %4130 = vmatprep.mubr.f32.mxu1 %v11087_v52  ;;  %v7033_v12 = vpop.f32.mrf.mxu0  ;;  %v11142_v40 = vsub.f32 %v13753_v34, %v11108_v20  ;;  %v11147_v52 = vand.u32 4294901760, %v13763_v47  ;;  %v7090_v50 = vadd.f32 %v11066_v37, %v11053_v21  ;;  %v13768_v37 = vld [vmem:[#allocation78_spill] sm:$0xff]  ;;  %v13769_v21 = vld [vmem:[#allocation17_spill] sm:$0xff] }
 0x2d5   :  { %7472 = vmatpush3.msra.mxu0 %v13760_v25  ;;  %7536 = vmatpush3.msra.mxu1 %v10658_v10  ;;  %v7034_v3 = vadd.f32 %v7033_v12, %v7032_v18  ;;  %v7183_v13 = vpop.f32.mrf.mxu1  ;;  %v11151_v10 = vsub.f32 %v13757_v55, %v11126_v6  ;;  %v13765_v18 = vand.u32 4294901760, %v11103_v22 }
 0x2d6   :  { %7473 = vmatprep.subr.mxu0 %v13761_v4  ;;  %7537 = vmatprep.subr.mxu1 %v10686_v56  ;;  %13764 = vst [vmem:[#allocation48_spill] sm:$0xff] %v11147_v52  ;;  %v11153_v38 = vadd.f32 %v7183_v13, %v7182_v30  ;;  %v3821_v34 = vand.u32 4294901760, %v3820_v36  ;;  %v13766_v56 = vld [vmem:[#allocation70_spill] sm:$0xff] }
 0x2d7   :  { %7474 = vmatpush3.msra.mxu0 %v13762_v27  ;;  %7538 = vmatpush3.msra.mxu1 %v10688_v45  ;;  %v3826_v12 = vsub.f32 %v11103_v22, %v13765_v18  ;;  %v2146_v27 = vadd.f32 %v7034_v3, %v10854_v61 }
 0x2d8   :  { %3813 = vmatmul.mubr.f32.gmra.mxu0 %v3812_v58  ;;  %4132 = vmatmul.mubr.f32.gmra.mxu1 %v11108_v20  ;;  %v7123_v55 = vpop.f32.mrf.mxu0  ;;  %v13767_v58 = vand.u32 4294901760, %v11112_v31 }
 0x2d9   :  { %7475 = vmatprep.subr.mxu0 %v13766_v56  ;;  %7539 = vmatprep.subr.mxu1 %v10710_v35  ;;  %v7185_v30 = vpop.f32.mrf.mxu1  ;;  %v11169_v18 = vadd.f32 %v7090_v50, %v2146_v27  ;;  %v3827_v3 = vand.u32 4294901760, %v3826_v12  ;;  %v13770_v50 = vld [vmem:[#allocation83_spill] sm:$0xff] }
 0x2da   :  { %3822 = vmatprep.mubr.f32.mxu0 %v3821_v34  ;;  %v3835_v13 = vsub.f32 %v11112_v31, %v13767_v58  ;;  %4137 = vmatprep.mubr.f32.mxu1 %v11126_v6  ;;  %v7124_v61 = vpop.f32.mrf.mxu0  ;;  %v11178_v58 = vsub.f32 %v13763_v47, %v11147_v52  ;;  %v13772_v47 = vld [vmem:[#allocation18_spill] sm:$0xff] }
 0x2db   :  { %7476 = vmatpush3.msra.mxu0 %v13768_v37  ;;  %7540 = vmatpush3.msra.mxu1 %v10718_v15  ;;  %v7125_v36 = vadd.f32 %v7124_v61, %v7123_v55  ;;  %v7186_v20 = vpop.f32.mrf.mxu1 }
 0x2dc   :  { %7477 = vmatprep.subr.mxu0 %v13769_v21  ;;  %7541 = vmatprep.subr.mxu1 %v10737_v59  ;;  %v7187_v27 = vadd.f32 %v7186_v20, %v7185_v30  ;;  %v3836_v6 = vand.u32 4294901760, %v3835_v13  ;;  %v13771_v21 = vand.u32 4294901760, %v11142_v40  ;;  %v13773_v20 = vand.u32 4294901760, %v11151_v10 }
 0x2dd   :  { %7478 = vmatpush3.msra.mxu0 %v13770_v50  ;;  %7542 = vmatpush3.msra.mxu1 %v10754_v57  ;;  %v2499_v34 = vadd.f32 %v7125_v36, %v10900_v5  ;;  %v13300_v13 = vand.u32 4294901760, %v11178_v58  ;;  %v13774_v36 = vld [vmem:[#allocation81_spill] sm:$0xff] }
 0x2de   :  { %3828 = vmatmul.mubr.f32.gmra.mxu0 %v3827_v3  ;;  %v3841_v12 = vsub.f32 %v11142_v40, %v13771_v21  ;;  %4139 = vmatmul.mubr.f32.gmra.mxu1 %v11147_v52  ;;  %v7126_v55 = vpop.f32.mrf.mxu0  ;;  %v3850_v30 = vsub.f32 %v11151_v10, %v13773_v20  ;;  %v13775_v21 = vand.u32 4294901760, %v13774_v36 }
 0x2df   :  { %7479 = vmatprep.subr.mxu0 %v13772_v47  ;;  %7543 = vmatprep.subr.mxu1 %v10772_v46  ;;  %v7188_v61 = vpop.f32.mrf.mxu1  ;;  %v11195_v3 = vadd.f32 %v11114_v17, %v2499_v34  ;;  %v3856_v34 = vsub.f32 %v11178_v58, %v13300_v13 }
 0x2e0   :  { %3837 = vmatprep.mubr.f32.mxu0 %v3836_v6  ;;  %7480 = vmatpush3.msra.mxu0 %v10708_v1  ;;  %v7127_v5 = vpop.f32.mrf.mxu0  ;;  %v3842_v6 = vand.u32 4294901760, %v3841_v12  ;;  %v3851_v17 = vand.u32 4294901760, %v3850_v30  ;;  %v13776_v12 = vand.u32 4294901760, %v10906_v14  ;;  %v13777_v30 = vand.u32 4294901760, %v10917_v28 }
 0x2e1   :  { %7544 = vmatpush3.msra.mxu1 %v10781_v60  ;;  %4444 = vmatprep.mubr.f32.mxu1 %v13775_v21  ;;  %v7128_v52 = vadd.f32 %v7127_v5, %v7126_v55  ;;  %v7189_v46 = vpop.f32.mrf.mxu1 }
 0x2e2   :  { %7481 = vmatprep.subr.mxu0 %v10732_v43  ;;  %7545 = vmatprep.subr.mxu1 %v10793_v16  ;;  %v7190_v20 = vadd.f32 %v7189_v46, %v7188_v61 }
 0x2e3   :  { %7482 = vmatpush3.msra.mxu0 %v10735_v7  ;;  %7546 = vmatpush3.msra.mxu1 %v10801_v29  ;;  %v2506_v21 = vadd.f32 %v7128_v52, %v10930_v9  ;;  %v13778_v52 = vld [vmem:[#allocation6_spill] sm:$0xff]  ;;  %v13779_v9 = vld [vmem:[#allocation3_spill] sm:$0xff] }
 0x2e4   :  { %3843 = vmatmul.mubr.f32.gmra.mxu0 %v3842_v6  ;;  %7483 = vmatprep.subr.mxu0 %v10770_v51  ;;  %v7129_v55 = vpop.f32.mrf.mxu0  ;;  %v3857_v6 = vand.u32 4294901760, %v3856_v34  ;;  %v13780_v51 = vld [vmem:[#allocation38_spill] sm:$0xff]  ;;  %v13786_v34 = vld [vmem:[#allocation41_spill] sm:$0xff] }
 0x2e5   :  { %4448 = vmatmul.mubr.f32.vlgmr.msra.gmra.mxu1 %v13776_v12  ;;  %7627 = vmatprep.subr.mxu1 %v13708_v53  ;;  %v7191_v46 = vpop.f32.mrf.mxu1  ;;  %v11214_v61 = vadd.f32 %v11153_v38, %v2506_v21  ;;  %v13781_v53 = vld [vmem:[#allocation32_spill] sm:$0xff]  ;;  %v13782_v21 = vld [vmem:[#allocation27_spill] sm:$0xff] }
 0x2e6   :  { %3852 = vmatprep.mubr.f32.mxu0 %v3851_v17  ;;  %7484 = vmatpush3.msra.mxu0 %v10779_v62  ;;  %v7130_v5 = vpop.f32.mrf.mxu0 }
 0x2e7   :  { %4455 = vmatprep.mubr.f32.mxu1 %v13777_v30  ;;  %7628 = vmatpush3.msra.mxu1 %v13778_v52  ;;  %v7131_v12 = vadd.f32 %v7130_v5, %v7129_v55  ;;  %v7192_v13 = vpop.f32.mrf.mxu1  ;;  %v13783_v30 = vld [vmem:[#allocation82_spill] sm:$0xff] }
 0x2e8   :  { %7485 = vmatprep.subr.mxu0 %v13779_v9  ;;  %7629 = vmatprep.subr.mxu1 %v13780_v51  ;;  %v7193_v17 = vadd.f32 %v7192_v13, %v7191_v46  ;;  %v13784_v62 = vand.u32 4294901760, %v13783_v30  ;;  %v13785_v9 = vld [vmem:[#allocation64_spill] sm:$0xff]  ;;  %v13789_v46 = vld [vmem:[#allocation34_spill] sm:$0xff] }
 0x2e9   :  { %7486 = vmatpush3.msra.mxu0 %v13781_v53  ;;  %7630 = vmatpush3.msra.mxu1 %v13715_v11  ;;  %v2513_v38 = vadd.f32 %v7131_v12, %v10973_v2  ;;  %v13787_v11 = vand.u32 4294901760, %v10950_v39  ;;  %v13788_v2 = vld [vmem:[#allocation9_spill] sm:$0xff] }
 0x2ea   :  { %3858 = vmatmul.mubr.f32.gmra.mxu0 %v3857_v6  ;;  %7487 = vmatprep.subr.mxu0 %v13782_v21  ;;  %v7132_v52 = vpop.f32.mrf.mxu0  ;;  %v13790_v6 = vld [vmem:[#allocation10_spill] sm:$0xff] }
 0x2eb   :  { %4459 = vmatmul.mubr.f32.gmra.mxu1 %v13784_v62  ;;  %7631 = vmatprep.subr.mxu1 %v13785_v9  ;;  %v7194_v55 = vpop.f32.mrf.mxu1  ;;  %v11230_v51 = vadd.f32 %v7187_v27, %v2513_v38  ;;  %v13791_v9 = vld [vmem:[#allocation5_spill] sm:$0xff]  ;;  %v13794_v38 = vld [vmem:[#allocation40_spill] sm:$0xff] }
 0x2ec   :  { %7488 = vmatpush3.msra.mxu0 %v13786_v34  ;;  %4274 = vmatprep.mubr.f32.mxu0 %v13774_v36  ;;  %v7133_v13 = vpop.f32.mrf.mxu0  ;;  %v13792_v34 = vld [vmem:[#allocation19_spill] sm:$0xff]  ;;  %v13793_v36 = vand.u32 4294901760, %v10979_v32 }
 0x2ed   :  { %4466 = vmatprep.mubr.f32.mxu1 %v13787_v11  ;;  %7632 = vmatpush3.msra.mxu1 %v13788_v2  ;;  %v7134_v5 = vadd.f32 %v7133_v13, %v7132_v52  ;;  %v7195_v62 = vpop.f32.mrf.mxu1  ;;  %v13795_v11 = vand.u32 4294901760, %v13794_v38  ;;  %v13796_v52 = vld [vmem:[#allocation23_spill] sm:$0xff] }
 0x2ee   :  { %7489 = vmatprep.subr.mxu0 %v13789_v46  ;;  %7633 = vmatprep.subr.mxu1 %v13790_v6  ;;  %v7196_v12 = vadd.f32 %v7195_v62, %v7194_v55 }
 0x2ef   :  { %7490 = vmatpush3.msra.mxu0 %v13791_v9  ;;  %7634 = vmatpush3.msra.mxu1 %v13792_v34  ;;  %v2520_v27 = vadd.f32 %v7134_v5, %v11014_v42  ;;  %v13797_v34 = vand.u32 4294901760, %v10997_v63  ;;  %v13800_v5 = vld [vmem:[#allocation8_spill] sm:$0xff] }
 0x2f0   :  { %4277 = vmatmul.mubr.f32.vlgmr.msra.gmra.mxu0 %v10906_v14  ;;  %4470 = vmatmul.mubr.f32.gmra.mxu1 %v13793_v36  ;;  %v7135_v2 = vpop.f32.mrf.mxu0  ;;  %v13798_v14 = vld [vmem:[#allocation42_spill] sm:$0xff]  ;;  %v13801_v62 = vand.u32 4294901760, %v13800_v5 }
 0x2f1   :  { %7571 = vmatprep.subr.mxu0 %v13795_v11  ;;  %7635 = vmatprep.subr.mxu1 %v13796_v52  ;;  %v7197_v13 = vpop.f32.mrf.mxu1  ;;  %v11248_v6 = vadd.f32 %v7190_v20, %v2520_v27  ;;  %v13799_v55 = vand.u32 4294901760, %v13798_v14  ;;  %v13802_v11 = vld [vmem:[#allocation14_spill] sm:$0xff]  ;;  %v13805_v27 = vld [vmem:[#allocation25_spill] sm:$0xff]  ;;  %v13806_v14 = vand.u32 4294901760, %v11020_v26 }
 0x2f2   :  { %4283 = vmatprep.mubr.f32.mxu0 %v10917_v28  ;;  %4477 = vmatprep.mubr.f32.mxu1 %v13797_v34  ;;  %v7136_v42 = vpop.f32.mrf.mxu0  ;;  %v13803_v28 = vld [vmem:[#allocation4_spill] sm:$0xff] }
 0x2f3   :  { %7572 = vmatpush3.msra.mxu0 %v13799_v55  ;;  %7636 = vmatpush3.msra.mxu1 %v10427_v23  ;;  %v7137_v36 = vadd.f32 %v7136_v42, %v7135_v2  ;;  %v7198_v38 = vpop.f32.mrf.mxu1  ;;  %v13804_v52 = vand.u32 4294901760, %v13803_v28  ;;  %v13807_v23 = vld [vmem:[#allocation11_spill] sm:$0xff] }
 0x2f4   :  { %7573 = vmatprep.subr.mxu0 %v13801_v62  ;;  %7637 = vmatprep.subr.mxu1 %v13802_v11  ;;  %v7199_v20 = vadd.f32 %v7198_v38, %v7197_v13  ;;  %v13808_v55 = vand.u32 4294901760, %v13807_v23  ;;  %v13809_v42 = vld [vmem:[#allocation15_spill] sm:$0xff]  ;;  %v13810_v13 = vand.u32 4294901760, %v11038_v49  ;;  %v13814_v11 = vld [vmem:[#allocation21_spill] sm:$0xff] }
 0x2f5   :  { %7574 = vmatpush3.msra.mxu0 %v13804_v52  ;;  %7638 = vmatpush3.msra.mxu1 %v13805_v27  ;;  %v2527_v34 = vadd.f32 %v7137_v36, %v11055_v54  ;;  %v13813_v36 = vld [vmem:[#allocation57_spill] sm:$0xff]  ;;  %v13815_v28 = vand.u32 4294901760, %v13814_v11 }
 0x2f6   :  { %4286 = vmatmul.mubr.f32.gmra.mxu0 %v13783_v30  ;;  %4481 = vmatmul.mubr.f32.gmra.mxu1 %v13806_v14  ;;  %v7138_v2 = vpop.f32.mrf.mxu0  ;;  %v13811_v30 = vld [vmem:[#allocation12_spill] sm:$0xff]  ;;  %v13816_v14 = vld [vmem:[#allocation61_spill] sm:$0xff] }
 0x2f7   :  { %7575 = vmatprep.subr.mxu0 %v13808_v55  ;;  %7639 = vmatprep.subr.mxu1 %v13809_v42  ;;  %v7200_v5 = vpop.f32.mrf.mxu1  ;;  %v11269_v62 = vadd.f32 %v7193_v17, %v2527_v34  ;;  %v13812_v38 = vand.u32 4294901760, %v13811_v30  ;;  %v13819_v55 = vand.u32 4294901760, %v11064_v19  ;;  %v13820_v42 = vld [vmem:[#allocation28_spill] sm:$0xff]  ;;  %v13822_v30 = vld [vmem:[#allocation58_spill] sm:$0xff] }
 0x2f8   :  { %4292 = vmatprep.mubr.f32.mxu0 %v10950_v39  ;;  %4488 = vmatprep.mubr.f32.mxu1 %v13810_v13  ;;  %v7139_v54 = vpop.f32.mrf.mxu0  ;;  %v13817_v39 = vld [vmem:[#allocation13_spill] sm:$0xff]  ;;  %v13821_v13 = vand.u32 4294901760, %v13820_v42  ;;  %v13835_v42 = vand.u32 4294901760, %v13760_v25  ;;  %v13839_v25 = vld [vmem:[#allocation67_spill] sm:$0xff] }
 0x2f9   :  { %7576 = vmatpush3.msra.mxu0 %v13812_v38  ;;  %7640 = vmatpush3.msra.mxu1 %v13813_v36  ;;  %v7140_v52 = vadd.f32 %v7139_v54, %v7138_v2  ;;  %v7201_v27 = vpop.f32.mrf.mxu1  ;;  %v13818_v23 = vand.u32 4294901760, %v13817_v39  ;;  %v13825_v54 = vld [vmem:[#allocation74_spill] sm:$0xff]  ;;  %v13826_v36 = vand.u32 4294901760, %v13751_v0  ;;  %v13831_v39 = vld [vmem:[#allocation60_spill] sm:$0xff] }
 0x2fa   :  { %7577 = vmatprep.subr.mxu0 %v13815_v28  ;;  %7641 = vmatprep.subr.mxu1 %v13816_v14  ;;  %v7202_v17 = vadd.f32 %v7201_v27, %v7200_v5  ;;  %v13823_v5 = vand.u32 4294901760, %v11079_v24  ;;  %v13830_v14 = vand.u32 4294901760, %v11103_v22 }
 0x2fb   :  { %7578 = vmatpush3.msra.mxu0 %v13818_v23  ;;  %7642 = vmatpush3.msra.mxu1 %v10514_v8  ;;  %v2534_v34 = vadd.f32 %v7140_v52, %v11094_v44  ;;  %v13824_v8 = vand.u32 4294901760, %v13750_v48  ;;  %v1400_v52 = vld [vmem:[%s12949_s4 + $0x170] sm:$0xff]  ;;  %v13832_v23 = vand.u32 4294901760, %v13831_v39  ;;  %v13845_v39 = vld [vmem:[#allocation17_spill] sm:$0xff] }
 0x2fc   :  { %4295 = vmatmul.mubr.f32.gmra.mxu0 %v10979_v32  ;;  %4492 = vmatmul.mubr.f32.gmra.mxu1 %v13819_v55  ;;  %v7141_v2 = vpop.f32.mrf.mxu0  ;;  %v1401_v32 = vld [vmem:[%s12949_s4 + $0x178] sm:$0xff] }
 0x2fd   :  { %7579 = vmatprep.subr.mxu0 %v13821_v13  ;;  %7643 = vmatprep.subr.mxu1 %v13822_v30  ;;  %v11290_v38 = vadd.f32 %v7196_v12, %v2534_v34  ;;  %v13828_v12 = vld [vmem:[#allocation22_spill] sm:$0xff]  ;;  %v11307_v48 = vand.u32 4294901760, %v1401_v32  ;;  %v7935_v27 = vpop.f32.mrf.mxu1  ;;  %v13833_v55 = vld [vmem:[#allocation77_spill] sm:$0xff]  ;;  %v1399_v13 = vld [vmem:[%s12949_s4 + $0x168] sm:$0xff] }
 0x2fe   :  { %4301 = vmatprep.mubr.f32.mxu0 %v10997_v63  ;;  %4499 = vmatprep.mubr.f32.mxu1 %v13823_v5  ;;  %v7142_v44 = vpop.f32.mrf.mxu0  ;;  %v13827_v63 = vld [vmem:[#allocation75_spill] sm:$0xff]  ;;  %v13829_v28 = vand.u32 4294901760, %v13828_v12  ;;  %v13836_v30 = vld [vmem:[#allocation84_spill] sm:$0xff]  ;;  %v13837_v5 = vand.u32 4294901760, %v13761_v4  ;;  %v1398_v4 = vld [vmem:[%s12949_s4 + $0x160] sm:$0xff] }
 0x2ff   :  { %7580 = vmatpush3.msra.mxu0 %v13824_v8  ;;  %7644 = vmatpush3.msra.mxu1 %v13825_v54  ;;  %v7143_v11 = vadd.f32 %v7142_v44, %v7141_v2  ;;  %v13838_v44 = vld [vmem:[#allocation20_spill] sm:$0xff]  ;;  %v13840_v54 = vand.u32 4294901760, %v13839_v25  ;;  %v13853_v25 = vand.u32 4294901760, %v10732_v43 }
 0x300   :  { %7581 = vmatprep.subr.mxu0 %v13826_v36  ;;  %7645 = vmatprep.subr.mxu1 %v13827_v63  ;;  %v11341_v36 = vand.u32 4294901760, %v1399_v13  ;;  %v13842_v63 = vand.u32 4294901760, %v13766_v56  ;;  %v13844_v56 = vand.u32 4294901760, %v13768_v37  ;;  %v13847_v37 = vand.u32 4294901760, %v13770_v50 }
 0x301   :  { %7582 = vmatpush3.msra.mxu0 %v13829_v28  ;;  %7646 = vmatpush3.msra.mxu1 %v10592_v41  ;;  %v2541_v0 = vadd.f32 %v7143_v11, %v11133_v33  ;;  %v11325_v33 = vand.u32 4294901760, %v1400_v52  ;;  %v13841_v11 = vand.u32 4294901760, %v11142_v40  ;;  %v13848_v50 = vand.u32 4294901760, %v11178_v58 }
 0x302   :  { %4304 = vmatmul.mubr.f32.gmra.mxu0 %v11020_v26  ;;  %4503 = vmatmul.mubr.f32.gmra.mxu1 %v13830_v14  ;;  %v7144_v34 = vpop.f32.mrf.mxu0  ;;  %v13834_v26 = vand.u32 4294901760, %v11112_v31  ;;  %v13843_v14 = vand.u32 4294901760, %v11151_v10 }
 0x303   :  { %7583 = vmatprep.subr.mxu0 %v13832_v23  ;;  %7647 = vmatprep.subr.mxu1 %v13833_v55  ;;  %v11319_v41 = vadd.f32 %v7199_v20, %v2541_v0  ;;  %v3012_v20 = vpop.f32.mrf.mxu1  ;;  %v11352_v12 = vsub.f32 %v1400_v52, %v11325_v33  ;;  %v11366_v52 = vand.u32 4294901760, %v1398_v4  ;;  %v13846_v23 = vand.u32 4294901760, %v13845_v39 }
 0x304   :  { %4310 = vmatprep.mubr.f32.mxu0 %v11038_v49  ;;  %4510 = vmatprep.mubr.f32.mxu1 %v13834_v26  ;;  %v7145_v2 = vpop.f32.mrf.mxu0  ;;  %v11334_v49 = vsub.f32 %v1401_v32, %v11307_v48 }
 0x305   :  { %7584 = vmatpush3.msra.mxu0 %v13835_v42  ;;  %7648 = vmatpush3.msra.mxu1 %v13836_v30  ;;  %v7146_v8 = vadd.f32 %v7145_v2, %v7144_v34  ;;  %v7938_v28 = vpop.f32.mrf.mxu1  ;;  %v11384_v55 = vand.u32 4294901760, %v11352_v12  ;;  %v13849_v42 = vand.u32 4294901760, %v13772_v47 }
 0x306   :  { %7585 = vmatprep.subr.mxu0 %v13837_v5  ;;  %7649 = vmatprep.subr.mxu1 %v13838_v44  ;;  %v13851_v5 = vand.u32 4294901760, %v10708_v1  ;;  %v13852_v44 = vld [vmem:[#allocation43_spill] sm:$0xff] }
 0x307   :  { %7586 = vmatpush3.msra.mxu0 %v13840_v54  ;;  %7650 = vmatpush3.msra.mxu1 %v10688_v45  ;;  %v2548_v32 = vadd.f32 %v7146_v8, %v11169_v18  ;;  %v5072_v47 = vsub.f32 %v11352_v12, %v11384_v55  ;;  %v1395_v8 = vld [vmem:[%s12949_s4 + $0x148] sm:$0xff] }
 0x308   :  { %4313 = vmatmul.mubr.f32.gmra.mxu0 %v11064_v19  ;;  %4514 = vmatmul.mubr.f32.gmra.mxu1 %v13841_v11  ;;  %v7891_v45 = vpop.f32.mrf.mxu0  ;;  %v11357_v19 = vand.u32 4294901760, %v11334_v49 }
 0x309   :  { %7587 = vmatprep.subr.mxu0 %v13842_v63  ;;  %7651 = vmatprep.subr.mxu1 %v10710_v35  ;;  %v2802_v18 = vadd.f32 %v7891_v45, %v11214_v61  ;;  %v11360_v0 = vadd.f32 %v7202_v17, %v2548_v32  ;;  %v1397_v35 = vld [vmem:[%s12949_s4 + $0x158] sm:$0xff]  ;;  %v11375_v61 = vsub.f32 %v1399_v13, %v11341_v36  ;;  %v13850_v13 = vld [vmem:[#allocation39_spill] sm:$0xff]  ;;  %v13854_v32 = vand.u32 4294901760, %v10735_v7  ;;  %v13856_v7 = vld [vmem:[#allocation24_spill] sm:$0xff] }
 0x30a   :  { %4319 = vmatprep.mubr.f32.mxu0 %v11079_v24  ;;  %4521 = vmatprep.mubr.f32.mxu1 %v13843_v14  ;;  %v2791_v24 = vpop.f32.mrf.mxu0  ;;  %v11390_v26 = vand.u32 4294901760, %v1397_v35  ;;  %v11439_v63 = vand.u32 4294901760, %v1395_v8  ;;  %v13857_v45 = vand.u32 4294901760, %v13856_v7 }
 0x30b   :  { %7588 = vmatpush3.msra.mxu0 %v13844_v56  ;;  %7652 = vmatpush3.msra.mxu1 %v10718_v15  ;;  %v2792_v17 = vadd.f32 %v2791_v24, %v11195_v3  ;;  %v11378_v34 = vadd.f32 %v7935_v27, %v2802_v18  ;;  %v5065_v15 = vsub.f32 %v11334_v49, %v11357_v19  ;;  %v1396_v3 = vld [vmem:[%s12949_s4 + $0x150] sm:$0xff]  ;;  %v11407_v2 = vand.u32 4294901760, %v11375_v61 }
 0x30c   :  { %7589 = vmatprep.subr.mxu0 %v13846_v23  ;;  %7653 = vmatprep.subr.mxu1 %v10737_v59  ;;  %v3024_v59 = vpop.f32.mrf.mxu1  ;;  %v11424_v1 = vsub.f32 %v1397_v35, %v11390_v26  ;;  %v5073_v18 = vand.u32 4294901760, %v5072_v47  ;;  %v13860_v24 = vld [vmem:[#allocation52_spill] sm:$0xff]  ;;  %v13862_v23 = vld [vmem:[#allocation50_spill] sm:$0xff] }
 0x30d   :  { %7590 = vmatpush3.msra.mxu0 %v13847_v37  ;;  %7654 = vmatpush3.msra.mxu1 %v10754_v57  ;;  %v11395_v27 = vadd.f32 %v3012_v20, %v2792_v17  ;;  %v11402_v57 = vsub.f32 %v1398_v4, %v11366_v52  ;;  %v11415_v20 = vand.u32 4294901760, %v1396_v3  ;;  %v5079_v43 = vsub.f32 %v11375_v61, %v11407_v2 }
 0x30e   :  { %4322 = vmatmul.mubr.f32.gmra.mxu0 %v11103_v22  ;;  %4525 = vmatmul.mubr.f32.gmra.mxu1 %v13848_v50  ;;  %v7894_v22 = vpop.f32.mrf.mxu0  ;;  %v11454_v14 = vand.u32 4294901760, %v11424_v1  ;;  %v13861_v39 = vand.u32 4294901760, %v13860_v24  ;;  %v11470_v50 = vsub.f32 %v1395_v8, %v11439_v63 }
 0x30f   :  { %7591 = vmatprep.subr.mxu0 %v13849_v42  ;;  %7655 = vmatprep.subr.mxu1 %v13850_v13  ;;  %v2822_v30 = vadd.f32 %v7894_v22, %v11248_v6  ;;  %v5066_v6 = vand.u32 4294901760, %v5065_v15  ;;  %v11433_v11 = vand.u32 4294901760, %v11402_v57  ;;  %v13865_v13 = vand.u32 4294901760, %v13781_v53 }
 0x310   :  { %4328 = vmatprep.mubr.f32.mxu0 %v11112_v31  ;;  %7592 = vmatpush3.msra.mxu0 %v13851_v5  ;;  %v2811_v31 = vpop.f32.mrf.mxu0  ;;  %13859 = vst [vmem:[#allocation72_spill] sm:$0xff] %v11454_v14  ;;  %v5093_v5 = vsub.f32 %v11424_v1, %v11454_v14  ;;  %v13867_v53 = vand.u32 4294901760, %v13782_v21  ;;  %v11500_v7 = vand.u32 4294901760, %v11470_v50  ;;  %v13872_v21 = vld [vmem:[#allocation51_spill] sm:$0xff] }
 0x311   :  { %7656 = vmatpush3.msra.mxu1 %v10781_v60  ;;  %4844 = vmatprep.mubr.f32.mxu1 %v13852_v44  ;;  %v7941_v60 = vpop.f32.mrf.mxu1  ;;  %v2812_v54 = vadd.f32 %v2811_v31, %v11230_v51  ;;  %v11427_v4 = vadd.f32 %v7938_v28, %v2822_v30  ;;  %13855 = vst [vmem:[#allocation71_spill] sm:$0xff] %v11433_v11  ;;  %v1394_v51 = vld [vmem:[%s12949_s4 + $0x140] sm:$0xff] }
 0x312   :  { %7593 = vmatprep.subr.mxu0 %v13853_v25  ;;  %7657 = vmatprep.subr.mxu1 %v10793_v16  ;;  %v13858_v28 = vld [vmem:[#allocation30_spill] sm:$0xff]  ;;  %v5086_v17 = vsub.f32 %v11402_v57, %v11433_v11  ;;  %v11462_v37 = vand.u32 4294901760, %v1394_v51  ;;  %13871 = vst [vmem:[#allocation73_spill] sm:$0xff] %v11500_v7 }
 0x313   :  { %7594 = vmatpush3.msra.mxu0 %v13854_v32  ;;  %7658 = vmatpush3.msra.mxu1 %v10801_v29  ;;  %v11444_v16 = vadd.f32 %v3024_v59, %v2812_v54  ;;  %v11450_v29 = vsub.f32 %v1396_v3, %v11415_v20  ;;  %v3036_v56 = vpop.f32.mrf.mxu1  ;;  %v13863_v3 = vld [vmem:[#allocation3_spill] sm:$0xff]  ;;  %v13869_v32 = vld [vmem:[#allocation41_spill] sm:$0xff] }
 0x314   :  { %4331 = vmatmul.mubr.f32.gmra.mxu0 %v11142_v40  ;;  %7595 = vmatprep.subr.mxu0 %v13857_v45  ;;  %v7897_v40 = vpop.f32.mrf.mxu0  ;;  %v13864_v59 = vand.u32 4294901760, %v13863_v3 }
 0x315   :  { %4846 = vmatmul.mubr.f32.vlgmr.msra.gmra.mxu1 %v13858_v28  ;;  %8165 = vmatprep.subr.mxu1 %v5066_v6  ;;  %v2842_v35 = vadd.f32 %v7897_v40, %v11290_v38  ;;  %v5080_v38 = vand.u32 4294901760, %v5079_v43  ;;  %v11478_v30 = vand.u32 4294901760, %v11450_v29  ;;  %v7944_v8 = vpop.f32.mrf.mxu1  ;;  %v13870_v43 = vand.u32 4294901760, %v13869_v32  ;;  %v13880_v32 = vld [vmem:[#allocation55_spill] sm:$0xff] }
 0x316   :  { %4337 = vmatprep.mubr.f32.mxu0 %v11151_v10  ;;  %7596 = vmatpush3.msra.mxu0 %v13861_v39  ;;  %v1393_v10 = vld [vmem:[%s12949_s4 + $0x138] sm:$0xff]  ;;  %v2831_v15 = vpop.f32.mrf.mxu0 }
 0x317   :  { %4851 = vmatprep.mubr.f32.mxu1 %v13862_v23  ;;  %8166 = vmatpush3.msra.mxu1 %v5066_v6  ;;  %v2832_v42 = vadd.f32 %v2831_v15, %v11269_v62  ;;  %v11473_v22 = vadd.f32 %v7941_v60, %v2842_v35  ;;  %13866 = vst [vmem:[#allocation35_spill] sm:$0xff] %v11478_v30  ;;  %v11483_v47 = vand.u32 4294901760, %v1393_v10  ;;  %v1392_v62 = vld [vmem:[%s12949_s4 + $0x130] sm:$0xff]  ;;  %v13868_v6 = vld [vmem:[#allocation53_spill] sm:$0xff]  ;;  %v5087_v60 = vand.u32 4294901760, %v5086_v17  ;;  %v3048_v39 = vpop.f32.mrf.mxu1 }
 0x318   :  { %7597 = vmatprep.subr.mxu0 %v13864_v59  ;;  %8167 = vmatprep.subr.mxu1 %v5073_v18  ;;  %v11506_v40 = vand.u32 4294901760, %v1392_v62  ;;  %v13873_v35 = vand.u32 4294901760, %v13789_v46  ;;  %v13874_v17 = vand.u32 4294901760, %v13791_v9  ;;  %v5107_v46 = vsub.f32 %v11470_v50, %v11500_v7  ;;  %v13876_v59 = vld [vmem:[#allocation54_spill] sm:$0xff] }
 0x319   :  { %7598 = vmatpush3.msra.mxu0 %v13865_v13  ;;  %8168 = vmatpush3.msra.mxu1 %v5073_v18  ;;  %v7900_v31 = vpop.f32.mrf.mxu0  ;;  %v11488_v25 = vadd.f32 %v3036_v56, %v2832_v42  ;;  %v5100_v18 = vsub.f32 %v11450_v29, %v11478_v30  ;;  %v11517_v24 = vsub.f32 %v1393_v10, %v11483_v47  ;;  %v1390_v10 = vld [vmem:[%s12949_s4 + $0x120] sm:$0xff]  ;;  %v13878_v42 = vld [vmem:[#allocation36_spill] sm:$0xff] }
 0x31a   :  { %4340 = vmatmul.mubr.f32.gmra.mxu0 %v11178_v58  ;;  %7599 = vmatprep.subr.mxu0 %v13867_v53  ;;  %v11494_v58 = vsub.f32 %v1394_v51, %v11462_v37  ;;  %v2862_v54 = vadd.f32 %v7900_v31, %v11360_v0  ;;  %v1391_v0 = vld [vmem:[%s12949_s4 + $0x128] sm:$0xff] }
 0x31b   :  { %4853 = vmatmul.mubr.f32.gmra.mxu1 %v13868_v6  ;;  %8169 = vmatprep.subr.mxu1 %v5080_v38  ;;  %v2851_v45 = vpop.f32.mrf.mxu0  ;;  %v5101_v9 = vand.u32 4294901760, %v5100_v18  ;;  %v13882_v18 = vld [vmem:[#allocation33_spill] sm:$0xff] }
 0x31c   :  { %7600 = vmatpush3.msra.mxu0 %v13870_v43  ;;  %4691 = vmatprep.mubr.f32.mxu0 %v13852_v44  ;;  %v2852_v51 = vadd.f32 %v2851_v45, %v11319_v41  ;;  %v11512_v56 = vadd.f32 %v7944_v8, %v2862_v54  ;;  %v5094_v44 = vand.u32 4294901760, %v5093_v5  ;;  %v11522_v15 = vand.u32 4294901760, %v11494_v58  ;;  %v1388_v54 = vld [vmem:[%s12949_s4 + $0x110] sm:$0xff] }
 0x31d   :  { %4858 = vmatprep.mubr.f32.mxu1 %v13872_v21  ;;  %8170 = vmatpush3.msra.mxu1 %v5080_v38  ;;  %v11529_v41 = vand.u32 4294901760, %v1391_v0  ;;  %v11537_v38 = vsub.f32 %v1392_v62, %v11506_v40  ;;  %v11547_v5 = vand.u32 4294901760, %v1390_v10  ;;  %v1389_v62 = vld [vmem:[%s12949_s4 + $0x118] sm:$0xff] }
 0x31e   :  { %7601 = vmatprep.subr.mxu0 %v13873_v35  ;;  %8171 = vmatprep.subr.mxu1 %v5087_v60  ;;  %13875 = vst [vmem:[#allocation16_spill] sm:$0xff] %v11522_v15  ;;  %v11524_v3 = vadd.f32 %v3048_v39, %v2852_v51  ;;  %v5114_v13 = vsub.f32 %v11494_v58, %v11522_v15  ;;  %v11581_v51 = vand.u32 4294901760, %v1388_v54  ;;  %v1387_v35 = vld [vmem:[%s12949_s4 + $0x108] sm:$0xff] }
 0x31f   :  { %7602 = vmatpush3.msra.mxu0 %v13874_v17  ;;  %8172 = vmatpush3.msra.mxu1 %v5087_v60  ;;  %v11554_v8 = vsub.f32 %v1391_v0, %v11529_v41  ;;  %v11558_v31 = vand.u32 4294901760, %v11537_v38  ;;  %v11563_v60 = vand.u32 4294901760, %v1389_v62  ;;  %v11571_v45 = vsub.f32 %v1390_v10, %v11547_v5 }
 0x320   :  { %4693 = vmatmul.mubr.f32.vlgmr.msra.gmra.mxu0 %v13858_v28  ;;  %4860 = vmatmul.mubr.f32.gmra.mxu1 %v13876_v59  ;;  %v11541_v28 = vand.u32 4294901760, %v11517_v24  ;;  %v5115_v43 = vand.u32 4294901760, %v5114_v13  ;;  %v11597_v10 = vand.u32 4294901760, %v1387_v35  ;;  %v13884_v13 = vld [vmem:[#allocation7_spill] sm:$0xff] }
 0x321   :  { %8121 = vmatprep.subr.mxu0 %v11307_v48  ;;  %8173 = vmatprep.subr.mxu1 %v5094_v44  ;;  %13879 = vst [vmem:[#allocation76_spill] sm:$0xff] %v11558_v31  ;;  %v5128_v0 = vsub.f32 %v11537_v38, %v11558_v31  ;;  %v11588_v39 = vsub.f32 %v1389_v62, %v11563_v60  ;;  %v11592_v17 = vand.u32 4294901760, %v11571_v45 }
 0x322   :  { %4698 = vmatprep.mubr.f32.mxu0 %v13862_v23  ;;  %13877 = vst [vmem:[#allocation29_spill] sm:$0xff] %v11541_v28  ;;  %4865 = vmatprep.mubr.f32.mxu1 %v13878_v42  ;;  %v5108_v23 = vand.u32 4294901760, %v5107_v46  ;;  %v5121_v53 = vsub.f32 %v11517_v24, %v11541_v28 }
 0x323   :  { %8122 = vmatpush3.msra.mxu0 %v11307_v48  ;;  %8174 = vmatpush3.msra.mxu1 %v5094_v44  ;;  %13883 = vst [vmem:[#allocation62_spill] sm:$0xff] %v11592_v17  ;;  %v5129_v62 = vand.u32 4294901760, %v5128_v0  ;;  %v11619_v0 = vsub.f32 %v1387_v35, %v11597_v10 }
 0x324   :  { %8123 = vmatprep.subr.mxu0 %v11325_v33  ;;  %8175 = vmatprep.subr.mxu1 %v5101_v9 }
 0x325   :  { %8124 = vmatpush3.msra.mxu0 %v11325_v33  ;;  %8176 = vmatpush3.msra.mxu1 %v5101_v9  ;;  %v1386_v9 = vld [vmem:[%s12949_s4 + $0x100] sm:$0xff]  ;;  %s8498_s4 = smov 96  }
 0x326   :  { %4700 = vmatmul.mubr.f32.gmra.mxu0 %v13868_v6  ;;  %4867 = vmatmul.mubr.f32.gmra.mxu1 %v13880_v32  ;;  %v11575_v6 = vand.u32 4294901760, %v11554_v8  ;;  %v8023_v44 = vpop.f32.mrf.mxu1  ;;  %v11615_v31 = vand.u32 4294901760, %v1386_v9 }
 0x327   :  { %8125 = vmatprep.subr.mxu0 %v11341_v36  ;;  %8177 = vmatprep.subr.mxu1 %v5108_v23 }
 0x328   :  { %4705 = vmatprep.mubr.f32.mxu0 %v13872_v21  ;;  %13881 = vst [vmem:[#allocation79_spill] sm:$0xff] %v11575_v6  ;;  %4872 = vmatprep.mubr.f32.mxu1 %v13882_v18  ;;  %v5122_v21 = vand.u32 4294901760, %v5121_v53  ;;  %v5135_v46 = vsub.f32 %v11554_v8, %v11575_v6  ;;  %v3296_v53 = vpop.f32.mrf.mxu1  ;;  %v5142_v6 = vsub.f32 %v11571_v45, %v11592_v17  ;;  %v13888_v17 = vld [vmem:[#allocation63_spill] sm:$0xff] }
 0x329   :  { %8126 = vmatpush3.msra.mxu0 %v11341_v36  ;;  %8178 = vmatpush3.msra.mxu1 %v5108_v23  ;;  %v11605_v23 = vsub.f32 %v1388_v54, %v11581_v51  ;;  %v11632_v30 = vsub.f32 %v1386_v9, %v11615_v31 }
 0x32a   :  { %8127 = vmatprep.subr.mxu0 %v11366_v52  ;;  %8179 = vmatprep.subr.mxu1 %v5115_v43  ;;  %v5136_v54 = vand.u32 4294901760, %v5135_v46  ;;  %v5143_v35 = vand.u32 4294901760, %v5142_v6 }
 0x32b   :  { %8128 = vmatpush3.msra.mxu0 %v11366_v52  ;;  %8180 = vmatpush3.msra.mxu1 %v5115_v43  ;;  %v13886_v43 = vld [vmem:[#allocation59_spill] sm:$0xff]  ;;  %v11623_v28 = vand.u32 4294901760, %v11605_v23  ;;  %v8026_v15 = vpop.f32.mrf.mxu1 }
 0x32c   :  { %4707 = vmatmul.mubr.f32.gmra.mxu0 %v13876_v59  ;;  %4874 = vmatmul.mubr.f32.gmra.mxu1 %v13884_v13  ;;  %v11609_v59 = vand.u32 4294901760, %v11588_v39 }
 0x32d   :  { %8129 = vmatprep.subr.mxu0 %v11390_v26  ;;  %8181 = vmatprep.subr.mxu1 %v5122_v21  ;;  %13887 = vst [vmem:[#allocation80_spill] sm:$0xff] %v11623_v28  ;;  %v5156_v6 = vsub.f32 %v11605_v23, %v11623_v28 }
 0x32e   :  { %4712 = vmatprep.mubr.f32.mxu0 %v13878_v42  ;;  %13885 = vst [vmem:[#allocation65_spill] sm:$0xff] %v11609_v59  ;;  %4879 = vmatprep.mubr.f32.mxu1 %v13886_v43 }
 0x32f   :  { %8130 = vmatpush3.msra.mxu0 %v11390_v26  ;;  %8182 = vmatpush3.msra.mxu1 %v5122_v21  ;;  %v7979_v42 = vpop.f32.mrf.mxu0  ;;  %v5149_v21 = vsub.f32 %v11588_v39, %v11609_v59 }
 0x330   :  { %8131 = vmatprep.subr.mxu0 %v11415_v20  ;;  %8183 = vmatprep.subr.mxu1 %v5129_v62  ;;  %v3166_v7 = vadd.f32 %v7979_v42, %v11378_v34  ;;  %v11639_v34 = vand.u32 4294901760, %v11619_v0  ;;  %v5157_v42 = vand.u32 4294901760, %v5156_v6 }
 0x331   :  { %8132 = vmatpush3.msra.mxu0 %v11415_v20  ;;  %8184 = vmatpush3.msra.mxu1 %v5129_v62  ;;  %v3158_v46 = vpop.f32.mrf.mxu0  ;;  %v3312_v62 = vpop.f32.mrf.mxu1 }
 0x332   :  { %4714 = vmatmul.mubr.f32.gmra.mxu0 %v13880_v32  ;;  %4881 = vmatmul.mubr.f32.gmra.mxu1 %v13888_v17  ;;  %v3159_v14 = vadd.f32 %v3158_v46, %v11395_v27  ;;  %v11635_v11 = vadd.f32 %v8023_v44, %v3166_v7  ;;  %13889 = vst [vmem:[#allocation70_spill] sm:$0xff] %v11639_v34  ;;  %v13890_v32 = vld [vmem:[#allocation69_spill] sm:$0xff]  ;;  %v5150_v27 = vand.u32 4294901760, %v5149_v21 }
 0x333   :  { %8133 = vmatprep.subr.mxu0 %v11439_v63  ;;  %8185 = vmatprep.subr.mxu1 %v5136_v54  ;;  %v8029_v21 = vpop.f32.mrf.mxu1 }
 0x334   :  { %4719 = vmatprep.mubr.f32.mxu0 %v13882_v18  ;;  %4886 = vmatprep.mubr.f32.mxu1 %v13890_v32  ;;  %v11645_v9 = vadd.f32 %v3296_v53, %v3159_v14  ;;  %v11650_v18 = vand.u32 4294901760, %v11632_v30  ;;  %v5163_v14 = vsub.f32 %v11619_v0, %v11639_v34 }
 0x335   :  { %8134 = vmatpush3.msra.mxu0 %v11439_v63  ;;  %8186 = vmatpush3.msra.mxu1 %v5136_v54  ;;  %v7982_v7 = vpop.f32.mrf.mxu0  ;;  %v13892_v54 = vld [vmem:[#allocation66_spill] sm:$0xff] }
 0x336   :  { %8135 = vmatprep.subr.mxu0 %v11462_v37  ;;  %8187 = vmatprep.subr.mxu1 %v5143_v35  ;;  %13891 = vst [vmem:[#allocation78_spill] sm:$0xff] %v11650_v18  ;;  %v3180_v44 = vadd.f32 %v7982_v7, %v11427_v4  ;;  %v13893_v4 = vld [vmem:[#allocation68_spill] sm:$0xff]  ;;  %v5170_v7 = vsub.f32 %v11632_v30, %v11650_v18 }
 0x337   :  { %8136 = vmatpush3.msra.mxu0 %v11462_v37  ;;  %8188 = vmatpush3.msra.mxu1 %v5143_v35  ;;  %v3172_v53 = vpop.f32.mrf.mxu0 }
 0x338   :  { %4721 = vmatmul.mubr.f32.gmra.mxu0 %v13884_v13  ;;  %4888 = vmatmul.mubr.f32.gmra.mxu1 %v13892_v54  ;;  %v3173_v46 = vadd.f32 %v3172_v53, %v11444_v16  ;;  %v11659_v28 = vadd.f32 %v8026_v15, %v3180_v44  ;;  %v13894_v13 = vld [vmem:[#allocation47_spill] sm:$0xff]  ;;  %v5164_v16 = vand.u32 4294901760, %v5163_v14  ;;  %v13895_v44 = vld [vmem:[#allocation49_spill] sm:$0xff] }
 0x339   :  { %8137 = vmatprep.subr.mxu0 %v11483_v47  ;;  %8189 = vmatprep.subr.mxu1 %v5150_v27  ;;  %v11665_v35 = vand.u32 4294901760, %v13894_v13  ;;  %v11676_v53 = vand.u32 4294901760, %v13895_v44 }
 0x33a   :  { %4726 = vmatprep.mubr.f32.mxu0 %v13886_v43  ;;  %4893 = vmatprep.mubr.f32.mxu1 %v13893_v4  ;;  %v11669_v34 = vadd.f32 %v3312_v62, %v3173_v46  ;;  %v3328_v43 = vpop.f32.mrf.mxu1  ;;  %v13896_v62 = vld [vmem:[#allocation48_spill] sm:$0xff] }
 0x33b   :  { %8138 = vmatpush3.msra.mxu0 %v11483_v47  ;;  %8190 = vmatpush3.msra.mxu1 %v5150_v27  ;;  %v7985_v15 = vpop.f32.mrf.mxu0  ;;  %v5171_v27 = vand.u32 4294901760, %v5170_v7  ;;  %v11682_v14 = vsub.f32 %v13894_v13, %v11665_v35  ;;  %v13899_v13 = vld [vmem:[#allocation31_spill] sm:$0xff] }
 0x33c   :  { %8139 = vmatprep.subr.mxu0 %v11506_v40  ;;  %8191 = vmatprep.subr.mxu1 %v5157_v42  ;;  %v3194_v6 = vadd.f32 %v7985_v15, %v11473_v22  ;;  %v13897_v22 = vld [vmem:[#allocation56_spill] sm:$0xff] }
 0x33d   :  { %8140 = vmatpush3.msra.mxu0 %v11506_v40  ;;  %8192 = vmatpush3.msra.mxu1 %v5157_v42  ;;  %v3186_v18 = vpop.f32.mrf.mxu0  ;;  %v8032_v42 = vpop.f32.mrf.mxu1 }
 0x33e   :  { %4728 = vmatmul.mubr.f32.gmra.mxu0 %v13888_v17  ;;  %4895 = vmatmul.mubr.f32.gmra.mxu1 %v13896_v62  ;;  %v3187_v46 = vadd.f32 %v3186_v18, %v11488_v25  ;;  %v11685_v59 = vadd.f32 %v8029_v21, %v3194_v6  ;;  %v11689_v17 = vand.u32 4294901760, %v13897_v22  ;;  %v11698_v25 = vsub.f32 %v13895_v44, %v11676_v53 }
 0x33f   :  { %8141 = vmatprep.subr.mxu0 %v11529_v41  ;;  %8193 = vmatprep.subr.mxu1 %v5164_v16  ;;  %v13330_v18 = vand.u32 4294901760, %v11682_v14 }
 0x340   :  { %4733 = vmatprep.mubr.f32.mxu0 %v13890_v32  ;;  %13898 = vst [vmem:[#allocation83_spill] sm:$0xff] %v11689_v17  ;;  %8142 = vmatpush3.msra.mxu0 %v11529_v41  ;;  %v7988_v15 = vpop.f32.mrf.mxu0  ;;  %v11692_v7 = vadd.f32 %v3328_v43, %v3187_v46  ;;  %v11709_v43 = vsub.f32 %v13897_v22, %v11689_v17  ;;  %v13329_v46 = vand.u32 4294901760, %v11698_v25 }
 0x341   :  { %8194 = vmatpush3.msra.mxu1 %v5164_v16  ;;  %8197 = vmatprep.mubr.f32.mxu1 %v11665_v35  ;;  %v3208_v32 = vadd.f32 %v7988_v15, %v11512_v56  ;;  %v11705_v16 = vand.u32 4294901760, %v13899_v13  ;;  %v3344_v56 = vpop.f32.mrf.mxu1 }
 0x342   :  { %8143 = vmatprep.subr.mxu0 %v11547_v5  ;;  %8195 = vmatprep.subr.mxu1 %v5171_v27  ;;  %v3200_v21 = vpop.f32.mrf.mxu0  ;;  %v4994_v15 = vsub.f32 %v11698_v25, %v13329_v46 }
 0x343   :  { %8144 = vmatpush3.msra.mxu0 %v11547_v5  ;;  %8196 = vmatpush3.msra.mxu1 %v5171_v27  ;;  %13900 = vst [vmem:[#allocation18_spill] sm:$0xff] %v11705_v16  ;;  %v3201_v6 = vadd.f32 %v3200_v21, %v11524_v3  ;;  %v11712_v44 = vadd.f32 %v8032_v42, %v3208_v32  ;;  %v13903_v32 = vld [vmem:[#allocation86_spill] sm:$0xff] }
 0x344   :  { %4735 = vmatmul.mubr.f32.gmra.mxu0 %v13892_v54  ;;  %8145 = vmatprep.subr.mxu0 %v11563_v60  ;;  %v13901_v54 = vld [vmem:[#allocation85_spill] sm:$0xff]  ;;  %v4984_v3 = vsub.f32 %v11682_v14, %v13330_v18  ;;  %v11734_v42 = vsub.f32 %v13899_v13, %v11705_v16  ;;  %v11744_v21 = vand.u32 4294901760, %v13903_v32 }
 0x345   :  { %8198 = vmatmul.mubr.f32.vlgmr.msra.gmra.mxu1 %v11676_v53  ;;  %8253 = vmatprep.subr.mxu1 %v11307_v48  ;;  %v11719_v27 = vand.u32 4294901760, %v13901_v54  ;;  %v11722_v22 = vadd.f32 %v3344_v56, %v3201_v6  ;;  %v13905_v56 = vld [vmem:[#allocation37_spill] sm:$0xff] }
 0x346   :  { %4740 = vmatprep.mubr.f32.mxu0 %v13893_v4  ;;  %8146 = vmatpush3.msra.mxu0 %v11563_v60  ;;  %v13333_v4 = vand.u32 4294901760, %v11709_v43  ;;  %13904 = vst [vmem:[#allocation6_spill] sm:$0xff] %v11744_v21  ;;  %v4985_v13 = vand.u32 4294901760, %v4984_v3  ;;  %v11758_v46 = vand.u32 4294901760, %v13905_v56 }
 0x347   :  { %13902 = vst [vmem:[#allocation81_spill] sm:$0xff] %v11719_v27  ;;  %8200 = vmatprep.mubr.f32.mxu1 %v11689_v17  ;;  %8254 = vmatpush3.msra.mxu1 %v11307_v48  ;;  %v11748_v6 = vsub.f32 %v13901_v54, %v11719_v27  ;;  %v4995_v54 = vand.u32 4294901760, %v4994_v15 }
 0x348   :  { %8147 = vmatprep.subr.mxu0 %v11581_v51  ;;  %8255 = vmatprep.subr.mxu1 %v11325_v33  ;;  %13906 = vst [vmem:[#allocation38_spill] sm:$0xff] %v11758_v46  ;;  %v11780_v3 = vsub.f32 %v13905_v56, %v11758_v46 }
 0x349   :  { %8148 = vmatpush3.msra.mxu0 %v11581_v51  ;;  %8256 = vmatpush3.msra.mxu1 %v11325_v33  ;;  %v13910_v17 = vand.u32 4294901760, %v11748_v6 }
 0x34a   :  { %4742 = vmatmul.mubr.f32.gmra.mxu0 %v13896_v62  ;;  %8149 = vmatprep.subr.mxu0 %v11597_v10  ;;  %v5004_v62 = vsub.f32 %v11709_v43, %v13333_v4  ;;  %v13907_v4 = vld [vmem:[#allocation26_spill] sm:$0xff] }
 0x34b   :  { %8201 = vmatmul.mubr.f32.gmra.mxu1 %v11705_v16  ;;  %8257 = vmatprep.subr.mxu1 %v11341_v36  ;;  %v11767_v16 = vsub.f32 %v13903_v32, %v11744_v21  ;;  %v11772_v18 = vand.u32 4294901760, %v13907_v4 }
 0x34c   :  { %8150 = vmatpush3.msra.mxu0 %v11597_v10  ;;  %8153 = vmatprep.mubr.f32.mxu0 %v4985_v13  ;;  %v5005_v13 = vand.u32 4294901760, %v5004_v62  ;;  %v5024_v62 = vsub.f32 %v11748_v6, %v13910_v17 }
 0x34d   :  { %8203 = vmatprep.mubr.f32.mxu1 %v11719_v27  ;;  %8258 = vmatpush3.msra.mxu1 %v11341_v36  ;;  %13908 = vst [vmem:[#allocation32_spill] sm:$0xff] %v11772_v18  ;;  %v13909_v27 = vand.u32 4294901760, %v11734_v42 }
 0x34e   :  { %8151 = vmatprep.subr.mxu0 %v11615_v31  ;;  %8259 = vmatprep.subr.mxu1 %v11366_v52  ;;  %v8111_v32 = vpop.f32.mrf.mxu1 }
 0x34f   :  { %8152 = vmatpush3.msra.mxu0 %v11615_v31  ;;  %8260 = vmatpush3.msra.mxu1 %v11366_v52  ;;  %v5014_v15 = vsub.f32 %v11734_v42, %v13909_v27  ;;  %v11793_v27 = vsub.f32 %v13907_v4, %v11772_v18 }
 0x350   :  { %8154 = vmatmul.mubr.f32.vlgmr.msra.gmra.mxu0 %v4995_v54  ;;  %8204 = vmatmul.mubr.f32.gmra.mxu1 %v11744_v21  ;;  %v13340_v54 = vand.u32 4294901760, %v11767_v16  ;;  %v3600_v17 = vpop.f32.mrf.mxu1 }
 0x351   :  { %8209 = vmatprep.subr.mxu0 %v11334_v49  ;;  %8261 = vmatprep.subr.mxu1 %v11390_v26  ;;  %v5015_v56 = vand.u32 4294901760, %v5014_v15 }
 0x352   :  { %8156 = vmatprep.mubr.f32.mxu0 %v5005_v13  ;;  %8206 = vmatprep.mubr.f32.mxu1 %v11758_v46  ;;  %v13343_v13 = vand.u32 4294901760, %v11780_v3  ;;  %v5034_v4 = vsub.f32 %v11767_v16, %v13340_v54  ;;  %v13911_v54 = vand.u32 4294901760, %v11682_v14 }
 0x353   :  { %8210 = vmatpush3.msra.mxu0 %v11334_v49  ;;  %8262 = vmatpush3.msra.mxu1 %v11390_v26  ;;  %v5025_v49 = vand.u32 4294901760, %v5024_v62  ;;  %v8114_v62 = vpop.f32.mrf.mxu1 }
 0x354   :  { %8211 = vmatprep.subr.mxu0 %v11352_v12  ;;  %8263 = vmatprep.subr.mxu1 %v11415_v20  ;;  %v5035_v15 = vand.u32 4294901760, %v5034_v4 }
 0x355   :  { %8212 = vmatpush3.msra.mxu0 %v11352_v12  ;;  %8264 = vmatpush3.msra.mxu1 %v11415_v20  ;;  %v5044_v12 = vsub.f32 %v11780_v3, %v13343_v13 }
 0x356   :  { %8157 = vmatmul.mubr.f32.gmra.mxu0 %v5015_v56  ;;  %8207 = vmatmul.mubr.f32.gmra.mxu1 %v11772_v18 }
 0x357   :  { %8213 = vmatprep.subr.mxu0 %v11375_v61  ;;  %8265 = vmatprep.subr.mxu1 %v11439_v63  ;;  %v8067_v46 = vpop.f32.mrf.mxu0 }
 0x358   :  { %8159 = vmatprep.mubr.f32.mxu0 %v5025_v49  ;;  %8214 = vmatpush3.msra.mxu0 %v11375_v61  ;;  %v3478_v56 = vadd.f32 %v8067_v46, %v11635_v11  ;;  %v13912_v49 = vand.u32 4294901760, %v11793_v27  ;;  %v5045_v11 = vand.u32 4294901760, %v5044_v12  ;;  %v3612_v46 = vpop.f32.mrf.mxu1 }
 0x359   :  { %8266 = vmatpush3.msra.mxu1 %v11439_v63  ;;  %8285 = vmatprep.mubr.f32.mxu1 %v13911_v54  ;;  %v3471_v18 = vpop.f32.mrf.mxu0 }
 0x35a   :  { %8215 = vmatprep.subr.mxu0 %v11402_v57  ;;  %8267 = vmatprep.subr.mxu1 %v11462_v37  ;;  %v5054_v61 = vsub.f32 %v11793_v27, %v13912_v49  ;;  %v11822_v13 = vadd.f32 %v8111_v32, %v3478_v56  ;;  %v3472_v21 = vadd.f32 %v3471_v18, %v11645_v9 }
 0x35b   :  { %8216 = vmatpush3.msra.mxu0 %v11402_v57  ;;  %8268 = vmatpush3.msra.mxu1 %v11462_v37 }
 0x35c   :  { %8160 = vmatmul.mubr.f32.gmra.mxu0 %v5035_v15  ;;  %8217 = vmatprep.subr.mxu0 %v11424_v1  ;;  %v11828_v54 = vadd.f32 %v3600_v17, %v3472_v21  ;;  %v5055_v9 = vand.u32 4294901760, %v5054_v61  ;;  %v8117_v21 = vpop.f32.mrf.mxu1 }
 0x35d   :  { %8269 = vmatprep.subr.mxu1 %v11483_v47  ;;  %8162 = vmatprep.mubr.f32.mxu0 %v5045_v11  ;;  %v8070_v57 = vpop.f32.mrf.mxu0  ;;  %v13922_v11 = vld [vmem:[#allocation35_spill] sm:$0xff] }
 0x35e   :  { %8218 = vmatpush3.msra.mxu0 %v11424_v1  ;;  %8270 = vmatpush3.msra.mxu1 %v11483_v47  ;;  %v3490_v18 = vadd.f32 %v8070_v57, %v11659_v28  ;;  %v13923_v57 = vld [vmem:[#allocation73_spill] sm:$0xff] }
 0x35f   :  { %8219 = vmatprep.subr.mxu0 %v11450_v29  ;;  %8271 = vmatprep.subr.mxu1 %v11506_v40  ;;  %v3483_v32 = vpop.f32.mrf.mxu0 }
 0x360   :  { %8220 = vmatpush3.msra.mxu0 %v11450_v29  ;;  %8272 = vmatpush3.msra.mxu1 %v11506_v40  ;;  %v11837_v17 = vadd.f32 %v8114_v62, %v3490_v18  ;;  %v3484_v1 = vadd.f32 %v3483_v32, %v11669_v34  ;;  %v3624_v34 = vpop.f32.mrf.mxu1  ;;  %v13924_v18 = vld [vmem:[#allocation16_spill] sm:$0xff] }
 0x361   :  { %8163 = vmatmul.mubr.f32.gmra.mxu0 %v5055_v9  ;;  %8221 = vmatprep.subr.mxu0 %v11470_v50 }
 0x362   :  { %8273 = vmatprep.subr.mxu1 %v11529_v41  ;;  %8222 = vmatpush3.msra.mxu0 %v11470_v50  ;;  %v11844_v28 = vadd.f32 %v3612_v46, %v3484_v1 }
 0x363   :  { %8241 = vmatprep.mubr.f32.mxu0 %v11682_v14  ;;  %8274 = vmatpush3.msra.mxu1 %v11529_v41  ;;  %v8073_v29 = vpop.f32.mrf.mxu0 }
 0x364   :  { %8223 = vmatprep.subr.mxu0 %v11494_v58  ;;  %8275 = vmatprep.subr.mxu1 %v11547_v5  ;;  %v3502_v4 = vadd.f32 %v8073_v29, %v11685_v59 }
 0x365   :  { %8224 = vmatpush3.msra.mxu0 %v11494_v58  ;;  %8276 = vmatpush3.msra.mxu1 %v11547_v5  ;;  %v3495_v50 = vpop.f32.mrf.mxu0  ;;  %v8120_v58 = vpop.f32.mrf.mxu1 }
 0x366   :  { %8225 = vmatprep.subr.mxu0 %v11517_v24  ;;  %8277 = vmatprep.subr.mxu1 %v11563_v60  ;;  %v11855_v14 = vadd.f32 %v8117_v21, %v3502_v4  ;;  %v3496_v15 = vadd.f32 %v3495_v50, %v11692_v7  ;;  %v13925_v21 = vld [vmem:[#allocation29_spill] sm:$0xff] }
 0x367   :  { %8226 = vmatpush3.msra.mxu0 %v11517_v24  ;;  %8278 = vmatpush3.msra.mxu1 %v11563_v60  ;;  %v3636_v56 = vpop.f32.mrf.mxu1 }
 0x368   :  { %8227 = vmatprep.subr.mxu0 %v11537_v38  ;;  %8279 = vmatprep.subr.mxu1 %v11581_v51  ;;  %v11862_v59 = vadd.f32 %v3624_v34, %v3496_v15  ;;  %v13927_v34 = vld [vmem:[#allocation79_spill] sm:$0xff]  ;;  %v13928_v15 = vld [vmem:[#allocation62_spill] sm:$0xff] }
 0x369   :  { %8228 = vmatpush3.msra.mxu0 %v11537_v38  ;;  %v8076_v12 = vpop.f32.mrf.mxu0  ;;  %8280 = vmatpush3.msra.mxu1 %v11581_v51 }
 0x36a   :  { %8229 = vmatprep.subr.mxu0 %v11554_v8  ;;  %v3514_v24 = vadd.f32 %v8076_v12, %v11712_v44  ;;  %8281 = vmatprep.subr.mxu1 %v11597_v10  ;;  %v13929_v12 = vld [vmem:[#allocation65_spill] sm:$0xff] }
 0x36b   :  { %8230 = vmatpush3.msra.mxu0 %v11554_v8  ;;  %v3507_v7 = vpop.f32.mrf.mxu0  ;;  %8282 = vmatpush3.msra.mxu1 %v11597_v10  ;;  %v13913_v8 = vand.u32 4294901760, %v11698_v25 }
 0x36c   :  { %8231 = vmatprep.subr.mxu0 %v11571_v45  ;;  %v11871_v38 = vadd.f32 %v8120_v58, %v3514_v24  ;;  %v3508_v62 = vadd.f32 %v3507_v7, %v11722_v22  ;;  %8283 = vmatprep.subr.mxu1 %v11615_v31  ;;  %v13914_v22 = vand.u32 4294901760, %v11709_v43  ;;  %v13930_v7 = vld [vmem:[#allocation83_spill] sm:$0xff] }
 0x36d   :  { %8232 = vmatpush3.msra.mxu0 %v11571_v45  ;;  %8284 = vmatpush3.msra.mxu1 %v11615_v31  ;;  %v13915_v45 = vand.u32 4294901760, %v11734_v42 }
 0x36e   :  { %8233 = vmatprep.subr.mxu0 %v11588_v39  ;;  %v11878_v44 = vadd.f32 %v3636_v56, %v3508_v62  ;;  %8286 = vmatmul.mubr.f32.vlgmr.msra.gmra.mxu1 %v13913_v8  ;;  %v13931_v62 = vld [vmem:[#allocation80_spill] sm:$0xff] }
 0x36f   :  { %8341 = vmatprep.subr.mxu1 %v11307_v48  ;;  %8234 = vmatpush3.msra.mxu0 %v11588_v39  ;;  %v13916_v39 = vand.u32 4294901760, %v11748_v6 }
 0x370   :  { %8288 = vmatprep.mubr.f32.mxu1 %v13914_v22  ;;  %8342 = vmatpush3.msra.mxu1 %v11307_v48 }
 0x371   :  { %8235 = vmatprep.subr.mxu0 %v11605_v23  ;;  %8343 = vmatprep.subr.mxu1 %v11325_v33 }
 0x372   :  { %8236 = vmatpush3.msra.mxu0 %v11605_v23  ;;  %8344 = vmatpush3.msra.mxu1 %v11325_v33  ;;  %v13917_v33 = vand.u32 4294901760, %v11767_v16 }
 0x373   :  { %8237 = vmatprep.subr.mxu0 %v11619_v0  ;;  %8289 = vmatmul.mubr.f32.gmra.mxu1 %v13915_v45 }
 0x374   :  { %8345 = vmatprep.subr.mxu1 %v11341_v36  ;;  %8238 = vmatpush3.msra.mxu0 %v11619_v0  ;;  %v13918_v0 = vand.u32 4294901760, %v11780_v3 }
 0x375   :  { %8291 = vmatprep.mubr.f32.mxu1 %v13916_v39  ;;  %8346 = vmatpush3.msra.mxu1 %v11341_v36  ;;  %v13933_v39 = vld [vmem:[#allocation18_spill] sm:$0xff] }
 0x376   :  { %8239 = vmatprep.subr.mxu0 %v11632_v30  ;;  %8347 = vmatprep.subr.mxu1 %v11366_v52  ;;  %v7435_v48 = vpop.f32.mrf.mxu1 }
 0x377   :  { %8240 = vmatpush3.msra.mxu0 %v11632_v30  ;;  %8348 = vmatpush3.msra.mxu1 %v11366_v52 }
 0x378   :  { %8242 = vmatmul.mubr.f32.vlgmr.msra.gmra.mxu0 %v11698_v25  ;;  %8292 = vmatmul.mubr.f32.gmra.mxu1 %v13917_v33  ;;  %v7436_v23 = vpop.f32.mrf.mxu1  ;;  %v13919_v25 = vmov %v13912_v49 }
 0x379   :  { %8297 = vmatprep.subr.mxu0 %v11357_v19  ;;  %8349 = vmatprep.subr.mxu1 %v11390_v26  ;;  %v7437_v36 = vadd.f32 %v7436_v23, %v7435_v48  ;;  %v13935_v23 = vld [vmem:[#allocation78_spill] sm:$0xff] }
 0x37a   :  { %8244 = vmatprep.mubr.f32.mxu0 %v11709_v43  ;;  %8294 = vmatprep.mubr.f32.mxu1 %v13918_v0 }
 0x37b   :  { %8298 = vmatpush3.msra.mxu0 %v11357_v19  ;;  %8350 = vmatpush3.msra.mxu1 %v11390_v26  ;;  %v7438_v52 = vpop.f32.mrf.mxu1 }
 0x37c   :  { %8299 = vmatprep.subr.mxu0 %v11384_v55  ;;  %8351 = vmatprep.subr.mxu1 %v11415_v20 }
 0x37d   :  { %8300 = vmatpush3.msra.mxu0 %v11384_v55  ;;  %8352 = vmatpush3.msra.mxu1 %v11415_v20  ;;  %v7439_v30 = vpop.f32.mrf.mxu1  ;;  %v13920_v20 = vld [vmem:[#allocation71_spill] sm:$0xff] }
 0x37e   :  { %8245 = vmatmul.mubr.f32.gmra.mxu0 %v11734_v42  ;;  %8295 = vmatmul.mubr.f32.gmra.mxu1 %v13919_v25  ;;  %v7440_v19 = vadd.f32 %v7439_v30, %v7438_v52  ;;  %v13936_v30 = vld [vmem:[#allocation6_spill] sm:$0xff] }
 0x37f   :  { %8301 = vmatprep.subr.mxu0 %v11407_v2  ;;  %8353 = vmatprep.subr.mxu1 %v11439_v63 }
 0x380   :  { %8247 = vmatprep.mubr.f32.mxu0 %v11748_v6  ;;  %v7379_v26 = vpop.f32.mrf.mxu0  ;;  %8302 = vmatpush3.msra.mxu0 %v11407_v2  ;;  %v7441_v55 = vpop.f32.mrf.mxu1  ;;  %v13921_v2 = vld [vmem:[#allocation72_spill] sm:$0xff] }
 0x381   :  { %8354 = vmatpush3.msra.mxu1 %v11439_v63  ;;  %8373 = vmatprep.mubr.f32.mxu1 %v11665_v35 }
 0x382   :  { %8303 = vmatprep.subr.mxu0 %v13920_v20  ;;  %v7380_v43 = vpop.f32.mrf.mxu0  ;;  %8355 = vmatprep.subr.mxu1 %v11462_v37  ;;  %v7442_v49 = vpop.f32.mrf.mxu1 }
 0x383   :  { %8304 = vmatpush3.msra.mxu0 %v13920_v20  ;;  %v7381_v42 = vadd.f32 %v7380_v43, %v7379_v26  ;;  %8356 = vmatpush3.msra.mxu1 %v11462_v37  ;;  %v7443_v6 = vadd.f32 %v7442_v49, %v7441_v55  ;;  %v13937_v26 = vld [vmem:[#allocation38_spill] sm:$0xff]  ;;  %v13938_v49 = vld [vmem:[#allocation32_spill] sm:$0xff] }
 0x384   :  { %8248 = vmatmul.mubr.f32.gmra.mxu0 %v11767_v16  ;;  %8305 = vmatprep.subr.mxu0 %v13921_v2 }
 0x385   :  { %8357 = vmatprep.subr.mxu1 %v11483_v47  ;;  %v3755_v63 = vadd.f32 %v7381_v42, %v11828_v54  ;;  %8250 = vmatprep.mubr.f32.mxu0 %v11780_v3 }
 0x386   :  { %8306 = vmatpush3.msra.mxu0 %v13921_v2  ;;  %v7382_v61 = vpop.f32.mrf.mxu0  ;;  %8358 = vmatpush3.msra.mxu1 %v11483_v47  ;;  %v7444_v46 = vpop.f32.mrf.mxu1 }
 0x387   :  { %8307 = vmatprep.subr.mxu0 %v13922_v11  ;;  %v11938_v37 = vadd.f32 %v7437_v36, %v3755_v63  ;;  %8359 = vmatprep.subr.mxu1 %v11506_v40 }
 0x388   :  { %8308 = vmatpush3.msra.mxu0 %v13922_v11  ;;  %v7383_v16 = vpop.f32.mrf.mxu0  ;;  %8360 = vmatpush3.msra.mxu1 %v11506_v40  ;;  %v7445_v54 = vpop.f32.mrf.mxu1 }
 0x389   :  { %8251 = vmatmul.mubr.f32.gmra.mxu0 %v11793_v27  ;;  %v7384_v3 = vadd.f32 %v7383_v16, %v7382_v61  ;;  %8309 = vmatprep.subr.mxu0 %v13923_v57  ;;  %v7446_v47 = vadd.f32 %v7445_v54, %v7444_v46 }
 0x38a   :  { %8361 = vmatprep.subr.mxu1 %v11529_v41  ;;  %8310 = vmatpush3.msra.mxu0 %v13923_v57 }
 0x38b   :  { %8329 = vmatprep.mubr.f32.mxu0 %v11665_v35  ;;  %v3770_v9 = vadd.f32 %v7384_v3, %v11822_v13  ;;  %8362 = vmatpush3.msra.mxu1 %v11529_v41  ;;  %v13926_v13 = vld [vmem:[#allocation76_spill] sm:$0xff] }
 0x38c   :  { %8311 = vmatprep.subr.mxu0 %v13924_v18  ;;  %v7385_v40 = vpop.f32.mrf.mxu0  ;;  %8363 = vmatprep.subr.mxu1 %v11547_v5  ;;  %v7447_v27 = vpop.f32.mrf.mxu1 }
 0x38d   :  { %8312 = vmatpush3.msra.mxu0 %v13924_v18  ;;  %v11953_v32 = vadd.f32 %v7440_v19, %v3770_v9  ;;  %8364 = vmatpush3.msra.mxu1 %v11547_v5 }
 0x38e   :  { %8313 = vmatprep.subr.mxu0 %v13925_v21  ;;  %v7386_v1 = vpop.f32.mrf.mxu0  ;;  %8365 = vmatprep.subr.mxu1 %v11563_v60  ;;  %v7448_v35 = vpop.f32.mrf.mxu1 }
 0x38f   :  { %8314 = vmatpush3.msra.mxu0 %v13925_v21  ;;  %v7387_v41 = vadd.f32 %v7386_v1, %v7385_v40  ;;  %8366 = vmatpush3.msra.mxu1 %v11563_v60  ;;  %v7449_v29 = vadd.f32 %v7448_v35, %v7447_v27 }
 0x390   :  { %8315 = vmatprep.subr.mxu0 %v13926_v13  ;;  %8367 = vmatprep.subr.mxu1 %v11581_v51 }
 0x391   :  { %8316 = vmatpush3.msra.mxu0 %v13926_v13  ;;  %v3785_v5 = vadd.f32 %v7387_v41, %v11844_v28  ;;  %8368 = vmatpush3.msra.mxu1 %v11581_v51 }
 0x392   :  { %8317 = vmatprep.subr.mxu0 %v13927_v34  ;;  %v7388_v4 = vpop.f32.mrf.mxu0  ;;  %8369 = vmatprep.subr.mxu1 %v11597_v10  ;;  %v7450_v50 = vpop.f32.mrf.mxu1 }
 0x393   :  { %8318 = vmatpush3.msra.mxu0 %v13927_v34  ;;  %v11968_v60 = vadd.f32 %v7443_v6, %v3785_v5  ;;  %8370 = vmatpush3.msra.mxu1 %v11597_v10 }
 0x394   :  { %8319 = vmatprep.subr.mxu0 %v13928_v15  ;;  %v7389_v58 = vpop.f32.mrf.mxu0  ;;  %8371 = vmatprep.subr.mxu1 %v11615_v31  ;;  %v7451_v28 = vpop.f32.mrf.mxu1 }
 0x395   :  { %8320 = vmatpush3.msra.mxu0 %v13928_v15  ;;  %v7390_v51 = vadd.f32 %v7389_v58, %v7388_v4  ;;  %8372 = vmatpush3.msra.mxu1 %v11615_v31  ;;  %v7452_v24 = vadd.f32 %v7451_v28, %v7450_v50  ;;  %v13932_v31 = vld [vmem:[#allocation70_spill] sm:$0xff] }
 0x396   :  { %8321 = vmatprep.subr.mxu0 %v13929_v12  ;;  %8374 = vmatmul.mubr.f32.vlgmr.msra.gmra.mxu1 %v11676_v53 }
 0x397   :  { %8322 = vmatpush3.msra.mxu0 %v13929_v12  ;;  %v3800_v10 = vadd.f32 %v7390_v51, %v11837_v17  ;;  %8376 = vmatprep.mubr.f32.mxu1 %v13930_v7  ;;  %v13934_v17 = vld [vmem:[#allocation81_spill] sm:$0xff] }
 0x398   :  { %8323 = vmatprep.subr.mxu0 %v13931_v62  ;;  %v7391_v56 = vpop.f32.mrf.mxu0  ;;  %v7453_v8 = vpop.f32.mrf.mxu1 }
 0x399   :  { %8324 = vmatpush3.msra.mxu0 %v13931_v62  ;;  %v11982_v22 = vadd.f32 %v7446_v47, %v3800_v10 }
 0x39a   :  { %8325 = vmatprep.subr.mxu0 %v13932_v31  ;;  %v7392_v45 = vpop.f32.mrf.mxu0  ;;  %8377 = vmatmul.mubr.f32.gmra.mxu1 %v13933_v39  ;;  %v7454_v33 = vpop.f32.mrf.mxu1 }
 0x39b   :  { %8326 = vmatpush3.msra.mxu0 %v13932_v31  ;;  %v7393_v48 = vadd.f32 %v7392_v45, %v7391_v56  ;;  %8379 = vmatprep.mubr.f32.mxu1 %v13934_v17  ;;  %v7455_v36 = vadd.f32 %v7454_v33, %v7453_v8 }
 0x39c   :  { %8327 = vmatprep.subr.mxu0 %v13935_v23 }
 0x39d   :  { %8328 = vmatpush3.msra.mxu0 %v13935_v23  ;;  %v3815_v0 = vadd.f32 %v7393_v48, %v11862_v59 }
 0x39e   :  { %8330 = vmatmul.mubr.f32.vlgmr.msra.gmra.mxu0 %v11676_v53  ;;  %v7394_v52 = vpop.f32.mrf.mxu0  ;;  %8380 = vmatmul.mubr.f32.gmra.mxu1 %v13936_v30  ;;  %v7456_v25 = vpop.f32.mrf.mxu1 }
 0x39f   :  { %8332 = vmatprep.mubr.f32.mxu0 %v13930_v7  ;;  %v11994_v19 = vadd.f32 %v7449_v29, %v3815_v0  ;;  %8382 = vmatprep.mubr.f32.mxu1 %v13937_v26 }
 0x3a0   :  { %v7395_v55 = vpop.f32.mrf.mxu0  ;;  %v7457_v43 = vpop.f32.mrf.mxu1 }
 0x3a1   :  { %v7396_v20 = vadd.f32 %v7395_v55, %v7394_v52  ;;  %v7458_v42 = vadd.f32 %v7457_v43, %v7456_v25 }
 0x3a2   :  { %8333 = vmatmul.mubr.f32.gmra.mxu0 %v13933_v39  ;;  %8383 = vmatmul.mubr.f32.gmra.mxu1 %v13938_v49 }
 0x3a3   :  { %8335 = vmatprep.mubr.f32.mxu0 %v13934_v17  ;;  %v3830_v53 = vadd.f32 %v7396_v20, %v11855_v14 }
 0x3a4   :  { %v7397_v59 = vpop.f32.mrf.mxu0 }
 0x3a5   :  { %v7547_v6 = vpop.f32.mrf.mxu1  ;;  %v12001_v2 = vadd.f32 %v7452_v24, %v3830_v53 }
 0x3a6   :  { %8336 = vmatmul.mubr.f32.gmra.mxu0 %v13936_v30  ;;  %v7398_v63 = vpop.f32.mrf.mxu0 }
 0x3a7   :  { %8338 = vmatprep.mubr.f32.mxu0 %v13937_v26  ;;  %v7399_v61 = vadd.f32 %v7398_v63, %v7397_v59  ;;  %v7548_v11 = vpop.f32.mrf.mxu1 }
 0x3a8   :  { %v7549_v46 = vadd.f32 %v7548_v11, %v7547_v6 }
 0x3a9   :  { %v3845_v16 = vadd.f32 %v7399_v61, %v11878_v44 }
 0x3aa   :  { %8339 = vmatmul.mubr.f32.gmra.mxu0 %v13938_v49  ;;  %v7400_v3 = vpop.f32.mrf.mxu0 }
 0x3ab   :  { %v7550_v54 = vpop.f32.mrf.mxu1  ;;  %v4134_v57 = vadd.f32 %v7455_v36, %v3845_v16 }
 0x3ac   :  { %v7401_v14 = vpop.f32.mrf.mxu0 }
 0x3ad   :  { %v7402_v47 = vadd.f32 %v7401_v14, %v7400_v3  ;;  %v7551_v9 = vpop.f32.mrf.mxu1 }
 0x3ae   :  { %v7552_v18 = vadd.f32 %v7551_v9, %v7550_v54 }
 0x3af   :  { %v3860_v40 = vadd.f32 %v7402_v47, %v11871_v38 }
 0x3b0   :  { %v7491_v27 = vpop.f32.mrf.mxu0  ;;  %v7553_v21 = vpop.f32.mrf.mxu1 }
 0x3b1   :  { %v4141_v1 = vadd.f32 %v7458_v42, %v3860_v40 }
 0x3b2   :  { %v7492_v41 = vpop.f32.mrf.mxu0  ;;  %v7554_v13 = vpop.f32.mrf.mxu1 }
 0x3b3   :  { %v7493_v35 = vadd.f32 %v7492_v41, %v7491_v27  ;;  %v7555_v29 = vadd.f32 %v7554_v13, %v7553_v21  ;;  %v13939_v27 = vlaneseq  ;;  %v13940_v21 = vmov 0.0  }
 0x3b5   :  { %v4279_v44 = vadd.f32 %v7493_v35, %v11938_v37  ;;  %vm5852_vm1 = vcmp.lt.s32.totalorder %v13939_v27, 384  ;;  %vm5857_vm2 = vcmp.lt.s32.totalorder %v13939_v27, 7  ;;  %vm5888_vm3 = vcmp.ge.s32.totalorder %v13939_v27, 5 }
 0x3b6   :  { %v7494_v5 = vpop.f32.mrf.mxu0  ;;  %v7556_v34 = vpop.f32.mrf.mxu1  ;;  %5854 = vst.msk [vmem:[%s12950_s9] sm:$0x7] %vm5852_vm1, %v13940_v21  ;;  %vm5889_vm4 = vcmp.lt.s32.totalorder %v13939_v27, 12  ;;  %vm5898_vm6 = vcmp.ge.s32.totalorder %v13939_v27, 10  ;;  %vm5899_vm7 = vcmp.lt.s32.totalorder %v13939_v27, 17  ;;  %vm5908_vm9 = vcmp.ge.s32.totalorder %v13939_v27, 15 }
 0x3b7   :  { %v12009_v4 = vadd.f32 %v7549_v46, %v4279_v44  ;;  %vm5890_vm5 = vmand %vm5888_vm3, %vm5889_vm4  ;;  %vm5909_vm10 = vcmp.lt.s32.totalorder %v13939_v27, 22  ;;  %vm5932_vm12 = vcmp.ge.s32.totalorder %v13939_v27, 20  ;;  %vm5933_vm13 = vcmp.lt.s32.totalorder %v13939_v27, 27 }
 0x3b8   :  { %v7495_v50 = vpop.f32.mrf.mxu0  ;;  %v7557_v58 = vpop.f32.mrf.mxu1  ;;  %vm5900_vm8 = vmand %vm5898_vm6, %vm5899_vm7  ;;  %vm5949_vm15 = vcmp.ge.s32.totalorder %v13939_v27, 25  ;;  %vm5950_vm0 = vcmp.lt.s32.totalorder %v13939_v27, 32  ;;  %vm5960_vm3 = vcmp.lt.s32.totalorder %v13939_v27, 37  ;;  %vm5970_vm6 = vcmp.lt.s32.totalorder %v13939_v27, 42 }
 0x3b9   :  { %v7496_v15 = vadd.f32 %v7495_v50, %v7494_v5  ;;  %v7558_v51 = vadd.f32 %v7557_v58, %v7556_v34  ;;  %vm5910_vm11 = vmand %vm5908_vm9, %vm5909_vm10  ;;  %vm5994_vm9 = vcmp.lt.s32.totalorder %v13939_v27, 47 }
 0x3ba   :  { %vm5934_vm14 = vmand %vm5932_vm12, %vm5933_vm13  ;;  %vm6011_vm12 = vcmp.lt.s32.totalorder %v13939_v27, 52 }
 0x3bb   :  { %v4288_v28 = vadd.f32 %v7496_v15, %v11953_v32  ;;  %vm5951_vm1 = vmand %vm5949_vm15, %vm5950_vm0  ;;  %vm6021_vm15 = vcmp.lt.s32.totalorder %v13939_v27, 57 }
 0x3bc   :  { %v7497_v38 = vpop.f32.mrf.mxu0  ;;  %v7559_v12 = vpop.f32.mrf.mxu1 }
 0x3bd   :  { %v12012_v24 = vadd.f32 %v7552_v18, %v4288_v28 }
 0x3be   :  { %v7498_v10 = vpop.f32.mrf.mxu0  ;;  %v7560_v62 = vpop.f32.mrf.mxu1 }
 0x3bf   :  { %v7499_v7 = vadd.f32 %v7498_v10, %v7497_v38  ;;  %v7561_v56 = vadd.f32 %v7560_v62, %v7559_v12 }
 0x3c1   :  { %v4297_v37 = vadd.f32 %v7499_v7, %v11968_v60 }
 0x3c2   :  { %v7500_v8 = vpop.f32.mrf.mxu0  ;;  %v7562_v31 = vpop.f32.mrf.mxu1 }
 0x3c3   :  { %v4472_v45 = vadd.f32 %v7555_v29, %v4297_v37 }
 0x3c4   :  { %v7501_v39 = vpop.f32.mrf.mxu0  ;;  %v7563_v33 = vpop.f32.mrf.mxu1 }
 0x3c5   :  { %v7502_v48 = vadd.f32 %v7501_v39, %v7500_v8  ;;  %v7564_v17 = vadd.f32 %v7563_v33, %v7562_v31 }
 0x3c7   :  { %v4306_v23 = vadd.f32 %v7502_v48, %v11982_v22 }
 0x3c8   :  { %v7503_v32 = vpop.f32.mrf.mxu0  ;;  %v7565_v36 = vpop.f32.mrf.mxu1 }
 0x3c9   :  { %v4483_v0 = vadd.f32 %v7558_v51, %v4306_v23 }
 0x3ca   :  { %v7504_v52 = vpop.f32.mrf.mxu0  ;;  %v7566_v25 = vpop.f32.mrf.mxu1 }
 0x3cb   :  { %v7505_v30 = vadd.f32 %v7504_v52, %v7503_v32  ;;  %v7567_v26 = vadd.f32 %v7566_v25, %v7565_v36 }
 0x3cd   :  { %v4315_v55 = vadd.f32 %v7505_v30, %v11994_v19 }
 0x3ce   :  { %v7506_v20 = vpop.f32.mrf.mxu0  ;;  %v7568_v60 = vpop.f32.mrf.mxu1 }
 0x3cf   :  { %v4494_v43 = vadd.f32 %v7561_v56, %v4315_v55 }
 0x3d0   :  { %v7507_v42 = vpop.f32.mrf.mxu0  ;;  %v7569_v53 = vpop.f32.mrf.mxu1 }
 0x3d1   :  { %v7508_v49 = vadd.f32 %v7507_v42, %v7506_v20  ;;  %v7570_v59 = vadd.f32 %v7569_v53, %v7568_v60 }
 0x3d3   :  { %v4324_v6 = vadd.f32 %v7508_v49, %v12001_v2 }
 0x3d4   :  { %v7509_v63 = vpop.f32.mrf.mxu0 }
 0x3d5   :  { %v12018_v22 = vpop.f32.mrf.mxu1  ;;  %v4505_v61 = vadd.f32 %v7564_v17, %v4324_v6 }
 0x3d6   :  { %v7510_v11 = vpop.f32.mrf.mxu0 }
 0x3d7   :  { %v7511_v46 = vadd.f32 %v7510_v11, %v7509_v63  ;;  %v12020_v16 = vpop.f32.mrf.mxu1 }
 0x3d9   :  { %v4333_v3 = vadd.f32 %v7511_v46, %v4134_v57 }
 0x3da   :  { %v7512_v54 = vpop.f32.mrf.mxu0 }
 0x3db   :  { %v12022_v19 = vpop.f32.mrf.mxu1  ;;  %v4516_v14 = vadd.f32 %v7567_v26, %v4333_v3 }
 0x3dc   :  { %v7513_v47 = vpop.f32.mrf.mxu0 }
 0x3dd   :  { %v7514_v9 = vadd.f32 %v7513_v47, %v7512_v54  ;;  %v12024_v18 = vpop.f32.mrf.mxu1 }
 0x3df   :  { %v4342_v40 = vadd.f32 %v7514_v9, %v4141_v1 }
 0x3e0   :  { %v12027_v2 = vpop.f32.mrf.mxu0  ;;  %v7665_v41 = vpop.f32.mrf.mxu1 }
 0x3e1   :  { %v4527_v57 = vadd.f32 %v7570_v59, %v4342_v40 }
 0x3e2   :  { %v12033_v35 = vpop.f32.mrf.mxu0  ;;  %v7666_v13 = vpop.f32.mrf.mxu1 }
 0x3e3   :  { %v7667_v29 = vadd.f32 %v7666_v13, %v7665_v41 }
 0x3e6   :  { %v12035_v44 = vpop.f32.mrf.mxu0  ;;  %v7668_v5 = vpop.f32.mrf.mxu1 }
 0x3e8   :  { %v12037_v34 = vpop.f32.mrf.mxu0  ;;  %v7669_v1 = vpop.f32.mrf.mxu1 }
 0x3e9   :  { %v7670_v50 = vadd.f32 %v7669_v1, %v7668_v5 }
 0x3ec   :  { %v7609_v15 = vpop.f32.mrf.mxu0  ;;  %v7671_v58 = vpop.f32.mrf.mxu1 }
 0x3ee   :  { %v7610_v51 = vpop.f32.mrf.mxu0  ;;  %v7672_v38 = vpop.f32.mrf.mxu1 }
 0x3ef   :  { %v7611_v28 = vadd.f32 %v7610_v51, %v7609_v15  ;;  %v7673_v12 = vadd.f32 %v7672_v38, %v7671_v58 }
 0x3f1   :  { %v4709_v10 = vadd.f32 %v7611_v28, %v4472_v45 }
 0x3f2   :  { %v7612_v7 = vpop.f32.mrf.mxu0  ;;  %v7674_v62 = vpop.f32.mrf.mxu1 }
 0x3f3   :  { %v12039_v56 = vadd.f32 %v7667_v29, %v4709_v10 }
 0x3f4   :  { %v7613_v37 = vpop.f32.mrf.mxu0  ;;  %v7675_v31 = vpop.f32.mrf.mxu1 }
 0x3f5   :  { %v7614_v8 = vadd.f32 %v7613_v37, %v7612_v7  ;;  %v7676_v39 = vadd.f32 %v7675_v31, %v7674_v62 }
 0x3f7   :  { %v4716_v48 = vadd.f32 %v7614_v8, %v4483_v0 }
 0x3f8   :  { %v7615_v33 = vpop.f32.mrf.mxu0  ;;  %v7677_v17 = vpop.f32.mrf.mxu1 }
 0x3f9   :  { %v12041_v23 = vadd.f32 %v7670_v50, %v4716_v48 }
 0x3fa   :  { %v7616_v32 = vpop.f32.mrf.mxu0  ;;  %v7678_v52 = vpop.f32.mrf.mxu1 }
 0x3fb   :  { %v7617_v36 = vadd.f32 %v7616_v32, %v7615_v33  ;;  %v7679_v30 = vadd.f32 %v7678_v52, %v7677_v17 }
 0x3fd   :  { %v4723_v25 = vadd.f32 %v7617_v36, %v4494_v43 }
 0x3fe   :  { %v7618_v26 = vpop.f32.mrf.mxu0  ;;  %v7680_v45 = vpop.f32.mrf.mxu1 }
 0x3ff   :  { %v4876_v55 = vadd.f32 %v7673_v12, %v4723_v25 }
 0x400   :  { %v7619_v20 = vpop.f32.mrf.mxu0  ;;  %v7681_v42 = vpop.f32.mrf.mxu1 }
 0x401   :  { %v7620_v60 = vadd.f32 %v7619_v20, %v7618_v26  ;;  %v7682_v49 = vadd.f32 %v7681_v42, %v7680_v45 }
 0x403   :  { %v4730_v53 = vadd.f32 %v7620_v60, %v4505_v61 }
 0x404   :  { %v7621_v59 = vpop.f32.mrf.mxu0 }
 0x405   :  { %v4883_v6 = vadd.f32 %v7676_v39, %v4730_v53  ;;  %v12043_v11 = vpop.f32.mrf.mxu1 }
 0x406   :  { %v7622_v0 = vpop.f32.mrf.mxu0 }
 0x407   :  { %v7623_v63 = vadd.f32 %v7622_v0, %v7621_v59  ;;  %v5208_v9 = vpop.f32.mrf.mxu1 }
 0x409   :  { %v4737_v46 = vadd.f32 %v7623_v63, %v4516_v14  ;;  %v7608_v63 = vadd.f32 %v12037_v34, %v12035_v44 }
 0x40a   :  { %v7624_v3 = vpop.f32.mrf.mxu0 }
 0x40b   :  { %v4890_v54 = vadd.f32 %v7679_v30, %v4737_v46  ;;  %v12045_v41 = vpop.f32.mrf.mxu1 }
 0x40c   :  { %v7625_v47 = vpop.f32.mrf.mxu0 }
 0x40d   :  { %v7626_v43 = vadd.f32 %v7625_v47, %v7624_v3  ;;  %v12047_v5 = vpop.f32.mrf.mxu1 }
 0x40f   :  { %v4744_v40 = vadd.f32 %v7626_v43, %v4527_v57 }
 0x410   :  { %v8155_v21 = vpop.f32.mrf.mxu0  ;;  %v8205_v50 = vpop.f32.mrf.mxu1 }
 0x411   :  { %v4897_v13 = vadd.f32 %v7682_v49, %v4744_v40  ;;  %v4702_v40 = vadd.f32 %v7608_v63, %v12012_v24 }
 0x412   :  { %v4987_v29 = vpop.f32.mrf.mxu0  ;;  %v5232_v58 = vpop.f32.mrf.mxu1 }
 0x416   :  { %v8158_v61 = vpop.f32.mrf.mxu0  ;;  %v8208_v12 = vpop.f32.mrf.mxu1 }
 0x418   :  { %v12049_v1 = vpop.f32.mrf.mxu0  ;;  %v5244_v31 = vpop.f32.mrf.mxu1 }
 0x41c   :  { %v8161_v15 = vpop.f32.mrf.mxu0 }
 0x41d   :  { %v5038_v14 = vadd.f32 %v8161_v15, %v4883_v6  ;;  %v7605_v6 = vadd.f32 %v12033_v35, %v12027_v2  ;;  %v7664_v2 = vadd.f32 %v12024_v18, %v12022_v19 }
 0x41e   :  { %v5027_v51 = vpop.f32.mrf.mxu0 }
 0x41f   :  { %v5028_v28 = vadd.f32 %v5027_v51, %v4876_v55  ;;  %v5239_v38 = vadd.f32 %v8205_v50, %v5038_v14  ;;  %v4695_v43 = vadd.f32 %v7605_v6, %v12009_v4  ;;  %v4855_v50 = vadd.f32 %v7664_v2, %v4702_v40 }
 0x421   :  { %v8164_v10 = vpop.f32.mrf.mxu0  ;;  %v5233_v57 = vadd.f32 %v5232_v58, %v5028_v28  ;;  %v4998_v44 = vadd.f32 %v8155_v21, %v4855_v50  ;;  %v5018_v58 = vadd.f32 %v8158_v61, %v12041_v23 }
 0x422   :  { %v5058_v7 = vadd.f32 %v8164_v10, %v4897_v13  ;;  %v7661_v13 = vadd.f32 %v12020_v16, %v12018_v22 }
 0x423   :  { %v5047_v62 = vpop.f32.mrf.mxu0  ;;  %v5215_v28 = vadd.f32 %v12043_v11, %v4998_v44  ;;  %v5227_v22 = vadd.f32 %v12045_v41, %v5018_v58  ;;  %v5855_v41 = vld [vmem:[%s12950_s9] sm:$0x1] }
 0x424   :  { %v5048_v37 = vadd.f32 %v5047_v62, %v4890_v54  ;;  %v5251_v8 = vadd.f32 %v8208_v12, %v5058_v7  ;;  %v4848_v35 = vadd.f32 %v7661_v13, %v4695_v43  ;;  %v8473_v12 = vmov 1966171168  }
 0x425   :  { %v5863_v10 = vunpack.c.l.s4 %v8473_v12 }
 0x426   :  { %v5245_v39 = vadd.f32 %v5244_v31, %v5048_v37  ;;  %v4988_v15 = vadd.f32 %v4987_v29, %v4848_v35 }
 0x427   :  { %v5864_v62 = vunpack.c.0.s8 %v5863_v10 }
 0x428   :  { %v5209_v14 = vadd.f32 %v5208_v9, %v4988_v15 }
 0x42e   :  { %v8287_v48 = vpop.f32.mrf.mxu1 }
 0x430   :  { %v5492_v33 = vpop.f32.mrf.mxu1 }
 0x433   :  { %v8290_v32 = vpop.f32.mrf.mxu1 }
 0x435   :  { %v12051_v52 = vpop.f32.mrf.mxu1 }
 0x438   :  { %v8243_v17 = vpop.f32.mrf.mxu0  ;;  %v8293_v26 = vpop.f32.mrf.mxu1 }
 0x439   :  { %v5362_v24 = vadd.f32 %v8243_v17, %v5215_v28 }
 0x43a   :  { %v5354_v36 = vpop.f32.mrf.mxu0  ;;  %v5524_v55 = vpop.f32.mrf.mxu1 }
 0x43b   :  { %v5355_v4 = vadd.f32 %v5354_v36, %v5209_v14  ;;  %v5501_v21 = vadd.f32 %v8287_v48, %v5362_v24  ;;  %v13941_v36 = vld [vmem:[#allocation2_spill] sm:$0xff] }
 0x43d   :  { %v5493_v29 = vadd.f32 %v5492_v33, %v5355_v4  ;;  %v12080_v33 = vsub.s32 %v5864_v62, %v13941_v36 }
 0x43e   :  { %v8246_v30 = vpop.f32.mrf.mxu0  ;;  %v8296_v49 = vpop.f32.mrf.mxu1 }
 0x43f   :  { %v5376_v18 = vadd.f32 %v8246_v30, %v5227_v22 }
 0x440   :  { %v12053_v25 = vpop.f32.mrf.mxu0  ;;  %v5540_v54 = vpop.f32.mrf.mxu1 }
 0x441   :  { %v5517_v31 = vadd.f32 %v8290_v32, %v5376_v18 }
 0x444   :  { %v8249_v45 = vpop.f32.mrf.mxu0 }
 0x445   :  { %v5390_v20 = vadd.f32 %v8249_v45, %v5239_v38 }
 0x446   :  { %v5382_v60 = vpop.f32.mrf.mxu0 }
 0x447   :  { %v5533_v42 = vadd.f32 %v8293_v26, %v5390_v20  ;;  %v5383_v11 = vadd.f32 %v5382_v60, %v5233_v57 }
 0x449   :  { %v8252_v53 = vpop.f32.mrf.mxu0 }
 0x44a   :  { %v5404_v59 = vadd.f32 %v8252_v53, %v5251_v8 }
 0x44b   :  { %v5396_v0 = vpop.f32.mrf.mxu0 }
 0x44c   :  { %v5397_v46 = vadd.f32 %v5396_v0, %v5245_v39  ;;  %v12059_v3 = vadd.f32 %v8296_v49, %v5404_v59  ;;  %v5008_v39 = vadd.f32 %v12049_v1, %v12039_v56  ;;  %v5525_v56 = vadd.f32 %v5524_v55, %v5383_v11 }
 0x44e   :  { %v12061_v47 = vadd.f32 %v5540_v54, %v5397_v46  ;;  %v5221_v1 = vadd.f32 %v12047_v5, %v5008_v39 }
 0x450   :  { %v5369_v63 = vadd.f32 %v12053_v25, %v5221_v1 }
 0x456   :  { %v8375_v34 = vpop.f32.mrf.mxu1 }
 0x458   :  { %v5796_v51 = vpop.f32.mrf.mxu1 }
 0x45a   :  { %v8378_v38 = vpop.f32.mrf.mxu1 }
 0x45c   :  { %v12072_v16 = vpop.f32.mrf.mxu1 }
 0x45e   :  { %v8331_v19 = vpop.f32.mrf.mxu0  ;;  %v8381_v61 = vpop.f32.mrf.mxu1 }
 0x45f   :  { %v5674_v9 = vadd.f32 %v8331_v19, %v5501_v21 }
 0x460   :  { %v5667_v7 = vpop.f32.mrf.mxu0  ;;  %v5820_v45 = vpop.f32.mrf.mxu1 }
 0x461   :  { %v5668_v23 = vadd.f32 %v5667_v7, %v5493_v29  ;;  %v5803_v26 = vadd.f32 %v8375_v34, %v5674_v9 }
 0x462   :  { %v8334_v37 = vpop.f32.mrf.mxu0  ;;  %v8384_v54 = vpop.f32.mrf.mxu1 }
 0x463   :  { %v5797_v8 = vadd.f32 %v5796_v51, %v5668_v23  ;;  %v5686_v30 = vadd.f32 %v8334_v37, %v5517_v31  ;;  %v5843_v46 = vmul.f32 0.055555556, %v5803_v26 }
 0x464   :  { %v5679_v17 = vpop.f32.mrf.mxu0  ;;  %v5832_v14 = vpop.f32.mrf.mxu1 }
 0x465   :  { %v5842_v48 = vmul.f32 0.055555556, %v5797_v8  ;;  %v5815_v59 = vadd.f32 %v8378_v38, %v5686_v30  ;;  %v12098_v58 = vrot.slane %v5843_v46, %v12080_v33  ;;  %v6035_v19 = vcombine.high %v5843_v46, %v5843_v46 }
 0x466   :  { %v8337_v57 = vpop.f32.mrf.mxu0 }
 0x467   :  { %v5856_v20 = vadd.f32 %v5855_v41, %v5842_v48  ;;  %v5868_v32 = vrot.slane %v5842_v48, %v12080_v33  ;;  %v5913_v60 = vcombine.high %v5842_v48, %v5842_v48  ;;  %v5698_v49 = vadd.f32 %v8337_v57, %v5533_v42 }
 0x468   :  { %v5691_v53 = vpop.f32.mrf.mxu0  ;;  %v12094_v44 = vmul.f32 0.055555556, %v5815_v59  ;;  %v5988_v18 = vrot.slane %v12098_v58, %v12080_v33  ;;  %v12121_v11 = vrot.slane %v6035_v19, %v12080_v33  ;;  %v5998_v46 = vcombine.high %v12098_v58, %v12098_v58 }
 0x469   :  { %5859 = vst.msk [vmem:[%s12950_s9] sm:$0x1] %vm5857_vm2, %v5856_v20  ;;  %v5692_v6 = vadd.f32 %v5691_v53, %v5525_v56  ;;  %v5869_v0 = vcombine.high %v5868_v32, %v5868_v32  ;;  %v5827_v43 = vadd.f32 %v8381_v61, %v5698_v49  ;;  %v5920_v13 = vrot.slane %v5913_v60, %v12080_v33 }
 0x46a   :  { %v8340_v40 = vpop.f32.mrf.mxu0  ;;  %v5876_v2 = vrot.slane %v5868_v32, %v12080_v33  ;;  %v6015_v37 = vcombine.high %v5988_v18, %v5988_v18  ;;  %v6049_v48 = vrot.slane %v12121_v11, %v12080_v33  ;;  %v6225_v19 = vrot.slane %v12094_v44, %v12080_v33 }
 0x46b   :  { %v5821_v55 = vadd.f32 %v5820_v45, %v5692_v6  ;;  %v5710_v5 = vadd.f32 %v8340_v40, %v12059_v3  ;;  %v5883_v42 = vrot.slane %v5869_v0, %v12080_v33  ;;  %v5847_v35 = vmul.f32 0.055555556, %v5827_v43 }
 0x46c   :  { %v5703_v50 = vpop.f32.mrf.mxu0  ;;  %v5927_v15 = vrot.slane %v5920_v13, %v12080_v33  ;;  %v5509_v3 = vadd.f32 %v12051_v52, %v5369_v63  ;;  %v5893_v12 = vcombine.high %v5876_v2, %v5876_v2  ;;  %v5937_v8 = vcombine.high %v5920_v13, %v5920_v13 }
 0x46d   :  { %v5839_v25 = vadd.f32 %v8384_v54, %v5710_v5  ;;  %v5704_v34 = vadd.f32 %v5703_v50, %v12061_v47  ;;  %5884 = vrot.lane.b32.xlu1 %v5883_v42, %s8474_s22  ;;  %v6472_v51 = vrot.slane %v5847_v35, %v12080_v33  ;;  %v5846_v4 = vmul.f32 0.055555556, %v5821_v55  ;;  %s8504_s22 = smov 126  }
 0x46e   :  { %v5954_v28 = vcombine.high %v5927_v15, %v5927_v15  ;;  %v6282_v47 = vcombine.high %v12094_v44, %v12094_v44  ;;  %v5680_v10 = vadd.f32 %v5679_v17, %v5509_v3  ;;  %v5903_v7 = vcombine.high %v5883_v42, %v5883_v42 }
 0x46f   :  { %v12102_v38 = vmul.f32 0.055555556, %v5839_v25  ;;  %v5833_v24 = vadd.f32 %v5832_v14, %v5704_v34  ;;  %v6404_v29 = vcombine.high %v5846_v4, %v5846_v4  ;;  %v6526_v9 = vcombine.high %v5847_v35, %v5847_v35 }
 0x470   :  { %5955 = vrot.lane.b32.xlu0 %v5954_v28, %s8475_s3  ;;  %v5809_v62 = vadd.f32 %v12072_v16, %v5680_v10  ;;  %v12115_v23 = vrot.slane %v6282_v47, %v12080_v33  ;;  %v12118_v61 = vrot.slane %v5846_v4, %v12080_v33  ;;  %v12130_v36 = vrot.slane %v6472_v51, %v12080_v33  ;;  %s8505_s3 = smov 44  }
 0x471   :  { %v12108_v22 = vrot.slane %v12102_v38, %v12080_v33  ;;  %v5848_v52 = vmul.f32 0.055555556, %v5833_v24  ;;  %5894 = vrot.lane.b32.xlu1 %v5893_v12, %s8476_s23  ;;  %v6411_v31 = vrot.slane %v6404_v29, %v12080_v33  ;;  %v6533_v45 = vrot.slane %v6526_v9, %v12080_v33  ;;  %s8506_s23 = smov 8  }
 0x472   :  { %v6306_v16 = vcombine.high %v12115_v23, %v12115_v23  ;;  %v5844_v39 = vmul.f32 0.055555556, %v5809_v62  ;;  %v6367_v26 = vcombine.high %v12118_v61, %v12118_v61  ;;  %v5944_v57 = vrot.slane %v5937_v8, %v12080_v33 }
 0x473   :  { %v6594_v21 = vrot.slane %v5848_v52, %v12080_v33  ;;  %v6651_v41 = vcombine.high %v5848_v52, %v5848_v52  ;;  %v12127_v17 = vrot.slane %v6411_v31, %v12080_v33  ;;  %v6428_v20 = vcombine.high %v6411_v31, %v6411_v31 }
 0x474   :  { %5989 = vrot.lane.b32.xlu0 %v5988_v18, %s8477_s24  ;;  %v12135_v30 = vrot.slane %v6306_v16, %v12080_v33  ;;  %v6773_v60 = vcombine.high %v12102_v38, %v12102_v38  ;;  %v12147_v56 = vrot.slane %v6367_v26, %v12080_v33  ;;  %v12150_v1 = vrot.slane %v6533_v45, %v12080_v33  ;;  %s8507_s24 = smov 54  }
 0x475   :  { %5904 = vrot.lane.b32.xlu1 %v5903_v7, %s8478_s25  ;;  %v12142_v32 = vrot.slane %v6594_v21, %v12080_v33  ;;  %v6489_v49 = vcombine.high %v6472_v51, %v6472_v51  ;;  %v6103_v53 = vrot.slane %v5844_v39, %v12080_v33  ;;  %v12154_v59 = vrot.slane %v6428_v20, %v12080_v33  ;;  %s8508_s25 = smov 18  }
 0x476   :  { %v6658_v6 = vrot.slane %v6651_v41, %v12080_v33  ;;  %v6550_v0 = vcombine.high %v6533_v45, %v6533_v45  ;;  %v6076_v63 = vcombine.high %v6049_v48, %v6049_v48  ;;  %v12164_v43 = vrot.slane %v12108_v22, %v12080_v33 }
 0x477   :  { %v12160_v54 = vrot.slane %v6489_v49, %v12080_v33  ;;  %v5964_v40 = vcombine.high %v5944_v57, %v5944_v57  ;;  %v6611_v5 = vcombine.high %v6594_v21, %v6594_v21  ;;  %v6780_v42 = vrot.slane %v6773_v60, %v12080_v33 }
 0x478   :  { %6016 = vrot.lane.b32.xlu0 %v6015_v37, %s8479_s26  ;;  %v12167_v13 = vrot.slane %v6658_v6, %v12080_v33  ;;  %v12170_v55 = vrot.slane %v6550_v0, %v12080_v33  ;;  %v6675_v2 = vcombine.high %v6658_v6, %v6658_v6  ;;  %v6157_v35 = vcombine.high %v5844_v39, %v5844_v39  ;;  %s8509_s26 = smov 64  }
 0x479   :  { %5928 = vrot.lane.b32.xlu1 %v5927_v15, %s8480_s6  ;;  %v12174_v50 = vrot.slane %v6611_v5, %v12080_v33  ;;  %v6110_v15 = vrot.slane %v6103_v53, %v12080_v33  ;;  %v12178_v25 = vrot.slane %v6780_v42, %v12080_v33  ;;  %v6736_v58 = vcombine.high %v12108_v22, %v12108_v22  ;;  %s8510_s6 = smov 28  }
 0x47a   :  { %v12181_v34 = vrot.slane %v6675_v2, %v12080_v33  ;;  %v6005_v3 = vrot.slane %v5998_v46, %v12080_v33  ;;  %v6797_v51 = vcombine.high %v6780_v42, %v6780_v42  ;;  %v6164_v4 = vrot.slane %v6157_v35, %v12080_v33 }
 0x47b   :  { %v12187_v14 = vrot.slane %v6736_v58, %v12080_v33  ;;  %v6137_v28 = vcombine.high %v6110_v15, %v6110_v15  ;;  %v8487_v38 = vmov 2   ;;  %v8488_v24 = vmov 3  }
 0x47c   :  { %6050 = vrot.lane.b32.xlu0 %v6049_v48, %s8481_s5  ;;  %8460 = vset.pattern.permute.xlu1 %v8487_v38  ;;  %v6025_v12 = vcombine.high %v6005_v3, %v6005_v3  ;;  %v6059_v47 = vcombine.high %v12121_v11, %v12121_v11  ;;  %v12193_v10 = vrot.slane %v6797_v51, %v12080_v33  ;;  %s8511_s5 = smov 74   ;;  %vm5959_vm2 = vcmp.ge.s32.totalorder %v13939_v27, 30 }
 0x47d   :  { %5945 = vrot.lane.b32.xlu1 %v5944_v57, %s8482_s27  ;;  %8461 = vset.pattern.permute.xlu0 %v8488_v24  ;;  %v6171_v22 = vrot.slane %v6164_v4, %v12080_v33  ;;  %v6120_v21 = vcombine.high %v6103_v53, %v6103_v53  ;;  %v6232_v7 = vrot.slane %v6225_v19, %v12080_v33  ;;  %s8512_s27 = smov 39   ;;  %v5860_v53 = vld [vmem:[%s12950_s9] sm:$0x1]  ;;  %vm5961_vm4 = vmand %vm5959_vm2, %vm5960_vm3  ;;  %vm6031_vm2 = vcmp.lt.s32.totalorder %v13939_v27, 62 }
 0x47e   :  { %v6066_v52 = vrot.slane %v6059_v47, %v12080_v33  ;;  %v6181_v11 = vcombine.high %v6164_v4, %v6164_v4  ;;  %v6296_v44 = vrot.slane %v12115_v23, %v12080_v33  ;;  %v6242_v39 = vcombine.high %v6225_v19, %v6225_v19 }
 0x47f   :  { %v6198_v18 = vcombine.high %v6171_v22, %v6171_v22  ;;  %v6127_v62 = vrot.slane %v6120_v21, %v12080_v33  ;;  %v6262_v9 = vcombine.high %v6232_v7, %v6232_v7  ;;  %v6357_v41 = vrot.slane %v12118_v61, %v12080_v33 }
 0x480   :  { %6077 = vrot.lane.b32.xlu0 %v6076_v63, %s8483_s28  ;;  %v6086_v29 = vcombine.high %v6066_v52, %v6066_v52  ;;  %v6188_v8 = vrot.slane %v6181_v11, %v12080_v33  ;;  %v6323_v31 = vcombine.high %v6296_v44, %v6296_v44  ;;  %v6249_v48 = vrot.slane %v6242_v39, %v12080_v33  ;;  %s8513_s28 = smov 84  }
 0x481   :  { %5965 = vrot.lane.b32.xlu1 %v5964_v40, %s8484_s29  ;;  %v6147_v37 = vcombine.high %v6127_v62, %v6127_v62  ;;  %v6384_v23 = vcombine.high %v6357_v41, %v6357_v41  ;;  %v6445_v61 = vcombine.high %v12127_v17, %v12127_v17  ;;  %v6333_v33 = vcombine.high %v12135_v30, %v12135_v30  ;;  %s8514_s29 = smov 49  }
 0x482   :  { %v6208_v16 = vcombine.high %v6188_v8, %v6188_v8  ;;  %v6272_v26 = vcombine.high %v6249_v48, %v6249_v48  ;;  %v6506_v45 = vcombine.high %v12130_v36, %v12130_v36  ;;  %v6394_v57 = vcombine.high %v12147_v56, %v12147_v56 }
 0x483   :  { %v6516_v20 = vcombine.high %v12160_v54, %v12160_v54  ;;  %v6692_v60 = vcombine.high %v12167_v13, %v12167_v13  ;;  %v6814_v49 = vcombine.high %v12178_v25, %v12178_v25  ;;  %v6702_v6 = vcombine.high %v12181_v34, %v12181_v34 }
 0x484   :  { %6111 = vrot.lane.b32.xlu0 %v6110_v15, %s8485_s30  ;;  %s8515_s30 = smov 94  }
 0x485   :  { %6006 = vrot.lane.b32.xlu1 %v6005_v3, %s8486_s10  ;;  %s8516_s10 = smov 59   ;;  %v6824_v3 = vcombine.high %v12193_v10, %v12193_v10 }
 0x488   :  { %6138 = vrot.lane.b32.xlu0 %v6137_v28, %s8489_s11  ;;  %s8517_s11 = smov 104  }
 0x489   :  { %6026 = vrot.lane.b32.xlu1 %v6025_v12, %s8490_s12  ;;  %s8518_s12 = smov 69  }
 0x48c   :  { %6172 = vrot.lane.b32.xlu0 %v6171_v22, %s8491_s13  ;;  %s8519_s13 = smov 115  }
 0x48d   :  { %6067 = vrot.lane.b32.xlu1 %v6066_v52, %s8492_s14  ;;  %s8520_s14 = smov 79  }
 0x490   :  { %6199 = vrot.lane.b32.xlu0 %v6198_v18, %s8493_s15  ;;  %s8521_s15 = smov 125  }
 0x491   :  { %6087 = vrot.lane.b32.xlu1 %v6086_v29, %s8494_s16  ;;  %s8522_s16 = smov 89  }
 0x494   :  { %6233 = vrot.lane.b32.xlu0 %v6232_v7, %s8495_s17  ;;  %s8523_s17 = smov 7  }
 0x495   :  { %6128 = vrot.lane.b32.xlu1 %v6127_v62, %s8496_s18  ;;  %s8524_s18 = smov 99  }
 0x498   :  { %6263 = vrot.lane.b32.xlu0 %v6262_v9, %s8497_s0  ;;  %s8525_s0 = smov 17  }
 0x499   :  { %6148 = vrot.lane.b32.xlu1 %v6147_v37, %s8498_s4  ;;  %s8526_s4 = smov 109  }
 0x49c   :  { %6297 = vrot.lane.b32.xlu0 %v6296_v44, %s8499_s1  ;;  %s8527_s1 = smov 27  }
 0x49d   :  { %6189 = vrot.lane.b32.xlu1 %v6188_v8, %s8500_s19  ;;  %s8528_s19 = smov 120  }
 0x4a0   :  { %6324 = vrot.lane.b32.xlu0 %v6323_v31, %s8501_s20  ;;  %s8529_s20 = smov 37  }
 0x4a1   :  { %6209 = vrot.lane.b32.xlu1 %v6208_v16, %s8502_s21  ;;  %s8530_s21 = smov 2  }
 0x4a4   :  { %6358 = vrot.lane.b32.xlu0 %v6357_v41, %s8503_s7  ;;  %s8531_s7 = smov 47  }
 0x4a5   :  { %6250 = vrot.lane.b32.xlu1 %v6249_v48, %s8504_s22  ;;  %s8532_s22 = smov 12  }
 0x4a8   :  { %6385 = vrot.lane.b32.xlu0 %v6384_v23, %s8505_s3 }
 0x4a9   :  { %6273 = vrot.lane.b32.xlu1 %v6272_v26, %s8506_s23 }
 0x4ac   :  { %6419 = vrot.lane.b32.xlu0 %v12127_v17, %s8507_s24  ;;  %v6567_v17 = vcombine.high %v12150_v1, %v12150_v1  ;;  %s8533_s24 = smov 57  }
 0x4ad   :  { %6314 = vrot.lane.b32.xlu1 %v12135_v30, %s8508_s25  ;;  %v6455_v30 = vcombine.high %v12154_v59, %v12154_v59  ;;  %s8534_s25 = smov 22  }
 0x4b0   :  { %6446 = vrot.lane.b32.xlu0 %v6445_v61, %s8509_s26 }
 0x4b1   :  { %6334 = vrot.lane.b32.xlu1 %v6333_v33, %s8510_s6 }
 0x4b4   :  { %6480 = vrot.lane.b32.xlu0 %v12130_v36, %s8511_s5  ;;  %v6628_v36 = vcombine.high %v12142_v32, %v12142_v32 }
 0x4b5   :  { %6375 = vrot.lane.b32.xlu1 %v12147_v56, %s8512_s27  ;;  %v6577_v56 = vcombine.high %v12170_v55, %v12170_v55 }
 0x4b8   :  { %6507 = vrot.lane.b32.xlu0 %v6506_v45, %s8513_s28  ;;  %s8535_s28 = smov 32  }
 0x4b9   :  { %6395 = vrot.lane.b32.xlu1 %v6394_v57, %s8514_s29 }
 0x4bc   :  { %6541 = vrot.lane.b32.xlu0 %v12150_v1, %s8515_s30  ;;  %v6641_v1 = vcombine.high %v12174_v50, %v12174_v50 }
 0x4bd   :  { %6436 = vrot.lane.b32.xlu1 %v12154_v59, %s8516_s10 }
 0x4c0   :  { %6568 = vrot.lane.b32.xlu0 %v6567_v17, %s8517_s11 }
 0x4c1   :  { %6456 = vrot.lane.b32.xlu1 %v6455_v30, %s8518_s12  ;;  %s8537_s12 = smov 52  }
 0x4c4   :  { %6602 = vrot.lane.b32.xlu0 %v12142_v32, %s8519_s13  ;;  %v6753_v32 = vcombine.high %v12164_v43, %v12164_v43 }
 0x4c5   :  { %6497 = vrot.lane.b32.xlu1 %v12160_v54, %s8520_s14  ;;  %v8467_v54 = vld [vmem:[%s12945_s2] sm:$0xff]  ;;  %s8536_s2 = smov 42  }
 0x4c8   :  { %6629 = vrot.lane.b32.xlu0 %v6628_v36, %s8521_s15  ;;  %s8538_s15 = smov 62  }
 0x4c9   :  { %6517 = vrot.lane.b32.xlu1 %v6516_v20, %s8522_s16 }
 0x4cc   :  { %6666 = vrot.lane.b32.xlu0 %v12167_v13, %s8523_s17  ;;  %v6763_v13 = vcombine.high %v12187_v14, %v12187_v14 }
 0x4cd   :  { %6558 = vrot.lane.b32.xlu1 %v12170_v55, %s8524_s18  ;;  %v13942_v55 = vmov 5  }
 0x4d0   :  { %6693 = vrot.lane.b32.xlu0 %v6692_v60, %s8525_s0 }
 0x4d1   :  { %6578 = vrot.lane.b32.xlu1 %v6577_v56, %s8526_s4 }
 0x4d4   :  { %6727 = vrot.lane.b32.xlu0 %v12164_v43, %s8527_s1 }
 0x4d5   :  { %6619 = vrot.lane.b32.xlu1 %v12174_v50, %s8528_s19 }
 0x4d8   :  { %6754 = vrot.lane.b32.xlu0 %v6753_v32, %s8529_s20 }
 0x4d9   :  { %6642 = vrot.lane.b32.xlu1 %v6641_v1, %s8530_s21 }
 0x4dc   :  { %6788 = vrot.lane.b32.xlu0 %v12178_v25, %s8531_s7 }
 0x4dd   :  { %6683 = vrot.lane.b32.xlu1 %v12181_v34, %s8532_s22 }
 0x4df   :  { %v5885_v59 = vpop.permute.xlu1 %5884 }
 0x4e0   :  { %6815 = vrot.lane.b32.xlu0 %v6814_v49, %s8533_s24  ;;  %v5887_v0 = vadd.f32 %v5885_v59, %v5860_v53 }
 0x4e1   :  { %6703 = vrot.lane.b32.xlu1 %v6702_v6, %s8534_s25 }
 0x4e2   :  { %5891 = vst.msk [vmem:[%s12950_s9] sm:$0x1] %vm5890_vm5, %v5887_v0  ;;  %v12257_v63 = vpop.permute.xlu0 %5955  ;;  %vm5969_vm5 = vcmp.ge.s32.totalorder %v13939_v27, 35 }
 0x4e3   :  { %v5895_v46 = vpop.permute.xlu1 %5894  ;;  %vm5971_vm7 = vmand %vm5969_vm5, %vm5970_vm6  ;;  %vm6055_vm5 = vcmp.lt.s32.totalorder %v13939_v27, 67 }
 0x4e4   :  { %1130 = vperm.xlu0 %8461, %v8467_v54  }
 0x4e5   :  { %6744 = vrot.lane.b32.xlu1 %v12187_v14, %s8535_s28 }
 0x4e6   :  { %v12265_v43 = vpop.permute.xlu0 %5989 }
 0x4e7   :  { %v5905_v40 = vpop.permute.xlu1 %5904 }
 0x4e8   :  { %8462 = vset.pattern.permute.xlu0 %v13942_v55 }
 0x4e9   :  { %v5892_v5 = vld [vmem:[%s12950_s9] sm:$0x1]  ;;  %6764 = vrot.lane.b32.xlu1 %v6763_v13, %s8536_s2 }
 0x4ea   :  { %v5897_v42 = vadd.f32 %v5895_v46, %v5892_v5  ;;  %v12273_v2 = vpop.permute.xlu0 %6016 }
 0x4eb   :  { %v5929_v35 = vpop.permute.xlu1 %5928 }
 0x4ec   :  { %5901 = vst.msk [vmem:[%s12950_s9] sm:$0x1] %vm5900_vm8, %v5897_v42  ;;  %vm5993_vm8 = vcmp.ge.s32.totalorder %v13939_v27, 40 }
 0x4ed   :  { %6805 = vrot.lane.b32.xlu1 %v12193_v10, %s8537_s12  ;;  %vm5995_vm10 = vmand %vm5993_vm8, %vm5994_vm9  ;;  %vm6072_vm8 = vcmp.lt.s32.totalorder %v13939_v27, 72 }
 0x4ee   :  { %v12279_v50 = vpop.permute.xlu0 %6050 }
 0x4ef   :  { %v5946_v15 = vpop.permute.xlu1 %5945 }
 0x4f1   :  { %1123 = vperm.xlu1 %8460, %v8467_v54  }
 0x4f2   :  { %v12283_v25 = vpop.permute.xlu0 %6077 }
 0x4f3   :  { %v5902_v34 = vld [vmem:[%s12950_s9] sm:$0x1]  ;;  %v5966_v58 = vpop.permute.xlu1 %5965 }
 0x4f4   :  { %v5907_v14 = vadd.f32 %v5905_v40, %v5902_v34 }
 0x4f5   :  { %6825 = vrot.lane.b32.xlu1 %v6824_v3, %s8538_s15 }
 0x4f6   :  { %5911 = vst.msk [vmem:[%s12950_s9] sm:$0x1] %vm5910_vm11, %v5907_v14  ;;  %v12293_v51 = vpop.permute.xlu0 %6111  ;;  %vm6010_vm11 = vcmp.ge.s32.totalorder %v13939_v27, 45 }
 0x4f7   :  { %v6007_v28 = vpop.permute.xlu1 %6006  ;;  %vm6012_vm13 = vmand %vm6010_vm11, %vm6011_vm12  ;;  %vm6082_vm11 = vcmp.lt.s32.totalorder %v13939_v27, 77 }
 0x4fa   :  { %v12297_v4 = vpop.permute.xlu0 %6138 }
 0x4fb   :  { %v12299_v38 = vpop.permute.xlu1 %6026 }
 0x4fd   :  { %v5912_v24 = vld [vmem:[%s12950_s9] sm:$0x1] }
 0x4fe   :  { %v5931_v12 = vadd.f32 %v5929_v35, %v5912_v24  ;;  %v12304_v47 = vpop.permute.xlu0 %6172 }
 0x4ff   :  { %v12306_v10 = vpop.permute.xlu1 %6067 }
 0x500   :  { %5935 = vst.msk [vmem:[%s12950_s9] sm:$0x1] %vm5934_vm14, %v5931_v12  ;;  %vm6020_vm14 = vcmp.ge.s32.totalorder %v13939_v27, 50 }
 0x501   :  { %vm6022_vm0 = vmand %vm6020_vm14, %vm6021_vm15  ;;  %vm6092_vm14 = vcmp.lt.s32.totalorder %v13939_v27, 82 }
 0x502   :  { %v12311_v22 = vpop.permute.xlu0 %6199 }
 0x503   :  { %v12313_v52 = vpop.permute.xlu1 %6087 }
 0x506   :  { %v12317_v19 = vpop.permute.xlu0 %6233 }
 0x507   :  { %v5936_v18 = vld [vmem:[%s12950_s9] sm:$0x1]  ;;  %v12322_v29 = vpop.permute.xlu1 %6128 }
 0x508   :  { %v5948_v21 = vadd.f32 %v5946_v15, %v5936_v18 }
 0x50a   :  { %5952 = vst.msk [vmem:[%s12950_s9] sm:$0x1] %vm5951_vm1, %v5948_v21  ;;  %v12327_v7 = vpop.permute.xlu0 %6263  ;;  %vm6030_vm1 = vcmp.ge.s32.totalorder %v13939_v27, 55 }
 0x50b   :  { %v12329_v62 = vpop.permute.xlu1 %6148  ;;  %vm6032_vm3 = vmand %vm6030_vm1, %vm6031_vm2  ;;  %vm6116_vm1 = vcmp.lt.s32.totalorder %v13939_v27, 88 }
 0x50e   :  { %v12333_v9 = vpop.permute.xlu0 %6297 }
 0x50f   :  { %v12335_v37 = vpop.permute.xlu1 %6189 }
 0x511   :  { %v5953_v11 = vld [vmem:[%s12950_s9] sm:$0x1] }
 0x512   :  { %v5958_v44 = vadd.f32 %v12257_v63, %v5953_v11  ;;  %v12341_v8 = vpop.permute.xlu0 %6324 }
 0x513   :  { %v12343_v31 = vpop.permute.xlu1 %6209 }
 0x514   :  { %5962 = vst.msk [vmem:[%s12950_s9] sm:$0x1] %vm5961_vm4, %v5958_v44  ;;  %vm6054_vm4 = vcmp.ge.s32.totalorder %v13939_v27, 60 }
 0x515   :  { %vm6056_vm6 = vmand %vm6054_vm4, %vm6055_vm5  ;;  %vm6133_vm4 = vcmp.lt.s32.totalorder %v13939_v27, 93 }
 0x516   :  { %v12348_v16 = vpop.permute.xlu0 %6358 }
 0x517   :  { %v12350_v39 = vpop.permute.xlu1 %6250 }
 0x51a   :  { %v12354_v41 = vpop.permute.xlu0 %6385 }
 0x51b   :  { %v5963_v48 = vld [vmem:[%s12950_s9] sm:$0x1]  ;;  %v12359_v23 = vpop.permute.xlu1 %6273 }
 0x51c   :  { %v5968_v26 = vadd.f32 %v5966_v58, %v5963_v48 }
 0x51e   :  { %5972 = vst.msk [vmem:[%s12950_s9] sm:$0x1] %vm5971_vm7, %v5968_v26  ;;  %v12364_v61 = vpop.permute.xlu0 %6419  ;;  %vm6071_vm7 = vcmp.ge.s32.totalorder %v13939_v27, 65 }
 0x51f   :  { %v12366_v33 = vpop.permute.xlu1 %6314  ;;  %vm6073_vm9 = vmand %vm6071_vm7, %vm6072_vm8  ;;  %vm6143_vm7 = vcmp.lt.s32.totalorder %v13939_v27, 98 }
 0x522   :  { %v12370_v45 = vpop.permute.xlu0 %6446 }
 0x523   :  { %v12372_v57 = vpop.permute.xlu1 %6334 }
 0x525   :  { %v5973_v17 = vld [vmem:[%s12950_s9] sm:$0x1] }
 0x526   :  { %v5992_v30 = vadd.f32 %v12265_v43, %v5973_v17  ;;  %v12378_v36 = vpop.permute.xlu0 %6480 }
 0x527   :  { %v12380_v20 = vpop.permute.xlu1 %6375 }
 0x528   :  { %5996 = vst.msk [vmem:[%s12950_s9] sm:$0x1] %vm5995_vm10, %v5992_v30  ;;  %vm6081_vm10 = vcmp.ge.s32.totalorder %v13939_v27, 70 }
 0x529   :  { %vm6083_vm12 = vmand %vm6081_vm10, %vm6082_vm11  ;;  %vm6153_vm10 = vcmp.lt.s32.totalorder %v13939_v27, 103 }
 0x52a   :  { %v12389_v56 = vpop.permute.xlu0 %6507 }
 0x52b   :  { %v12385_v60 = vpop.permute.xlu1 %6395 }
 0x52e   :  { %v12399_v53 = vpop.permute.xlu0 %6541 }
 0x52f   :  { %v5997_v32 = vld [vmem:[%s12950_s9] sm:$0x1]  ;;  %v12394_v1 = vpop.permute.xlu1 %6436 }
 0x530   :  { %v6009_v49 = vadd.f32 %v6007_v28, %v5997_v32 }
 0x532   :  { %6013 = vst.msk [vmem:[%s12950_s9] sm:$0x1] %vm6012_vm13, %v6009_v49  ;;  %v12407_v0 = vpop.permute.xlu0 %6568  ;;  %vm6091_vm13 = vcmp.ge.s32.totalorder %v13939_v27, 75  ;;  %v13943_v49 = vld [vmem:[#allocation44_spill] sm:$0xff] }
 0x533   :  { %v12401_v59 = vpop.permute.xlu1 %6456  ;;  %vm6093_vm15 = vmand %vm6091_vm13, %vm6092_vm14  ;;  %vm6177_vm13 = vcmp.lt.s32.totalorder %v13939_v27, 108 }
 0x536   :  { %v12418_v43 = vpop.permute.xlu0 %6602 }
 0x537   :  { %v12405_v6 = vpop.permute.xlu1 %6497 }
 0x539   :  { %v6014_v63 = vld [vmem:[%s12950_s9] sm:$0x1] }
 0x53a   :  { %v6019_v46 = vadd.f32 %v12273_v2, %v6014_v63  ;;  %v12430_v42 = vpop.permute.xlu0 %6629 }
 0x53b   :  { %v12413_v54 = vpop.permute.xlu1 %6517 }
 0x53c   :  { %6023 = vst.msk [vmem:[%s12950_s9] sm:$0x1] %vm6022_vm0, %v6019_v46  ;;  %v13944_v46 = vld [vmem:[#allocation45_spill] sm:$0xff]  ;;  %vm6115_vm0 = vcmp.ge.s32.totalorder %v13939_v27, 81 }
 0x53d   :  { %vm6117_vm2 = vmand %vm6115_vm0, %vm6116_vm1  ;;  %vm6194_vm0 = vcmp.lt.s32.totalorder %v13939_v27, 113 }
 0x53e   :  { %v12439_v35 = vpop.permute.xlu0 %6666 }
 0x53f   :  { %v12420_v40 = vpop.permute.xlu1 %6558 }
 0x542   :  { %v12450_v3 = vpop.permute.xlu0 %6693 }
 0x543   :  { %v6024_v13 = vld [vmem:[%s12950_s9] sm:$0x1]  ;;  %v12427_v55 = vpop.permute.xlu1 %6578 }
 0x544   :  { %v6029_v5 = vadd.f32 %v12299_v38, %v6024_v13 }
 0x546   :  { %6033 = vst.msk [vmem:[%s12950_s9] sm:$0x1] %vm6032_vm3, %v6029_v5  ;;  %v12456_v28 = vpop.permute.xlu0 %6727  ;;  %v13945_v5 = vld [vmem:[#allocation46_spill] sm:$0xff]  ;;  %vm6132_vm3 = vcmp.ge.s32.totalorder %v13939_v27, 86 }
 0x547   :  { %v12435_v2 = vpop.permute.xlu1 %6619  ;;  %vm6134_vm5 = vmand %vm6132_vm3, %vm6133_vm4  ;;  %vm6204_vm3 = vcmp.lt.s32.totalorder %v13939_v27, 118 }
 0x54a   :  { %v12467_v12 = vpop.permute.xlu0 %6754 }
 0x54b   :  { %v12441_v15 = vpop.permute.xlu1 %6642 }
 0x54d   :  { %v6034_v34 = vld [vmem:[%s12950_s9] sm:$0x1] }
 0x54e   :  { %v6053_v58 = vadd.f32 %v12279_v50, %v6034_v34 }
 0x54f   :  { %v12452_v14 = vpop.permute.xlu1 %6683 }
 0x550   :  { %6057 = vst.msk [vmem:[%s12950_s9] sm:$0x1] %vm6056_vm6, %v6053_v58  ;;  %vm6142_vm6 = vcmp.ge.s32.totalorder %v13939_v27, 91 }
 0x551   :  { %vm6144_vm8 = vmand %vm6142_vm6, %vm6143_vm7  ;;  %vm6214_vm6 = vcmp.lt.s32.totalorder %v13939_v27, 123 }
 0x553   :  { %v12458_v38 = vpop.permute.xlu1 %6703 }
 0x557   :  { %v6058_v50 = vld [vmem:[%s12950_s9] sm:$0x1]  ;;  %v12469_v18 = vpop.permute.xlu1 %6744 }
 0x558   :  { %v6070_v24 = vadd.f32 %v12306_v10, %v6058_v50  ;;  %v12477_v10 = vpop.permute.xlu0 %6788 }
 0x55a   :  { %6074 = vst.msk [vmem:[%s12950_s9] sm:$0x1] %vm6073_vm9, %v6070_v24  ;;  %vm6152_vm9 = vcmp.ge.s32.totalorder %v13939_v27, 96 }
 0x55b   :  { %v12479_v44 = vpop.permute.xlu1 %6764  ;;  %vm6154_vm11 = vmand %vm6152_vm9, %vm6153_vm10  ;;  %vm6238_vm9 = vcmp.lt.s32.totalorder %v13939_v27, 128 }
 0x55c   :  { %v12486_v48 = vpop.permute.xlu0 %6815 }
 0x55f   :  { %v12488_v26 = vpop.permute.xlu1 %6805 }
 0x560   :  { %v1131_v32 = vpop.permute.xlu0 %1130 }
 0x561   :  { %v6075_v21 = vld [vmem:[%s12950_s9] sm:$0x1] }
 0x562   :  { %v6080_v11 = vadd.f32 %v12283_v25, %v6075_v21 }
 0x564   :  { %6084 = vst.msk [vmem:[%s12950_s9] sm:$0x1] %vm6083_vm12, %v6080_v11  ;;  %vm6176_vm12 = vcmp.ge.s32.totalorder %v13939_v27, 101 }
 0x565   :  { %vm6178_vm14 = vmand %vm6176_vm12, %vm6177_vm13  ;;  %vm6257_vm12 = vcmp.ge.s32.totalorder %v13939_v27, 126  ;;  %vm6258_vm13 = vcmp.lt.s32.totalorder %v13939_v27, 133 }
 0x56b   :  { %v6085_v25 = vld [vmem:[%s12950_s9] sm:$0x1] }
 0x56c   :  { %v6090_v17 = vadd.f32 %v12313_v52, %v6085_v25  ;;  %v1124_v30 = vpop.permute.xlu1 %1123 }
 0x56d   :  { %v1126_v63 = vmul.f32 %v1124_v30, %v13943_v49  ;;  %v1127_v13 = vmul.f32 %v1124_v30, %v13944_v46  ;;  %v1128_v34 = vmul.f32 %v1124_v30, %v13945_v5 }
 0x56e   :  { %6094 = vst.msk [vmem:[%s12950_s9] sm:$0x1] %vm6093_vm15, %v6090_v17  ;;  %vm6193_vm15 = vcmp.ge.s32.totalorder %v13939_v27, 106 }
 0x56f   :  { %v1133_v58 = vadd.f32 %v1131_v32, %v1126_v63  ;;  %v1134_v50 = vadd.f32 %v1131_v32, %v1127_v13  ;;  %v1135_v24 = vadd.f32 %v1131_v32, %v1128_v34  ;;  %vm6195_vm1 = vmand %vm6193_vm15, %vm6194_vm0  ;;  %vm6267_vm15 = vcmp.ge.s32.totalorder %v13939_v27, 3 }
 0x570   :  { %vm6268_vm0 = vcmp.lt.s32.totalorder %v13939_v27, 10 }
 0x571   :  { %1156 = vst [vmem:[%s12951_s8] sm:$0xff] %v1133_v58  ;;  %1157 = vst [vmem:[%s12951_s8 + $0x8] sm:$0xff] %v1134_v50 }
 0x572   :  { %1158 = vst [vmem:[%s12951_s8 + $0x10] sm:$0xff] %v1135_v24 }
 0x575   :  { %v6095_v52 = vld [vmem:[%s12950_s9] sm:$0x1] }
 0x576   :  { %v6114_v21 = vadd.f32 %v12293_v51, %v6095_v52 }
 0x578   :  { %6118 = vst.msk [vmem:[%s12950_s9] sm:$0x1] %vm6117_vm2, %v6114_v21  ;;  %vm6203_vm2 = vcmp.ge.s32.totalorder %v13939_v27, 111 }
 0x579   :  { %vm6205_vm4 = vmand %vm6203_vm2, %vm6204_vm3  ;;  %vm6277_vm2 = vcmp.ge.s32.totalorder %v13939_v27, 8  ;;  %vm6278_vm3 = vcmp.lt.s32.totalorder %v13939_v27, 15 }
 0x57f   :  { %v6119_v11 = vld [vmem:[%s12950_s9] sm:$0x1] }
 0x580   :  { %v6131_v25 = vadd.f32 %v12322_v29, %v6119_v11 }
 0x582   :  { %6135 = vst.msk [vmem:[%s12950_s9] sm:$0x1] %vm6134_vm5, %v6131_v25  ;;  %vm6213_vm5 = vcmp.ge.s32.totalorder %v13939_v27, 116 }
 0x583   :  { %vm6215_vm7 = vmand %vm6213_vm5, %vm6214_vm6  ;;  %vm6301_vm5 = vcmp.ge.s32.totalorder %v13939_v27, 13  ;;  %vm6302_vm6 = vcmp.lt.s32.totalorder %v13939_v27, 20 }
 0x589   :  { %v6136_v51 = vld [vmem:[%s12950_s9] sm:$0x1] }
 0x58a   :  { %v6141_v17 = vadd.f32 %v12297_v4, %v6136_v51 }
 0x58c   :  { %6145 = vst.msk [vmem:[%s12950_s9] sm:$0x1] %vm6144_vm8, %v6141_v17  ;;  %vm6237_vm8 = vcmp.ge.s32.totalorder %v13939_v27, 121 }
 0x58d   :  { %vm6239_vm10 = vmand %vm6237_vm8, %vm6238_vm9  ;;  %vm6318_vm8 = vcmp.ge.s32.totalorder %v13939_v27, 18  ;;  %vm6319_vm9 = vcmp.lt.s32.totalorder %v13939_v27, 25 }
 0x593   :  { %v6146_v29 = vld [vmem:[%s12950_s9] sm:$0x1] }
 0x594   :  { %v6151_v30 = vadd.f32 %v12329_v62, %v6146_v29 }
 0x596   :  { %6155 = vst.msk [vmem:[%s12950_s9] sm:$0x1] %vm6154_vm11, %v6151_v30  ;;  %vm6253_vm11 = vcmask 1031168  }
 0x59d   :  { %v6156_v4 = vld [vmem:[%s12950_s9] sm:$0x1] }
 0x59e   :  { %v6175_v32 = vadd.f32 %v12304_v47, %v6156_v4 }
 0x5a0   :  { %6179 = vst.msk [vmem:[%s12950_s9] sm:$0x1] %vm6178_vm14, %v6175_v32  ;;  %vm6259_vm14 = vmand %vm6257_vm12, %vm6258_vm13  ;;  %vm6329_vm12 = vcmp.lt.s32.totalorder %v13939_v27, 30 }
 0x5a7   :  { %v6180_v62 = vld [vmem:[%s12950_s9] sm:$0x1] }
 0x5a8   :  { %v6192_v49 = vadd.f32 %v12335_v37, %v6180_v62 }
 0x5aa   :  { %6196 = vst.msk [vmem:[%s12950_s9] sm:$0x1] %vm6195_vm1, %v6192_v49  ;;  %vm6269_vm1 = vmand %vm6267_vm15, %vm6268_vm0  ;;  %vm6339_vm15 = vcmp.lt.s32.totalorder %v13939_v27, 35 }
 0x5b1   :  { %v6197_v47 = vld [vmem:[%s12950_s9] sm:$0x1] }
 0x5b2   :  { %v6202_v63 = vadd.f32 %v12311_v22, %v6197_v47 }
 0x5b4   :  { %6206 = vst.msk [vmem:[%s12950_s9] sm:$0x1] %vm6205_vm4, %v6202_v63  ;;  %vm6279_vm4 = vmand %vm6277_vm2, %vm6278_vm3  ;;  %vm6363_vm2 = vcmp.lt.s32.totalorder %v13939_v27, 41 }
 0x5bb   :  { %v6207_v37 = vld [vmem:[%s12950_s9] sm:$0x1] }
 0x5bc   :  { %v6212_v46 = vadd.f32 %v12343_v31, %v6207_v37  ;;  %v6252_v31 = vrot.slane %v12350_v39, 7 }
 0x5be   :  { %6216 = vst.msk [vmem:[%s12950_s9] sm:$0x1] %vm6215_vm7, %v6212_v46  ;;  %v6254_v34 = vsel %vm6253_vm11, %v6252_v31, %v12350_v39  ;;  %vm6303_vm7 = vmand %vm6301_vm5, %vm6302_vm6  ;;  %vm6328_vm11 = vcmp.ge.s32.totalorder %v13939_v27, 23  ;;  %vm6380_vm5 = vcmp.lt.s32.totalorder %v13939_v27, 46 }
 0x5bf   :  { %vm6330_vm13 = vmand %vm6328_vm11, %vm6329_vm12  ;;  %vm6400_vm11 = vcmp.lt.s32.totalorder %v13939_v27, 56 }
 0x5c5   :  { %v6217_v22 = vld [vmem:[%s12950_s9] sm:$0x1] }
 0x5c6   :  { %v6236_v13 = vadd.f32 %v12317_v19, %v6217_v22 }
 0x5c8   :  { %6240 = vst.msk [vmem:[%s12950_s9] sm:$0x1] %vm6239_vm10, %v6236_v13  ;;  %vm6320_vm10 = vmand %vm6318_vm8, %vm6319_vm9  ;;  %vm6390_vm8 = vcmp.lt.s32.totalorder %v13939_v27, 51 }
 0x5cf   :  { %v6241_v5 = vld [vmem:[%s12950_s9] sm:$0x3] }
 0x5d0   :  { %v6256_v58 = vadd.f32 %v6254_v34, %v6241_v5 }
 0x5d2   :  { %6260 = vst.msk [vmem:[%s12950_s9] sm:$0x3] %vm6259_vm14, %v6256_v58  ;;  %vm6338_vm14 = vcmp.ge.s32.totalorder %v13939_v27, 28 }
 0x5d3   :  { %vm6340_vm0 = vmand %vm6338_vm14, %vm6339_vm15  ;;  %vm6424_vm14 = vcmp.lt.s32.totalorder %v13939_v27, 61 }
 0x5d9   :  { %v6261_v19 = vld [vmem:[%s12950_s9 + $0x1] sm:$0x1] }
 0x5da   :  { %v6266_v50 = vadd.f32 %v12327_v7, %v6261_v19 }
 0x5dc   :  { %6270 = vst.msk [vmem:[%s12950_s9 + $0x1] sm:$0x1] %vm6269_vm1, %v6266_v50  ;;  %vm6362_vm1 = vcmp.ge.s32.totalorder %v13939_v27, 34 }
 0x5dd   :  { %vm6364_vm3 = vmand %vm6362_vm1, %vm6363_vm2  ;;  %vm6441_vm1 = vcmp.lt.s32.totalorder %v13939_v27, 66 }
 0x5e3   :  { %v6271_v39 = vld [vmem:[%s12950_s9 + $0x1] sm:$0x1] }
 0x5e4   :  { %v6276_v24 = vadd.f32 %v12359_v23, %v6271_v39 }
 0x5e6   :  { %6280 = vst.msk [vmem:[%s12950_s9 + $0x1] sm:$0x1] %vm6279_vm4, %v6276_v24  ;;  %vm6379_vm4 = vcmp.ge.s32.totalorder %v13939_v27, 39 }
 0x5e7   :  { %vm6381_vm6 = vmand %vm6379_vm4, %vm6380_vm5  ;;  %vm6451_vm4 = vcmp.lt.s32.totalorder %v13939_v27, 71 }
 0x5ed   :  { %v6281_v7 = vld [vmem:[%s12950_s9 + $0x1] sm:$0x1] }
 0x5ee   :  { %v6300_v52 = vadd.f32 %v12333_v9, %v6281_v7 }
 0x5f0   :  { %6304 = vst.msk [vmem:[%s12950_s9 + $0x1] sm:$0x1] %vm6303_vm7, %v6300_v52  ;;  %vm6389_vm7 = vcmp.ge.s32.totalorder %v13939_v27, 44 }
 0x5f1   :  { %vm6391_vm9 = vmand %vm6389_vm7, %vm6390_vm8  ;;  %vm6461_vm7 = vcmp.lt.s32.totalorder %v13939_v27, 76 }
 0x5f7   :  { %v6305_v23 = vld [vmem:[%s12950_s9 + $0x1] sm:$0x1] }
 0x5f8   :  { %v6317_v21 = vadd.f32 %v12366_v33, %v6305_v23 }
 0x5fa   :  { %6321 = vst.msk [vmem:[%s12950_s9 + $0x1] sm:$0x1] %vm6320_vm10, %v6317_v21  ;;  %vm6399_vm10 = vcmp.ge.s32.totalorder %v13939_v27, 49 }
 0x5fb   :  { %vm6401_vm12 = vmand %vm6399_vm10, %vm6400_vm11  ;;  %vm6485_vm10 = vcmp.lt.s32.totalorder %v13939_v27, 81 }
 0x601   :  { %v6322_v9 = vld [vmem:[%s12950_s9 + $0x1] sm:$0x1] }
 0x602   :  { %v6327_v11 = vadd.f32 %v12341_v8, %v6322_v9 }
 0x604   :  { %6331 = vst.msk [vmem:[%s12950_s9 + $0x1] sm:$0x1] %vm6330_vm13, %v6327_v11  ;;  %vm6423_vm13 = vcmp.ge.s32.totalorder %v13939_v27, 54 }
 0x605   :  { %vm6425_vm15 = vmand %vm6423_vm13, %vm6424_vm14  ;;  %vm6502_vm13 = vcmp.lt.s32.totalorder %v13939_v27, 86 }
 0x60b   :  { %v6332_v33 = vld [vmem:[%s12950_s9 + $0x1] sm:$0x1] }
 0x60c   :  { %v6337_v25 = vadd.f32 %v12372_v57, %v6332_v33 }
 0x60e   :  { %6341 = vst.msk [vmem:[%s12950_s9 + $0x1] sm:$0x1] %vm6340_vm0, %v6337_v25  ;;  %vm6440_vm0 = vcmp.ge.s32.totalorder %v13939_v27, 59 }
 0x60f   :  { %vm6442_vm2 = vmand %vm6440_vm0, %vm6441_vm1  ;;  %vm6512_vm0 = vcmp.lt.s32.totalorder %v13939_v27, 91 }
 0x615   :  { %v6342_v8 = vld [vmem:[%s12950_s9 + $0x1] sm:$0x1] }
 0x616   :  { %v6361_v51 = vadd.f32 %v12348_v16, %v6342_v8 }
 0x618   :  { %6365 = vst.msk [vmem:[%s12950_s9 + $0x1] sm:$0x1] %vm6364_vm3, %v6361_v51  ;;  %vm6450_vm3 = vcmp.ge.s32.totalorder %v13939_v27, 64 }
 0x619   :  { %vm6452_vm5 = vmand %vm6450_vm3, %vm6451_vm4  ;;  %vm6522_vm3 = vcmp.lt.s32.totalorder %v13939_v27, 96 }
 0x61f   :  { %v6366_v57 = vld [vmem:[%s12950_s9 + $0x1] sm:$0x1] }
 0x620   :  { %v6378_v17 = vadd.f32 %v12380_v20, %v6366_v57 }
 0x622   :  { %6382 = vst.msk [vmem:[%s12950_s9 + $0x1] sm:$0x1] %vm6381_vm6, %v6378_v17  ;;  %vm6460_vm6 = vcmp.ge.s32.totalorder %v13939_v27, 69 }
 0x623   :  { %vm6462_vm8 = vmand %vm6460_vm6, %vm6461_vm7  ;;  %vm6546_vm6 = vcmp.lt.s32.totalorder %v13939_v27, 101 }
 0x629   :  { %v6383_v16 = vld [vmem:[%s12950_s9 + $0x1] sm:$0x1] }
 0x62a   :  { %v6388_v29 = vadd.f32 %v12354_v41, %v6383_v16 }
 0x62c   :  { %6392 = vst.msk [vmem:[%s12950_s9 + $0x1] sm:$0x1] %vm6391_vm9, %v6388_v29  ;;  %vm6484_vm9 = vcmp.ge.s32.totalorder %v13939_v27, 74 }
 0x62d   :  { %vm6486_vm11 = vmand %vm6484_vm9, %vm6485_vm10  ;;  %vm6563_vm9 = vcmp.lt.s32.totalorder %v13939_v27, 106 }
 0x633   :  { %v6393_v20 = vld [vmem:[%s12950_s9 + $0x1] sm:$0x1] }
 0x634   :  { %v6398_v30 = vadd.f32 %v12385_v60, %v6393_v20 }
 0x636   :  { %6402 = vst.msk [vmem:[%s12950_s9 + $0x1] sm:$0x1] %vm6401_vm12, %v6398_v30  ;;  %vm6501_vm12 = vcmp.ge.s32.totalorder %v13939_v27, 79 }
 0x637   :  { %vm6503_vm14 = vmand %vm6501_vm12, %vm6502_vm13  ;;  %vm6573_vm12 = vcmp.lt.s32.totalorder %v13939_v27, 111 }
 0x63d   :  { %v6403_v41 = vld [vmem:[%s12950_s9 + $0x1] sm:$0x1] }
 0x63e   :  { %v6422_v4 = vadd.f32 %v12364_v61, %v6403_v41 }
 0x640   :  { %6426 = vst.msk [vmem:[%s12950_s9 + $0x1] sm:$0x1] %vm6425_vm15, %v6422_v4  ;;  %vm6511_vm15 = vcmp.ge.s32.totalorder %v13939_v27, 84 }
 0x641   :  { %vm6513_vm1 = vmand %vm6511_vm15, %vm6512_vm0  ;;  %vm6583_vm15 = vcmp.lt.s32.totalorder %v13939_v27, 116 }
 0x647   :  { %v6427_v60 = vld [vmem:[%s12950_s9 + $0x1] sm:$0x1] }
 0x648   :  { %v6439_v32 = vadd.f32 %v12394_v1, %v6427_v60 }
 0x64a   :  { %6443 = vst.msk [vmem:[%s12950_s9 + $0x1] sm:$0x1] %vm6442_vm2, %v6439_v32  ;;  %vm6521_vm2 = vcmp.ge.s32.totalorder %v13939_v27, 89 }
 0x64b   :  { %vm6523_vm4 = vmand %vm6521_vm2, %vm6522_vm3  ;;  %vm6607_vm2 = vcmp.lt.s32.totalorder %v13939_v27, 122 }
 0x651   :  { %v6444_v61 = vld [vmem:[%s12950_s9 + $0x1] sm:$0x1] }
 0x652   :  { %v6449_v62 = vadd.f32 %v12370_v45, %v6444_v61 }
 0x654   :  { %6453 = vst.msk [vmem:[%s12950_s9 + $0x1] sm:$0x1] %vm6452_vm5, %v6449_v62  ;;  %vm6545_vm5 = vcmp.ge.s32.totalorder %v13939_v27, 94 }
 0x655   :  { %vm6547_vm7 = vmand %vm6545_vm5, %vm6546_vm6  ;;  %vm6624_vm5 = vcmp.lt.s32.totalorder %v13939_v27, 127 }
 0x65b   :  { %v6454_v1 = vld [vmem:[%s12950_s9 + $0x1] sm:$0x1] }
 0x65c   :  { %v6459_v49 = vadd.f32 %v12401_v59, %v6454_v1 }
 0x65e   :  { %6463 = vst.msk [vmem:[%s12950_s9 + $0x1] sm:$0x1] %vm6462_vm8, %v6459_v49  ;;  %vm6562_vm8 = vcmp.ge.s32.totalorder %v13939_v27, 99 }
 0x65f   :  { %vm6564_vm10 = vmand %vm6562_vm8, %vm6563_vm9  ;;  %vm6636_vm8 = vcmp.ge.s32.totalorder %v13939_v27, 125  ;;  %vm6637_vm9 = vcmp.lt.s32.totalorder %v13939_v27, 132 }
 0x665   :  { %v6464_v45 = vld [vmem:[%s12950_s9 + $0x1] sm:$0x1] }
 0x666   :  { %v6483_v47 = vadd.f32 %v12378_v36, %v6464_v45 }
 0x668   :  { %6487 = vst.msk [vmem:[%s12950_s9 + $0x1] sm:$0x1] %vm6486_vm11, %v6483_v47  ;;  %vm6572_vm11 = vcmp.ge.s32.totalorder %v13939_v27, 104 }
 0x669   :  { %vm6574_vm13 = vmand %vm6572_vm11, %vm6573_vm12  ;;  %vm6646_vm11 = vcmp.ge.s32.totalorder %v13939_v27, 2  ;;  %vm6647_vm12 = vcmp.lt.s32.totalorder %v13939_v27, 9 }
 0x66f   :  { %v6488_v59 = vld [vmem:[%s12950_s9 + $0x1] sm:$0x1] }
 0x670   :  { %v6500_v63 = vadd.f32 %v12405_v6, %v6488_v59 }
 0x672   :  { %6504 = vst.msk [vmem:[%s12950_s9 + $0x1] sm:$0x1] %vm6503_vm14, %v6500_v63  ;;  %vm6582_vm14 = vcmp.ge.s32.totalorder %v13939_v27, 109 }
 0x673   :  { %vm6584_vm0 = vmand %vm6582_vm14, %vm6583_vm15  ;;  %vm6670_vm14 = vcmp.ge.s32.totalorder %v13939_v27, 7  ;;  %vm6671_vm15 = vcmp.lt.s32.totalorder %v13939_v27, 14 }
 0x679   :  { %v6505_v36 = vld [vmem:[%s12950_s9 + $0x1] sm:$0x1] }
 0x67a   :  { %v6510_v37 = vadd.f32 %v12389_v56, %v6505_v36 }
 0x67c   :  { %6514 = vst.msk [vmem:[%s12950_s9 + $0x1] sm:$0x1] %vm6513_vm1, %v6510_v37  ;;  %vm6606_vm1 = vcmp.ge.s32.totalorder %v13939_v27, 115 }
 0x67d   :  { %vm6608_vm3 = vmand %vm6606_vm1, %vm6607_vm2  ;;  %vm6687_vm1 = vcmp.ge.s32.totalorder %v13939_v27, 12  ;;  %vm6688_vm2 = vcmp.lt.s32.totalorder %v13939_v27, 19 }
 0x683   :  { %v6515_v6 = vld [vmem:[%s12950_s9 + $0x1] sm:$0x1] }
 0x684   :  { %v6520_v46 = vadd.f32 %v12413_v54, %v6515_v6 }
 0x686   :  { %6524 = vst.msk [vmem:[%s12950_s9 + $0x1] sm:$0x1] %vm6523_vm4, %v6520_v46  ;;  %vm6623_vm4 = vcmp.ge.s32.totalorder %v13939_v27, 120 }
 0x687   :  { %vm6625_vm6 = vmand %vm6623_vm4, %vm6624_vm5  ;;  %vm6697_vm4 = vcmp.ge.s32.totalorder %v13939_v27, 17  ;;  %vm6698_vm5 = vcmp.lt.s32.totalorder %v13939_v27, 24 }
 0x68d   :  { %v6525_v56 = vld [vmem:[%s12950_s9 + $0x1] sm:$0x1] }
 0x68e   :  { %v6544_v22 = vadd.f32 %v12399_v53, %v6525_v56 }
 0x690   :  { %6548 = vst.msk [vmem:[%s12950_s9 + $0x1] sm:$0x1] %vm6547_vm7, %v6544_v22  ;;  %vm6632_vm7 = vcmask 1022976  }
 0x697   :  { %v6549_v54 = vld [vmem:[%s12950_s9 + $0x1] sm:$0x1] }
 0x698   :  { %v6561_v13 = vadd.f32 %v12420_v40, %v6549_v54 }
 0x69a   :  { %6565 = vst.msk [vmem:[%s12950_s9 + $0x1] sm:$0x1] %vm6564_vm10, %v6561_v13  ;;  %vm6638_vm10 = vmand %vm6636_vm8, %vm6637_vm9  ;;  %vm6708_vm8 = vcmp.lt.s32.totalorder %v13939_v27, 29 }
 0x6a1   :  { %v6566_v53 = vld [vmem:[%s12950_s9 + $0x1] sm:$0x1] }
 0x6a2   :  { %v6571_v31 = vadd.f32 %v12407_v0, %v6566_v53 }
 0x6a4   :  { %6575 = vst.msk [vmem:[%s12950_s9 + $0x1] sm:$0x1] %vm6574_vm13, %v6571_v31  ;;  %vm6648_vm13 = vmand %vm6646_vm11, %vm6647_vm12  ;;  %vm6732_vm11 = vcmp.lt.s32.totalorder %v13939_v27, 34 }
 0x6ab   :  { %v6576_v40 = vld [vmem:[%s12950_s9 + $0x1] sm:$0x1] }
 0x6ac   :  { %v6581_v5 = vadd.f32 %v12427_v55, %v6576_v40 }
 0x6ae   :  { %6585 = vst.msk [vmem:[%s12950_s9 + $0x1] sm:$0x1] %vm6584_vm0, %v6581_v5  ;;  %vm6672_vm0 = vmand %vm6670_vm14, %vm6671_vm15  ;;  %vm6749_vm14 = vcmp.lt.s32.totalorder %v13939_v27, 39 }
 0x6b5   :  { %v6586_v0 = vld [vmem:[%s12950_s9 + $0x1] sm:$0x1] }
 0x6b6   :  { %v6605_v34 = vadd.f32 %v12418_v43, %v6586_v0  ;;  %v6631_v43 = vrot.slane %v12430_v42, 7 }
 0x6b8   :  { %6609 = vst.msk [vmem:[%s12950_s9 + $0x1] sm:$0x1] %vm6608_vm3, %v6605_v34  ;;  %v6633_v19 = vsel %vm6632_vm7, %v6631_v43, %v12430_v42  ;;  %vm6689_vm3 = vmand %vm6687_vm1, %vm6688_vm2  ;;  %vm6707_vm7 = vcmp.ge.s32.totalorder %v13939_v27, 22  ;;  %vm6759_vm1 = vcmp.lt.s32.totalorder %v13939_v27, 44 }
 0x6b9   :  { %vm6709_vm9 = vmand %vm6707_vm7, %vm6708_vm8  ;;  %vm6793_vm7 = vcmp.lt.s32.totalorder %v13939_v27, 54 }
 0x6bf   :  { %v6610_v55 = vld [vmem:[%s12950_s9 + $0x1] sm:$0x1] }
 0x6c0   :  { %v6622_v58 = vadd.f32 %v12435_v2, %v6610_v55 }
 0x6c2   :  { %6626 = vst.msk [vmem:[%s12950_s9 + $0x1] sm:$0x1] %vm6625_vm6, %v6622_v58  ;;  %vm6699_vm6 = vmand %vm6697_vm4, %vm6698_vm5  ;;  %vm6769_vm4 = vcmp.lt.s32.totalorder %v13939_v27, 49 }
 0x6c9   :  { %v6627_v50 = vld [vmem:[%s12950_s9 + $0x1] sm:$0x3] }
 0x6ca   :  { %v6635_v39 = vadd.f32 %v6633_v19, %v6627_v50 }
 0x6cc   :  { %6639 = vst.msk [vmem:[%s12950_s9 + $0x1] sm:$0x3] %vm6638_vm10, %v6635_v39  ;;  %vm6731_vm10 = vcmp.ge.s32.totalorder %v13939_v27, 27 }
 0x6cd   :  { %vm6733_vm12 = vmand %vm6731_vm10, %vm6732_vm11  ;;  %vm6810_vm10 = vcmp.lt.s32.totalorder %v13939_v27, 59 }
 0x6d3   :  { %v6640_v2 = vld [vmem:[%s12950_s9 + $0x2] sm:$0x1] }
 0x6d4   :  { %v6645_v42 = vadd.f32 %v12441_v15, %v6640_v2 }
 0x6d6   :  { %6649 = vst.msk [vmem:[%s12950_s9 + $0x2] sm:$0x1] %vm6648_vm13, %v6645_v42  ;;  %vm6748_vm13 = vcmp.ge.s32.totalorder %v13939_v27, 32 }
 0x6d7   :  { %vm6750_vm15 = vmand %vm6748_vm13, %vm6749_vm14  ;;  %vm6820_vm13 = vcmp.lt.s32.totalorder %v13939_v27, 64 }
 0x6dd   :  { %v6650_v24 = vld [vmem:[%s12950_s9 + $0x2] sm:$0x1] }
 0x6de   :  { %v6669_v7 = vadd.f32 %v12439_v35, %v6650_v24 }
 0x6e0   :  { %6673 = vst.msk [vmem:[%s12950_s9 + $0x2] sm:$0x1] %vm6672_vm0, %v6669_v7  ;;  %vm6758_vm0 = vcmp.ge.s32.totalorder %v13939_v27, 37 }
 0x6e1   :  { %vm6760_vm2 = vmand %vm6758_vm0, %vm6759_vm1  ;;  %vm6830_vm0 = vcmp.lt.s32.totalorder %v13939_v27, 69 }
 0x6e7   :  { %v6674_v15 = vld [vmem:[%s12950_s9 + $0x2] sm:$0x1] }
 0x6e8   :  { %v6686_v52 = vadd.f32 %v12452_v14, %v6674_v15 }
 0x6ea   :  { %6690 = vst.msk [vmem:[%s12950_s9 + $0x2] sm:$0x1] %vm6689_vm3, %v6686_v52  ;;  %vm6768_vm3 = vcmp.ge.s32.totalorder %v13939_v27, 42 }
 0x6eb   :  { %vm6770_vm5 = vmand %vm6768_vm3, %vm6769_vm4 }
 0x6f1   :  { %v6691_v35 = vld [vmem:[%s12950_s9 + $0x2] sm:$0x1] }
 0x6f2   :  { %v6696_v23 = vadd.f32 %v12450_v3, %v6691_v35 }
 0x6f4   :  { %6700 = vst.msk [vmem:[%s12950_s9 + $0x2] sm:$0x1] %vm6699_vm6, %v6696_v23  ;;  %vm6792_vm6 = vcmp.ge.s32.totalorder %v13939_v27, 47 }
 0x6f5   :  { %vm6794_vm8 = vmand %vm6792_vm6, %vm6793_vm7 }
 0x6fb   :  { %v6701_v14 = vld [vmem:[%s12950_s9 + $0x2] sm:$0x1] }
 0x6fc   :  { %v6706_v21 = vadd.f32 %v12458_v38, %v6701_v14 }
 0x6fe   :  { %6710 = vst.msk [vmem:[%s12950_s9 + $0x2] sm:$0x1] %vm6709_vm9, %v6706_v21  ;;  %vm6809_vm9 = vcmp.ge.s32.totalorder %v13939_v27, 52 }
 0x6ff   :  { %vm6811_vm11 = vmand %vm6809_vm9, %vm6810_vm10 }
 0x705   :  { %v6711_v3 = vld [vmem:[%s12950_s9 + $0x2] sm:$0x1] }
 0x706   :  { %v6730_v9 = vadd.f32 %v12456_v28, %v6711_v3 }
 0x708   :  { %6734 = vst.msk [vmem:[%s12950_s9 + $0x2] sm:$0x1] %vm6733_vm12, %v6730_v9  ;;  %vm6819_vm12 = vcmp.ge.s32.totalorder %v13939_v27, 57 }
 0x709   :  { %vm6821_vm14 = vmand %vm6819_vm12, %vm6820_vm13 }
 0x70f   :  { %v6735_v38 = vld [vmem:[%s12950_s9 + $0x2] sm:$0x1] }
 0x710   :  { %v6747_v11 = vadd.f32 %v12469_v18, %v6735_v38 }
 0x712   :  { %6751 = vst.msk [vmem:[%s12950_s9 + $0x2] sm:$0x1] %vm6750_vm15, %v6747_v11  ;;  %vm6829_vm15 = vcmp.ge.s32.totalorder %v13939_v27, 62 }
 0x713   :  { %vm6831_vm1 = vmand %vm6829_vm15, %vm6830_vm0 }
 0x719   :  { %v6752_v28 = vld [vmem:[%s12950_s9 + $0x2] sm:$0x1] }
 0x71a   :  { %v6757_v33 = vadd.f32 %v12467_v12, %v6752_v28 }
 0x71c   :  { %6761 = vst.msk [vmem:[%s12950_s9 + $0x2] sm:$0x1] %vm6760_vm2, %v6757_v33 }
 0x723   :  { %v6762_v18 = vld [vmem:[%s12950_s9 + $0x2] sm:$0x1] }
 0x724   :  { %v6767_v25 = vadd.f32 %v12479_v44, %v6762_v18 }
 0x726   :  { %6771 = vst.msk [vmem:[%s12950_s9 + $0x2] sm:$0x1] %vm6770_vm5, %v6767_v25 }
 0x72d   :  { %v6772_v12 = vld [vmem:[%s12950_s9 + $0x2] sm:$0x1] }
 0x72e   :  { %v6791_v8 = vadd.f32 %v12477_v10, %v6772_v12 }
 0x730   :  { %6795 = vst.msk [vmem:[%s12950_s9 + $0x2] sm:$0x1] %vm6794_vm8, %v6791_v8 }
 0x737   :  { %v6796_v44 = vld [vmem:[%s12950_s9 + $0x2] sm:$0x1] }
 0x738   :  { %v6808_v51 = vadd.f32 %v12488_v26, %v6796_v44  ;;  %v6826_v26 = vpop.permute.xlu1 %6825 }
 0x73a   :  { %6812 = vst.msk [vmem:[%s12950_s9 + $0x2] sm:$0x1] %vm6811_vm11, %v6808_v51 }
 0x741   :  { %v6813_v10 = vld [vmem:[%s12950_s9 + $0x2] sm:$0x1] }
 0x742   :  { %v6818_v57 = vadd.f32 %v12486_v48, %v6813_v10 }
 0x744   :  { %6822 = vst.msk [vmem:[%s12950_s9 + $0x2] sm:$0x1] %vm6821_vm14, %v6818_v57 }
 0x74b   :  { %v6823_v17 = vld [vmem:[%s12950_s9 + $0x2] sm:$0x1] }
 0x74c   :  { %v6828_v16 = vadd.f32 %v6826_v26, %v6823_v17 }
 0x74e   :  { %6832 = vst.msk [vmem:[%s12950_s9 + $0x2] sm:$0x1] %vm6831_vm1, %v6828_v16 }

</bundles_post_ra>
